<compile_context>
chip_gen: v7x
topology: tpu7x:2x2x1
jax: 0.10.0
libtpu: 0.0.40
codegen_flags: <defaults>
</compile_context>

<pallas_src>
import functools

import jax
import jax.numpy as jnp
from jax.experimental import pallas as pl
from jax.experimental.pallas import tpu as pltpu


def pointnet_kernel(x_ref,
                    w1, b1, w2, b2,            # MLP1 (conv1d k=1, BN folded)
                    w3, b3, w4, b4, w5, b5,    # MLP2 (conv1d k=1, BN folded)
                    w6, b6, w7, b7, w8, b8,    # MLP3 (linear layers)
                    out_ref, *, n_points):
    """One batch tile per grid step.

    x_ref block: (Bt*N, dim_pad) bf16.  out_ref block: (Bt, code_dim) f32.
    Matmuls take bf16 operands and accumulate in f32 on the MXU; bias add and
    ReLU run in f32 on the VPU, then activations are cast back to bf16.
    """
    m, _ = x_ref.shape
    bt = m // n_points
    x = x_ref[...]                                   # (Bt*N, dim_pad) bf16

    def layer(h, w_ref, b_ref, *, relu=True, out_bf16=True):
        y = jnp.dot(h, w_ref[...], preferred_element_type=jnp.float32)
        y = y + b_ref[...]                           # f32 bias add (VPU)
        if relu:
            y = jnp.maximum(y, 0.0)
        return y.astype(jnp.bfloat16) if out_bf16 else y

    # ---- MLP1 + MLP2: five Conv1d(k=1)+BN+ReLU layers as (Bt*N, C) matmuls ----
    h = layer(x, w1, b1)                             # (Bt*N, 64)
    h = layer(h, w2, b2)                             # (Bt*N, 64)
    h = layer(h, w3, b3)                             # (Bt*N, 64)
    h = layer(h, w4, b4)                             # (Bt*N, 128)
    h = layer(h, w5, b5)                             # (Bt*N, pc_size)

    # ---- MaxPool1d(pc_size): global max over the point axis (N == pc_size) ----
    pc = h.shape[-1]
    g = jnp.max(h.reshape(bt, n_points, pc), axis=1)  # (Bt, pc_size) bf16

    # ---- MLP3: Linear(pc,512)+ReLU, Linear(512,256)+Dropout+ReLU,
    #            Linear(256,code_dim) ----
    g = layer(g, w6, b6)                             # (Bt, 512)
    # TODO(synk): nn.Dropout(0.3) is identity in eval mode; training-mode
    # dropout (stateful PRNG masking) is not implemented here.
    g = layer(g, w7, b7)                             # (Bt, 256)
    g = layer(g, w8, b8, relu=False, out_bf16=False)  # (Bt, code_dim) f32
    out_ref[...] = g


def init_params(key, dim, pc_size, code_dim, eps=1e-5):
    """Deterministic synthetic params (f32).  Conv+BN pairs folded (eval mode)."""
    conv_dims = [(dim, 64), (64, 64), (64, 64), (64, 128), (128, pc_size)]
    lin_dims = [(pc_size, 512), (512, 256), (256, code_dim)]
    params = []
    k = key
    for cin, cout in conv_dims:
        k, kw, kb, kg, kbe, km, kv = jax.random.split(k, 7)
        w = jax.random.normal(kw, (cin, cout), jnp.float32) / jnp.sqrt(float(cin))
        b = 0.05 * jax.random.normal(kb, (cout,), jnp.float32)
        gamma = 1.0 + 0.1 * jax.random.normal(kg, (cout,), jnp.float32)
        beta = 0.05 * jax.random.normal(kbe, (cout,), jnp.float32)
        r_mean = 0.05 * jax.random.normal(km, (cout,), jnp.float32)
        r_var = 1.0 + 0.1 * jax.random.uniform(kv, (cout,), jnp.float32)
        scale = gamma / jnp.sqrt(r_var + eps)
        w_f = w * scale[None, :]                     # fold BN scale into weight
        b_f = (b - r_mean) * scale + beta            # fold BN shift into bias
        params.append((w_f, b_f.reshape(1, cout)))
    for cin, cout in lin_dims:
        k, kw, kb = jax.random.split(k, 3)
        w = jax.random.normal(kw, (cin, cout), jnp.float32) / jnp.sqrt(float(cin))
        b = 0.05 * jax.random.normal(kb, (cout,), jnp.float32)
        params.append((w, b.reshape(1, cout)))
    return params


def _build_call(x2d, args, weight_specs, *, B, N, dim_pad, block_b, code_dim,
                pc_size, flops, bytes_accessed):
    return pl.pallas_call(
        functools.partial(pointnet_kernel, n_points=N),
        out_shape=jax.ShapeDtypeStruct((B, code_dim), jnp.float32),
        grid_spec=pltpu.PrefetchScalarGridSpec(
            num_scalar_prefetch=0,
            grid=(B // block_b,),
            in_specs=[pl.BlockSpec((block_b * N, dim_pad), lambda i: (i, 0))]
                     + weight_specs,
            out_specs=pl.BlockSpec((block_b, code_dim), lambda i: (i, 0)),
        ),
        compiler_params=pltpu.CompilerParams(
            dimension_semantics=("parallel",)),
        cost_estimate=pl.CostEstimate(
            flops=int(flops), transcendentals=0,
            bytes_accessed=int(bytes_accessed)),
    )(x2d, *args)


def pointnet_forward(x_ncw, params, *, code_dim, block_b):
    """x_ncw: (B, dim, N) float32 (PyTorch NCW convention)."""
    B, dim, N = x_ncw.shape
    pc_size = params[4][1].shape[-1]
    # MaxPool1d(pc_size) in the PyTorch module reduces the whole point axis
    # when n_points == pc_size (the intended usage).
    assert N == pc_size, "PointNetBasic requires n_points == pc_size"
    assert B % block_b == 0, "batch must be divisible by the batch tile"

    # Points-major layout; zero-pad the tiny channel axis dim -> 8 so the first
    # matmul's K dim is sublane aligned (exact: padded rows/cols are zero), and
    # flatten to a 2-D (B*N, dim_pad) matmul operand in the wrapper.
    dim_pad = 8
    x = jnp.transpose(x_ncw, (0, 2, 1))                         # (B, N, dim)
    x = jnp.pad(x, ((0, 0), (0, 0), (0, dim_pad - dim)))
    x = x.reshape(B * N, dim_pad).astype(jnp.bfloat16)

    def build_weight_args(single_buffer):
        wspec_kwargs = {}
        if single_buffer:
            # Weights are grid-invariant; single-buffer them to halve their VMEM.
            wspec_kwargs = dict(pipeline_mode=pl.Buffered(1))
        args, specs = [], []
        for li, (w, b) in enumerate(params):
            if li == 0:
                w = jnp.pad(w, ((0, dim_pad - dim), (0, 0)))
            args += [w.astype(jnp.bfloat16), b]      # bf16 weights, f32 biases
            specs.append(pl.BlockSpec(w.shape, lambda i: (0, 0), **wspec_kwargs))
            specs.append(pl.BlockSpec(b.shape, lambda i: (0, 0), **wspec_kwargs))
        return args, specs

    flops = (2 * B * N * (dim_pad * 64 + 64 * 64 + 64 * 64 + 64 * 128
                          + 128 * pc_size)
             + 2 * B * (pc_size * 512 + 512 * 256 + 256 * code_dim))

    args, weight_specs = build_weight_args(True)
    bytes_accessed = (x.size * 2
                      + sum(int(a.size) * a.dtype.itemsize for a in args)
                      + B * code_dim * 4)
    kw = dict(B=B, N=N, dim_pad=dim_pad, block_b=block_b, code_dim=code_dim,
              pc_size=pc_size, flops=flops, bytes_accessed=bytes_accessed)
    try:
        return _build_call(x, args, weight_specs, **kw)
    except Exception:
        # pipeline_mode=pl.Buffered(1) unsupported on this jax version -> use
        # default double-buffering for the (grid-invariant) weights.
        args, weight_specs = build_weight_args(False)
        return _build_call(x, args, weight_specs, **kw)


def pointnet_reference(x_ncw, params):
    """Pure-JAX reference with the same bf16-operand / f32-accumulate math."""
    x = jnp.transpose(x_ncw, (0, 2, 1)).astype(jnp.bfloat16)    # (B, N, dim)
    h = x
    for w, b in params[:5]:
        y = jnp.einsum('bnc,cd->bnd', h, w.astype(jnp.bfloat16),
                       preferred_element_type=jnp.float32) + b[None]
        h = jnp.maximum(y, 0.0).astype(jnp.bfloat16)
    g = jnp.max(h, axis=1)                                      # (B, pc_size)
    out = None
    for i, (w, b) in enumerate(params[5:]):
        y = jnp.dot(g, w.astype(jnp.bfloat16),
                    preferred_element_type=jnp.float32) + b
        if i < 2:
            g = jnp.maximum(y, 0.0).astype(jnp.bfloat16)        # dropout = id (eval)
        else:
            out = y
    return out


if __name__ == "__main__":
    B = 16           # total batch
    BT = 8           # batch tile -> grid=(2,): amortizes per-step overhead and
                     # keeps both v7x TensorCores busy; MLP3 runs at M=8, not 1.
    DIM = 3
    PC_SIZE = 128    # number of points == MaxPool1d kernel == pc_size
    CODE_DIM = 128

    key = jax.random.PRNGKey(0)
    k_x, k_p = jax.random.split(key)
    x = jax.random.normal(k_x, (B, DIM, PC_SIZE), jnp.float32)   # NCW input
    params = init_params(k_p, DIM, PC_SIZE, CODE_DIM)

    out = pointnet_forward(x, params, code_dim=CODE_DIM, block_b=BT)
    out = jax.block_until_ready(out)

    ref = pointnet_reference(x, params)
    assert out.shape == (B, CODE_DIM), out.shape
    assert jnp.allclose(out, ref, atol=1e-2, rtol=1e-2), "mismatch vs reference"

    print("KERNEL_OK")
</pallas_src>

<mosaic_0001>
module attributes {stable_mosaic.version = 11 : i64} {
  func.func @pointnet_kernel(%arg0: i32, %arg1: memref<1024x8xbf16, #tpu.memory_space<vmem>>, %arg2: memref<8x64xbf16, #tpu.memory_space<vmem>>, %arg3: memref<1x64xf32, #tpu.memory_space<vmem>>, %arg4: memref<64x64xbf16, #tpu.memory_space<vmem>>, %arg5: memref<1x64xf32, #tpu.memory_space<vmem>>, %arg6: memref<64x64xbf16, #tpu.memory_space<vmem>>, %arg7: memref<1x64xf32, #tpu.memory_space<vmem>>, %arg8: memref<64x128xbf16, #tpu.memory_space<vmem>>, %arg9: memref<1x128xf32, #tpu.memory_space<vmem>>, %arg10: memref<128x128xbf16, #tpu.memory_space<vmem>>, %arg11: memref<1x128xf32, #tpu.memory_space<vmem>>, %arg12: memref<128x512xbf16, #tpu.memory_space<vmem>>, %arg13: memref<1x512xf32, #tpu.memory_space<vmem>>, %arg14: memref<512x256xbf16, #tpu.memory_space<vmem>>, %arg15: memref<1x256xf32, #tpu.memory_space<vmem>>, %arg16: memref<256x128xbf16, #tpu.memory_space<vmem>>, %arg17: memref<1x128xf32, #tpu.memory_space<vmem>>, %arg18: memref<8x128xf32, #tpu.memory_space<vmem>>) attributes {dimension_semantics = [#tpu.dimension_semantics<parallel>], iteration_bounds = array<i64: 2>, scalar_prefetch = 0 : i64, scratch_operands = 0 : i64, tpu.core_type = #tpu.core_type<tc>, window_params = [{transform_indices = @transform_0, window_bounds = array<i64: 1024, 8>}, {pipeline_mode = #tpu.pipeline_mode<synchronous>, transform_indices = @transform_1, window_bounds = array<i64: 8, 64>}, {pipeline_mode = #tpu.pipeline_mode<synchronous>, transform_indices = @transform_2, window_bounds = array<i64: 1, 64>}, {pipeline_mode = #tpu.pipeline_mode<synchronous>, transform_indices = @transform_3, window_bounds = array<i64: 64, 64>}, {pipeline_mode = #tpu.pipeline_mode<synchronous>, transform_indices = @transform_4, window_bounds = array<i64: 1, 64>}, {pipeline_mode = #tpu.pipeline_mode<synchronous>, transform_indices = @transform_5, window_bounds = array<i64: 64, 64>}, {pipeline_mode = #tpu.pipeline_mode<synchronous>, transform_indices = @transform_6, window_bounds = array<i64: 1, 64>}, {pipeline_mode = #tpu.pipeline_mode<synchronous>, transform_indices = @transform_7, window_bounds = array<i64: 64, 128>}, {pipeline_mode = #tpu.pipeline_mode<synchronous>, transform_indices = @transform_8, window_bounds = array<i64: 1, 128>}, {pipeline_mode = #tpu.pipeline_mode<synchronous>, transform_indices = @transform_9, window_bounds = array<i64: 128, 128>}, {pipeline_mode = #tpu.pipeline_mode<synchronous>, transform_indices = @transform_10, window_bounds = array<i64: 1, 128>}, {pipeline_mode = #tpu.pipeline_mode<synchronous>, transform_indices = @transform_11, window_bounds = array<i64: 128, 512>}, {pipeline_mode = #tpu.pipeline_mode<synchronous>, transform_indices = @transform_12, window_bounds = array<i64: 1, 512>}, {pipeline_mode = #tpu.pipeline_mode<synchronous>, transform_indices = @transform_13, window_bounds = array<i64: 512, 256>}, {pipeline_mode = #tpu.pipeline_mode<synchronous>, transform_indices = @transform_14, window_bounds = array<i64: 1, 256>}, {pipeline_mode = #tpu.pipeline_mode<synchronous>, transform_indices = @transform_15, window_bounds = array<i64: 256, 128>}, {pipeline_mode = #tpu.pipeline_mode<synchronous>, transform_indices = @transform_16, window_bounds = array<i64: 1, 128>}, {transform_indices = @transform_17, window_bounds = array<i64: 8, 128>}]} {
    %c0 = arith.constant 0 : index
    %c0_0 = arith.constant 0 : index
    %0 = vector.load %arg1[%c0, %c0_0] : memref<1024x8xbf16, #tpu.memory_space<vmem>>, vector<1024x8xbf16>
    %c0_1 = arith.constant 0 : index
    %c0_2 = arith.constant 0 : index
    %1 = vector.load %arg2[%c0_1, %c0_2] : memref<8x64xbf16, #tpu.memory_space<vmem>>, vector<8x64xbf16>
    %cst = arith.constant dense<0.000000e+00> : vector<1024x64xf32>
    %2 = tpu.matmul %0, %1, %cst {dimension_numbers = #tpu.dot_dimension_numbers<[1], [0], [0], [1], [0, 0, 1, 1], [], []>} : vector<1024x8xbf16>, vector<8x64xbf16>, vector<1024x64xf32> -> vector<1024x64xf32>
    %c0_3 = arith.constant 0 : index
    %c0_4 = arith.constant 0 : index
    %3 = vector.load %arg3[%c0_3, %c0_4] : memref<1x64xf32, #tpu.memory_space<vmem>>, vector<1x64xf32>
    %4 = vector.broadcast %3 : vector<1x64xf32> to vector<1024x64xf32>
    %5 = arith.addf %2, %4 : vector<1024x64xf32>
    %cst_5 = arith.constant 0.000000e+00 : f32
    %6 = vector.broadcast %cst_5 : f32 to vector<1024x64xf32>
    %7 = arith.maximumf %5, %6 : vector<1024x64xf32>
    %8 = arith.truncf %7 : vector<1024x64xf32> to vector<1024x64xbf16>
    %c0_6 = arith.constant 0 : index
    %c0_7 = arith.constant 0 : index
    %9 = vector.load %arg4[%c0_6, %c0_7] : memref<64x64xbf16, #tpu.memory_space<vmem>>, vector<64x64xbf16>
    %cst_8 = arith.constant dense<0.000000e+00> : vector<1024x64xf32>
    %10 = tpu.matmul %8, %9, %cst_8 {dimension_numbers = #tpu.dot_dimension_numbers<[1], [0], [0], [1], [0, 0, 1, 1], [], []>} : vector<1024x64xbf16>, vector<64x64xbf16>, vector<1024x64xf32> -> vector<1024x64xf32>
    %c0_9 = arith.constant 0 : index
    %c0_10 = arith.constant 0 : index
    %11 = vector.load %arg5[%c0_9, %c0_10] : memref<1x64xf32, #tpu.memory_space<vmem>>, vector<1x64xf32>
    %12 = vector.broadcast %11 : vector<1x64xf32> to vector<1024x64xf32>
    %13 = arith.addf %10, %12 : vector<1024x64xf32>
    %cst_11 = arith.constant 0.000000e+00 : f32
    %14 = vector.broadcast %cst_11 : f32 to vector<1024x64xf32>
    %15 = arith.maximumf %13, %14 : vector<1024x64xf32>
    %16 = arith.truncf %15 : vector<1024x64xf32> to vector<1024x64xbf16>
    %c0_12 = arith.constant 0 : index
    %c0_13 = arith.constant 0 : index
    %17 = vector.load %arg6[%c0_12, %c0_13] : memref<64x64xbf16, #tpu.memory_space<vmem>>, vector<64x64xbf16>
    %cst_14 = arith.constant dense<0.000000e+00> : vector<1024x64xf32>
    %18 = tpu.matmul %16, %17, %cst_14 {dimension_numbers = #tpu.dot_dimension_numbers<[1], [0], [0], [1], [0, 0, 1, 1], [], []>} : vector<1024x64xbf16>, vector<64x64xbf16>, vector<1024x64xf32> -> vector<1024x64xf32>
    %c0_15 = arith.constant 0 : index
    %c0_16 = arith.constant 0 : index
    %19 = vector.load %arg7[%c0_15, %c0_16] : memref<1x64xf32, #tpu.memory_space<vmem>>, vector<1x64xf32>
    %20 = vector.broadcast %19 : vector<1x64xf32> to vector<1024x64xf32>
    %21 = arith.addf %18, %20 : vector<1024x64xf32>
    %cst_17 = arith.constant 0.000000e+00 : f32
    %22 = vector.broadcast %cst_17 : f32 to vector<1024x64xf32>
    %23 = arith.maximumf %21, %22 : vector<1024x64xf32>
    %24 = arith.truncf %23 : vector<1024x64xf32> to vector<1024x64xbf16>
    %c0_18 = arith.constant 0 : index
    %c0_19 = arith.constant 0 : index
    %25 = vector.load %arg8[%c0_18, %c0_19] : memref<64x128xbf16, #tpu.memory_space<vmem>>, vector<64x128xbf16>
    %cst_20 = arith.constant dense<0.000000e+00> : vector<1024x128xf32>
    %26 = tpu.matmul %24, %25, %cst_20 {dimension_numbers = #tpu.dot_dimension_numbers<[1], [0], [0], [1], [0, 0, 1, 1], [], []>} : vector<1024x64xbf16>, vector<64x128xbf16>, vector<1024x128xf32> -> vector<1024x128xf32>
    %c0_21 = arith.constant 0 : index
    %c0_22 = arith.constant 0 : index
    %27 = vector.load %arg9[%c0_21, %c0_22] : memref<1x128xf32, #tpu.memory_space<vmem>>, vector<1x128xf32>
    %28 = vector.broadcast %27 : vector<1x128xf32> to vector<1024x128xf32>
    %29 = arith.addf %26, %28 : vector<1024x128xf32>
    %cst_23 = arith.constant 0.000000e+00 : f32
    %30 = vector.broadcast %cst_23 : f32 to vector<1024x128xf32>
    %31 = arith.maximumf %29, %30 : vector<1024x128xf32>
    %32 = arith.truncf %31 : vector<1024x128xf32> to vector<1024x128xbf16>
    %c0_24 = arith.constant 0 : index
    %c0_25 = arith.constant 0 : index
    %33 = vector.load %arg10[%c0_24, %c0_25] : memref<128x128xbf16, #tpu.memory_space<vmem>>, vector<128x128xbf16>
    %cst_26 = arith.constant dense<0.000000e+00> : vector<1024x128xf32>
    %34 = tpu.matmul %32, %33, %cst_26 {dimension_numbers = #tpu.dot_dimension_numbers<[1], [0], [0], [1], [0, 0, 1, 1], [], []>} : vector<1024x128xbf16>, vector<128x128xbf16>, vector<1024x128xf32> -> vector<1024x128xf32>
    %c0_27 = arith.constant 0 : index
    %c0_28 = arith.constant 0 : index
    %35 = vector.load %arg11[%c0_27, %c0_28] : memref<1x128xf32, #tpu.memory_space<vmem>>, vector<1x128xf32>
    %36 = vector.broadcast %35 : vector<1x128xf32> to vector<1024x128xf32>
    %37 = arith.addf %34, %36 : vector<1024x128xf32>
    %cst_29 = arith.constant 0.000000e+00 : f32
    %38 = vector.broadcast %cst_29 : f32 to vector<1024x128xf32>
    %39 = arith.maximumf %37, %38 : vector<1024x128xf32>
    %40 = arith.truncf %39 : vector<1024x128xf32> to vector<1024x128xbf16>
    %41 = vector.shape_cast %40 : vector<1024x128xbf16> to vector<8x128x128xbf16>
    %cst_30 = arith.constant dense<0xFF80> : vector<8x128xbf16>
    %42 = vector.multi_reduction <maximumf>, %41, %cst_30 [1] : vector<8x128x128xbf16> to vector<8x128xbf16>
    %c0_31 = arith.constant 0 : index
    %c0_32 = arith.constant 0 : index
    %43 = vector.load %arg12[%c0_31, %c0_32] : memref<128x512xbf16, #tpu.memory_space<vmem>>, vector<128x512xbf16>
    %cst_33 = arith.constant dense<0.000000e+00> : vector<8x512xf32>
    %44 = tpu.matmul %42, %43, %cst_33 {dimension_numbers = #tpu.dot_dimension_numbers<[1], [0], [0], [1], [0, 0, 1, 1], [], []>} : vector<8x128xbf16>, vector<128x512xbf16>, vector<8x512xf32> -> vector<8x512xf32>
    %c0_34 = arith.constant 0 : index
    %c0_35 = arith.constant 0 : index
    %45 = vector.load %arg13[%c0_34, %c0_35] : memref<1x512xf32, #tpu.memory_space<vmem>>, vector<1x512xf32>
    %46 = vector.broadcast %45 : vector<1x512xf32> to vector<8x512xf32>
    %47 = arith.addf %44, %46 : vector<8x512xf32>
    %cst_36 = arith.constant 0.000000e+00 : f32
    %48 = vector.broadcast %cst_36 : f32 to vector<8x512xf32>
    %49 = arith.maximumf %47, %48 : vector<8x512xf32>
    %50 = arith.truncf %49 : vector<8x512xf32> to vector<8x512xbf16>
    %c0_37 = arith.constant 0 : index
    %c0_38 = arith.constant 0 : index
    %51 = vector.load %arg14[%c0_37, %c0_38] : memref<512x256xbf16, #tpu.memory_space<vmem>>, vector<512x256xbf16>
    %cst_39 = arith.constant dense<0.000000e+00> : vector<8x256xf32>
    %52 = tpu.matmul %50, %51, %cst_39 {dimension_numbers = #tpu.dot_dimension_numbers<[1], [0], [0], [1], [0, 0, 1, 1], [], []>} : vector<8x512xbf16>, vector<512x256xbf16>, vector<8x256xf32> -> vector<8x256xf32>
    %c0_40 = arith.constant 0 : index
    %c0_41 = arith.constant 0 : index
    %53 = vector.load %arg15[%c0_40, %c0_41] : memref<1x256xf32, #tpu.memory_space<vmem>>, vector<1x256xf32>
    %54 = vector.broadcast %53 : vector<1x256xf32> to vector<8x256xf32>
    %55 = arith.addf %52, %54 : vector<8x256xf32>
    %cst_42 = arith.constant 0.000000e+00 : f32
    %56 = vector.broadcast %cst_42 : f32 to vector<8x256xf32>
    %57 = arith.maximumf %55, %56 : vector<8x256xf32>
    %58 = arith.truncf %57 : vector<8x256xf32> to vector<8x256xbf16>
    %c0_43 = arith.constant 0 : index
    %c0_44 = arith.constant 0 : index
    %59 = vector.load %arg16[%c0_43, %c0_44] : memref<256x128xbf16, #tpu.memory_space<vmem>>, vector<256x128xbf16>
    %cst_45 = arith.constant dense<0.000000e+00> : vector<8x128xf32>
    %60 = tpu.matmul %58, %59, %cst_45 {dimension_numbers = #tpu.dot_dimension_numbers<[1], [0], [0], [1], [0, 0, 1, 1], [], []>} : vector<8x256xbf16>, vector<256x128xbf16>, vector<8x128xf32> -> vector<8x128xf32>
    %c0_46 = arith.constant 0 : index
    %c0_47 = arith.constant 0 : index
    %61 = vector.load %arg17[%c0_46, %c0_47] : memref<1x128xf32, #tpu.memory_space<vmem>>, vector<1x128xf32>
    %62 = vector.broadcast %61 : vector<1x128xf32> to vector<8x128xf32>
    %63 = arith.addf %60, %62 : vector<8x128xf32>
    %c0_48 = arith.constant 0 : index
    %c0_49 = arith.constant 0 : index
    %64 = vector.load %arg18[%c0_48, %c0_49] : memref<8x128xf32, #tpu.memory_space<vmem>>, vector<8x128xf32>
    tpu.vector_store %arg18[%c0_48, %c0_49], %63 {strides = array<i32>} : memref<8x128xf32, #tpu.memory_space<vmem>>, vector<8x128xf32>,
    return
  }
  func.func @transform_0(%arg0: i32) -> (i32, i32) {
    %c0_i32 = arith.constant 0 : i32
    %c0_i32_0 = arith.constant 0 : i32
    return %arg0, %c0_i32 : i32, i32
  }
  func.func @transform_1(%arg0: i32) -> (i32, i32) {
    %c0_i32 = arith.constant 0 : i32
    %c0_i32_0 = arith.constant 0 : i32
    %c0_i32_1 = arith.constant 0 : i32
    return %c0_i32, %c0_i32_0 : i32, i32
  }
  func.func @transform_2(%arg0: i32) -> (i32, i32) {
    %c0_i32 = arith.constant 0 : i32
    %c0_i32_0 = arith.constant 0 : i32
    %c0_i32_1 = arith.constant 0 : i32
    return %c0_i32, %c0_i32_0 : i32, i32
  }
  func.func @transform_3(%arg0: i32) -> (i32, i32) {
    %c0_i32 = arith.constant 0 : i32
    %c0_i32_0 = arith.constant 0 : i32
    %c0_i32_1 = arith.constant 0 : i32
    return %c0_i32, %c0_i32_0 : i32, i32
  }
  func.func @transform_4(%arg0: i32) -> (i32, i32) {
    %c0_i32 = arith.constant 0 : i32
    %c0_i32_0 = arith.constant 0 : i32
    %c0_i32_1 = arith.constant 0 : i32
    return %c0_i32, %c0_i32_0 : i32, i32
  }
  func.func @transform_5(%arg0: i32) -> (i32, i32) {
    %c0_i32 = arith.constant 0 : i32
    %c0_i32_0 = arith.constant 0 : i32
    %c0_i32_1 = arith.constant 0 : i32
    return %c0_i32, %c0_i32_0 : i32, i32
  }
  func.func @transform_6(%arg0: i32) -> (i32, i32) {
    %c0_i32 = arith.constant 0 : i32
    %c0_i32_0 = arith.constant 0 : i32
    %c0_i32_1 = arith.constant 0 : i32
    return %c0_i32, %c0_i32_0 : i32, i32
  }
  func.func @transform_7(%arg0: i32) -> (i32, i32) {
    %c0_i32 = arith.constant 0 : i32
    %c0_i32_0 = arith.constant 0 : i32
    %c0_i32_1 = arith.constant 0 : i32
    return %c0_i32, %c0_i32_0 : i32, i32
  }
  func.func @transform_8(%arg0: i32) -> (i32, i32) {
    %c0_i32 = arith.constant 0 : i32
    %c0_i32_0 = arith.constant 0 : i32
    %c0_i32_1 = arith.constant 0 : i32
    return %c0_i32, %c0_i32_0 : i32, i32
  }
  func.func @transform_9(%arg0: i32) -> (i32, i32) {
    %c0_i32 = arith.constant 0 : i32
    %c0_i32_0 = arith.constant 0 : i32
    %c0_i32_1 = arith.constant 0 : i32
    return %c0_i32, %c0_i32_0 : i32, i32
  }
  func.func @transform_10(%arg0: i32) -> (i32, i32) {
    %c0_i32 = arith.constant 0 : i32
    %c0_i32_0 = arith.constant 0 : i32
    %c0_i32_1 = arith.constant 0 : i32
    return %c0_i32, %c0_i32_0 : i32, i32
  }
  func.func @transform_11(%arg0: i32) -> (i32, i32) {
    %c0_i32 = arith.constant 0 : i32
    %c0_i32_0 = arith.constant 0 : i32
    %c0_i32_1 = arith.constant 0 : i32
    return %c0_i32, %c0_i32_0 : i32, i32
  }
  func.func @transform_12(%arg0: i32) -> (i32, i32) {
    %c0_i32 = arith.constant 0 : i32
    %c0_i32_0 = arith.constant 0 : i32
    %c0_i32_1 = arith.constant 0 : i32
    return %c0_i32, %c0_i32_0 : i32, i32
  }
  func.func @transform_13(%arg0: i32) -> (i32, i32) {
    %c0_i32 = arith.constant 0 : i32
    %c0_i32_0 = arith.constant 0 : i32
    %c0_i32_1 = arith.constant 0 : i32
    return %c0_i32, %c0_i32_0 : i32, i32
  }
  func.func @transform_14(%arg0: i32) -> (i32, i32) {
    %c0_i32 = arith.constant 0 : i32
    %c0_i32_0 = arith.constant 0 : i32
    %c0_i32_1 = arith.constant 0 : i32
    return %c0_i32, %c0_i32_0 : i32, i32
  }
  func.func @transform_15(%arg0: i32) -> (i32, i32) {
    %c0_i32 = arith.constant 0 : i32
    %c0_i32_0 = arith.constant 0 : i32
    %c0_i32_1 = arith.constant 0 : i32
    return %c0_i32, %c0_i32_0 : i32, i32
  }
  func.func @transform_16(%arg0: i32) -> (i32, i32) {
    %c0_i32 = arith.constant 0 : i32
    %c0_i32_0 = arith.constant 0 : i32
    %c0_i32_1 = arith.constant 0 : i32
    return %c0_i32, %c0_i32_0 : i32, i32
  }
  func.func @transform_17(%arg0: i32) -> (i32, i32) {
    %c0_i32 = arith.constant 0 : i32
    %c0_i32_0 = arith.constant 0 : i32
    return %arg0, %c0_i32 : i32, i32
  }
}

module attributes {stable_mosaic.version = 11 : i64} {
  func.func @pointnet_kernel(%arg0: i32, %arg1: memref<1024x8xbf16, #tpu.memory_space<vmem>>, %arg2: memref<8x64xbf16, #tpu.memory_space<vmem>>, %arg3: memref<1x64xf32, #tpu.memory_space<vmem>>, %arg4: memref<64x64xbf16, #tpu.memory_space<vmem>>, %arg5: memref<1x64xf32, #tpu.memory_space<vmem>>, %arg6: memref<64x64xbf16, #tpu.memory_space<vmem>>, %arg7: memref<1x64xf32, #tpu.memory_space<vmem>>, %arg8: memref<64x128xbf16, #tpu.memory_space<vmem>>, %arg9: memref<1x128xf32, #tpu.memory_space<vmem>>, %arg10: memref<128x128xbf16, #tpu.memory_space<vmem>>, %arg11: memref<1x128xf32, #tpu.memory_space<vmem>>, %arg12: memref<128x512xbf16, #tpu.memory_space<vmem>>, %arg13: memref<1x512xf32, #tpu.memory_space<vmem>>, %arg14: memref<512x256xbf16, #tpu.memory_space<vmem>>, %arg15: memref<1x256xf32, #tpu.memory_space<vmem>>, %arg16: memref<256x128xbf16, #tpu.memory_space<vmem>>, %arg17: memref<1x128xf32, #tpu.memory_space<vmem>>, %arg18: memref<8x128xf32, #tpu.memory_space<vmem>>) attributes {dimension_semantics = [#tpu.dimension_semantics<parallel>], iteration_bounds = array<i64: 2>, scalar_prefetch = 0 : i64, scratch_operands = 0 : i64, tpu.core_type = #tpu.core_type<tc>, window_params = [{transform_indices = @transform_0, window_bounds = array<i64: 1024, 8>}, {pipeline_mode = #tpu.pipeline_mode<synchronous>, transform_indices = @transform_1, window_bounds = array<i64: 8, 64>}, {pipeline_mode = #tpu.pipeline_mode<synchronous>, transform_indices = @transform_2, window_bounds = array<i64: 1, 64>}, {pipeline_mode = #tpu.pipeline_mode<synchronous>, transform_indices = @transform_3, window_bounds = array<i64: 64, 64>}, {pipeline_mode = #tpu.pipeline_mode<synchronous>, transform_indices = @transform_4, window_bounds = array<i64: 1, 64>}, {pipeline_mode = #tpu.pipeline_mode<synchronous>, transform_indices = @transform_5, window_bounds = array<i64: 64, 64>}, {pipeline_mode = #tpu.pipeline_mode<synchronous>, transform_indices = @transform_6, window_bounds = array<i64: 1, 64>}, {pipeline_mode = #tpu.pipeline_mode<synchronous>, transform_indices = @transform_7, window_bounds = array<i64: 64, 128>}, {pipeline_mode = #tpu.pipeline_mode<synchronous>, transform_indices = @transform_8, window_bounds = array<i64: 1, 128>}, {pipeline_mode = #tpu.pipeline_mode<synchronous>, transform_indices = @transform_9, window_bounds = array<i64: 128, 128>}, {pipeline_mode = #tpu.pipeline_mode<synchronous>, transform_indices = @transform_10, window_bounds = array<i64: 1, 128>}, {pipeline_mode = #tpu.pipeline_mode<synchronous>, transform_indices = @transform_11, window_bounds = array<i64: 128, 512>}, {pipeline_mode = #tpu.pipeline_mode<synchronous>, transform_indices = @transform_12, window_bounds = array<i64: 1, 512>}, {pipeline_mode = #tpu.pipeline_mode<synchronous>, transform_indices = @transform_13, window_bounds = array<i64: 512, 256>}, {pipeline_mode = #tpu.pipeline_mode<synchronous>, transform_indices = @transform_14, window_bounds = array<i64: 1, 256>}, {pipeline_mode = #tpu.pipeline_mode<synchronous>, transform_indices = @transform_15, window_bounds = array<i64: 256, 128>}, {pipeline_mode = #tpu.pipeline_mode<synchronous>, transform_indices = @transform_16, window_bounds = array<i64: 1, 128>}, {transform_indices = @transform_17, window_bounds = array<i64: 8, 128>}]} {
    %c0 = arith.constant 0 : index
    %c0_0 = arith.constant 0 : index
    %0 = vector.load %arg1[%c0, %c0_0] : memref<1024x8xbf16, #tpu.memory_space<vmem>>, vector<1024x8xbf16>
    %c0_1 = arith.constant 0 : index
    %c0_2 = arith.constant 0 : index
    %1 = vector.load %arg2[%c0_1, %c0_2] : memref<8x64xbf16, #tpu.memory_space<vmem>>, vector<8x64xbf16>
    %cst = arith.constant dense<0.000000e+00> : vector<1024x64xf32>
    %2 = tpu.matmul %0, %1, %cst {dimension_numbers = #tpu.dot_dimension_numbers<[1], [0], [0], [1], [0, 0, 1, 1], [], []>} : vector<1024x8xbf16>, vector<8x64xbf16>, vector<1024x64xf32> -> vector<1024x64xf32>
    %c0_3 = arith.constant 0 : index
    %c0_4 = arith.constant 0 : index
    %3 = vector.load %arg3[%c0_3, %c0_4] : memref<1x64xf32, #tpu.memory_space<vmem>>, vector<1x64xf32>
    %4 = vector.broadcast %3 : vector<1x64xf32> to vector<1024x64xf32>
    %5 = arith.addf %2, %4 : vector<1024x64xf32>
    %cst_5 = arith.constant 0.000000e+00 : f32
    %6 = vector.broadcast %cst_5 : f32 to vector<1024x64xf32>
    %7 = arith.maximumf %5, %6 : vector<1024x64xf32>
    %8 = arith.truncf %7 : vector<1024x64xf32> to vector<1024x64xbf16>
    %c0_6 = arith.constant 0 : index
    %c0_7 = arith.constant 0 : index
    %9 = vector.load %arg4[%c0_6, %c0_7] : memref<64x64xbf16, #tpu.memory_space<vmem>>, vector<64x64xbf16>
    %cst_8 = arith.constant dense<0.000000e+00> : vector<1024x64xf32>
    %10 = tpu.matmul %8, %9, %cst_8 {dimension_numbers = #tpu.dot_dimension_numbers<[1], [0], [0], [1], [0, 0, 1, 1], [], []>} : vector<1024x64xbf16>, vector<64x64xbf16>, vector<1024x64xf32> -> vector<1024x64xf32>
    %c0_9 = arith.constant 0 : index
    %c0_10 = arith.constant 0 : index
    %11 = vector.load %arg5[%c0_9, %c0_10] : memref<1x64xf32, #tpu.memory_space<vmem>>, vector<1x64xf32>
    %12 = vector.broadcast %11 : vector<1x64xf32> to vector<1024x64xf32>
    %13 = arith.addf %10, %12 : vector<1024x64xf32>
    %cst_11 = arith.constant 0.000000e+00 : f32
    %14 = vector.broadcast %cst_11 : f32 to vector<1024x64xf32>
    %15 = arith.maximumf %13, %14 : vector<1024x64xf32>
    %16 = arith.truncf %15 : vector<1024x64xf32> to vector<1024x64xbf16>
    %c0_12 = arith.constant 0 : index
    %c0_13 = arith.constant 0 : index
    %17 = vector.load %arg6[%c0_12, %c0_13] : memref<64x64xbf16, #tpu.memory_space<vmem>>, vector<64x64xbf16>
    %cst_14 = arith.constant dense<0.000000e+00> : vector<1024x64xf32>
    %18 = tpu.matmul %16, %17, %cst_14 {dimension_numbers = #tpu.dot_dimension_numbers<[1], [0], [0], [1], [0, 0, 1, 1], [], []>} : vector<1024x64xbf16>, vector<64x64xbf16>, vector<1024x64xf32> -> vector<1024x64xf32>
    %c0_15 = arith.constant 0 : index
    %c0_16 = arith.constant 0 : index
    %19 = vector.load %arg7[%c0_15, %c0_16] : memref<1x64xf32, #tpu.memory_space<vmem>>, vector<1x64xf32>
    %20 = vector.broadcast %19 : vector<1x64xf32> to vector<1024x64xf32>
    %21 = arith.addf %18, %20 : vector<1024x64xf32>
    %cst_17 = arith.constant 0.000000e+00 : f32
    %22 = vector.broadcast %cst_17 : f32 to vector<1024x64xf32>
    %23 = arith.maximumf %21, %22 : vector<1024x64xf32>
    %24 = arith.truncf %23 : vector<1024x64xf32> to vector<1024x64xbf16>
    %c0_18 = arith.constant 0 : index
    %c0_19 = arith.constant 0 : index
    %25 = vector.load %arg8[%c0_18, %c0_19] : memref<64x128xbf16, #tpu.memory_space<vmem>>, vector<64x128xbf16>
    %cst_20 = arith.constant dense<0.000000e+00> : vector<1024x128xf32>
    %26 = tpu.matmul %24, %25, %cst_20 {dimension_numbers = #tpu.dot_dimension_numbers<[1], [0], [0], [1], [0, 0, 1, 1], [], []>} : vector<1024x64xbf16>, vector<64x128xbf16>, vector<1024x128xf32> -> vector<1024x128xf32>
    %c0_21 = arith.constant 0 : index
    %c0_22 = arith.constant 0 : index
    %27 = vector.load %arg9[%c0_21, %c0_22] : memref<1x128xf32, #tpu.memory_space<vmem>>, vector<1x128xf32>
    %28 = vector.broadcast %27 : vector<1x128xf32> to vector<1024x128xf32>
    %29 = arith.addf %26, %28 : vector<1024x128xf32>
    %cst_23 = arith.constant 0.000000e+00 : f32
    %30 = vector.broadcast %cst_23 : f32 to vector<1024x128xf32>
    %31 = arith.maximumf %29, %30 : vector<1024x128xf32>
    %32 = arith.truncf %31 : vector<1024x128xf32> to vector<1024x128xbf16>
    %c0_24 = arith.constant 0 : index
    %c0_25 = arith.constant 0 : index
    %33 = vector.load %arg10[%c0_24, %c0_25] : memref<128x128xbf16, #tpu.memory_space<vmem>>, vector<128x128xbf16>
    %cst_26 = arith.constant dense<0.000000e+00> : vector<1024x128xf32>
    %34 = tpu.matmul %32, %33, %cst_26 {dimension_numbers = #tpu.dot_dimension_numbers<[1], [0], [0], [1], [0, 0, 1, 1], [], []>} : vector<1024x128xbf16>, vector<128x128xbf16>, vector<1024x128xf32> -> vector<1024x128xf32>
    %c0_27 = arith.constant 0 : index
    %c0_28 = arith.constant 0 : index
    %35 = vector.load %arg11[%c0_27, %c0_28] : memref<1x128xf32, #tpu.memory_space<vmem>>, vector<1x128xf32>
    %36 = vector.broadcast %35 : vector<1x128xf32> to vector<1024x128xf32>
    %37 = arith.addf %34, %36 : vector<1024x128xf32>
    %cst_29 = arith.constant 0.000000e+00 : f32
    %38 = vector.broadcast %cst_29 : f32 to vector<1024x128xf32>
    %39 = arith.maximumf %37, %38 : vector<1024x128xf32>
    %40 = arith.truncf %39 : vector<1024x128xf32> to vector<1024x128xbf16>
    %41 = vector.shape_cast %40 : vector<1024x128xbf16> to vector<8x128x128xbf16>
    %cst_30 = arith.constant dense<0xFF80> : vector<8x128xbf16>
    %42 = vector.multi_reduction <maximumf>, %41, %cst_30 [1] : vector<8x128x128xbf16> to vector<8x128xbf16>
    %c0_31 = arith.constant 0 : index
    %c0_32 = arith.constant 0 : index
    %43 = vector.load %arg12[%c0_31, %c0_32] : memref<128x512xbf16, #tpu.memory_space<vmem>>, vector<128x512xbf16>
    %cst_33 = arith.constant dense<0.000000e+00> : vector<8x512xf32>
    %44 = tpu.matmul %42, %43, %cst_33 {dimension_numbers = #tpu.dot_dimension_numbers<[1], [0], [0], [1], [0, 0, 1, 1], [], []>} : vector<8x128xbf16>, vector<128x512xbf16>, vector<8x512xf32> -> vector<8x512xf32>
    %c0_34 = arith.constant 0 : index
    %c0_35 = arith.constant 0 : index
    %45 = vector.load %arg13[%c0_34, %c0_35] : memref<1x512xf32, #tpu.memory_space<vmem>>, vector<1x512xf32>
    %46 = vector.broadcast %45 : vector<1x512xf32> to vector<8x512xf32>
    %47 = arith.addf %44, %46 : vector<8x512xf32>
    %cst_36 = arith.constant 0.000000e+00 : f32
    %48 = vector.broadcast %cst_36 : f32 to vector<8x512xf32>
    %49 = arith.maximumf %47, %48 : vector<8x512xf32>
    %50 = arith.truncf %49 : vector<8x512xf32> to vector<8x512xbf16>
    %c0_37 = arith.constant 0 : index
    %c0_38 = arith.constant 0 : index
    %51 = vector.load %arg14[%c0_37, %c0_38] : memref<512x256xbf16, #tpu.memory_space<vmem>>, vector<512x256xbf16>
    %cst_39 = arith.constant dense<0.000000e+00> : vector<8x256xf32>
    %52 = tpu.matmul %50, %51, %cst_39 {dimension_numbers = #tpu.dot_dimension_numbers<[1], [0], [0], [1], [0, 0, 1, 1], [], []>} : vector<8x512xbf16>, vector<512x256xbf16>, vector<8x256xf32> -> vector<8x256xf32>
    %c0_40 = arith.constant 0 : index
    %c0_41 = arith.constant 0 : index
    %53 = vector.load %arg15[%c0_40, %c0_41] : memref<1x256xf32, #tpu.memory_space<vmem>>, vector<1x256xf32>
    %54 = vector.broadcast %53 : vector<1x256xf32> to vector<8x256xf32>
    %55 = arith.addf %52, %54 : vector<8x256xf32>
    %cst_42 = arith.constant 0.000000e+00 : f32
    %56 = vector.broadcast %cst_42 : f32 to vector<8x256xf32>
    %57 = arith.maximumf %55, %56 : vector<8x256xf32>
    %58 = arith.truncf %57 : vector<8x256xf32> to vector<8x256xbf16>
    %c0_43 = arith.constant 0 : index
    %c0_44 = arith.constant 0 : index
    %59 = vector.load %arg16[%c0_43, %c0_44] : memref<256x128xbf16, #tpu.memory_space<vmem>>, vector<256x128xbf16>
    %cst_45 = arith.constant dense<0.000000e+00> : vector<8x128xf32>
    %60 = tpu.matmul %58, %59, %cst_45 {dimension_numbers = #tpu.dot_dimension_numbers<[1], [0], [0], [1], [0, 0, 1, 1], [], []>} : vector<8x256xbf16>, vector<256x128xbf16>, vector<8x128xf32> -> vector<8x128xf32>
    %c0_46 = arith.constant 0 : index
    %c0_47 = arith.constant 0 : index
    %61 = vector.load %arg17[%c0_46, %c0_47] : memref<1x128xf32, #tpu.memory_space<vmem>>, vector<1x128xf32>
    %62 = vector.broadcast %61 : vector<1x128xf32> to vector<8x128xf32>
    %63 = arith.addf %60, %62 : vector<8x128xf32>
    %c0_48 = arith.constant 0 : index
    %c0_49 = arith.constant 0 : index
    %64 = vector.load %arg18[%c0_48, %c0_49] : memref<8x128xf32, #tpu.memory_space<vmem>>, vector<8x128xf32>
    tpu.vector_store %arg18[%c0_48, %c0_49], %63 {strides = array<i32>} : memref<8x128xf32, #tpu.memory_space<vmem>>, vector<8x128xf32>,
    return
  }
  func.func @transform_0(%arg0: i32) -> (i32, i32) {
    %c0_i32 = arith.constant 0 : i32
    %c0_i32_0 = arith.constant 0 : i32
    return %arg0, %c0_i32 : i32, i32
  }
  func.func @transform_1(%arg0: i32) -> (i32, i32) {
    %c0_i32 = arith.constant 0 : i32
    %c0_i32_0 = arith.constant 0 : i32
    %c0_i32_1 = arith.constant 0 : i32
    return %c0_i32, %c0_i32_0 : i32, i32
  }
  func.func @transform_2(%arg0: i32) -> (i32, i32) {
    %c0_i32 = arith.constant 0 : i32
    %c0_i32_0 = arith.constant 0 : i32
    %c0_i32_1 = arith.constant 0 : i32
    return %c0_i32, %c0_i32_0 : i32, i32
  }
  func.func @transform_3(%arg0: i32) -> (i32, i32) {
    %c0_i32 = arith.constant 0 : i32
    %c0_i32_0 = arith.constant 0 : i32
    %c0_i32_1 = arith.constant 0 : i32
    return %c0_i32, %c0_i32_0 : i32, i32
  }
  func.func @transform_4(%arg0: i32) -> (i32, i32) {
    %c0_i32 = arith.constant 0 : i32
    %c0_i32_0 = arith.constant 0 : i32
    %c0_i32_1 = arith.constant 0 : i32
    return %c0_i32, %c0_i32_0 : i32, i32
  }
  func.func @transform_5(%arg0: i32) -> (i32, i32) {
    %c0_i32 = arith.constant 0 : i32
    %c0_i32_0 = arith.constant 0 : i32
    %c0_i32_1 = arith.constant 0 : i32
    return %c0_i32, %c0_i32_0 : i32, i32
  }
  func.func @transform_6(%arg0: i32) -> (i32, i32) {
    %c0_i32 = arith.constant 0 : i32
    %c0_i32_0 = arith.constant 0 : i32
    %c0_i32_1 = arith.constant 0 : i32
    return %c0_i32, %c0_i32_0 : i32, i32
  }
  func.func @transform_7(%arg0: i32) -> (i32, i32) {
    %c0_i32 = arith.constant 0 : i32
    %c0_i32_0 = arith.constant 0 : i32
    %c0_i32_1 = arith.constant 0 : i32
    return %c0_i32, %c0_i32_0 : i32, i32
  }
  func.func @transform_8(%arg0: i32) -> (i32, i32) {
    %c0_i32 = arith.constant 0 : i32
    %c0_i32_0 = arith.constant 0 : i32
    %c0_i32_1 = arith.constant 0 : i32
    return %c0_i32, %c0_i32_0 : i32, i32
  }
  func.func @transform_9(%arg0: i32) -> (i32, i32) {
    %c0_i32 = arith.constant 0 : i32
    %c0_i32_0 = arith.constant 0 : i32
    %c0_i32_1 = arith.constant 0 : i32
    return %c0_i32, %c0_i32_0 : i32, i32
  }
  func.func @transform_10(%arg0: i32) -> (i32, i32) {
    %c0_i32 = arith.constant 0 : i32
    %c0_i32_0 = arith.constant 0 : i32
    %c0_i32_1 = arith.constant 0 : i32
    return %c0_i32, %c0_i32_0 : i32, i32
  }
  func.func @transform_11(%arg0: i32) -> (i32, i32) {
    %c0_i32 = arith.constant 0 : i32
    %c0_i32_0 = arith.constant 0 : i32
    %c0_i32_1 = arith.constant 0 : i32
    return %c0_i32, %c0_i32_0 : i32, i32
  }
  func.func @transform_12(%arg0: i32) -> (i32, i32) {
    %c0_i32 = arith.constant 0 : i32
    %c0_i32_0 = arith.constant 0 : i32
    %c0_i32_1 = arith.constant 0 : i32
    return %c0_i32, %c0_i32_0 : i32, i32
  }
  func.func @transform_13(%arg0: i32) -> (i32, i32) {
    %c0_i32 = arith.constant 0 : i32
    %c0_i32_0 = arith.constant 0 : i32
    %c0_i32_1 = arith.constant 0 : i32
    return %c0_i32, %c0_i32_0 : i32, i32
  }
  func.func @transform_14(%arg0: i32) -> (i32, i32) {
    %c0_i32 = arith.constant 0 : i32
    %c0_i32_0 = arith.constant 0 : i32
    %c0_i32_1 = arith.constant 0 : i32
    return %c0_i32, %c0_i32_0 : i32, i32
  }
  func.func @transform_15(%arg0: i32) -> (i32, i32) {
    %c0_i32 = arith.constant 0 : i32
    %c0_i32_0 = arith.constant 0 : i32
    %c0_i32_1 = arith.constant 0 : i32
    return %c0_i32, %c0_i32_0 : i32, i32
  }
  func.func @transform_16(%arg0: i32) -> (i32, i32) {
    %c0_i32 = arith.constant 0 : i32
    %c0_i32_0 = arith.constant 0 : i32
    %c0_i32_1 = arith.constant 0 : i32
    return %c0_i32, %c0_i32_0 : i32, i32
  }
  func.func @transform_17(%arg0: i32) -> (i32, i32) {
    %c0_i32 = arith.constant 0 : i32
    %c0_i32_0 = arith.constant 0 : i32
    return %arg0, %c0_i32 : i32, i32
  }
}

</mosaic_0001>

<bundles_post_ra>
// kernel: tpu_custom_call.1
= control target key start
LH: loop header
LB: loop body
LE: loop exit
PB: predicated region body
PF: predicated region fallthrough
CT: control target
= control target key end

     0   :  { %s10393_s0 = inlined_call_operand.vmem [shape: bf16[2048,8], index: 0, kind: input, shape index: {}]   ;;  %s10394_s1 = inlined_call_operand.vmem [shape: bf16[8,64], index: 1, kind: input, shape index: {}]   ;;  %s10395_s2 = inlined_call_operand.vmem [shape: f32[1,64], index: 2, kind: input, shape index: {}]   ;;  %s10396_s3 = inlined_call_operand.vmem [shape: bf16[64,64], index: 3, kind: input, shape index: {}]   ;;  %s10397_s4 = inlined_call_operand.vmem [shape: f32[1,64], index: 4, kind: input, shape index: {}]   ;;  %s10398_s5 = inlined_call_operand.vmem [shape: bf16[64,64], index: 5, kind: input, shape index: {}]   ;;  %s10399_s6 = inlined_call_operand.vmem [shape: f32[1,64], index: 6, kind: input, shape index: {}]   ;;  %s10400_s7 = inlined_call_operand.vmem [shape: bf16[64,128], index: 7, kind: input, shape index: {}]   ;;  %s10401_s8 = inlined_call_operand.vmem [shape: f32[1,128], index: 8, kind: input, shape index: {}]   ;;  %s10402_s9 = inlined_call_operand.vmem [shape: bf16[128,128], index: 9, kind: input, shape index: {}]   ;;  %s10403_s10 = inlined_call_operand.vmem [shape: f32[1,128], index: 10, kind: input, shape index: {}]   ;;  %s10404_s11 = inlined_call_operand.vmem [shape: bf16[128,512], index: 11, kind: input, shape index: {}]   ;;  %s10405_s12 = inlined_call_operand.vmem [shape: f32[1,512], index: 12, kind: input, shape index: {}]   ;;  %s10406_s13 = inlined_call_operand.vmem [shape: bf16[512,256], index: 13, kind: input, shape index: {}]   ;;  %s10407_s14 = inlined_call_operand.vmem [shape: f32[1,256], index: 14, kind: input, shape index: {}]   ;;  %s10408_s15 = inlined_call_operand.vmem [shape: bf16[256,128], index: 15, kind: input, shape index: {}]   ;;  %s10409_s16 = inlined_call_operand.vmem [shape: f32[1,128], index: 16, kind: input, shape index: {}]   ;;  %s10410_s17 = inlined_call_operand.hbm [shape: f32[16,128], index: 17, kind: output, shape index: {}]  }
   0x1   :  { %10415 = sst [smem:[#allocation9_spill]] %s10393_s0 }
   0x2   :  { %10416 = sst [smem:[#allocation10_spill]] %s10394_s1 }
   0x3   :  { %10417 = sst [smem:[#allocation11_spill]] %s10395_s2 }
   0x4   :  { %22 = vsyncpa [#allocation3], 0 }
   0x5   :  { %24 = vsyncpa [#allocation3 + $0x1], 0  ;;  %s8825_s24 = smov 0   ;;  %s8827_s25 = smov 0  }
   0x6   :  { %s8829_s26 = smov 0   ;;  %s8831_s27 = smov 0  }
   0x7 LB: > { %10418 = sst [smem:[#allocation5_spill]] %s8727_s26  ;;  %s6855_s28 = sadd.s32 4294967295, %s8731_s27   ;;  %s8731_s27 = sphi %s8831_s27, %s10428_s27   ;;  %s8727_s26 = sphi %s8829_s26, %s10430_s26   ;;  %s8723_s25 = sphi %s8827_s25, %s10432_s25   ;;  %s8719_s24 = sphi %s8825_s24, %s10431_s24  }
   0x8   : > { %s6856_s29 = sadd.s32 4294967294, %s8731_s27   ;;  %s8848_s0 = sadd.s32 1, %s8731_s27  }
   0x9   : > { %10419 = sst [smem:[#allocation6_spill]] %s8848_s0  ;;  %s399_s30 = sadd.s32 1, %s8727_s26 }
   0xa   : > { %s396_s18 = ssub.s32 %s8731_s27, %s8848_s0  ;;  %p409_p0 = scmp.ne.s32.totalorder %s8727_s26, %s8723_s25 }
   0xb   : > { %p397_p1 = scmp.eq.s32.totalorder %s396_s18, 0  ;;  %p410_p2 = scmp.eq.s32.totalorder %s6855_s28, 1 }
   0xc   : > { %p415_p3 = scmp.ne.s32.totalorder %s8723_s25, %s8719_s24  ;;  %p416_p4 = scmp.eq.s32.totalorder %s6856_s29, 1 }
   0xd   : > { %s8858_s19 = scalar_select %p397_p1, %s8727_s26, %s399_s30  }
   0xe   : > { %p8860_p5 = por %p410_p2, %p409_p0  ;;  %p8864_p6 = por %p416_p4, %p415_p3 }
   0xf   : > { %10420 = sst [smem:[#allocation7_spill]] %s8858_s19  ;;  %p6859_p7 = scmp.ge.s32.totalorder %s8731_s27, 1 }
  0x10   : > { %s10422_s20 = scalar_select %p8864_p6, 1, 0 }
  0x11   : > { %p491_p8 = scmp.lt.s32.totalorder %s8731_s27, 3 }
  0x12   : > { %10423 = sst [smem:[#allocation8_spill]] %s10422_s20 }
  0x13   : > { %p492_p9 = pnand %p6859_p7, %p491_p8 }
  0x14   : > { %s10424_s23 = sld [smem:[#allocation10_spill]] (!%p492_p9)  ;;  %vm1199_vm0 = vcmask (!%p492_p9), 1043456   ;;  %s8873_s29 = sshll.u32 (!%p492_p9), %s6855_s28, 7  ;;  %vm1006_vm1 = vcmask (!%p492_p9), 64512   ;;  %v8472_v23 = vld [vmem:[%s10396_s3] sm:$0xff] (!%p492_p9)   ;;  %v8477_v28 = vld [vmem:[%s10396_s3 + $0x8] sm:$0xff] (!%p492_p9)  }
  0x15   : > { %495 = sbr.rel (%p492_p9) target bundleno = 2153 (0x869), region = 88  ;;  %p544_p10 = scmp.lt.s32.totalorder (!%p492_p9), %s8873_s29, 255  ;;  %v8480_v31 = vld [vmem:[%s10396_s3 + $0x10] sm:$0xff] (!%p492_p9)   ;;  %v8483_v36 = vld [vmem:[%s10398_s5] sm:$0xff] (!%p492_p9)   ;;  %v8485_v37 = vld [vmem:[%s10396_s3 + $0x18] sm:$0xff] (!%p492_p9)   ;;  %vm1979_vm2 = vcmask (!%p492_p9), 523264  }
  0x16   : > { %s10425_s0 = sld [smem:[#allocation9_spill]] (!%p492_p9)  ;;  %v8489_v52 = vld [vmem:[%s10398_s5 + $0x8] sm:$0xff] (!%p492_p9)   ;;  %s10426_s2 = sld [smem:[#allocation11_spill]] (!%p492_p9)  ;;  %vm5859_vm3 = vcmask (!%p492_p9), 1041409   ;;  %vm5861_vm4 = vcmask (!%p492_p9), 1042434   ;;  %vm5863_vm5 = vcmask (!%p492_p9), 1043459  }
  0x17   : > { %vm5865_vm6 = vcmask (!%p492_p9), 1044484   ;;  %vm5867_vm7 = vcmask (!%p492_p9), 1045509   ;;  %vm5869_vm8 = vcmask (!%p492_p9), 1046534   ;;  %vm5871_vm9 = vcmask (!%p492_p9), 1047559  }
  0x1a   : > { %v678_v0 = vld [vmem:[%s10424_s23] sm:$0xf] (!%p492_p9) }
  0x1b   : > { %8378 = vmatprep.subr.msk.bf16.mxu0 (!%p492_p9), %vm1199_vm0, %v678_v0  ;;  %v1201_v1 = vsel (!%p492_p9), %vm1199_vm0, %v678_v0, 0  ;;  %8379 = vmatprep.subr.msk.bf16.mxu1 (!%p492_p9), %vm1199_vm0, %v678_v0 }
  0x1c   : > { %7689 = vmatpush3.bf16.msra.mxu0 %v1201_v1  ;;  %8371 = vmatpush3.bf16.msra.mxu1 %v1201_v1  ;;  %s545_s30 = scalar_select %p544_p10, %s8873_s29, 255 }
  0x1d   : > { %7818 = vmatprep.subr.bf16.mxu1 %v8472_v23  ;;  %7954 = vmatprep.subr.bf16.mxu0 %v8483_v36 }
  0x1e   : > { %s6862_s18 = sshll.u32 %s545_s30, 2 }
  0x1f   : > { %s8880_s20 = scalar_lea.vmem %s10425_s0, %s6862_s18  ;;  %s540_s18 = sand.u32 1, %s8723_s25  }
  0x20   : > { %v8420_v2 = vld [vmem:[%s8880_s20] sm:$0xff]   ;;  %v8421_v3 = vld [vmem:[%s8880_s20 + $0x8] sm:$0xff]   ;;  %v8422_v4 = vld [vmem:[%s8880_s20 + $0x10] sm:$0xff]   ;;  %s6860_s26 = sshll.u32 %s540_s18, 3  ;;  %s6784_s30 = scalar_lea.sflag [#allocation3], %s540_s18 }
  0x21   : > { %7690 = vmatprep.mubr.msk.bf16.mxu0 %vm1006_vm1, %v8420_v2  ;;  %v8423_v5 = vld [vmem:[%s8880_s20 + $0x18] sm:$0xff]   ;;  %v8424_v6 = vld [vmem:[%s8880_s20 + $0x20] sm:$0xff]   ;;  %v8425_v7 = vld [vmem:[%s8880_s20 + $0x28] sm:$0xff]   ;;  %s542_s19 = scalar_lea.vmem [#allocation2], %s6860_s26  ;;  %s8734_s26 = smov [#allocation2]  }
  0x22   : > { %7691 = vmatmul.mubr.msk.bf16.vlgmr.msra.gmra.mrb[0].mxu0 %vm1006_vm1, %v8421_v3  ;;  %v8426_v8 = vld [vmem:[%s8880_s20 + $0x30] sm:$0xff]   ;;  %v8427_v9 = vld [vmem:[%s8880_s20 + $0x38] sm:$0xff]   ;;  %v8428_v10 = vld [vmem:[%s8880_s20 + $0x40] sm:$0xff]   ;;  %s6797_s21 = sshll.u32 %s542_s19, 4  ;;  %s8673_s0 = sshll.u32 %s8734_s26, 4  ;;  %s10353_s21 = int_to_ptr.vmem [resolvable:$true] %s6797_s21  ;;  %s8674_s0 = int_to_ptr.vmem [resolvable:$false] %s8673_s0 }
  0x23   : > { %7694 = vmatprep.mubr.msk.bf16.mxu0 %vm1006_vm1, %v8422_v4  ;;  %v8429_v11 = vld [vmem:[%s8880_s20 + $0x48] sm:$0xff]   ;;  %v8430_v12 = vld [vmem:[%s8880_s20 + $0x50] sm:$0xff]   ;;  %v8431_v13 = vld [vmem:[%s8880_s20 + $0x58] sm:$0xff]   ;;  %7955 = vmatpush3.bf16.msra.mxu0 %v8483_v36  ;;  %s8669_s28 = scalar_lea.vmem %s10353_s21, 128  ;;  %p8676_p0 = scmp.lt.s32.totalorder %s10353_s21, %s8674_s0 }
  0x24   : > { %v8432_v14 = vld [vmem:[%s8880_s20 + $0x60] sm:$0xff]   ;;  %v8433_v15 = vld [vmem:[%s8880_s20 + $0x68] sm:$0xff]   ;;  %v8434_v16 = vld [vmem:[%s8880_s20 + $0x70] sm:$0xff]   ;;  %7956 = vmatprep.subr.bf16.mxu0 %v8489_v52  ;;  %p8670_p11 = scmp.ne.s32.totalorder %s10353_s21, %s8669_s28 }
  0x25   : > { %v8435_v17 = vld [vmem:[%s8880_s20 + $0x78] sm:$0xff]   ;;  %v8436_v18 = vld [vmem:[%s8880_s20 + $0x80] sm:$0xff]   ;;  %v8437_v19 = vld [vmem:[%s8880_s20 + $0x88] sm:$0xff]  }
  0x26   : > { %v8438_v20 = vld [vmem:[%s8880_s20 + $0x90] sm:$0xff]   ;;  %v8471_v22 = vld [vmem:[%s8880_s20 + $0x1d8] sm:$0xff]   ;;  %v8440_v25 = vld [vmem:[%s8880_s20 + $0xa0] sm:$0xff]   ;;  %p8671_p12 = pnand %p8670_p11, %p8860_p5 }
  0x27   : > { %v8470_v21 = vld [vmem:[%s8880_s20 + $0x1d0] sm:$0xff]   ;;  %v8439_v24 = vld [vmem:[%s8880_s20 + $0x98] sm:$0xff]   ;;  %v8475_v26 = vld [vmem:[%s8880_s20 + $0x1e0] sm:$0xff]   ;;  %7957 = vmatpush3.bf16.msra.mxu0 %v8489_v52 }
  0x28   : > { %7806 = vmatprep.mubr.msk.bf16.mxu1 %vm1006_vm1, %v8470_v21  ;;  %v8476_v27 = vld [vmem:[%s8880_s20 + $0x1e8] sm:$0xff]   ;;  %v8442_v30 = vld [vmem:[%s8880_s20 + $0xb0] sm:$0xff]   ;;  %v8482_v33 = vld [vmem:[%s8880_s20 + $0x1f8] sm:$0xff]   ;;  %p8672_p13 = pneg %p8671_p12 }
  0x29   : > { %7807 = vmatmul.mubr.msk.bf16.vlgmr.msra.gmra.mrb[0].mxu1 %vm1006_vm1, %v8471_v22  ;;  %v8441_v29 = vld [vmem:[%s8880_s20 + $0xa8] sm:$0xff]   ;;  %v8481_v32 = vld [vmem:[%s8880_s20 + $0x1f0] sm:$0xff]   ;;  %v8443_v34 = vld [vmem:[%s8880_s20 + $0xb8] sm:$0xff]  }
  0x2a   : > { %7695 = vmatmul.mubr.msk.bf16.gmra.mrb[4].mxu0 %vm1006_vm1, %v8423_v5  ;;  %7819 = vmatpush3.bf16.msra.mxu1 %v8472_v23  ;;  %v8444_v35 = vld [vmem:[%s8880_s20 + $0xc0] sm:$0xff]   ;;  %v8445_v38 = vld [vmem:[%s8880_s20 + $0xc8] sm:$0xff]   ;;  %v8446_v39 = vld [vmem:[%s8880_s20 + $0xd0] sm:$0xff]  }
  0x2b   : > { %7698 = vmatprep.mubr.msk.bf16.mxu0 %vm1006_vm1, %v8424_v6  ;;  %7810 = vmatprep.mubr.msk.bf16.mxu1 %vm1006_vm1, %v8475_v26  ;;  %v8447_v40 = vld [vmem:[%s8880_s20 + $0xd8] sm:$0xff]   ;;  %v8448_v41 = vld [vmem:[%s8880_s20 + $0xe0] sm:$0xff]   ;;  %v8449_v42 = vld [vmem:[%s8880_s20 + $0xe8] sm:$0xff]  }
  0x2c   : > { %7820 = vmatprep.subr.bf16.mxu1 %v8477_v28  ;;  %v8450_v43 = vld [vmem:[%s8880_s20 + $0xf0] sm:$0xff]   ;;  %v8451_v44 = vld [vmem:[%s8880_s20 + $0xf8] sm:$0xff]   ;;  %v8452_v45 = vld [vmem:[%s8880_s20 + $0x100] sm:$0xff]  }
  0x2d   : > { %v8453_v46 = vld [vmem:[%s8880_s20 + $0x108] sm:$0xff]   ;;  %v8454_v47 = vld [vmem:[%s8880_s20 + $0x110] sm:$0xff]   ;;  %v8455_v48 = vld [vmem:[%s8880_s20 + $0x118] sm:$0xff]  }
  0x2e   : > { %7821 = vmatpush3.bf16.msra.mxu1 %v8477_v28  ;;  %v8456_v49 = vld [vmem:[%s8880_s20 + $0x120] sm:$0xff]   ;;  %v8457_v50 = vld [vmem:[%s8880_s20 + $0x128] sm:$0xff]   ;;  %v8458_v51 = vld [vmem:[%s8880_s20 + $0x130] sm:$0xff]  }
  0x2f   : > { %7822 = vmatprep.subr.bf16.mxu1 %v8480_v31  ;;  %v8459_v53 = vld [vmem:[%s8880_s20 + $0x138] sm:$0xff]   ;;  %v8460_v54 = vld [vmem:[%s8880_s20 + $0x140] sm:$0xff]   ;;  %v8461_v55 = vld [vmem:[%s8880_s20 + $0x148] sm:$0xff]  }
  0x30   : > { %v8462_v56 = vld [vmem:[%s8880_s20 + $0x150] sm:$0xff]   ;;  %v8463_v57 = vld [vmem:[%s8880_s20 + $0x158] sm:$0xff]   ;;  %v8464_v58 = vld [vmem:[%s8880_s20 + $0x160] sm:$0xff]  }
  0x31   : > { %7811 = vmatmul.mubr.msk.bf16.gmra.mrb[4].mxu1 %vm1006_vm1, %v8476_v27  ;;  %v8465_v59 = vld [vmem:[%s8880_s20 + $0x168] sm:$0xff]   ;;  %v8466_v60 = vld [vmem:[%s8880_s20 + $0x170] sm:$0xff]   ;;  %v8467_v61 = vld [vmem:[%s8880_s20 + $0x178] sm:$0xff]  }
  0x32   : > { %7699 = vmatmul.mubr.msk.bf16.gmra.mrb[8].mxu0 %vm1006_vm1, %v8425_v7  ;;  %7814 = vmatprep.mubr.msk.bf16.mxu1 %vm1006_vm1, %v8481_v32  ;;  %v8468_v62 = vld [vmem:[%s8880_s20 + $0x180] sm:$0xff]   ;;  %v8469_v63 = vld [vmem:[%s8880_s20 + $0x188] sm:$0xff]   ;;  %v8473_v0 = vld [vmem:[%s8880_s20 + $0x190] sm:$0xff]  }
  0x33   : > { %7702 = vmatprep.mubr.msk.bf16.mxu0 %vm1006_vm1, %v8426_v8  ;;  %7823 = vmatpush3.bf16.msra.mxu1 %v8480_v31  ;;  %v8474_v1 = vld [vmem:[%s8880_s20 + $0x198] sm:$0xff]   ;;  %v8478_v2 = vld [vmem:[%s8880_s20 + $0x1a0] sm:$0xff]   ;;  %v8490_v3 = vld [vmem:[%s10398_s5 + $0x10] sm:$0xff]  }
  0x34   : > { %7824 = vmatprep.subr.bf16.mxu1 %v8485_v37  ;;  %v8479_v4 = vld [vmem:[%s8880_s20 + $0x1a8] sm:$0xff]   ;;  %v8484_v5 = vld [vmem:[%s8880_s20 + $0x1b0] sm:$0xff]   ;;  %7958 = vmatprep.subr.bf16.mxu0 %v8490_v3  ;;  %v9027_v6 = vld [vmem:[%s10426_s2] ss:$0 sm:$0xff] }
  0x35   : > { %7959 = vmatpush3.bf16.msra.mxu0 %v8490_v3  ;;  %v8488_v26 = vld [vmem:[%s8880_s20 + $0x1c8] sm:$0xff]  }
  0x37   : > { %7825 = vmatpush3.bf16.msra.mxu1 %v8485_v37 }
  0x39   : > { %7815 = vmatmul.mubr.msk.bf16.gmra.mrb[8].mxu1 %vm1006_vm1, %v8482_v33 }
  0x3a   : > { %7703 = vmatmul.mubr.msk.bf16.gmra.mrb[12].mxu0 %vm1006_vm1, %v8427_v9 }
  0x3b   : > { %7706 = vmatprep.mubr.msk.bf16.mxu0 %vm1006_vm1, %v8428_v10  ;;  %v8486_v10 = vld [vmem:[%s8880_s20 + $0x1b8] sm:$0xff]  }
  0x42   : > { %7707 = vmatmul.mubr.msk.bf16.gmra.mrb[16].mxu0 %vm1006_vm1, %v8429_v11 }
  0x43   : > { %7710 = vmatprep.mubr.msk.bf16.mxu0 %vm1006_vm1, %v8430_v12 }
  0x4a   : > { %7711 = vmatmul.mubr.msk.bf16.gmra.mrb[20].mxu0 %vm1006_vm1, %v8431_v13  ;;  %v8487_v13 = vld [vmem:[%s8880_s20 + $0x1c0] sm:$0xff]   ;;  %s10351_s20 = scalar_lea.hbm %s10410_s17, %s8873_s29 }
  0x4b   : > { %7714 = vmatprep.mubr.msk.bf16.mxu0 %vm1006_vm1, %v8432_v14 }
  0x52   : > { %7715 = vmatmul.mubr.msk.bf16.gmra.mrb[24].mxu0 %vm1006_vm1, %v8433_v15 }
  0x53   : > { %7718 = vmatprep.mubr.msk.bf16.mxu0 %vm1006_vm1, %v8434_v16 }
  0x5a   : > { %7719 = vmatmul.mubr.msk.bf16.gmra.mrb[28].mxu0 %vm1006_vm1, %v8435_v17 }
  0x5b   : > { %7722 = vmatprep.mubr.msk.bf16.mxu0 %vm1006_vm1, %v8436_v18 }
  0x62   : > { %7723 = vmatmul.mubr.msk.bf16.gmra.mrb[32].mxu0 %vm1006_vm1, %v8437_v19 }
  0x63   : > { %7726 = vmatprep.mubr.msk.bf16.mxu0 %vm1006_vm1, %v8438_v20 }
  0x6a   : > { %7727 = vmatmul.mubr.msk.bf16.gmra.mrb[36].mxu0 %vm1006_vm1, %v8439_v24 }
  0x6b   : > { %7730 = vmatprep.mubr.msk.bf16.mxu0 %vm1006_vm1, %v8440_v25 }
  0x72   : > { %7731 = vmatmul.mubr.msk.bf16.gmra.mrb[40].mxu0 %vm1006_vm1, %v8441_v29 }
  0x73   : > { %7734 = vmatprep.mubr.msk.bf16.mxu0 %vm1006_vm1, %v8442_v30 }
  0x7a   : > { %7735 = vmatmul.mubr.msk.bf16.gmra.mrb[44].mxu0 %vm1006_vm1, %v8443_v34 }
  0x7b   : > { %7738 = vmatprep.mubr.msk.bf16.mxu0 %vm1006_vm1, %v8444_v35 }
  0x82   : > { %7739 = vmatmul.mubr.msk.bf16.gmra.mrb[48].mxu0 %vm1006_vm1, %v8445_v38 }
  0x83   : > { %7742 = vmatprep.mubr.msk.bf16.mxu0 %vm1006_vm1, %v8446_v39 }
  0x8a   : > { %7743 = vmatmul.mubr.msk.bf16.gmra.mrb[52].mxu0 %vm1006_vm1, %v8447_v40 }
  0x8b   : > { %7746 = vmatprep.mubr.msk.bf16.mxu0 %vm1006_vm1, %v8448_v41 }
  0x92   : > { %7747 = vmatmul.mubr.msk.bf16.gmra.mrb[56].mxu0 %vm1006_vm1, %v8449_v42 }
  0x93   : > { %7750 = vmatprep.mubr.msk.bf16.mxu0 %vm1006_vm1, %v8450_v43 }
  0x9a   : > { %7751 = vmatmul.mubr.msk.bf16.gmra.mrb[60].mxu0 %vm1006_vm1, %v8451_v44 }
  0x9b   : > { %7754 = vmatprep.mubr.msk.bf16.mxu0 %vm1006_vm1, %v8452_v45 }
  0xa2   : > { %7755 = vmatmul.mubr.msk.bf16.gmra.mrb[64].mxu0 %vm1006_vm1, %v8453_v46 }
  0xa3   : > { %7758 = vmatprep.mubr.msk.bf16.mxu0 %vm1006_vm1, %v8454_v47 }
  0xaa   : > { %7759 = vmatmul.mubr.msk.bf16.gmra.mrb[68].mxu0 %vm1006_vm1, %v8455_v48 }
  0xab   : > { %7762 = vmatprep.mubr.msk.bf16.mxu0 %vm1006_vm1, %v8456_v49 }
  0xb2   : > { %7763 = vmatmul.mubr.msk.bf16.gmra.mrb[72].mxu0 %vm1006_vm1, %v8457_v50 }
  0xb3   : > { %7766 = vmatprep.mubr.msk.bf16.mxu0 %vm1006_vm1, %v8458_v51 }
  0xba   : > { %7767 = vmatmul.mubr.msk.bf16.gmra.mrb[76].mxu0 %vm1006_vm1, %v8459_v53 }
  0xbb   : > { %7770 = vmatprep.mubr.msk.bf16.mxu0 %vm1006_vm1, %v8460_v54 }
  0xc2   : > { %7771 = vmatmul.mubr.msk.bf16.gmra.mrb[80].mxu0 %vm1006_vm1, %v8461_v55 }
  0xc3   : > { %7774 = vmatprep.mubr.msk.bf16.mxu0 %vm1006_vm1, %v8462_v56 }
  0xca   : > { %7775 = vmatmul.mubr.msk.bf16.gmra.mrb[84].mxu0 %vm1006_vm1, %v8463_v57 }
  0xcb   : > { %7778 = vmatprep.mubr.msk.bf16.mxu0 %vm1006_vm1, %v8464_v58 }
  0xd2   : > { %7779 = vmatmul.mubr.msk.bf16.gmra.mrb[88].mxu0 %vm1006_vm1, %v8465_v59 }
  0xd3   : > { %7782 = vmatprep.mubr.msk.bf16.mxu0 %vm1006_vm1, %v8466_v60 }
  0xda   : > { %7783 = vmatmul.mubr.msk.bf16.gmra.mrb[92].mxu0 %vm1006_vm1, %v8467_v61 }
  0xdb   : > { %7786 = vmatprep.mubr.msk.bf16.mxu0 %vm1006_vm1, %v8468_v62 }
  0xe2   : > { %7787 = vmatmul.mubr.msk.bf16.gmra.mrb[96].mxu0 %vm1006_vm1, %v8469_v63 }
  0xe3   : > { %7790 = vmatprep.mubr.msk.bf16.mxu0 %vm1006_vm1, %v8473_v0 }
  0xea   : > { %7791 = vmatmul.mubr.msk.bf16.gmra.mrb[100].mxu0 %vm1006_vm1, %v8474_v1 }
  0xeb   : > { %7794 = vmatprep.mubr.msk.bf16.mxu0 %vm1006_vm1, %v8478_v2 }
  0xf2   : > { %7795 = vmatmul.mubr.msk.bf16.gmra.mrb[104].mxu0 %vm1006_vm1, %v8479_v4 }
  0xf3   : > { %7798 = vmatprep.mubr.msk.bf16.mxu0 %vm1006_vm1, %v8484_v5 }
  0xf5   : > { %v7692_v7 = vpop.f32.mrb[0].mxu0 }
  0xf6   : > { %v1246_v8 = vadd.f32 %v7692_v7, %v9027_v6  ;;  %v1237_v9 = vpop.f32.mrb[1].mxu0 }
  0xf7   : > { %v1238_v11 = vadd.f32 %v9027_v6, %v1237_v9  ;;  %v7693_v12 = vpop.f32.mrb[2].mxu0 }
  0xf8   : > { %v1249_v14 = vadd.f32 %v7693_v12, %v9027_v6  ;;  %v1240_v15 = vpop.f32.mrb[3].mxu0  ;;  %v1750_v17 = vmax.f32 %v1246_v8, 0.0 }
  0xf9   : > { %v1241_v16 = vadd.f32 %v9027_v6, %v1240_v15  ;;  %v1748_v19 = vmax.f32 %v1238_v11, 0.0 }
  0xfa   : > { %v1751_v18 = vmax.f32 %v1249_v14, 0.0  ;;  %7799 = vmatmul.mubr.msk.bf16.gmra.mrb[108].mxu0 %vm1006_vm1, %v8486_v10 }
  0xfb   : > { %v1749_v20 = vmax.f32 %v1241_v16, 0.0  ;;  %7802 = vmatprep.mubr.msk.bf16.mxu0 %vm1006_vm1, %v8487_v13 }
  0xfc   : > { %v1877_v21 = vpack.c.bf16 %v1751_v18, %v1750_v17 }
  0xfd   : > { %v1876_v22 = vpack.c.bf16 %v1749_v20, %v1748_v19  ;;  %v7696_v23 = vpop.f32.mrb[4].mxu0 }
  0xfe   : > { %v1262_v24 = vadd.f32 %v7696_v23, %v9027_v6  ;;  %v1253_v25 = vpop.f32.mrb[5].mxu0 }
  0xff   : > { %v1254_v27 = vadd.f32 %v9027_v6, %v1253_v25  ;;  %v7697_v28 = vpop.f32.mrb[6].mxu0  ;;  %7826 = vmatprep.mubr.msk.bf16.mxu1 %vm1979_vm2, %v1876_v22 }
 0x100   : > { %v1265_v29 = vadd.f32 %v7697_v28, %v9027_v6  ;;  %v1256_v30 = vpop.f32.mrb[7].mxu0  ;;  %7827 = vmatmul.mubr.msk.bf16.vlgmr.msra.gmra.mrb[12].mxu1 %vm1979_vm2, %v1877_v21  ;;  %v1754_v32 = vmax.f32 %v1262_v24, 0.0 }
 0x101   : > { %v1257_v31 = vadd.f32 %v9027_v6, %v1256_v30  ;;  %v1752_v34 = vmax.f32 %v1254_v27, 0.0 }
 0x102   : > { %v1755_v33 = vmax.f32 %v1265_v29, 0.0  ;;  %7803 = vmatmul.mubr.msk.bf16.gmra.mrb[112].mxu0 %vm1006_vm1, %v8488_v26 }
 0x103   : > { %v1753_v35 = vmax.f32 %v1257_v31, 0.0 }
 0x104   : > { %v1879_v36 = vpack.c.bf16 %v1755_v33, %v1754_v32  ;;  %v8491_v32 = vld [vmem:[%s10398_s5 + $0x18] sm:$0xff]  }
 0x105   : > { %v1878_v37 = vpack.c.bf16 %v1753_v35, %v1752_v34  ;;  %v7700_v38 = vpop.f32.mrb[8].mxu0  ;;  %7960 = vmatprep.subr.bf16.mxu0 %v8491_v32 }
 0x106   : > { %v1278_v39 = vadd.f32 %v7700_v38, %v9027_v6  ;;  %v1269_v40 = vpop.f32.mrb[9].mxu0  ;;  %7961 = vmatpush3.bf16.msra.mxu0 %v8491_v32 }
 0x107   : > { %v1270_v41 = vadd.f32 %v9027_v6, %v1269_v40  ;;  %v7701_v42 = vpop.f32.mrb[10].mxu0  ;;  %7830 = vmatprep.mubr.msk.bf16.mxu1 %vm1979_vm2, %v1878_v37 }
 0x108   : > { %v1281_v43 = vadd.f32 %v7701_v42, %v9027_v6  ;;  %v1272_v44 = vpop.f32.mrb[11].mxu0  ;;  %7831 = vmatmul.mubr.msk.bf16.gmra.mrb[16].mxu1 %vm1979_vm2, %v1879_v36  ;;  %v1758_v46 = vmax.f32 %v1278_v39, 0.0 }
 0x109   : > { %v1273_v45 = vadd.f32 %v9027_v6, %v1272_v44  ;;  %v1756_v48 = vmax.f32 %v1270_v41, 0.0 }
 0x10a   : > { %v1759_v47 = vmax.f32 %v1281_v43, 0.0 }
 0x10b   : > { %v1757_v49 = vmax.f32 %v1273_v45, 0.0 }
 0x10c   : > { %v1881_v50 = vpack.c.bf16 %v1759_v47, %v1758_v46 }
 0x10d   : > { %v1880_v51 = vpack.c.bf16 %v1757_v49, %v1756_v48  ;;  %v7704_v52 = vpop.f32.mrb[12].mxu0 }
 0x10e   : > { %v1294_v53 = vadd.f32 %v7704_v52, %v9027_v6  ;;  %v1285_v54 = vpop.f32.mrb[13].mxu0 }
 0x10f   : > { %v1286_v55 = vadd.f32 %v9027_v6, %v1285_v54  ;;  %v7705_v56 = vpop.f32.mrb[14].mxu0  ;;  %7834 = vmatprep.mubr.msk.bf16.mxu1 %vm1979_vm2, %v1880_v51 }
 0x110   : > { %v1297_v57 = vadd.f32 %v7705_v56, %v9027_v6  ;;  %v1288_v58 = vpop.f32.mrb[15].mxu0  ;;  %7835 = vmatmul.mubr.msk.bf16.gmra.mrb[20].mxu1 %vm1979_vm2, %v1881_v50  ;;  %v1762_v60 = vmax.f32 %v1294_v53, 0.0 }
 0x111   : > { %v1289_v59 = vadd.f32 %v9027_v6, %v1288_v58  ;;  %v1760_v62 = vmax.f32 %v1286_v55, 0.0 }
 0x112   : > { %v1763_v61 = vmax.f32 %v1297_v57, 0.0 }
 0x113   : > { %v1761_v63 = vmax.f32 %v1289_v59, 0.0 }
 0x114   : > { %v1883_v0 = vpack.c.bf16 %v1763_v61, %v1762_v60 }
 0x115   : > { %v1882_v1 = vpack.c.bf16 %v1761_v63, %v1760_v62  ;;  %v7708_v2 = vpop.f32.mrb[16].mxu0 }
 0x116   : > { %v1310_v3 = vadd.f32 %v7708_v2, %v9027_v6  ;;  %v1301_v4 = vpop.f32.mrb[17].mxu0 }
 0x117   : > { %v1302_v5 = vadd.f32 %v9027_v6, %v1301_v4  ;;  %v7709_v7 = vpop.f32.mrb[18].mxu0  ;;  %7838 = vmatprep.mubr.msk.bf16.mxu1 %vm1979_vm2, %v1882_v1 }
 0x118   : > { %v1313_v8 = vadd.f32 %v7709_v7, %v9027_v6  ;;  %v1304_v9 = vpop.f32.mrb[19].mxu0  ;;  %7839 = vmatmul.mubr.msk.bf16.gmra.mrb[24].mxu1 %vm1979_vm2, %v1883_v0  ;;  %v1766_v11 = vmax.f32 %v1310_v3, 0.0  ;;  %v7808_v3 = vpop.f32.mrb[0].mxu1 }
 0x119   : > { %v1305_v10 = vadd.f32 %v9027_v6, %v1304_v9  ;;  %v1764_v13 = vmax.f32 %v1302_v5, 0.0  ;;  %v1701_v5 = vpop.f32.mrb[1].mxu1 }
 0x11a   : > { %v1767_v12 = vmax.f32 %v1313_v8, 0.0  ;;  %v7809_v9 = vpop.f32.mrb[2].mxu1 }
 0x11b   : > { %v1765_v14 = vmax.f32 %v1305_v10, 0.0 }
 0x11c   : > { %v1885_v15 = vpack.c.bf16 %v1767_v12, %v1766_v11  ;;  %v1704_v12 = vpop.f32.mrb[3].mxu1 }
 0x11d   : > { %v1884_v16 = vpack.c.bf16 %v1765_v14, %v1764_v13  ;;  %v7712_v17 = vpop.f32.mrb[20].mxu0  ;;  %v1710_v14 = vadd.f32 %v7808_v3, %v9027_v6  ;;  %v7812_v32 = vpop.f32.mrb[4].mxu1 }
 0x11e   : > { %v1326_v18 = vadd.f32 %v7712_v17, %v9027_v6  ;;  %v1317_v19 = vpop.f32.mrb[21].mxu0 }
 0x11f   : > { %v1318_v20 = vadd.f32 %v9027_v6, %v1317_v19  ;;  %v7713_v21 = vpop.f32.mrb[22].mxu0  ;;  %7842 = vmatprep.mubr.msk.bf16.mxu1 %vm1979_vm2, %v1884_v16  ;;  %v1713_v16 = vadd.f32 %v7809_v9, %v9027_v6  ;;  %v1705_v19 = vadd.f32 %v9027_v6, %v1704_v12 }
 0x120   : > { %v1329_v22 = vadd.f32 %v7713_v21, %v9027_v6  ;;  %v1320_v23 = vpop.f32.mrb[23].mxu0  ;;  %7843 = vmatmul.mubr.msk.bf16.gmra.mrb[28].mxu1 %vm1979_vm2, %v1885_v15  ;;  %v1770_v25 = vmax.f32 %v1326_v18, 0.0  ;;  %v1702_v15 = vadd.f32 %v9027_v6, %v1701_v5 }
 0x121   : > { %v1321_v24 = vadd.f32 %v9027_v6, %v1320_v23  ;;  %v1768_v27 = vmax.f32 %v1318_v20, 0.0  ;;  %v8492_v20 = vld [vmem:[%s10400_s7] sm:$0xff]   ;;  %v1866_v23 = vmax.f32 %v1710_v14, 0.0 }
 0x122   : > { %v1771_v26 = vmax.f32 %v1329_v22, 0.0  ;;  %8090 = vmatprep.subr.bf16.mxu1 %v8492_v20 }
 0x123   : > { %v1769_v28 = vmax.f32 %v1321_v24, 0.0  ;;  %v1864_v24 = vmax.f32 %v1702_v15, 0.0  ;;  %8091 = vmatpush3.bf16.msra.mxu1 %v8492_v20 }
 0x124   : > { %v1887_v29 = vpack.c.bf16 %v1771_v26, %v1770_v25  ;;  %v1867_v25 = vmax.f32 %v1713_v16, 0.0 }
 0x125   : > { %v1886_v30 = vpack.c.bf16 %v1769_v28, %v1768_v27  ;;  %v7716_v31 = vpop.f32.mrb[24].mxu0  ;;  %v1865_v28 = vmax.f32 %v1705_v19, 0.0 }
 0x126   : > { %v1342_v33 = vadd.f32 %v7716_v31, %v9027_v6  ;;  %v1333_v34 = vpop.f32.mrb[25].mxu0  ;;  %v9103_v31 = vpack.c.bf16 %v1867_v25, %v1866_v23 }
 0x127   : > { %v1334_v35 = vadd.f32 %v9027_v6, %v1333_v34  ;;  %v7717_v36 = vpop.f32.mrb[26].mxu0  ;;  %7846 = vmatprep.mubr.msk.bf16.mxu1 %vm1979_vm2, %v1886_v30  ;;  %v9106_v34 = vpack.c.bf16 %v1865_v28, %v1864_v24 }
 0x128   : > { %v1345_v37 = vadd.f32 %v7717_v36, %v9027_v6  ;;  %v1336_v38 = vpop.f32.mrb[27].mxu0  ;;  %7847 = vmatmul.mubr.msk.bf16.gmra.mrb[32].mxu1 %vm1979_vm2, %v1887_v29  ;;  %v1774_v40 = vmax.f32 %v1342_v33, 0.0 }
 0x129   : > { %v1337_v39 = vadd.f32 %v9027_v6, %v1336_v38  ;;  %v1772_v42 = vmax.f32 %v1334_v35, 0.0  ;;  %v1717_v35 = vpop.f32.mrb[5].mxu1 }
 0x12a   : > { %v1775_v41 = vmax.f32 %v1345_v37, 0.0  ;;  %v7813_v38 = vpop.f32.mrb[6].mxu1 }
 0x12b   : > { %v1773_v43 = vmax.f32 %v1337_v39, 0.0 }
 0x12c   : > { %v1889_v44 = vpack.c.bf16 %v1775_v41, %v1774_v40  ;;  %v1720_v41 = vpop.f32.mrb[7].mxu1 }
 0x12d   : > { %v1888_v45 = vpack.c.bf16 %v1773_v43, %v1772_v42  ;;  %v7720_v46 = vpop.f32.mrb[28].mxu0  ;;  %v1726_v43 = vadd.f32 %v7812_v32, %v9027_v6 }
 0x12e   : > { %v1358_v47 = vadd.f32 %v7720_v46, %v9027_v6  ;;  %v1349_v48 = vpop.f32.mrb[29].mxu0 }
 0x12f   : > { %v1350_v49 = vadd.f32 %v9027_v6, %v1349_v48  ;;  %v7721_v50 = vpop.f32.mrb[30].mxu0  ;;  %7850 = vmatprep.mubr.msk.bf16.mxu1 %vm1979_vm2, %v1888_v45  ;;  %v1729_v45 = vadd.f32 %v7813_v38, %v9027_v6  ;;  %v1721_v48 = vadd.f32 %v9027_v6, %v1720_v41 }
 0x130   : > { %v1361_v51 = vadd.f32 %v7721_v50, %v9027_v6  ;;  %v1352_v52 = vpop.f32.mrb[31].mxu0  ;;  %7851 = vmatmul.mubr.msk.bf16.gmra.mrb[36].mxu1 %vm1979_vm2, %v1889_v44  ;;  %v1778_v54 = vmax.f32 %v1358_v47, 0.0  ;;  %v1718_v44 = vadd.f32 %v9027_v6, %v1717_v35 }
 0x131   : > { %v1353_v53 = vadd.f32 %v9027_v6, %v1352_v52  ;;  %v1776_v56 = vmax.f32 %v1350_v49, 0.0 }
 0x132   : > { %v1779_v55 = vmax.f32 %v1361_v51, 0.0  ;;  %v1870_v51 = vmax.f32 %v1726_v43, 0.0  ;;  %v1868_v52 = vmax.f32 %v1718_v44, 0.0 }
 0x133   : > { %v1777_v57 = vmax.f32 %v1353_v53, 0.0  ;;  %v1871_v53 = vmax.f32 %v1729_v45, 0.0 }
 0x134   : > { %v1891_v58 = vpack.c.bf16 %v1779_v55, %v1778_v54 }
 0x135   : > { %v1890_v59 = vpack.c.bf16 %v1777_v57, %v1776_v56  ;;  %v7724_v60 = vpop.f32.mrb[32].mxu0  ;;  %v1869_v56 = vmax.f32 %v1721_v48, 0.0 }
 0x136   : > { %v1374_v61 = vadd.f32 %v7724_v60, %v9027_v6  ;;  %v1365_v62 = vpop.f32.mrb[33].mxu0 }
 0x137   : > { %v1366_v63 = vadd.f32 %v9027_v6, %v1365_v62  ;;  %v7725_v0 = vpop.f32.mrb[34].mxu0  ;;  %7854 = vmatprep.mubr.msk.bf16.mxu1 %vm1979_vm2, %v1890_v59  ;;  %v9117_v59 = vpack.c.bf16 %v1871_v53, %v1870_v51  ;;  %v7816_v62 = vpop.f32.mrb[8].mxu1 }
 0x138   : > { %v1377_v1 = vadd.f32 %v7725_v0, %v9027_v6  ;;  %v1368_v2 = vpop.f32.mrb[35].mxu0  ;;  %7855 = vmatmul.mubr.msk.bf16.gmra.mrb[40].mxu1 %vm1979_vm2, %v1891_v58  ;;  %v1782_v7 = vmax.f32 %v1374_v61, 0.0  ;;  %v9120_v61 = vpack.c.bf16 %v1869_v56, %v1868_v52 }
 0x139   : > { %v1369_v4 = vadd.f32 %v9027_v6, %v1368_v2  ;;  %v1780_v10 = vmax.f32 %v1366_v63, 0.0 }
 0x13a   : > { %v1783_v8 = vmax.f32 %v1377_v1, 0.0  ;;  %v1733_v1 = vpop.f32.mrb[9].mxu1 }
 0x13b   : > { %v1781_v11 = vmax.f32 %v1369_v4, 0.0  ;;  %v7817_v4 = vpop.f32.mrb[10].mxu1 }
 0x13c   : > { %v1893_v13 = vpack.c.bf16 %v1783_v8, %v1782_v7  ;;  %v1742_v7 = vadd.f32 %v7816_v62, %v9027_v6  ;;  %v1734_v8 = vadd.f32 %v9027_v6, %v1733_v1  ;;  %v1745_v9 = vadd.f32 %v7817_v4, %v9027_v6 }
 0x13d   : > { %v1892_v17 = vpack.c.bf16 %v1781_v11, %v1780_v10  ;;  %v7728_v18 = vpop.f32.mrb[36].mxu0  ;;  %v1736_v10 = vpop.f32.mrb[11].mxu1 }
 0x13e   : > { %v1390_v21 = vadd.f32 %v7728_v18, %v9027_v6  ;;  %v1381_v22 = vpop.f32.mrb[37].mxu0  ;;  %v1874_v16 = vmax.f32 %v1742_v7, 0.0  ;;  %v1875_v18 = vmax.f32 %v1745_v9, 0.0 }
 0x13f   : > { %v1382_v26 = vadd.f32 %v9027_v6, %v1381_v22  ;;  %v7729_v27 = vpop.f32.mrb[38].mxu0  ;;  %7858 = vmatprep.mubr.msk.bf16.mxu1 %vm1979_vm2, %v1892_v17  ;;  %v1872_v17 = vmax.f32 %v1734_v8, 0.0 }
 0x140   : > { %v1393_v29 = vadd.f32 %v7729_v27, %v9027_v6  ;;  %v1384_v30 = vpop.f32.mrb[39].mxu0  ;;  %7859 = vmatmul.mubr.msk.bf16.gmra.mrb[44].mxu1 %vm1979_vm2, %v1893_v13  ;;  %v1786_v36 = vmax.f32 %v1390_v21, 0.0  ;;  %v1737_v13 = vadd.f32 %v9027_v6, %v1736_v10  ;;  %v9131_v24 = vpack.c.bf16 %v1875_v18, %v1874_v16 }
 0x141   : > { %v1385_v33 = vadd.f32 %v9027_v6, %v1384_v30  ;;  %v1784_v39 = vmax.f32 %v1382_v26, 0.0 }
 0x142   : > { %v1787_v37 = vmax.f32 %v1393_v29, 0.0  ;;  %v1873_v21 = vmax.f32 %v1737_v13, 0.0 }
 0x143   : > { %v1785_v40 = vmax.f32 %v1385_v33, 0.0 }
 0x144   : > { %v1895_v42 = vpack.c.bf16 %v1787_v37, %v1786_v36  ;;  %v9134_v26 = vpack.c.bf16 %v1873_v21, %v1872_v17 }
 0x145   : > { %v1894_v46 = vpack.c.bf16 %v1785_v40, %v1784_v39  ;;  %v7732_v47 = vpop.f32.mrb[40].mxu0 }
 0x146   : > { %v1406_v49 = vadd.f32 %v7732_v47, %v9027_v6  ;;  %v1397_v50 = vpop.f32.mrb[41].mxu0 }
 0x147   : > { %v1398_v54 = vadd.f32 %v9027_v6, %v1397_v50  ;;  %v7733_v55 = vpop.f32.mrb[42].mxu0  ;;  %7862 = vmatprep.mubr.msk.bf16.mxu1 %vm1979_vm2, %v1894_v46 }
 0x148   : > { %v1409_v57 = vadd.f32 %v7733_v55, %v9027_v6  ;;  %v1400_v58 = vpop.f32.mrb[43].mxu0  ;;  %7863 = vmatmul.mubr.msk.bf16.gmra.mrb[48].mxu1 %vm1979_vm2, %v1895_v42  ;;  %v1790_v63 = vmax.f32 %v1406_v49, 0.0 }
 0x149   : > { %v1401_v60 = vadd.f32 %v9027_v6, %v1400_v58  ;;  %v1788_v2 = vmax.f32 %v1398_v54, 0.0 }
 0x14a   : > { %v1791_v0 = vmax.f32 %v1409_v57, 0.0 }
 0x14b   : > { %v1789_v3 = vmax.f32 %v1401_v60, 0.0 }
 0x14c   : > { %v1897_v5 = vpack.c.bf16 %v1791_v0, %v1790_v63 }
 0x14d   : > { %v1896_v11 = vpack.c.bf16 %v1789_v3, %v1788_v2  ;;  %v7736_v12 = vpop.f32.mrb[44].mxu0 }
 0x14e   : > { %v1422_v14 = vadd.f32 %v7736_v12, %v9027_v6  ;;  %v1413_v15 = vpop.f32.mrb[45].mxu0 }
 0x14f   : > { %v1414_v19 = vadd.f32 %v9027_v6, %v1413_v15  ;;  %v7737_v20 = vpop.f32.mrb[46].mxu0  ;;  %7866 = vmatprep.mubr.msk.bf16.mxu1 %vm1979_vm2, %v1896_v11 }
 0x150   : > { %v1425_v22 = vadd.f32 %v7737_v20, %v9027_v6  ;;  %v1416_v23 = vpop.f32.mrb[47].mxu0  ;;  %7867 = vmatmul.mubr.msk.bf16.gmra.mrb[52].mxu1 %vm1979_vm2, %v1897_v5  ;;  %v1794_v27 = vmax.f32 %v1422_v14, 0.0 }
 0x151   : > { %v1417_v25 = vadd.f32 %v9027_v6, %v1416_v23  ;;  %v1792_v29 = vmax.f32 %v1414_v19, 0.0 }
 0x152   : > { %v1795_v28 = vmax.f32 %v1425_v22, 0.0 }
 0x153   : > { %v1793_v30 = vmax.f32 %v1417_v25, 0.0 }
 0x154   : > { %v1899_v32 = vpack.c.bf16 %v1795_v28, %v1794_v27 }
 0x155   : > { %v1898_v33 = vpack.c.bf16 %v1793_v30, %v1792_v29  ;;  %v7740_v35 = vpop.f32.mrb[48].mxu0 }
 0x156   : > { %v1438_v36 = vadd.f32 %v7740_v35, %v9027_v6  ;;  %v1429_v37 = vpop.f32.mrb[49].mxu0 }
 0x157   : > { %v1430_v38 = vadd.f32 %v9027_v6, %v1429_v37  ;;  %v7741_v39 = vpop.f32.mrb[50].mxu0  ;;  %7870 = vmatprep.mubr.msk.bf16.mxu1 %vm1979_vm2, %v1898_v33 }
 0x158   : > { %v1441_v40 = vadd.f32 %v7741_v39, %v9027_v6  ;;  %v1432_v41 = vpop.f32.mrb[51].mxu0  ;;  %7871 = vmatmul.mubr.msk.bf16.gmra.mrb[56].mxu1 %vm1979_vm2, %v1899_v32  ;;  %v1798_v43 = vmax.f32 %v1438_v36, 0.0 }
 0x159   : > { %v1433_v42 = vadd.f32 %v9027_v6, %v1432_v41  ;;  %v1796_v45 = vmax.f32 %v1430_v38, 0.0 }
 0x15a   : > { %v1799_v44 = vmax.f32 %v1441_v40, 0.0 }
 0x15b   : > { %v1797_v46 = vmax.f32 %v1433_v42, 0.0 }
 0x15c   : > { %v1901_v47 = vpack.c.bf16 %v1799_v44, %v1798_v43 }
 0x15d   : > { %v1900_v48 = vpack.c.bf16 %v1797_v46, %v1796_v45  ;;  %v7744_v49 = vpop.f32.mrb[52].mxu0 }
 0x15e   : > { %v1454_v50 = vadd.f32 %v7744_v49, %v9027_v6  ;;  %v1445_v51 = vpop.f32.mrb[53].mxu0 }
 0x15f   : > { %v1446_v52 = vadd.f32 %v9027_v6, %v1445_v51  ;;  %v7745_v53 = vpop.f32.mrb[54].mxu0  ;;  %7874 = vmatprep.mubr.msk.bf16.mxu1 %vm1979_vm2, %v1900_v48  ;;  %v8493_v51 = vld [vmem:[%s10400_s7 + $0x8] sm:$0xff]  }
 0x160   : > { %v1457_v54 = vadd.f32 %v7745_v53, %v9027_v6  ;;  %v1448_v55 = vpop.f32.mrb[55].mxu0  ;;  %7875 = vmatmul.mubr.msk.bf16.gmra.mrb[60].mxu1 %vm1979_vm2, %v1901_v47  ;;  %v1802_v57 = vmax.f32 %v1454_v50, 0.0  ;;  %8092 = vmatprep.subr.bf16.mxu1 %v8493_v51 }
 0x161   : > { %v1449_v56 = vadd.f32 %v9027_v6, %v1448_v55  ;;  %v1800_v60 = vmax.f32 %v1446_v52, 0.0  ;;  %8093 = vmatpush3.bf16.msra.mxu1 %v8493_v51 }
 0x162   : > { %v1803_v58 = vmax.f32 %v1457_v54, 0.0 }
 0x163   : > { %v1801_v62 = vmax.f32 %v1449_v56, 0.0 }
 0x164   : > { %v1903_v63 = vpack.c.bf16 %v1803_v58, %v1802_v57 }
 0x165   : > { %v1902_v0 = vpack.c.bf16 %v1801_v62, %v1800_v60  ;;  %v7748_v1 = vpop.f32.mrb[56].mxu0 }
 0x166   : > { %v1470_v2 = vadd.f32 %v7748_v1, %v9027_v6  ;;  %v1461_v3 = vpop.f32.mrb[57].mxu0 }
 0x167   : > { %v1462_v4 = vadd.f32 %v9027_v6, %v1461_v3  ;;  %v7749_v5 = vpop.f32.mrb[58].mxu0  ;;  %7878 = vmatprep.mubr.msk.bf16.mxu1 %vm1979_vm2, %v1902_v0 }
 0x168   : > { %v1473_v7 = vadd.f32 %v7749_v5, %v9027_v6  ;;  %v1464_v8 = vpop.f32.mrb[59].mxu0  ;;  %7879 = vmatmul.mubr.msk.bf16.gmra.mrb[64].mxu1 %vm1979_vm2, %v1903_v63  ;;  %v1806_v10 = vmax.f32 %v1470_v2, 0.0 }
 0x169   : > { %v1465_v9 = vadd.f32 %v9027_v6, %v1464_v8  ;;  %v1804_v12 = vmax.f32 %v1462_v4, 0.0 }
 0x16a   : > { %v1807_v11 = vmax.f32 %v1473_v7, 0.0 }
 0x16b   : > { %v1805_v13 = vmax.f32 %v1465_v9, 0.0 }
 0x16c   : > { %v1905_v14 = vpack.c.bf16 %v1807_v11, %v1806_v10 }
 0x16d   : > { %v1904_v15 = vpack.c.bf16 %v1805_v13, %v1804_v12  ;;  %v7752_v16 = vpop.f32.mrb[60].mxu0 }
 0x16e   : > { %v1486_v17 = vadd.f32 %v7752_v16, %v9027_v6  ;;  %v1477_v18 = vpop.f32.mrb[61].mxu0 }
 0x16f   : > { %v1478_v19 = vadd.f32 %v9027_v6, %v1477_v18  ;;  %v7753_v20 = vpop.f32.mrb[62].mxu0  ;;  %7882 = vmatprep.mubr.msk.bf16.mxu1 %vm1979_vm2, %v1904_v15 }
 0x170   : > { %v1489_v21 = vadd.f32 %v7753_v20, %v9027_v6  ;;  %v1480_v22 = vpop.f32.mrb[63].mxu0  ;;  %7883 = vmatmul.mubr.msk.bf16.gmra.mrb[68].mxu1 %vm1979_vm2, %v1905_v14  ;;  %v1810_v25 = vmax.f32 %v1486_v17, 0.0 }
 0x171   : > { %v1481_v23 = vadd.f32 %v9027_v6, %v1480_v22  ;;  %v1808_v28 = vmax.f32 %v1478_v19, 0.0 }
 0x172   : > { %v1811_v27 = vmax.f32 %v1489_v21, 0.0 }
 0x173   : > { %v1809_v29 = vmax.f32 %v1481_v23, 0.0 }
 0x174   : > { %v1907_v30 = vpack.c.bf16 %v1811_v27, %v1810_v25 }
 0x175   : > { %v1906_v32 = vpack.c.bf16 %v1809_v29, %v1808_v28  ;;  %v7756_v33 = vpop.f32.mrb[64].mxu0 }
 0x176   : > { %v1502_v35 = vadd.f32 %v7756_v33, %v9027_v6  ;;  %v1493_v36 = vpop.f32.mrb[65].mxu0 }
 0x177   : > { %v1494_v37 = vadd.f32 %v9027_v6, %v1493_v36  ;;  %v7757_v38 = vpop.f32.mrb[66].mxu0  ;;  %7886 = vmatprep.mubr.msk.bf16.mxu1 %vm1979_vm2, %v1906_v32 }
 0x178   : > { %v1505_v39 = vadd.f32 %v7757_v38, %v9027_v6  ;;  %v1496_v40 = vpop.f32.mrb[67].mxu0  ;;  %7887 = vmatmul.mubr.msk.bf16.gmra.mrb[72].mxu1 %vm1979_vm2, %v1907_v30  ;;  %v1814_v42 = vmax.f32 %v1502_v35, 0.0 }
 0x179   : > { %v1497_v41 = vadd.f32 %v9027_v6, %v1496_v40  ;;  %v1812_v44 = vmax.f32 %v1494_v37, 0.0 }
 0x17a   : > { %v1815_v43 = vmax.f32 %v1505_v39, 0.0 }
 0x17b   : > { %v1813_v45 = vmax.f32 %v1497_v41, 0.0 }
 0x17c   : > { %v1909_v46 = vpack.c.bf16 %v1815_v43, %v1814_v42 }
 0x17d   : > { %v1908_v47 = vpack.c.bf16 %v1813_v45, %v1812_v44  ;;  %v7760_v48 = vpop.f32.mrb[68].mxu0 }
 0x17e   : > { %v1518_v49 = vadd.f32 %v7760_v48, %v9027_v6  ;;  %v1509_v50 = vpop.f32.mrb[69].mxu0 }
 0x17f   : > { %v1510_v52 = vadd.f32 %v9027_v6, %v1509_v50  ;;  %v7761_v53 = vpop.f32.mrb[70].mxu0  ;;  %7890 = vmatprep.mubr.msk.bf16.mxu1 %vm1979_vm2, %v1908_v47 }
 0x180   : > { %v1521_v54 = vadd.f32 %v7761_v53, %v9027_v6  ;;  %v1512_v55 = vpop.f32.mrb[71].mxu0  ;;  %7891 = vmatmul.mubr.msk.bf16.gmra.mrb[76].mxu1 %vm1979_vm2, %v1909_v46  ;;  %v1818_v57 = vmax.f32 %v1518_v49, 0.0 }
 0x181   : > { %v1513_v56 = vadd.f32 %v9027_v6, %v1512_v55  ;;  %v1816_v60 = vmax.f32 %v1510_v52, 0.0 }
 0x182   : > { %v1819_v58 = vmax.f32 %v1521_v54, 0.0 }
 0x183   : > { %v1817_v62 = vmax.f32 %v1513_v56, 0.0 }
 0x184   : > { %v1911_v63 = vpack.c.bf16 %v1819_v58, %v1818_v57 }
 0x185   : > { %v1910_v0 = vpack.c.bf16 %v1817_v62, %v1816_v60  ;;  %v7764_v1 = vpop.f32.mrb[72].mxu0 }
 0x186   : > { %v1534_v2 = vadd.f32 %v7764_v1, %v9027_v6  ;;  %v1525_v3 = vpop.f32.mrb[73].mxu0 }
 0x187   : > { %v1526_v4 = vadd.f32 %v9027_v6, %v1525_v3  ;;  %v7765_v5 = vpop.f32.mrb[74].mxu0  ;;  %7894 = vmatprep.mubr.msk.bf16.mxu1 %vm1979_vm2, %v1910_v0 }
 0x188   : > { %v1537_v7 = vadd.f32 %v7765_v5, %v9027_v6  ;;  %v1528_v8 = vpop.f32.mrb[75].mxu0  ;;  %7895 = vmatmul.mubr.msk.bf16.gmra.mrb[80].mxu1 %vm1979_vm2, %v1911_v63  ;;  %v1822_v10 = vmax.f32 %v1534_v2, 0.0 }
 0x189   : > { %v1529_v9 = vadd.f32 %v9027_v6, %v1528_v8  ;;  %v1820_v12 = vmax.f32 %v1526_v4, 0.0 }
 0x18a   : > { %v1823_v11 = vmax.f32 %v1537_v7, 0.0 }
 0x18b   : > { %v1821_v13 = vmax.f32 %v1529_v9, 0.0 }
 0x18c   : > { %v1913_v14 = vpack.c.bf16 %v1823_v11, %v1822_v10 }
 0x18d   : > { %v1912_v15 = vpack.c.bf16 %v1821_v13, %v1820_v12  ;;  %v7768_v16 = vpop.f32.mrb[76].mxu0 }
 0x18e   : > { %v1550_v17 = vadd.f32 %v7768_v16, %v9027_v6  ;;  %v1541_v18 = vpop.f32.mrb[77].mxu0 }
 0x18f   : > { %v1542_v19 = vadd.f32 %v9027_v6, %v1541_v18  ;;  %v7769_v20 = vpop.f32.mrb[78].mxu0  ;;  %7898 = vmatprep.mubr.msk.bf16.mxu1 %vm1979_vm2, %v1912_v15 }
 0x190   : > { %v1553_v21 = vadd.f32 %v7769_v20, %v9027_v6  ;;  %v1544_v22 = vpop.f32.mrb[79].mxu0  ;;  %7899 = vmatmul.mubr.msk.bf16.gmra.mrb[84].mxu1 %vm1979_vm2, %v1913_v14  ;;  %v1826_v25 = vmax.f32 %v1550_v17, 0.0 }
 0x191   : > { %v1545_v23 = vadd.f32 %v9027_v6, %v1544_v22  ;;  %v1824_v28 = vmax.f32 %v1542_v19, 0.0 }
 0x192   : > { %v1827_v27 = vmax.f32 %v1553_v21, 0.0 }
 0x193   : > { %v1825_v29 = vmax.f32 %v1545_v23, 0.0 }
 0x194   : > { %v1915_v30 = vpack.c.bf16 %v1827_v27, %v1826_v25 }
 0x195   : > { %v1914_v32 = vpack.c.bf16 %v1825_v29, %v1824_v28  ;;  %v7772_v33 = vpop.f32.mrb[80].mxu0 }
 0x196   : > { %v1566_v35 = vadd.f32 %v7772_v33, %v9027_v6  ;;  %v1557_v36 = vpop.f32.mrb[81].mxu0 }
 0x197   : > { %v1558_v37 = vadd.f32 %v9027_v6, %v1557_v36  ;;  %v7773_v38 = vpop.f32.mrb[82].mxu0  ;;  %7902 = vmatprep.mubr.msk.bf16.mxu1 %vm1979_vm2, %v1914_v32 }
 0x198   : > { %v1569_v39 = vadd.f32 %v7773_v38, %v9027_v6  ;;  %v1560_v40 = vpop.f32.mrb[83].mxu0  ;;  %7903 = vmatmul.mubr.msk.bf16.gmra.mrb[88].mxu1 %vm1979_vm2, %v1915_v30  ;;  %v1830_v42 = vmax.f32 %v1566_v35, 0.0 }
 0x199   : > { %v1561_v41 = vadd.f32 %v9027_v6, %v1560_v40  ;;  %v1828_v44 = vmax.f32 %v1558_v37, 0.0 }
 0x19a   : > { %v1831_v43 = vmax.f32 %v1569_v39, 0.0 }
 0x19b   : > { %v1829_v45 = vmax.f32 %v1561_v41, 0.0 }
 0x19c   : > { %v1917_v46 = vpack.c.bf16 %v1831_v43, %v1830_v42 }
 0x19d   : > { %v1916_v47 = vpack.c.bf16 %v1829_v45, %v1828_v44  ;;  %v7776_v48 = vpop.f32.mrb[84].mxu0 }
 0x19e   : > { %v1582_v49 = vadd.f32 %v7776_v48, %v9027_v6  ;;  %v1573_v50 = vpop.f32.mrb[85].mxu0 }
 0x19f   : > { %v1574_v51 = vadd.f32 %v9027_v6, %v1573_v50  ;;  %v7777_v52 = vpop.f32.mrb[86].mxu0  ;;  %7906 = vmatprep.mubr.msk.bf16.mxu1 %vm1979_vm2, %v1916_v47  ;;  %v8494_v50 = vld [vmem:[%s10400_s7 + $0x10] sm:$0xff]  }
 0x1a0   : > { %v1585_v53 = vadd.f32 %v7777_v52, %v9027_v6  ;;  %v1576_v54 = vpop.f32.mrb[87].mxu0  ;;  %7907 = vmatmul.mubr.msk.bf16.gmra.mrb[92].mxu1 %vm1979_vm2, %v1917_v46  ;;  %v1834_v56 = vmax.f32 %v1582_v49, 0.0  ;;  %8094 = vmatprep.subr.bf16.mxu1 %v8494_v50 }
 0x1a1   : > { %v1577_v55 = vadd.f32 %v9027_v6, %v1576_v54  ;;  %v1832_v58 = vmax.f32 %v1574_v51, 0.0  ;;  %8095 = vmatpush3.bf16.msra.mxu1 %v8494_v50 }
 0x1a2   : > { %v1835_v57 = vmax.f32 %v1585_v53, 0.0 }
 0x1a3   : > { %v1833_v60 = vmax.f32 %v1577_v55, 0.0 }
 0x1a4   : > { %v1919_v62 = vpack.c.bf16 %v1835_v57, %v1834_v56 }
 0x1a5   : > { %v1918_v63 = vpack.c.bf16 %v1833_v60, %v1832_v58  ;;  %v7780_v0 = vpop.f32.mrb[88].mxu0 }
 0x1a6   : > { %v1598_v1 = vadd.f32 %v7780_v0, %v9027_v6  ;;  %v1589_v2 = vpop.f32.mrb[89].mxu0 }
 0x1a7   : > { %v1590_v3 = vadd.f32 %v9027_v6, %v1589_v2  ;;  %v7781_v4 = vpop.f32.mrb[90].mxu0  ;;  %7910 = vmatprep.mubr.msk.bf16.mxu1 %vm1979_vm2, %v1918_v63 }
 0x1a8   : > { %v1601_v5 = vadd.f32 %v7781_v4, %v9027_v6  ;;  %v1592_v7 = vpop.f32.mrb[91].mxu0  ;;  %7911 = vmatmul.mubr.msk.bf16.gmra.mrb[96].mxu1 %vm1979_vm2, %v1919_v62  ;;  %v1838_v9 = vmax.f32 %v1598_v1, 0.0 }
 0x1a9   : > { %v1593_v8 = vadd.f32 %v9027_v6, %v1592_v7  ;;  %v1836_v11 = vmax.f32 %v1590_v3, 0.0 }
 0x1aa   : > { %v1839_v10 = vmax.f32 %v1601_v5, 0.0 }
 0x1ab   : > { %v1837_v12 = vmax.f32 %v1593_v8, 0.0 }
 0x1ac   : > { %v1921_v13 = vpack.c.bf16 %v1839_v10, %v1838_v9 }
 0x1ad   : > { %v1920_v14 = vpack.c.bf16 %v1837_v12, %v1836_v11  ;;  %v7784_v15 = vpop.f32.mrb[92].mxu0 }
 0x1ae   : > { %v1614_v16 = vadd.f32 %v7784_v15, %v9027_v6  ;;  %v1605_v17 = vpop.f32.mrb[93].mxu0 }
 0x1af   : > { %v1606_v18 = vadd.f32 %v9027_v6, %v1605_v17  ;;  %v7785_v19 = vpop.f32.mrb[94].mxu0  ;;  %7914 = vmatprep.mubr.msk.bf16.mxu1 %vm1979_vm2, %v1920_v14 }
 0x1b0   : > { %v1617_v20 = vadd.f32 %v7785_v19, %v9027_v6  ;;  %v1608_v21 = vpop.f32.mrb[95].mxu0  ;;  %7915 = vmatmul.mubr.msk.bf16.gmra.mrb[100].mxu1 %vm1979_vm2, %v1921_v13  ;;  %v1842_v23 = vmax.f32 %v1614_v16, 0.0 }
 0x1b1   : > { %v1609_v22 = vadd.f32 %v9027_v6, %v1608_v21  ;;  %v1840_v27 = vmax.f32 %v1606_v18, 0.0 }
 0x1b2   : > { %v1843_v25 = vmax.f32 %v1617_v20, 0.0 }
 0x1b3   : > { %v1841_v28 = vmax.f32 %v1609_v22, 0.0 }
 0x1b4   : > { %v1923_v29 = vpack.c.bf16 %v1843_v25, %v1842_v23  ;;  %v9241_v23 = vld [vmem:[%s10397_s4] ss:$0 sm:$0xff] }
 0x1b5   : > { %v1922_v30 = vpack.c.bf16 %v1841_v28, %v1840_v27  ;;  %v7788_v32 = vpop.f32.mrb[96].mxu0 }
 0x1b6   : > { %v1630_v33 = vadd.f32 %v7788_v32, %v9027_v6  ;;  %v1621_v35 = vpop.f32.mrb[97].mxu0 }
 0x1b7   : > { %v1622_v36 = vadd.f32 %v9027_v6, %v1621_v35  ;;  %v7789_v37 = vpop.f32.mrb[98].mxu0  ;;  %7918 = vmatprep.mubr.msk.bf16.mxu1 %vm1979_vm2, %v1922_v30 }
 0x1b8   : > { %v1633_v38 = vadd.f32 %v7789_v37, %v9027_v6  ;;  %v1624_v39 = vpop.f32.mrb[99].mxu0  ;;  %7919 = vmatmul.mubr.msk.bf16.gmra.mrb[104].mxu1 %vm1979_vm2, %v1923_v29  ;;  %v1846_v41 = vmax.f32 %v1630_v33, 0.0 }
 0x1b9   : > { %v1625_v40 = vadd.f32 %v9027_v6, %v1624_v39  ;;  %v1844_v43 = vmax.f32 %v1622_v36, 0.0 }
 0x1ba   : > { %v1847_v42 = vmax.f32 %v1633_v38, 0.0 }
 0x1bb   : > { %v1845_v44 = vmax.f32 %v1625_v40, 0.0 }
 0x1bc   : > { %v1925_v45 = vpack.c.bf16 %v1847_v42, %v1846_v41 }
 0x1bd   : > { %v1924_v46 = vpack.c.bf16 %v1845_v44, %v1844_v43  ;;  %v7792_v47 = vpop.f32.mrb[100].mxu0 }
 0x1be   : > { %v1646_v48 = vadd.f32 %v7792_v47, %v9027_v6  ;;  %v1637_v49 = vpop.f32.mrb[101].mxu0 }
 0x1bf   : > { %v1638_v51 = vadd.f32 %v9027_v6, %v1637_v49  ;;  %v7793_v52 = vpop.f32.mrb[102].mxu0  ;;  %7922 = vmatprep.mubr.msk.bf16.mxu1 %vm1979_vm2, %v1924_v46 }
 0x1c0   : > { %v1649_v53 = vadd.f32 %v7793_v52, %v9027_v6  ;;  %v1640_v54 = vpop.f32.mrb[103].mxu0  ;;  %7923 = vmatmul.mubr.msk.bf16.gmra.mrb[108].mxu1 %vm1979_vm2, %v1925_v45  ;;  %v1850_v56 = vmax.f32 %v1646_v48, 0.0 }
 0x1c1   : > { %v1641_v55 = vadd.f32 %v9027_v6, %v1640_v54  ;;  %v1848_v58 = vmax.f32 %v1638_v51, 0.0 }
 0x1c2   : > { %v1851_v57 = vmax.f32 %v1649_v53, 0.0 }
 0x1c3   : > { %v1849_v60 = vmax.f32 %v1641_v55, 0.0 }
 0x1c4   : > { %v1927_v62 = vpack.c.bf16 %v1851_v57, %v1850_v56 }
 0x1c5   : > { %v1926_v63 = vpack.c.bf16 %v1849_v60, %v1848_v58  ;;  %v7796_v0 = vpop.f32.mrb[104].mxu0 }
 0x1c6   : > { %v1662_v1 = vadd.f32 %v7796_v0, %v9027_v6  ;;  %v1653_v2 = vpop.f32.mrb[105].mxu0 }
 0x1c7   : > { %v1654_v3 = vadd.f32 %v9027_v6, %v1653_v2  ;;  %v7797_v4 = vpop.f32.mrb[106].mxu0  ;;  %7926 = vmatprep.mubr.msk.bf16.mxu1 %vm1979_vm2, %v1926_v63 }
 0x1c8   : > { %v1665_v5 = vadd.f32 %v7797_v4, %v9027_v6  ;;  %v1656_v7 = vpop.f32.mrb[107].mxu0  ;;  %7927 = vmatmul.mubr.msk.bf16.gmra.mrb[112].mxu1 %vm1979_vm2, %v1927_v62  ;;  %v1854_v9 = vmax.f32 %v1662_v1, 0.0 }
 0x1c9   : > { %v1657_v8 = vadd.f32 %v9027_v6, %v1656_v7  ;;  %v1852_v11 = vmax.f32 %v1654_v3, 0.0 }
 0x1ca   : > { %v1855_v10 = vmax.f32 %v1665_v5, 0.0 }
 0x1cb   : > { %v1853_v12 = vmax.f32 %v1657_v8, 0.0 }
 0x1cc   : > { %v1929_v13 = vpack.c.bf16 %v1855_v10, %v1854_v9 }
 0x1cd   : > { %v1928_v14 = vpack.c.bf16 %v1853_v12, %v1852_v11  ;;  %v7800_v15 = vpop.f32.mrb[108].mxu0 }
 0x1ce   : > { %v1678_v16 = vadd.f32 %v7800_v15, %v9027_v6  ;;  %v1669_v17 = vpop.f32.mrb[109].mxu0 }
 0x1cf   : > { %v1670_v18 = vadd.f32 %v9027_v6, %v1669_v17  ;;  %v7801_v19 = vpop.f32.mrb[110].mxu0  ;;  %7930 = vmatprep.mubr.msk.bf16.mxu1 %vm1979_vm2, %v1928_v14 }
 0x1d0   : > { %v1681_v20 = vadd.f32 %v7801_v19, %v9027_v6  ;;  %v1672_v21 = vpop.f32.mrb[111].mxu0  ;;  %7931 = vmatmul.mubr.msk.bf16.gmra.mrb[116].mxu1 %vm1979_vm2, %v1929_v13  ;;  %v1858_v25 = vmax.f32 %v1678_v16, 0.0 }
 0x1d1   : > { %v1673_v22 = vadd.f32 %v9027_v6, %v1672_v21  ;;  %v1856_v28 = vmax.f32 %v1670_v18, 0.0  ;;  %v8664_v6 = vld [vmem:[%s10426_s2] ss:$0 sm:$0xff]  ;;  %s8675_s2 = scalar_lea.vmem %s8674_s0, 256 }
 0x1d2   : > { %v1859_v27 = vmax.f32 %v1681_v20, 0.0  ;;  %p8677_p1 = scmp.lt.s32.totalorder %s8675_s2, %s8669_s28 }
 0x1d3   : > { %v1857_v29 = vmax.f32 %v1673_v22, 0.0  ;;  %v7828_v30 = vpop.f32.mrb[12].mxu1 }
 0x1d4   : > { %v1931_v32 = vpack.c.bf16 %v1859_v27, %v1858_v25  ;;  %v2215_v33 = vadd.f32 %v7828_v30, %v9241_v23  ;;  %v2206_v35 = vpop.f32.mrb[13].mxu1  ;;  %p8678_p2 = por %p8677_p1, %p8676_p0 }
 0x1d5   : > { %v1930_v36 = vpack.c.bf16 %v1857_v29, %v1856_v28  ;;  %v2207_v37 = vadd.f32 %v9241_v23, %v2206_v35  ;;  %v7804_v38 = vpop.f32.mrb[112].mxu0  ;;  %v7829_v39 = vpop.f32.mrb[14].mxu1 }
 0x1d6   : > { %v1694_v40 = vadd.f32 %v8664_v6, %v7804_v38  ;;  %v2218_v41 = vadd.f32 %v7829_v39, %v9241_v23  ;;  %v1685_v42 = vpop.f32.mrb[113].mxu0  ;;  %v2209_v43 = vpop.f32.mrb[15].mxu1  ;;  %v2719_v47 = vmax.f32 %v2215_v33, 0.0  ;;  %p8679_p3 = pnand %p8678_p2, %p8672_p13 }
 0x1d7   : > { %v1686_v44 = vadd.f32 %v8664_v6, %v1685_v42  ;;  %v2210_v45 = vadd.f32 %v9241_v23, %v2209_v43  ;;  %v7805_v46 = vpop.f32.mrb[114].mxu0  ;;  %7934 = vmatprep.mubr.msk.bf16.mxu1 %vm1979_vm2, %v1930_v36  ;;  %v2717_v51 = vmax.f32 %v2207_v37, 0.0 }
 0x1d8   : > { %v2720_v48 = vmax.f32 %v2218_v41, 0.0  ;;  %v1697_v49 = vadd.f32 %v8664_v6, %v7805_v46  ;;  %v1688_v50 = vpop.f32.mrb[115].mxu0  ;;  %7935 = vmatmul.mubr.msk.bf16.gmra.mrb[120].mxu1 %vm1979_vm2, %v1931_v32  ;;  %v1862_v54 = vmax.f32 %v1694_v40, 0.0 }
 0x1d9   : > { %v2718_v52 = vmax.f32 %v2210_v45, 0.0  ;;  %v1689_v53 = vadd.f32 %v8664_v6, %v1688_v50  ;;  %v1860_v57 = vmax.f32 %v1686_v44, 0.0 }
 0x1da   : > { %v2846_v55 = vpack.c.bf16 %v2720_v48, %v2719_v47  ;;  %v1863_v56 = vmax.f32 %v1697_v49, 0.0 }
 0x1db   : > { %v2845_v58 = vpack.c.bf16 %v2718_v52, %v2717_v51  ;;  %v1861_v60 = vmax.f32 %v1689_v53, 0.0  ;;  %v7832_v62 = vpop.f32.mrb[16].mxu1 }
 0x1dc   : > { %v1933_v63 = vpack.c.bf16 %v1863_v56, %v1862_v54  ;;  %v2231_v0 = vadd.f32 %v7832_v62, %v9241_v23  ;;  %v2222_v1 = vpop.f32.mrb[17].mxu1 }
 0x1dd   : > { %v1932_v2 = vpack.c.bf16 %v1861_v60, %v1860_v57  ;;  %v2223_v3 = vadd.f32 %v9241_v23, %v2222_v1  ;;  %v7833_v4 = vpop.f32.mrb[18].mxu1  ;;  %7962 = vmatprep.mubr.msk.bf16.mxu0 %vm1979_vm2, %v2845_v58 }
 0x1de   : > { %v2234_v5 = vadd.f32 %v7833_v4, %v9241_v23  ;;  %v2225_v7 = vpop.f32.mrb[19].mxu1  ;;  %7963 = vmatmul.mubr.msk.bf16.vlgmr.msra.gmra.mrb[116].mxu0 %vm1979_vm2, %v2846_v55  ;;  %v2723_v9 = vmax.f32 %v2231_v0, 0.0 }
 0x1df   : > { %v2226_v8 = vadd.f32 %v9241_v23, %v2225_v7  ;;  %7938 = vmatprep.mubr.msk.bf16.mxu1 %vm1979_vm2, %v1932_v2  ;;  %v2721_v11 = vmax.f32 %v2223_v3, 0.0 }
 0x1e0   : > { %v2724_v10 = vmax.f32 %v2234_v5, 0.0  ;;  %7939 = vmatmul.mubr.msk.bf16.gmra.mrb[124].mxu1 %vm1979_vm2, %v1933_v63 }
 0x1e1   : > { %v2722_v12 = vmax.f32 %v2226_v8, 0.0  ;;  %7942 = vmatprep.mubr.msk.bf16.mxu1 %vm1979_vm2, %v9106_v34 }
 0x1e2   : > { %v2848_v13 = vpack.c.bf16 %v2724_v10, %v2723_v9 }
 0x1e3   : > { %v2847_v14 = vpack.c.bf16 %v2722_v12, %v2721_v11  ;;  %v7836_v15 = vpop.f32.mrb[20].mxu1 }
 0x1e4   : > { %v2247_v16 = vadd.f32 %v7836_v15, %v9241_v23  ;;  %v2238_v17 = vpop.f32.mrb[21].mxu1 }
 0x1e5   : > { %v2239_v18 = vadd.f32 %v9241_v23, %v2238_v17  ;;  %v7837_v19 = vpop.f32.mrb[22].mxu1  ;;  %7966 = vmatprep.mubr.msk.bf16.mxu0 %vm1979_vm2, %v2847_v14 }
 0x1e6   : > { %v2250_v20 = vadd.f32 %v7837_v19, %v9241_v23  ;;  %v2241_v21 = vpop.f32.mrb[23].mxu1  ;;  %7967 = vmatmul.mubr.msk.bf16.gmra.mrb[120].mxu0 %vm1979_vm2, %v2848_v13  ;;  %v2727_v25 = vmax.f32 %v2247_v16, 0.0 }
 0x1e7   : > { %v2242_v22 = vadd.f32 %v9241_v23, %v2241_v21  ;;  %v2725_v27 = vmax.f32 %v2239_v18, 0.0 }
 0x1e8   : > { %v2728_v34 = vmax.f32 %v2250_v20, 0.0  ;;  %7943 = vmatmul.mubr.msk.bf16.gmra.mrb[128].mxu1 %vm1979_vm2, %v9103_v31 }
 0x1e9   : > { %v2726_v28 = vmax.f32 %v2242_v22, 0.0  ;;  %7946 = vmatprep.mubr.msk.bf16.mxu1 %vm1979_vm2, %v9120_v61 }
 0x1ea   : > { %v2850_v29 = vpack.c.bf16 %v2728_v34, %v2727_v25 }
 0x1eb   : > { %v7840_v30 = vpop.f32.mrb[24].mxu1  ;;  %v2849_v32 = vpack.c.bf16 %v2726_v28, %v2725_v27 }
 0x1ec   : > { %v2263_v33 = vadd.f32 %v7840_v30, %v9241_v23  ;;  %v2254_v35 = vpop.f32.mrb[25].mxu1 }
 0x1ed   : > { %v2255_v36 = vadd.f32 %v9241_v23, %v2254_v35  ;;  %v7841_v37 = vpop.f32.mrb[26].mxu1  ;;  %7970 = vmatprep.mubr.msk.bf16.mxu0 %vm1979_vm2, %v2849_v32 }
 0x1ee   : > { %v2266_v38 = vadd.f32 %v7841_v37, %v9241_v23  ;;  %v2257_v39 = vpop.f32.mrb[27].mxu1  ;;  %7971 = vmatmul.mubr.msk.bf16.gmra.mrb[124].mxu0 %vm1979_vm2, %v2850_v29  ;;  %v2731_v6 = vmax.f32 %v2263_v33, 0.0 }
 0x1ef   : > { %v2258_v31 = vadd.f32 %v9241_v23, %v2257_v39  ;;  %v2729_v40 = vmax.f32 %v2255_v36, 0.0 }
 0x1f0   : > { %v2732_v61 = vmax.f32 %v2266_v38, 0.0  ;;  %7947 = vmatmul.mubr.msk.bf16.gmra.mrb[132].mxu1 %vm1979_vm2, %v9117_v59 }
 0x1f1   : > { %v2730_v41 = vmax.f32 %v2258_v31, 0.0  ;;  %7950 = vmatprep.mubr.msk.bf16.mxu1 %vm1979_vm2, %v9134_v26 }
 0x1f2   : > { %v2852_v42 = vpack.c.bf16 %v2732_v61, %v2731_v6 }
 0x1f3   : > { %v2851_v43 = vpack.c.bf16 %v2730_v41, %v2729_v40  ;;  %v7844_v44 = vpop.f32.mrb[28].mxu1 }
 0x1f4   : > { %v2279_v45 = vadd.f32 %v7844_v44, %v9241_v23  ;;  %v2270_v46 = vpop.f32.mrb[29].mxu1 }
 0x1f5   : > { %v2271_v47 = vadd.f32 %v9241_v23, %v2270_v46  ;;  %v7845_v48 = vpop.f32.mrb[30].mxu1  ;;  %7974 = vmatprep.mubr.msk.bf16.mxu0 %vm1979_vm2, %v2851_v43 }
 0x1f6   : > { %v2282_v49 = vadd.f32 %v7845_v48, %v9241_v23  ;;  %v2273_v50 = vpop.f32.mrb[31].mxu1  ;;  %7975 = vmatmul.mubr.msk.bf16.gmra.mrb[128].mxu0 %vm1979_vm2, %v2852_v42  ;;  %v2735_v51 = vmax.f32 %v2279_v45, 0.0 }
 0x1f7   : > { %v2274_v59 = vadd.f32 %v9241_v23, %v2273_v50  ;;  %v2733_v52 = vmax.f32 %v2271_v47, 0.0 }
 0x1f8   : > { %v2736_v26 = vmax.f32 %v2282_v49, 0.0  ;;  %7951 = vmatmul.mubr.msk.bf16.gmra.mrb[136].mxu1 %vm1979_vm2, %v9131_v24  ;;  %v8495_v24 = vld [vmem:[%s10400_s7 + $0x18] sm:$0xff]  }
 0x1f9   : > { %v2734_v53 = vmax.f32 %v2274_v59, 0.0  ;;  %8096 = vmatprep.subr.bf16.mxu1 %v8495_v24 }
 0x1fa   : > { %v2854_v54 = vpack.c.bf16 %v2736_v26, %v2735_v51  ;;  %8097 = vmatpush3.bf16.msra.mxu1 %v8495_v24  ;;  %v8496_v26 = vld [vmem:[%s10402_s9] sm:$0xff]  }
 0x1fb   : > { %v2853_v55 = vpack.c.bf16 %v2734_v53, %v2733_v52  ;;  %v7848_v56 = vpop.f32.mrb[32].mxu1  ;;  %8226 = vmatprep.subr.bf16.mxu0 %v8496_v26 }
 0x1fc   : > { %v2295_v57 = vadd.f32 %v7848_v56, %v9241_v23  ;;  %v2286_v58 = vpop.f32.mrb[33].mxu1  ;;  %8227 = vmatpush3.bf16.msra.mxu0 %v8496_v26 }
 0x1fd   : > { %v2287_v60 = vadd.f32 %v9241_v23, %v2286_v58  ;;  %v7849_v62 = vpop.f32.mrb[34].mxu1  ;;  %7978 = vmatprep.mubr.msk.bf16.mxu0 %vm1979_vm2, %v2853_v55 }
 0x1fe   : > { %v2298_v63 = vadd.f32 %v7849_v62, %v9241_v23  ;;  %v2289_v0 = vpop.f32.mrb[35].mxu1  ;;  %7979 = vmatmul.mubr.msk.bf16.gmra.mrb[132].mxu0 %vm1979_vm2, %v2854_v54  ;;  %v2739_v2 = vmax.f32 %v2295_v57, 0.0 }
 0x1ff   : > { %v2290_v1 = vadd.f32 %v9241_v23, %v2289_v0  ;;  %v2737_v4 = vmax.f32 %v2287_v60, 0.0 }
 0x200   : > { %v2740_v3 = vmax.f32 %v2298_v63, 0.0 }
 0x201   : > { %v2738_v5 = vmax.f32 %v2290_v1, 0.0 }
 0x202   : > { %v2856_v7 = vpack.c.bf16 %v2740_v3, %v2739_v2 }
 0x203   : > { %v2855_v8 = vpack.c.bf16 %v2738_v5, %v2737_v4  ;;  %v7852_v9 = vpop.f32.mrb[36].mxu1 }
 0x204   : > { %v2311_v10 = vadd.f32 %v7852_v9, %v9241_v23  ;;  %v2302_v11 = vpop.f32.mrb[37].mxu1 }
 0x205   : > { %v2303_v12 = vadd.f32 %v9241_v23, %v2302_v11  ;;  %v7853_v13 = vpop.f32.mrb[38].mxu1  ;;  %7982 = vmatprep.mubr.msk.bf16.mxu0 %vm1979_vm2, %v2855_v8 }
 0x206   : > { %v2314_v14 = vadd.f32 %v7853_v13, %v9241_v23  ;;  %v2305_v15 = vpop.f32.mrb[39].mxu1  ;;  %7983 = vmatmul.mubr.msk.bf16.gmra.mrb[136].mxu0 %vm1979_vm2, %v2856_v7  ;;  %v2743_v17 = vmax.f32 %v2311_v10, 0.0 }
 0x207   : > { %v2306_v16 = vadd.f32 %v9241_v23, %v2305_v15  ;;  %v2741_v19 = vmax.f32 %v2303_v12, 0.0 }
 0x208   : > { %v2744_v18 = vmax.f32 %v2314_v14, 0.0 }
 0x209   : > { %v2742_v20 = vmax.f32 %v2306_v16, 0.0 }
 0x20a   : > { %v2858_v21 = vpack.c.bf16 %v2744_v18, %v2743_v17 }
 0x20b   : > { %v2857_v22 = vpack.c.bf16 %v2742_v20, %v2741_v19  ;;  %v7856_v25 = vpop.f32.mrb[40].mxu1 }
 0x20c   : > { %v2327_v34 = vadd.f32 %v7856_v25, %v9241_v23  ;;  %v2318_v27 = vpop.f32.mrb[41].mxu1 }
 0x20d   : > { %v2319_v28 = vadd.f32 %v9241_v23, %v2318_v27  ;;  %v7857_v29 = vpop.f32.mrb[42].mxu1  ;;  %7986 = vmatprep.mubr.msk.bf16.mxu0 %vm1979_vm2, %v2857_v22 }
 0x20e   : > { %v2330_v30 = vadd.f32 %v7857_v29, %v9241_v23  ;;  %v2321_v32 = vpop.f32.mrb[43].mxu1  ;;  %7987 = vmatmul.mubr.msk.bf16.gmra.mrb[140].mxu0 %vm1979_vm2, %v2858_v21  ;;  %v2747_v35 = vmax.f32 %v2327_v34, 0.0 }
 0x20f   : > { %v2322_v33 = vadd.f32 %v9241_v23, %v2321_v32  ;;  %v2745_v37 = vmax.f32 %v2319_v28, 0.0 }
 0x210   : > { %v2748_v36 = vmax.f32 %v2330_v30, 0.0 }
 0x211   : > { %v2746_v38 = vmax.f32 %v2322_v33, 0.0 }
 0x212   : > { %v2860_v39 = vpack.c.bf16 %v2748_v36, %v2747_v35 }
 0x213   : > { %v2859_v31 = vpack.c.bf16 %v2746_v38, %v2745_v37  ;;  %v7860_v6 = vpop.f32.mrb[44].mxu1 }
 0x214   : > { %v2343_v61 = vadd.f32 %v7860_v6, %v9241_v23  ;;  %v2334_v40 = vpop.f32.mrb[45].mxu1 }
 0x215   : > { %v2335_v41 = vadd.f32 %v9241_v23, %v2334_v40  ;;  %v7861_v42 = vpop.f32.mrb[46].mxu1  ;;  %7990 = vmatprep.mubr.msk.bf16.mxu0 %vm1979_vm2, %v2859_v31 }
 0x216   : > { %v2346_v43 = vadd.f32 %v7861_v42, %v9241_v23  ;;  %v2337_v44 = vpop.f32.mrb[47].mxu1  ;;  %7991 = vmatmul.mubr.msk.bf16.gmra.mrb[144].mxu0 %vm1979_vm2, %v2860_v39  ;;  %v2751_v46 = vmax.f32 %v2343_v61, 0.0 }
 0x217   : > { %v2338_v45 = vadd.f32 %v9241_v23, %v2337_v44  ;;  %v2749_v48 = vmax.f32 %v2335_v41, 0.0 }
 0x218   : > { %v2752_v47 = vmax.f32 %v2346_v43, 0.0 }
 0x219   : > { %v2750_v49 = vmax.f32 %v2338_v45, 0.0 }
 0x21a   : > { %v2862_v50 = vpack.c.bf16 %v2752_v47, %v2751_v46 }
 0x21b   : > { %v2861_v59 = vpack.c.bf16 %v2750_v49, %v2749_v48  ;;  %v7864_v51 = vpop.f32.mrb[48].mxu1  ;;  %v8497_v49 = vld [vmem:[%s10402_s9 + $0x8] sm:$0xff]  }
 0x21c   : > { %v2359_v52 = vadd.f32 %v7864_v51, %v9241_v23  ;;  %v2350_v53 = vpop.f32.mrb[49].mxu1  ;;  %8228 = vmatprep.subr.bf16.mxu0 %v8497_v49 }
 0x21d   : > { %v2351_v54 = vadd.f32 %v9241_v23, %v2350_v53  ;;  %v7865_v55 = vpop.f32.mrb[50].mxu1  ;;  %7994 = vmatprep.mubr.msk.bf16.mxu0 %vm1979_vm2, %v2861_v59  ;;  %8229 = vmatpush3.bf16.msra.mxu0 %v8497_v49 }
 0x21e   : > { %v2362_v56 = vadd.f32 %v7865_v55, %v9241_v23  ;;  %v2353_v57 = vpop.f32.mrb[51].mxu1  ;;  %7995 = vmatmul.mubr.msk.bf16.gmra.mrb[148].mxu0 %vm1979_vm2, %v2862_v50  ;;  %v2755_v60 = vmax.f32 %v2359_v52, 0.0 }
 0x21f   : > { %v2354_v58 = vadd.f32 %v9241_v23, %v2353_v57  ;;  %v2753_v63 = vmax.f32 %v2351_v54, 0.0 }
 0x220   : > { %v2756_v62 = vmax.f32 %v2362_v56, 0.0 }
 0x221   : > { %v2754_v0 = vmax.f32 %v2354_v58, 0.0 }
 0x222   : > { %v2864_v24 = vpack.c.bf16 %v2756_v62, %v2755_v60 }
 0x223   : > { %v2863_v1 = vpack.c.bf16 %v2754_v0, %v2753_v63  ;;  %v7868_v2 = vpop.f32.mrb[52].mxu1 }
 0x224   : > { %v2375_v3 = vadd.f32 %v7868_v2, %v9241_v23  ;;  %v2366_v4 = vpop.f32.mrb[53].mxu1 }
 0x225   : > { %v2367_v5 = vadd.f32 %v9241_v23, %v2366_v4  ;;  %v7869_v7 = vpop.f32.mrb[54].mxu1  ;;  %7998 = vmatprep.mubr.msk.bf16.mxu0 %vm1979_vm2, %v2863_v1 }
 0x226   : > { %v2378_v8 = vadd.f32 %v7869_v7, %v9241_v23  ;;  %v2369_v9 = vpop.f32.mrb[55].mxu1  ;;  %7999 = vmatmul.mubr.msk.bf16.gmra.mrb[152].mxu0 %vm1979_vm2, %v2864_v24  ;;  %v2759_v11 = vmax.f32 %v2375_v3, 0.0 }
 0x227   : > { %v2370_v10 = vadd.f32 %v9241_v23, %v2369_v9  ;;  %v2757_v13 = vmax.f32 %v2367_v5, 0.0 }
 0x228   : > { %v2760_v12 = vmax.f32 %v2378_v8, 0.0 }
 0x229   : > { %v2758_v14 = vmax.f32 %v2370_v10, 0.0 }
 0x22a   : > { %v2866_v15 = vpack.c.bf16 %v2760_v12, %v2759_v11 }
 0x22b   : > { %v2865_v16 = vpack.c.bf16 %v2758_v14, %v2757_v13  ;;  %v7872_v17 = vpop.f32.mrb[56].mxu1 }
 0x22c   : > { %v2391_v18 = vadd.f32 %v7872_v17, %v9241_v23  ;;  %v2382_v19 = vpop.f32.mrb[57].mxu1 }
 0x22d   : > { %v2383_v20 = vadd.f32 %v9241_v23, %v2382_v19  ;;  %v7873_v21 = vpop.f32.mrb[58].mxu1  ;;  %8002 = vmatprep.mubr.msk.bf16.mxu0 %vm1979_vm2, %v2865_v16 }
 0x22e   : > { %v2394_v22 = vadd.f32 %v7873_v21, %v9241_v23  ;;  %v2385_v25 = vpop.f32.mrb[59].mxu1  ;;  %8003 = vmatmul.mubr.msk.bf16.gmra.mrb[156].mxu0 %vm1979_vm2, %v2866_v15  ;;  %v2763_v27 = vmax.f32 %v2391_v18, 0.0 }
 0x22f   : > { %v2386_v34 = vadd.f32 %v9241_v23, %v2385_v25  ;;  %v2761_v29 = vmax.f32 %v2383_v20, 0.0 }
 0x230   : > { %v2764_v28 = vmax.f32 %v2394_v22, 0.0 }
 0x231   : > { %v2762_v30 = vmax.f32 %v2386_v34, 0.0 }
 0x232   : > { %v2868_v32 = vpack.c.bf16 %v2764_v28, %v2763_v27 }
 0x233   : > { %v2867_v33 = vpack.c.bf16 %v2762_v30, %v2761_v29  ;;  %v7876_v35 = vpop.f32.mrb[60].mxu1 }
 0x234   : > { %v2407_v36 = vadd.f32 %v7876_v35, %v9241_v23  ;;  %v2398_v37 = vpop.f32.mrb[61].mxu1 }
 0x235   : > { %v2399_v38 = vadd.f32 %v9241_v23, %v2398_v37  ;;  %v7877_v39 = vpop.f32.mrb[62].mxu1  ;;  %8006 = vmatprep.mubr.msk.bf16.mxu0 %vm1979_vm2, %v2867_v33 }
 0x236   : > { %v2410_v31 = vadd.f32 %v7877_v39, %v9241_v23  ;;  %v2401_v6 = vpop.f32.mrb[63].mxu1  ;;  %8007 = vmatmul.mubr.msk.bf16.gmra.mrb[160].mxu0 %vm1979_vm2, %v2868_v32  ;;  %v2767_v40 = vmax.f32 %v2407_v36, 0.0 }
 0x237   : > { %v2402_v61 = vadd.f32 %v9241_v23, %v2401_v6  ;;  %v2765_v42 = vmax.f32 %v2399_v38, 0.0 }
 0x238   : > { %v2768_v41 = vmax.f32 %v2410_v31, 0.0 }
 0x239   : > { %v2766_v43 = vmax.f32 %v2402_v61, 0.0 }
 0x23a   : > { %v2870_v44 = vpack.c.bf16 %v2768_v41, %v2767_v40 }
 0x23b   : > { %v2869_v45 = vpack.c.bf16 %v2766_v43, %v2765_v42  ;;  %v7880_v46 = vpop.f32.mrb[64].mxu1  ;;  %v8498_v43 = vld [vmem:[%s10402_s9 + $0x10] sm:$0xff]  }
 0x23c   : > { %v2423_v47 = vadd.f32 %v7880_v46, %v9241_v23  ;;  %v2414_v48 = vpop.f32.mrb[65].mxu1  ;;  %8230 = vmatprep.subr.bf16.mxu0 %v8498_v43 }
 0x23d   : > { %v2415_v50 = vadd.f32 %v9241_v23, %v2414_v48  ;;  %v7881_v59 = vpop.f32.mrb[66].mxu1  ;;  %8010 = vmatprep.mubr.msk.bf16.mxu0 %vm1979_vm2, %v2869_v45  ;;  %8231 = vmatpush3.bf16.msra.mxu0 %v8498_v43 }
 0x23e   : > { %v2426_v51 = vadd.f32 %v7881_v59, %v9241_v23  ;;  %v2417_v26 = vpop.f32.mrb[67].mxu1  ;;  %8011 = vmatmul.mubr.msk.bf16.gmra.mrb[164].mxu0 %vm1979_vm2, %v2870_v44  ;;  %v2771_v53 = vmax.f32 %v2423_v47, 0.0 }
 0x23f   : > { %v2418_v52 = vadd.f32 %v9241_v23, %v2417_v26  ;;  %v2769_v55 = vmax.f32 %v2415_v50, 0.0 }
 0x240   : > { %v2772_v54 = vmax.f32 %v2426_v51, 0.0 }
 0x241   : > { %v2770_v56 = vmax.f32 %v2418_v52, 0.0 }
 0x242   : > { %v2872_v57 = vpack.c.bf16 %v2772_v54, %v2771_v53 }
 0x243   : > { %v2871_v58 = vpack.c.bf16 %v2770_v56, %v2769_v55  ;;  %v7884_v60 = vpop.f32.mrb[68].mxu1 }
 0x244   : > { %v2439_v62 = vadd.f32 %v7884_v60, %v9241_v23  ;;  %v2430_v63 = vpop.f32.mrb[69].mxu1 }
 0x245   : > { %v2431_v0 = vadd.f32 %v9241_v23, %v2430_v63  ;;  %v7885_v24 = vpop.f32.mrb[70].mxu1  ;;  %8014 = vmatprep.mubr.msk.bf16.mxu0 %vm1979_vm2, %v2871_v58 }
 0x246   : > { %v2442_v1 = vadd.f32 %v7885_v24, %v9241_v23  ;;  %v2433_v2 = vpop.f32.mrb[71].mxu1  ;;  %8015 = vmatmul.mubr.msk.bf16.gmra.mrb[168].mxu0 %vm1979_vm2, %v2872_v57  ;;  %v2775_v4 = vmax.f32 %v2439_v62, 0.0 }
 0x247   : > { %v2434_v3 = vadd.f32 %v9241_v23, %v2433_v2  ;;  %v2773_v7 = vmax.f32 %v2431_v0, 0.0 }
 0x248   : > { %v2776_v5 = vmax.f32 %v2442_v1, 0.0 }
 0x249   : > { %v2774_v8 = vmax.f32 %v2434_v3, 0.0 }
 0x24a   : > { %v2874_v9 = vpack.c.bf16 %v2776_v5, %v2775_v4 }
 0x24b   : > { %v2873_v10 = vpack.c.bf16 %v2774_v8, %v2773_v7  ;;  %v7888_v11 = vpop.f32.mrb[72].mxu1 }
 0x24c   : > { %v2455_v12 = vadd.f32 %v7888_v11, %v9241_v23  ;;  %v2446_v13 = vpop.f32.mrb[73].mxu1 }
 0x24d   : > { %v2447_v14 = vadd.f32 %v9241_v23, %v2446_v13  ;;  %v7889_v15 = vpop.f32.mrb[74].mxu1  ;;  %8018 = vmatprep.mubr.msk.bf16.mxu0 %vm1979_vm2, %v2873_v10 }
 0x24e   : > { %v2458_v16 = vadd.f32 %v7889_v15, %v9241_v23  ;;  %v2449_v17 = vpop.f32.mrb[75].mxu1  ;;  %8019 = vmatmul.mubr.msk.bf16.gmra.mrb[172].mxu0 %vm1979_vm2, %v2874_v9  ;;  %v2779_v19 = vmax.f32 %v2455_v12, 0.0 }
 0x24f   : > { %v2450_v18 = vadd.f32 %v9241_v23, %v2449_v17  ;;  %v2777_v21 = vmax.f32 %v2447_v14, 0.0 }
 0x250   : > { %v2780_v20 = vmax.f32 %v2458_v16, 0.0 }
 0x251   : > { %v2778_v22 = vmax.f32 %v2450_v18, 0.0 }
 0x252   : > { %v2876_v25 = vpack.c.bf16 %v2780_v20, %v2779_v19 }
 0x253   : > { %v2875_v34 = vpack.c.bf16 %v2778_v22, %v2777_v21  ;;  %v7892_v27 = vpop.f32.mrb[76].mxu1 }
 0x254   : > { %v2471_v28 = vadd.f32 %v7892_v27, %v9241_v23  ;;  %v2462_v29 = vpop.f32.mrb[77].mxu1 }
 0x255   : > { %v2463_v30 = vadd.f32 %v9241_v23, %v2462_v29  ;;  %v7893_v32 = vpop.f32.mrb[78].mxu1  ;;  %8022 = vmatprep.mubr.msk.bf16.mxu0 %vm1979_vm2, %v2875_v34 }
 0x256   : > { %v2474_v33 = vadd.f32 %v7893_v32, %v9241_v23  ;;  %v2465_v35 = vpop.f32.mrb[79].mxu1  ;;  %8023 = vmatmul.mubr.msk.bf16.gmra.mrb[176].mxu0 %vm1979_vm2, %v2876_v25  ;;  %v2783_v37 = vmax.f32 %v2471_v28, 0.0 }
 0x257   : > { %v2466_v36 = vadd.f32 %v9241_v23, %v2465_v35  ;;  %v2781_v39 = vmax.f32 %v2463_v30, 0.0 }
 0x258   : > { %v2784_v38 = vmax.f32 %v2474_v33, 0.0 }
 0x259   : > { %v2782_v31 = vmax.f32 %v2466_v36, 0.0 }
 0x25a   : > { %v2878_v6 = vpack.c.bf16 %v2784_v38, %v2783_v37 }
 0x25b   : > { %v2877_v61 = vpack.c.bf16 %v2782_v31, %v2781_v39  ;;  %v7896_v40 = vpop.f32.mrb[80].mxu1  ;;  %v8499_v31 = vld [vmem:[%s10402_s9 + $0x18] sm:$0xff]  }
 0x25c   : > { %v2487_v41 = vadd.f32 %v7896_v40, %v9241_v23  ;;  %v2478_v42 = vpop.f32.mrb[81].mxu1  ;;  %8232 = vmatprep.subr.bf16.mxu0 %v8499_v31 }
 0x25d   : > { %v2479_v44 = vadd.f32 %v9241_v23, %v2478_v42  ;;  %v7897_v45 = vpop.f32.mrb[82].mxu1  ;;  %8026 = vmatprep.mubr.msk.bf16.mxu0 %vm1979_vm2, %v2877_v61  ;;  %8233 = vmatpush3.bf16.msra.mxu0 %v8499_v31 }
 0x25e   : > { %v2490_v46 = vadd.f32 %v7897_v45, %v9241_v23  ;;  %v2481_v47 = vpop.f32.mrb[83].mxu1  ;;  %8027 = vmatmul.mubr.msk.bf16.gmra.mrb[180].mxu0 %vm1979_vm2, %v2878_v6  ;;  %v2787_v49 = vmax.f32 %v2487_v41, 0.0 }
 0x25f   : > { %v2482_v48 = vadd.f32 %v9241_v23, %v2481_v47  ;;  %v2785_v59 = vmax.f32 %v2479_v44, 0.0 }
 0x260   : > { %v2788_v50 = vmax.f32 %v2490_v46, 0.0 }
 0x261   : > { %v2786_v51 = vmax.f32 %v2482_v48, 0.0 }
 0x262   : > { %v2880_v26 = vpack.c.bf16 %v2788_v50, %v2787_v49 }
 0x263   : > { %v2879_v52 = vpack.c.bf16 %v2786_v51, %v2785_v59  ;;  %v7900_v53 = vpop.f32.mrb[84].mxu1 }
 0x264   : > { %v2503_v54 = vadd.f32 %v7900_v53, %v9241_v23  ;;  %v2494_v55 = vpop.f32.mrb[85].mxu1 }
 0x265   : > { %v2495_v56 = vadd.f32 %v9241_v23, %v2494_v55  ;;  %v7901_v57 = vpop.f32.mrb[86].mxu1  ;;  %8030 = vmatprep.mubr.msk.bf16.mxu0 %vm1979_vm2, %v2879_v52 }
 0x266   : > { %v2506_v58 = vadd.f32 %v7901_v57, %v9241_v23  ;;  %v2497_v60 = vpop.f32.mrb[87].mxu1  ;;  %8031 = vmatmul.mubr.msk.bf16.gmra.mrb[184].mxu0 %vm1979_vm2, %v2880_v26  ;;  %v2791_v63 = vmax.f32 %v2503_v54, 0.0 }
 0x267   : > { %v2498_v62 = vadd.f32 %v9241_v23, %v2497_v60  ;;  %v2789_v24 = vmax.f32 %v2495_v56, 0.0 }
 0x268   : > { %v2792_v0 = vmax.f32 %v2506_v58, 0.0 }
 0x269   : > { %v2790_v1 = vmax.f32 %v2498_v62, 0.0 }
 0x26a   : > { %v2882_v2 = vpack.c.bf16 %v2792_v0, %v2791_v63 }
 0x26b   : > { %v2881_v3 = vpack.c.bf16 %v2790_v1, %v2789_v24  ;;  %v7904_v4 = vpop.f32.mrb[88].mxu1 }
 0x26c   : > { %v2519_v5 = vadd.f32 %v7904_v4, %v9241_v23  ;;  %v2510_v7 = vpop.f32.mrb[89].mxu1 }
 0x26d   : > { %v2511_v8 = vadd.f32 %v9241_v23, %v2510_v7  ;;  %v7905_v9 = vpop.f32.mrb[90].mxu1  ;;  %8034 = vmatprep.mubr.msk.bf16.mxu0 %vm1979_vm2, %v2881_v3 }
 0x26e   : > { %v2522_v10 = vadd.f32 %v7905_v9, %v9241_v23  ;;  %v2513_v11 = vpop.f32.mrb[91].mxu1  ;;  %8035 = vmatmul.mubr.msk.bf16.gmra.mrb[188].mxu0 %vm1979_vm2, %v2882_v2  ;;  %v2795_v13 = vmax.f32 %v2519_v5, 0.0 }
 0x26f   : > { %v2514_v12 = vadd.f32 %v9241_v23, %v2513_v11  ;;  %v2793_v15 = vmax.f32 %v2511_v8, 0.0 }
 0x270   : > { %v2796_v14 = vmax.f32 %v2522_v10, 0.0 }
 0x271   : > { %v2794_v16 = vmax.f32 %v2514_v12, 0.0 }
 0x272   : > { %v2884_v17 = vpack.c.bf16 %v2796_v14, %v2795_v13 }
 0x273   : > { %v2883_v18 = vpack.c.bf16 %v2794_v16, %v2793_v15  ;;  %v7908_v19 = vpop.f32.mrb[92].mxu1 }
 0x274   : > { %v2535_v20 = vadd.f32 %v7908_v19, %v9241_v23  ;;  %v2526_v21 = vpop.f32.mrb[93].mxu1 }
 0x275   : > { %v2527_v22 = vadd.f32 %v9241_v23, %v2526_v21  ;;  %v7909_v25 = vpop.f32.mrb[94].mxu1  ;;  %8038 = vmatprep.mubr.msk.bf16.mxu0 %vm1979_vm2, %v2883_v18 }
 0x276   : > { %v2538_v34 = vadd.f32 %v7909_v25, %v9241_v23  ;;  %v2529_v27 = vpop.f32.mrb[95].mxu1  ;;  %8039 = vmatmul.mubr.msk.bf16.gmra.mrb[192].mxu0 %vm1979_vm2, %v2884_v17  ;;  %v2799_v29 = vmax.f32 %v2535_v20, 0.0 }
 0x277   : > { %v2530_v28 = vadd.f32 %v9241_v23, %v2529_v27  ;;  %v2797_v32 = vmax.f32 %v2527_v22, 0.0 }
 0x278   : > { %v2800_v30 = vmax.f32 %v2538_v34, 0.0 }
 0x279   : > { %v2798_v33 = vmax.f32 %v2530_v28, 0.0 }
 0x27a   : > { %v2886_v35 = vpack.c.bf16 %v2800_v30, %v2799_v29 }
 0x27b   : > { %v2885_v36 = vpack.c.bf16 %v2798_v33, %v2797_v32  ;;  %v7912_v37 = vpop.f32.mrb[96].mxu1  ;;  %v8500_v33 = vld [vmem:[%s10402_s9 + $0x20] sm:$0xff]  }
 0x27c   : > { %v2551_v38 = vadd.f32 %v7912_v37, %v9241_v23  ;;  %v2542_v39 = vpop.f32.mrb[97].mxu1  ;;  %8234 = vmatprep.subr.bf16.mxu0 %v8500_v33 }
 0x27d   : > { %v2543_v6 = vadd.f32 %v9241_v23, %v2542_v39  ;;  %v7913_v61 = vpop.f32.mrb[98].mxu1  ;;  %8042 = vmatprep.mubr.msk.bf16.mxu0 %vm1979_vm2, %v2885_v36  ;;  %8235 = vmatpush3.bf16.msra.mxu0 %v8500_v33 }
 0x27e   : > { %v2554_v40 = vadd.f32 %v7913_v61, %v9241_v23  ;;  %v2545_v41 = vpop.f32.mrb[99].mxu1  ;;  %8043 = vmatmul.mubr.msk.bf16.gmra.mrb[196].mxu0 %vm1979_vm2, %v2886_v35  ;;  %v2803_v43 = vmax.f32 %v2551_v38, 0.0 }
 0x27f   : > { %v2546_v42 = vadd.f32 %v9241_v23, %v2545_v41  ;;  %v2801_v45 = vmax.f32 %v2543_v6, 0.0 }
 0x280   : > { %v2804_v44 = vmax.f32 %v2554_v40, 0.0 }
 0x281   : > { %v2802_v46 = vmax.f32 %v2546_v42, 0.0 }
 0x282   : > { %v2888_v47 = vpack.c.bf16 %v2804_v44, %v2803_v43 }
 0x283   : > { %v2887_v48 = vpack.c.bf16 %v2802_v46, %v2801_v45  ;;  %v7916_v49 = vpop.f32.mrb[100].mxu1 }
 0x284   : > { %v2567_v50 = vadd.f32 %v7916_v49, %v9241_v23  ;;  %v2558_v59 = vpop.f32.mrb[101].mxu1 }
 0x285   : > { %v2559_v51 = vadd.f32 %v9241_v23, %v2558_v59  ;;  %v7917_v26 = vpop.f32.mrb[102].mxu1  ;;  %8046 = vmatprep.mubr.msk.bf16.mxu0 %vm1979_vm2, %v2887_v48 }
 0x286   : > { %v2570_v52 = vadd.f32 %v7917_v26, %v9241_v23  ;;  %v2561_v53 = vpop.f32.mrb[103].mxu1  ;;  %8047 = vmatmul.mubr.msk.bf16.gmra.mrb[200].mxu0 %vm1979_vm2, %v2888_v47  ;;  %v2807_v55 = vmax.f32 %v2567_v50, 0.0 }
 0x287   : > { %v2562_v54 = vadd.f32 %v9241_v23, %v2561_v53  ;;  %v2805_v57 = vmax.f32 %v2559_v51, 0.0 }
 0x288   : > { %v2808_v56 = vmax.f32 %v2570_v52, 0.0 }
 0x289   : > { %v2806_v58 = vmax.f32 %v2562_v54, 0.0 }
 0x28a   : > { %v2890_v60 = vpack.c.bf16 %v2808_v56, %v2807_v55 }
 0x28b   : > { %v2889_v62 = vpack.c.bf16 %v2806_v58, %v2805_v57  ;;  %v7920_v63 = vpop.f32.mrb[104].mxu1 }
 0x28c   : > { %v2583_v0 = vadd.f32 %v7920_v63, %v9241_v23  ;;  %v2574_v24 = vpop.f32.mrb[105].mxu1 }
 0x28d   : > { %v2575_v1 = vadd.f32 %v9241_v23, %v2574_v24  ;;  %v7921_v2 = vpop.f32.mrb[106].mxu1  ;;  %8050 = vmatprep.mubr.msk.bf16.mxu0 %vm1979_vm2, %v2889_v62  ;;  %v9449_v24 = vld [vmem:[%s10399_s6] ss:$0 sm:$0xff] }
 0x28e   : > { %v2586_v3 = vadd.f32 %v7921_v2, %v9241_v23  ;;  %v2577_v4 = vpop.f32.mrb[107].mxu1  ;;  %8051 = vmatmul.mubr.msk.bf16.gmra.mrb[204].mxu0 %vm1979_vm2, %v2890_v60  ;;  %v2811_v7 = vmax.f32 %v2583_v0, 0.0 }
 0x28f   : > { %v2578_v5 = vadd.f32 %v9241_v23, %v2577_v4  ;;  %v2809_v9 = vmax.f32 %v2575_v1, 0.0 }
 0x290   : > { %v2812_v8 = vmax.f32 %v2586_v3, 0.0 }
 0x291   : > { %v2810_v10 = vmax.f32 %v2578_v5, 0.0 }
 0x292   : > { %v2892_v11 = vpack.c.bf16 %v2812_v8, %v2811_v7 }
 0x293   : > { %v2891_v12 = vpack.c.bf16 %v2810_v10, %v2809_v9  ;;  %v7924_v13 = vpop.f32.mrb[108].mxu1 }
 0x294   : > { %v2599_v14 = vadd.f32 %v7924_v13, %v9241_v23  ;;  %v2590_v15 = vpop.f32.mrb[109].mxu1 }
 0x295   : > { %v2591_v16 = vadd.f32 %v9241_v23, %v2590_v15  ;;  %v7925_v17 = vpop.f32.mrb[110].mxu1  ;;  %8054 = vmatprep.mubr.msk.bf16.mxu0 %vm1979_vm2, %v2891_v12 }
 0x296   : > { %v2602_v18 = vadd.f32 %v7925_v17, %v9241_v23  ;;  %v2593_v19 = vpop.f32.mrb[111].mxu1  ;;  %8055 = vmatmul.mubr.msk.bf16.gmra.mrb[208].mxu0 %vm1979_vm2, %v2892_v11  ;;  %v2815_v21 = vmax.f32 %v2599_v14, 0.0 }
 0x297   : > { %v2594_v20 = vadd.f32 %v9241_v23, %v2593_v19  ;;  %v2813_v25 = vmax.f32 %v2591_v16, 0.0 }
 0x298   : > { %v2816_v22 = vmax.f32 %v2602_v18, 0.0 }
 0x299   : > { %v2814_v34 = vmax.f32 %v2594_v20, 0.0 }
 0x29a   : > { %v2894_v27 = vpack.c.bf16 %v2816_v22, %v2815_v21 }
 0x29b   : > { %v2893_v28 = vpack.c.bf16 %v2814_v34, %v2813_v25  ;;  %v7928_v29 = vpop.f32.mrb[112].mxu1  ;;  %v9461_v25 = vld [vmem:[%s10397_s4] ss:$0 sm:$0xff] }
 0x29c   : > { %v2615_v30 = vadd.f32 %v7928_v29, %v9241_v23  ;;  %v2606_v32 = vpop.f32.mrb[113].mxu1 }
 0x29d   : > { %v2607_v35 = vadd.f32 %v9241_v23, %v2606_v32  ;;  %v7929_v36 = vpop.f32.mrb[114].mxu1  ;;  %8058 = vmatprep.mubr.msk.bf16.mxu0 %vm1979_vm2, %v2893_v28 }
 0x29e   : > { %v2618_v37 = vadd.f32 %v7929_v36, %v9241_v23  ;;  %v2609_v38 = vpop.f32.mrb[115].mxu1  ;;  %8059 = vmatmul.mubr.msk.bf16.gmra.mrb[212].mxu0 %vm1979_vm2, %v2894_v27  ;;  %v2819_v31 = vmax.f32 %v2615_v30, 0.0 }
 0x29f   : > { %v2610_v39 = vadd.f32 %v9241_v23, %v2609_v38  ;;  %v2817_v61 = vmax.f32 %v2607_v35, 0.0 }
 0x2a0   : > { %v2820_v6 = vmax.f32 %v2618_v37, 0.0 }
 0x2a1   : > { %v2818_v40 = vmax.f32 %v2610_v39, 0.0 }
 0x2a2   : > { %v2896_v41 = vpack.c.bf16 %v2820_v6, %v2819_v31 }
 0x2a3   : > { %v2895_v42 = vpack.c.bf16 %v2818_v40, %v2817_v61  ;;  %v7932_v43 = vpop.f32.mrb[116].mxu1 }
 0x2a4   : > { %v2631_v44 = vadd.f32 %v7932_v43, %v9241_v23  ;;  %v2622_v45 = vpop.f32.mrb[117].mxu1 }
 0x2a5   : > { %v2623_v46 = vadd.f32 %v9241_v23, %v2622_v45  ;;  %v7933_v47 = vpop.f32.mrb[118].mxu1  ;;  %8062 = vmatprep.mubr.msk.bf16.mxu0 %vm1979_vm2, %v2895_v42 }
 0x2a6   : > { %v2634_v48 = vadd.f32 %v7933_v47, %v9241_v23  ;;  %v2625_v49 = vpop.f32.mrb[119].mxu1  ;;  %8063 = vmatmul.mubr.msk.bf16.gmra.mrb[216].mxu0 %vm1979_vm2, %v2896_v41  ;;  %v2823_v59 = vmax.f32 %v2631_v44, 0.0  ;;  %v8501_v47 = vld [vmem:[%s10402_s9 + $0x28] sm:$0xff]  }
 0x2a7   : > { %v2626_v50 = vadd.f32 %v9241_v23, %v2625_v49  ;;  %v2821_v26 = vmax.f32 %v2623_v46, 0.0  ;;  %8236 = vmatprep.subr.bf16.mxu0 %v8501_v47 }
 0x2a8   : > { %v2824_v51 = vmax.f32 %v2634_v48, 0.0  ;;  %8237 = vmatpush3.bf16.msra.mxu0 %v8501_v47 }
 0x2a9   : > { %v2822_v52 = vmax.f32 %v2626_v50, 0.0 }
 0x2aa   : > { %v2898_v53 = vpack.c.bf16 %v2824_v51, %v2823_v59 }
 0x2ab   : > { %v2897_v54 = vpack.c.bf16 %v2822_v52, %v2821_v26  ;;  %v7936_v55 = vpop.f32.mrb[120].mxu1 }
 0x2ac   : > { %v2647_v56 = vadd.f32 %v7936_v55, %v9241_v23  ;;  %v2638_v57 = vpop.f32.mrb[121].mxu1 }
 0x2ad   : > { %v2639_v58 = vadd.f32 %v9241_v23, %v2638_v57  ;;  %v7937_v60 = vpop.f32.mrb[122].mxu1  ;;  %8066 = vmatprep.mubr.msk.bf16.mxu0 %vm1979_vm2, %v2897_v54 }
 0x2ae   : > { %v2650_v62 = vadd.f32 %v7937_v60, %v9241_v23  ;;  %v2641_v63 = vpop.f32.mrb[123].mxu1  ;;  %8067 = vmatmul.mubr.msk.bf16.gmra.mrb[220].mxu0 %vm1979_vm2, %v2898_v53  ;;  %v2827_v1 = vmax.f32 %v2647_v56, 0.0 }
 0x2af   : > { %v2642_v0 = vadd.f32 %v9241_v23, %v2641_v63  ;;  %v2825_v3 = vmax.f32 %v2639_v58, 0.0 }
 0x2b0   : > { %v2828_v2 = vmax.f32 %v2650_v62, 0.0 }
 0x2b1   : > { %v2826_v4 = vmax.f32 %v2642_v0, 0.0  ;;  %v7964_v5 = vpop.f32.mrb[116].mxu0 }
 0x2b2   : > { %v2900_v7 = vpack.c.bf16 %v2828_v2, %v2827_v1  ;;  %v3183_v8 = vadd.f32 %v7964_v5, %v9449_v24  ;;  %v3174_v9 = vpop.f32.mrb[117].mxu0 }
 0x2b3   : > { %v2899_v10 = vpack.c.bf16 %v2826_v4, %v2825_v3  ;;  %v3175_v11 = vadd.f32 %v9449_v24, %v3174_v9  ;;  %v7940_v12 = vpop.f32.mrb[124].mxu1  ;;  %v7965_v13 = vpop.f32.mrb[118].mxu0 }
 0x2b4   : > { %v2663_v14 = vadd.f32 %v7940_v12, %v9241_v23  ;;  %v3186_v15 = vadd.f32 %v7965_v13, %v9449_v24  ;;  %v2654_v16 = vpop.f32.mrb[125].mxu1  ;;  %v3177_v17 = vpop.f32.mrb[119].mxu0  ;;  %v3687_v21 = vmax.f32 %v3183_v8, 0.0 }
 0x2b5   : > { %v2655_v18 = vadd.f32 %v9241_v23, %v2654_v16  ;;  %v3178_v19 = vadd.f32 %v9449_v24, %v3177_v17  ;;  %v7941_v20 = vpop.f32.mrb[126].mxu1  ;;  %8070 = vmatprep.mubr.msk.bf16.mxu0 %vm1979_vm2, %v2899_v10  ;;  %v3685_v28 = vmax.f32 %v3175_v11, 0.0 }
 0x2b6   : > { %v3688_v22 = vmax.f32 %v3186_v15, 0.0  ;;  %v2666_v34 = vadd.f32 %v9461_v25, %v7941_v20  ;;  %v2657_v27 = vpop.f32.mrb[127].mxu1  ;;  %8071 = vmatmul.mubr.msk.bf16.gmra.mrb[224].mxu0 %vm1979_vm2, %v2900_v7  ;;  %v2831_v30 = vmax.f32 %v2663_v14, 0.0 }
 0x2b7   : > { %v3686_v29 = vmax.f32 %v3178_v19, 0.0  ;;  %v2658_v23 = vadd.f32 %v9461_v25, %v2657_v27  ;;  %v2829_v35 = vmax.f32 %v2655_v18, 0.0 }
 0x2b8   : > { %v3814_v32 = vpack.c.bf16 %v3688_v22, %v3687_v21  ;;  %v2832_v33 = vmax.f32 %v2666_v34, 0.0 }
 0x2b9   : > { %v3813_v36 = vpack.c.bf16 %v3686_v29, %v3685_v28  ;;  %v2830_v37 = vmax.f32 %v2658_v23, 0.0  ;;  %v7968_v38 = vpop.f32.mrb[120].mxu0 }
 0x2ba   : > { %v2902_v39 = vpack.c.bf16 %v2832_v33, %v2831_v30  ;;  %v3199_v31 = vadd.f32 %v7968_v38, %v9449_v24  ;;  %v3190_v6 = vpop.f32.mrb[121].mxu0 }
 0x2bb   : > { %v2901_v61 = vpack.c.bf16 %v2830_v37, %v2829_v35  ;;  %v3191_v40 = vadd.f32 %v9449_v24, %v3190_v6  ;;  %v7944_v41 = vpop.f32.mrb[128].mxu1  ;;  %v7969_v42 = vpop.f32.mrb[122].mxu0  ;;  %8098 = vmatprep.mubr.msk.bf16.mxu1 %vm1979_vm2, %v3813_v36 }
 0x2bc   : > { %v2679_v43 = vadd.f32 %v9461_v25, %v7944_v41  ;;  %v3202_v44 = vadd.f32 %v7969_v42, %v9449_v24  ;;  %v2670_v45 = vpop.f32.mrb[129].mxu1  ;;  %v3193_v46 = vpop.f32.mrb[123].mxu0  ;;  %8099 = vmatmul.mubr.msk.bf16.vlgmr.msra.gmra.mrb[140].mxu1 %vm1979_vm2, %v3814_v32  ;;  %v3691_v59 = vmax.f32 %v3199_v31, 0.0 }
 0x2bd   : > { %v2671_v48 = vadd.f32 %v9461_v25, %v2670_v45  ;;  %v3194_v49 = vadd.f32 %v9449_v24, %v3193_v46  ;;  %v7945_v50 = vpop.f32.mrb[130].mxu1  ;;  %8074 = vmatprep.mubr.msk.bf16.mxu0 %vm1979_vm2, %v2901_v61  ;;  %v3689_v53 = vmax.f32 %v3191_v40, 0.0 }
 0x2be   : > { %v3692_v51 = vmax.f32 %v3202_v44, 0.0  ;;  %v2682_v26 = vadd.f32 %v9461_v25, %v7945_v50  ;;  %v2673_v52 = vpop.f32.mrb[131].mxu1  ;;  %8075 = vmatmul.mubr.msk.bf16.gmra.mrb[228].mxu0 %vm1979_vm2, %v2902_v39  ;;  %v2835_v56 = vmax.f32 %v2679_v43, 0.0 }
 0x2bf   : > { %v3690_v54 = vmax.f32 %v3194_v49, 0.0  ;;  %v2674_v55 = vadd.f32 %v9461_v25, %v2673_v52  ;;  %v2833_v60 = vmax.f32 %v2671_v48, 0.0 }
 0x2c0   : > { %v3816_v57 = vpack.c.bf16 %v3692_v51, %v3691_v59  ;;  %v2836_v58 = vmax.f32 %v2682_v26, 0.0 }
 0x2c1   : > { %v3815_v62 = vpack.c.bf16 %v3690_v54, %v3689_v53  ;;  %v2834_v63 = vmax.f32 %v2674_v55, 0.0  ;;  %v7972_v0 = vpop.f32.mrb[124].mxu0 }
 0x2c2   : > { %v2904_v1 = vpack.c.bf16 %v2836_v58, %v2835_v56  ;;  %v3215_v2 = vadd.f32 %v7972_v0, %v9449_v24  ;;  %v3206_v3 = vpop.f32.mrb[125].mxu0 }
 0x2c3   : > { %v2903_v4 = vpack.c.bf16 %v2834_v63, %v2833_v60  ;;  %v3207_v5 = vadd.f32 %v9449_v24, %v3206_v3  ;;  %v7948_v7 = vpop.f32.mrb[132].mxu1  ;;  %v7973_v8 = vpop.f32.mrb[126].mxu0  ;;  %8102 = vmatprep.mubr.msk.bf16.mxu1 %vm1979_vm2, %v3815_v62 }
 0x2c4   : > { %v2695_v9 = vadd.f32 %v9461_v25, %v7948_v7  ;;  %v3218_v10 = vadd.f32 %v7973_v8, %v9449_v24  ;;  %v2686_v11 = vpop.f32.mrb[133].mxu1  ;;  %v3209_v12 = vpop.f32.mrb[127].mxu0  ;;  %8103 = vmatmul.mubr.msk.bf16.gmra.mrb[144].mxu1 %vm1979_vm2, %v3816_v57  ;;  %v3695_v16 = vmax.f32 %v3215_v2, 0.0 }
 0x2c5   : > { %v2687_v13 = vadd.f32 %v9461_v25, %v2686_v11  ;;  %v3210_v14 = vadd.f32 %v9449_v24, %v3209_v12  ;;  %v7949_v15 = vpop.f32.mrb[134].mxu1  ;;  %8078 = vmatprep.mubr.msk.bf16.mxu0 %vm1979_vm2, %v2903_v4  ;;  %v3693_v20 = vmax.f32 %v3207_v5, 0.0 }
 0x2c6   : > { %v3696_v17 = vmax.f32 %v3218_v10, 0.0  ;;  %v2698_v18 = vadd.f32 %v9461_v25, %v7949_v15  ;;  %v2689_v19 = vpop.f32.mrb[135].mxu1  ;;  %8079 = vmatmul.mubr.msk.bf16.gmra.mrb[232].mxu0 %vm1979_vm2, %v2904_v1  ;;  %v2839_v34 = vmax.f32 %v2695_v9, 0.0 }
 0x2c7   : > { %v3694_v21 = vmax.f32 %v3210_v14, 0.0  ;;  %v2690_v22 = vadd.f32 %v9461_v25, %v2689_v19  ;;  %v2837_v29 = vmax.f32 %v2687_v13, 0.0 }
 0x2c8   : > { %v3818_v27 = vpack.c.bf16 %v3696_v17, %v3695_v16  ;;  %v2840_v28 = vmax.f32 %v2698_v18, 0.0  ;;  %v8502_v17 = vld [vmem:[%s10402_s9 + $0x30] sm:$0xff]  }
 0x2c9   : > { %v3817_v23 = vpack.c.bf16 %v3694_v21, %v3693_v20  ;;  %v2838_v30 = vmax.f32 %v2690_v22, 0.0  ;;  %v7976_v32 = vpop.f32.mrb[128].mxu0  ;;  %8238 = vmatprep.subr.bf16.mxu0 %v8502_v17 }
 0x2ca   : > { %v2906_v33 = vpack.c.bf16 %v2840_v28, %v2839_v34  ;;  %v3231_v35 = vadd.f32 %v7976_v32, %v9449_v24  ;;  %v3222_v36 = vpop.f32.mrb[129].mxu0  ;;  %8239 = vmatpush3.bf16.msra.mxu0 %v8502_v17 }
 0x2cb   : > { %v2905_v37 = vpack.c.bf16 %v2838_v30, %v2837_v29  ;;  %v3223_v38 = vadd.f32 %v9449_v24, %v3222_v36  ;;  %v7952_v39 = vpop.f32.mrb[136].mxu1  ;;  %v7977_v31 = vpop.f32.mrb[130].mxu0  ;;  %8106 = vmatprep.mubr.msk.bf16.mxu1 %vm1979_vm2, %v3817_v23 }
 0x2cc   : > { %v2711_v6 = vadd.f32 %v9461_v25, %v7952_v39  ;;  %v3234_v61 = vadd.f32 %v7977_v31, %v9449_v24  ;;  %v2702_v40 = vpop.f32.mrb[137].mxu1  ;;  %v3225_v41 = vpop.f32.mrb[131].mxu0  ;;  %8107 = vmatmul.mubr.msk.bf16.gmra.mrb[148].mxu1 %vm1979_vm2, %v3818_v27  ;;  %v3699_v45 = vmax.f32 %v3231_v35, 0.0 }
 0x2cd   : > { %v2703_v42 = vadd.f32 %v9461_v25, %v2702_v40  ;;  %v3226_v43 = vadd.f32 %v9449_v24, %v3225_v41  ;;  %v7953_v44 = vpop.f32.mrb[138].mxu1  ;;  %8082 = vmatprep.mubr.msk.bf16.mxu0 %vm1979_vm2, %v2905_v37  ;;  %v3697_v49 = vmax.f32 %v3223_v38, 0.0 }
 0x2ce   : > { %v3700_v46 = vmax.f32 %v3234_v61, 0.0  ;;  %v2714_v47 = vadd.f32 %v9461_v25, %v7953_v44  ;;  %v2705_v48 = vpop.f32.mrb[139].mxu1  ;;  %8083 = vmatmul.mubr.msk.bf16.gmra.mrb[236].mxu0 %vm1979_vm2, %v2906_v33  ;;  %v2843_v51 = vmax.f32 %v2711_v6, 0.0 }
 0x2cf   : > { %v3698_v50 = vmax.f32 %v3226_v43, 0.0  ;;  %v2706_v59 = vadd.f32 %v9461_v25, %v2705_v48  ;;  %v2841_v53 = vmax.f32 %v2703_v42, 0.0 }
 0x2d0   : > { %v3820_v26 = vpack.c.bf16 %v3700_v46, %v3699_v45  ;;  %v2844_v52 = vmax.f32 %v2714_v47, 0.0 }
 0x2d1   : > { %v3819_v54 = vpack.c.bf16 %v3698_v50, %v3697_v49  ;;  %v2842_v55 = vmax.f32 %v2706_v59, 0.0  ;;  %v7980_v56 = vpop.f32.mrb[132].mxu0 }
 0x2d2   : > { %v2908_v57 = vpack.c.bf16 %v2844_v52, %v2843_v51  ;;  %v3247_v58 = vadd.f32 %v7980_v56, %v9449_v24  ;;  %v3238_v60 = vpop.f32.mrb[133].mxu0 }
 0x2d3   : > { %v2907_v62 = vpack.c.bf16 %v2842_v55, %v2841_v53  ;;  %v3239_v63 = vadd.f32 %v9449_v24, %v3238_v60  ;;  %v7981_v0 = vpop.f32.mrb[134].mxu0  ;;  %8110 = vmatprep.mubr.msk.bf16.mxu1 %vm1979_vm2, %v3819_v54 }
 0x2d4   : > { %v3250_v1 = vadd.f32 %v7981_v0, %v9449_v24  ;;  %v3241_v25 = vpop.f32.mrb[135].mxu0  ;;  %8111 = vmatmul.mubr.msk.bf16.gmra.mrb[152].mxu1 %vm1979_vm2, %v3820_v26  ;;  %v3703_v3 = vmax.f32 %v3247_v58, 0.0 }
 0x2d5   : > { %v3242_v2 = vadd.f32 %v9449_v24, %v3241_v25  ;;  %8086 = vmatprep.mubr.msk.bf16.mxu0 %vm1979_vm2, %v2907_v62  ;;  %v3701_v5 = vmax.f32 %v3239_v63, 0.0 }
 0x2d6   : > { %v3704_v4 = vmax.f32 %v3250_v1, 0.0  ;;  %8087 = vmatmul.mubr.msk.bf16.gmra.mrb[240].mxu0 %vm1979_vm2, %v2908_v57 }
 0x2d7   : > { %v3702_v7 = vmax.f32 %v3242_v2, 0.0 }
 0x2d8   : > { %v3822_v8 = vpack.c.bf16 %v3704_v4, %v3703_v3 }
 0x2d9   : > { %v3821_v9 = vpack.c.bf16 %v3702_v7, %v3701_v5  ;;  %v7984_v10 = vpop.f32.mrb[136].mxu0 }
 0x2da   : > { %v3263_v11 = vadd.f32 %v7984_v10, %v9449_v24  ;;  %v3254_v12 = vpop.f32.mrb[137].mxu0 }
 0x2db   : > { %v3255_v13 = vadd.f32 %v9449_v24, %v3254_v12  ;;  %v7985_v14 = vpop.f32.mrb[138].mxu0  ;;  %8114 = vmatprep.mubr.msk.bf16.mxu1 %vm1979_vm2, %v3821_v9 }
 0x2dc   : > { %v3266_v15 = vadd.f32 %v7985_v14, %v9449_v24  ;;  %v3257_v16 = vpop.f32.mrb[139].mxu0  ;;  %8115 = vmatmul.mubr.msk.bf16.gmra.mrb[156].mxu1 %vm1979_vm2, %v3822_v8  ;;  %v3707_v19 = vmax.f32 %v3263_v11, 0.0  ;;  %v8503_v11 = vld [vmem:[%s10402_s9 + $0x38] sm:$0xff]  }
 0x2dd   : > { %v3258_v18 = vadd.f32 %v9449_v24, %v3257_v16  ;;  %v3705_v21 = vmax.f32 %v3255_v13, 0.0  ;;  %8240 = vmatprep.subr.bf16.mxu0 %v8503_v11 }
 0x2de   : > { %v3708_v20 = vmax.f32 %v3266_v15, 0.0  ;;  %8241 = vmatpush3.bf16.msra.mxu0 %v8503_v11 }
 0x2df   : > { %v3706_v22 = vmax.f32 %v3258_v18, 0.0 }
 0x2e0   : > { %v3824_v34 = vpack.c.bf16 %v3708_v20, %v3707_v19 }
 0x2e1   : > { %v3823_v27 = vpack.c.bf16 %v3706_v22, %v3705_v21  ;;  %v7988_v28 = vpop.f32.mrb[140].mxu0 }
 0x2e2   : > { %v3279_v29 = vadd.f32 %v7988_v28, %v9449_v24  ;;  %v3270_v23 = vpop.f32.mrb[141].mxu0 }
 0x2e3   : > { %v3271_v30 = vadd.f32 %v9449_v24, %v3270_v23  ;;  %v7989_v32 = vpop.f32.mrb[142].mxu0  ;;  %8118 = vmatprep.mubr.msk.bf16.mxu1 %vm1979_vm2, %v3823_v27 }
 0x2e4   : > { %v3282_v33 = vadd.f32 %v7989_v32, %v9449_v24  ;;  %v3273_v35 = vpop.f32.mrb[143].mxu0  ;;  %8119 = vmatmul.mubr.msk.bf16.gmra.mrb[160].mxu1 %vm1979_vm2, %v3824_v34  ;;  %v3711_v37 = vmax.f32 %v3279_v29, 0.0 }
 0x2e5   : > { %v3274_v36 = vadd.f32 %v9449_v24, %v3273_v35  ;;  %v3709_v39 = vmax.f32 %v3271_v30, 0.0 }
 0x2e6   : > { %v3712_v38 = vmax.f32 %v3282_v33, 0.0 }
 0x2e7   : > { %v3710_v31 = vmax.f32 %v3274_v36, 0.0 }
 0x2e8   : > { %v3826_v6 = vpack.c.bf16 %v3712_v38, %v3711_v37 }
 0x2e9   : > { %v3825_v61 = vpack.c.bf16 %v3710_v31, %v3709_v39  ;;  %v7992_v40 = vpop.f32.mrb[144].mxu0 }
 0x2ea   : > { %v3295_v41 = vadd.f32 %v7992_v40, %v9449_v24  ;;  %v3286_v42 = vpop.f32.mrb[145].mxu0 }
 0x2eb   : > { %v3287_v43 = vadd.f32 %v9449_v24, %v3286_v42  ;;  %v7993_v44 = vpop.f32.mrb[146].mxu0  ;;  %8122 = vmatprep.mubr.msk.bf16.mxu1 %vm1979_vm2, %v3825_v61 }
 0x2ec   : > { %v3298_v45 = vadd.f32 %v7993_v44, %v9449_v24  ;;  %v3289_v46 = vpop.f32.mrb[147].mxu0  ;;  %8123 = vmatmul.mubr.msk.bf16.gmra.mrb[164].mxu1 %vm1979_vm2, %v3826_v6  ;;  %v3715_v48 = vmax.f32 %v3295_v41, 0.0 }
 0x2ed   : > { %v3290_v47 = vadd.f32 %v9449_v24, %v3289_v46  ;;  %v3713_v50 = vmax.f32 %v3287_v43, 0.0 }
 0x2ee   : > { %v3716_v49 = vmax.f32 %v3298_v45, 0.0 }
 0x2ef   : > { %v3714_v59 = vmax.f32 %v3290_v47, 0.0 }
 0x2f0   : > { %v3828_v51 = vpack.c.bf16 %v3716_v49, %v3715_v48 }
 0x2f1   : > { %v3827_v26 = vpack.c.bf16 %v3714_v59, %v3713_v50  ;;  %v7996_v52 = vpop.f32.mrb[148].mxu0 }
 0x2f2   : > { %v3311_v53 = vadd.f32 %v7996_v52, %v9449_v24  ;;  %v3302_v54 = vpop.f32.mrb[149].mxu0 }
 0x2f3   : > { %v3303_v55 = vadd.f32 %v9449_v24, %v3302_v54  ;;  %v7997_v56 = vpop.f32.mrb[150].mxu0  ;;  %8126 = vmatprep.mubr.msk.bf16.mxu1 %vm1979_vm2, %v3827_v26 }
 0x2f4   : > { %v3314_v57 = vadd.f32 %v7997_v56, %v9449_v24  ;;  %v3305_v58 = vpop.f32.mrb[151].mxu0  ;;  %8127 = vmatmul.mubr.msk.bf16.gmra.mrb[168].mxu1 %vm1979_vm2, %v3828_v51  ;;  %v3719_v62 = vmax.f32 %v3311_v53, 0.0 }
 0x2f5   : > { %v3306_v60 = vadd.f32 %v9449_v24, %v3305_v58  ;;  %v3717_v0 = vmax.f32 %v3303_v55, 0.0 }
 0x2f6   : > { %v3720_v63 = vmax.f32 %v3314_v57, 0.0 }
 0x2f7   : > { %v3718_v1 = vmax.f32 %v3306_v60, 0.0 }
 0x2f8   : > { %v3830_v25 = vpack.c.bf16 %v3720_v63, %v3719_v62 }
 0x2f9   : > { %v3829_v2 = vpack.c.bf16 %v3718_v1, %v3717_v0  ;;  %v8000_v3 = vpop.f32.mrb[152].mxu0 }
 0x2fa   : > { %v3327_v4 = vadd.f32 %v8000_v3, %v9449_v24  ;;  %v3318_v5 = vpop.f32.mrb[153].mxu0 }
 0x2fb   : > { %v3319_v7 = vadd.f32 %v9449_v24, %v3318_v5  ;;  %v8001_v8 = vpop.f32.mrb[154].mxu0  ;;  %8130 = vmatprep.mubr.msk.bf16.mxu1 %vm1979_vm2, %v3829_v2 }
 0x2fc   : > { %v3330_v9 = vadd.f32 %v8001_v8, %v9449_v24  ;;  %v3321_v10 = vpop.f32.mrb[155].mxu0  ;;  %8131 = vmatmul.mubr.msk.bf16.gmra.mrb[172].mxu1 %vm1979_vm2, %v3830_v25  ;;  %v3723_v13 = vmax.f32 %v3327_v4, 0.0 }
 0x2fd   : > { %v3322_v12 = vadd.f32 %v9449_v24, %v3321_v10  ;;  %v3721_v15 = vmax.f32 %v3319_v7, 0.0 }
 0x2fe   : > { %v3724_v14 = vmax.f32 %v3330_v9, 0.0 }
 0x2ff   : > { %v3722_v16 = vmax.f32 %v3322_v12, 0.0 }
 0x300   : > { %v3832_v17 = vpack.c.bf16 %v3724_v14, %v3723_v13 }
 0x301   : > { %v3831_v18 = vpack.c.bf16 %v3722_v16, %v3721_v15  ;;  %v8004_v19 = vpop.f32.mrb[156].mxu0 }
 0x302   : > { %v3343_v20 = vadd.f32 %v8004_v19, %v9449_v24  ;;  %v3334_v21 = vpop.f32.mrb[157].mxu0 }
 0x303   : > { %v3335_v22 = vadd.f32 %v9449_v24, %v3334_v21  ;;  %v8005_v34 = vpop.f32.mrb[158].mxu0  ;;  %8134 = vmatprep.mubr.msk.bf16.mxu1 %vm1979_vm2, %v3831_v18 }
 0x304   : > { %v3346_v27 = vadd.f32 %v8005_v34, %v9449_v24  ;;  %v3337_v28 = vpop.f32.mrb[159].mxu0  ;;  %8135 = vmatmul.mubr.msk.bf16.gmra.mrb[176].mxu1 %vm1979_vm2, %v3832_v17  ;;  %v3727_v23 = vmax.f32 %v3343_v20, 0.0 }
 0x305   : > { %v3338_v29 = vadd.f32 %v9449_v24, %v3337_v28  ;;  %v3725_v32 = vmax.f32 %v3335_v22, 0.0 }
 0x306   : > { %v3728_v30 = vmax.f32 %v3346_v27, 0.0 }
 0x307   : > { %v3726_v33 = vmax.f32 %v3338_v29, 0.0 }
 0x308   : > { %v3834_v35 = vpack.c.bf16 %v3728_v30, %v3727_v23 }
 0x309   : > { %v3833_v36 = vpack.c.bf16 %v3726_v33, %v3725_v32  ;;  %v8008_v37 = vpop.f32.mrb[160].mxu0 }
 0x30a   : > { %v3359_v38 = vadd.f32 %v8008_v37, %v9449_v24  ;;  %v3350_v39 = vpop.f32.mrb[161].mxu0 }
 0x30b   : > { %v3351_v31 = vadd.f32 %v9449_v24, %v3350_v39  ;;  %v8009_v6 = vpop.f32.mrb[162].mxu0  ;;  %8138 = vmatprep.mubr.msk.bf16.mxu1 %vm1979_vm2, %v3833_v36 }
 0x30c   : > { %v3362_v61 = vadd.f32 %v8009_v6, %v9449_v24  ;;  %v3353_v40 = vpop.f32.mrb[163].mxu0  ;;  %8139 = vmatmul.mubr.msk.bf16.gmra.mrb[180].mxu1 %vm1979_vm2, %v3834_v35  ;;  %v3731_v42 = vmax.f32 %v3359_v38, 0.0 }
 0x30d   : > { %v3354_v41 = vadd.f32 %v9449_v24, %v3353_v40  ;;  %v3729_v44 = vmax.f32 %v3351_v31, 0.0 }
 0x30e   : > { %v3732_v43 = vmax.f32 %v3362_v61, 0.0 }
 0x30f   : > { %v3730_v45 = vmax.f32 %v3354_v41, 0.0 }
 0x310   : > { %v3836_v46 = vpack.c.bf16 %v3732_v43, %v3731_v42 }
 0x311   : > { %v3835_v47 = vpack.c.bf16 %v3730_v45, %v3729_v44  ;;  %v8012_v48 = vpop.f32.mrb[164].mxu0 }
 0x312   : > { %v3375_v49 = vadd.f32 %v8012_v48, %v9449_v24  ;;  %v3366_v50 = vpop.f32.mrb[165].mxu0 }
 0x313   : > { %v3367_v59 = vadd.f32 %v9449_v24, %v3366_v50  ;;  %v8013_v51 = vpop.f32.mrb[166].mxu0  ;;  %8142 = vmatprep.mubr.msk.bf16.mxu1 %vm1979_vm2, %v3835_v47 }
 0x314   : > { %v3378_v26 = vadd.f32 %v8013_v51, %v9449_v24  ;;  %v3369_v52 = vpop.f32.mrb[167].mxu0  ;;  %8143 = vmatmul.mubr.msk.bf16.gmra.mrb[184].mxu1 %vm1979_vm2, %v3836_v46  ;;  %v3735_v54 = vmax.f32 %v3375_v49, 0.0 }
 0x315   : > { %v3370_v53 = vadd.f32 %v9449_v24, %v3369_v52  ;;  %v3733_v56 = vmax.f32 %v3367_v59, 0.0 }
 0x316   : > { %v3736_v55 = vmax.f32 %v3378_v26, 0.0 }
 0x317   : > { %v3734_v57 = vmax.f32 %v3370_v53, 0.0 }
 0x318   : > { %v3838_v58 = vpack.c.bf16 %v3736_v55, %v3735_v54 }
 0x319   : > { %v3837_v60 = vpack.c.bf16 %v3734_v57, %v3733_v56  ;;  %v8016_v62 = vpop.f32.mrb[168].mxu0 }
 0x31a   : > { %v3391_v63 = vadd.f32 %v8016_v62, %v9449_v24  ;;  %v3382_v0 = vpop.f32.mrb[169].mxu0 }
 0x31b   : > { %v3383_v1 = vadd.f32 %v9449_v24, %v3382_v0  ;;  %v8017_v25 = vpop.f32.mrb[170].mxu0  ;;  %8146 = vmatprep.mubr.msk.bf16.mxu1 %vm1979_vm2, %v3837_v60 }
 0x31c   : > { %v3394_v2 = vadd.f32 %v8017_v25, %v9449_v24  ;;  %v3385_v3 = vpop.f32.mrb[171].mxu0  ;;  %8147 = vmatmul.mubr.msk.bf16.gmra.mrb[188].mxu1 %vm1979_vm2, %v3838_v58  ;;  %v3739_v5 = vmax.f32 %v3391_v63, 0.0 }
 0x31d   : > { %v3386_v4 = vadd.f32 %v9449_v24, %v3385_v3  ;;  %v3737_v8 = vmax.f32 %v3383_v1, 0.0 }
 0x31e   : > { %v3740_v7 = vmax.f32 %v3394_v2, 0.0 }
 0x31f   : > { %v3738_v9 = vmax.f32 %v3386_v4, 0.0 }
 0x320   : > { %v3840_v10 = vpack.c.bf16 %v3740_v7, %v3739_v5 }
 0x321   : > { %v3839_v11 = vpack.c.bf16 %v3738_v9, %v3737_v8  ;;  %v8020_v12 = vpop.f32.mrb[172].mxu0 }
 0x322   : > { %v3407_v13 = vadd.f32 %v8020_v12, %v9449_v24  ;;  %v3398_v14 = vpop.f32.mrb[173].mxu0 }
 0x323   : > { %v3399_v15 = vadd.f32 %v9449_v24, %v3398_v14  ;;  %v8021_v16 = vpop.f32.mrb[174].mxu0  ;;  %8150 = vmatprep.mubr.msk.bf16.mxu1 %vm1979_vm2, %v3839_v11 }
 0x324   : > { %v3410_v17 = vadd.f32 %v8021_v16, %v9449_v24  ;;  %v3401_v18 = vpop.f32.mrb[175].mxu0  ;;  %8151 = vmatmul.mubr.msk.bf16.gmra.mrb[192].mxu1 %vm1979_vm2, %v3840_v10  ;;  %v3743_v20 = vmax.f32 %v3407_v13, 0.0 }
 0x325   : > { %v3402_v19 = vadd.f32 %v9449_v24, %v3401_v18  ;;  %v3741_v22 = vmax.f32 %v3399_v15, 0.0 }
 0x326   : > { %v3744_v21 = vmax.f32 %v3410_v17, 0.0 }
 0x327   : > { %v3742_v34 = vmax.f32 %v3402_v19, 0.0 }
 0x328   : > { %v3842_v27 = vpack.c.bf16 %v3744_v21, %v3743_v20 }
 0x329   : > { %v3841_v28 = vpack.c.bf16 %v3742_v34, %v3741_v22  ;;  %v8024_v29 = vpop.f32.mrb[176].mxu0 }
 0x32a   : > { %v3423_v23 = vadd.f32 %v8024_v29, %v9449_v24  ;;  %v3414_v30 = vpop.f32.mrb[177].mxu0 }
 0x32b   : > { %v3415_v32 = vadd.f32 %v9449_v24, %v3414_v30  ;;  %v8025_v33 = vpop.f32.mrb[178].mxu0  ;;  %8154 = vmatprep.mubr.msk.bf16.mxu1 %vm1979_vm2, %v3841_v28 }
 0x32c   : > { %v3426_v35 = vadd.f32 %v8025_v33, %v9449_v24  ;;  %v3417_v36 = vpop.f32.mrb[179].mxu0  ;;  %8155 = vmatmul.mubr.msk.bf16.gmra.mrb[196].mxu1 %vm1979_vm2, %v3842_v27  ;;  %v3747_v38 = vmax.f32 %v3423_v23, 0.0 }
 0x32d   : > { %v3418_v37 = vadd.f32 %v9449_v24, %v3417_v36  ;;  %v3745_v31 = vmax.f32 %v3415_v32, 0.0 }
 0x32e   : > { %v3748_v39 = vmax.f32 %v3426_v35, 0.0 }
 0x32f   : > { %v3746_v6 = vmax.f32 %v3418_v37, 0.0 }
 0x330   : > { %v3844_v61 = vpack.c.bf16 %v3748_v39, %v3747_v38 }
 0x331   : > { %v3843_v40 = vpack.c.bf16 %v3746_v6, %v3745_v31  ;;  %v8028_v41 = vpop.f32.mrb[180].mxu0 }
 0x332   : > { %v3439_v42 = vadd.f32 %v8028_v41, %v9449_v24  ;;  %v3430_v43 = vpop.f32.mrb[181].mxu0 }
 0x333   : > { %v3431_v44 = vadd.f32 %v9449_v24, %v3430_v43  ;;  %v8029_v45 = vpop.f32.mrb[182].mxu0  ;;  %8158 = vmatprep.mubr.msk.bf16.mxu1 %vm1979_vm2, %v3843_v40 }
 0x334   : > { %v3442_v46 = vadd.f32 %v8029_v45, %v9449_v24  ;;  %v3433_v47 = vpop.f32.mrb[183].mxu0  ;;  %8159 = vmatmul.mubr.msk.bf16.gmra.mrb[200].mxu1 %vm1979_vm2, %v3844_v61  ;;  %v3751_v49 = vmax.f32 %v3439_v42, 0.0 }
 0x335   : > { %v3434_v48 = vadd.f32 %v9449_v24, %v3433_v47  ;;  %v3749_v59 = vmax.f32 %v3431_v44, 0.0 }
 0x336   : > { %v3752_v50 = vmax.f32 %v3442_v46, 0.0 }
 0x337   : > { %v3750_v51 = vmax.f32 %v3434_v48, 0.0 }
 0x338   : > { %v3846_v26 = vpack.c.bf16 %v3752_v50, %v3751_v49 }
 0x339   : > { %v3845_v52 = vpack.c.bf16 %v3750_v51, %v3749_v59  ;;  %v8032_v53 = vpop.f32.mrb[184].mxu0 }
 0x33a   : > { %v3455_v54 = vadd.f32 %v8032_v53, %v9449_v24  ;;  %v3446_v55 = vpop.f32.mrb[185].mxu0 }
 0x33b   : > { %v3447_v56 = vadd.f32 %v9449_v24, %v3446_v55  ;;  %v8033_v57 = vpop.f32.mrb[186].mxu0  ;;  %8162 = vmatprep.mubr.msk.bf16.mxu1 %vm1979_vm2, %v3845_v52 }
 0x33c   : > { %v3458_v58 = vadd.f32 %v8033_v57, %v9449_v24  ;;  %v3449_v60 = vpop.f32.mrb[187].mxu0  ;;  %8163 = vmatmul.mubr.msk.bf16.gmra.mrb[204].mxu1 %vm1979_vm2, %v3846_v26  ;;  %v3755_v63 = vmax.f32 %v3455_v54, 0.0 }
 0x33d   : > { %v3450_v62 = vadd.f32 %v9449_v24, %v3449_v60  ;;  %v3753_v1 = vmax.f32 %v3447_v56, 0.0 }
 0x33e   : > { %v3756_v0 = vmax.f32 %v3458_v58, 0.0 }
 0x33f   : > { %v3754_v25 = vmax.f32 %v3450_v62, 0.0 }
 0x340   : > { %v3848_v2 = vpack.c.bf16 %v3756_v0, %v3755_v63 }
 0x341   : > { %v3847_v3 = vpack.c.bf16 %v3754_v25, %v3753_v1  ;;  %v8036_v4 = vpop.f32.mrb[188].mxu0 }
 0x342   : > { %v3471_v5 = vadd.f32 %v8036_v4, %v9449_v24  ;;  %v3462_v7 = vpop.f32.mrb[189].mxu0 }
 0x343   : > { %v3463_v8 = vadd.f32 %v9449_v24, %v3462_v7  ;;  %v8037_v9 = vpop.f32.mrb[190].mxu0  ;;  %8166 = vmatprep.mubr.msk.bf16.mxu1 %vm1979_vm2, %v3847_v3 }
 0x344   : > { %v3474_v10 = vadd.f32 %v8037_v9, %v9449_v24  ;;  %v3465_v11 = vpop.f32.mrb[191].mxu0  ;;  %8167 = vmatmul.mubr.msk.bf16.gmra.mrb[208].mxu1 %vm1979_vm2, %v3848_v2  ;;  %v3759_v13 = vmax.f32 %v3471_v5, 0.0 }
 0x345   : > { %v3466_v12 = vadd.f32 %v9449_v24, %v3465_v11  ;;  %v3757_v15 = vmax.f32 %v3463_v8, 0.0 }
 0x346   : > { %v3760_v14 = vmax.f32 %v3474_v10, 0.0 }
 0x347   : > { %v3758_v16 = vmax.f32 %v3466_v12, 0.0 }
 0x348   : > { %v3850_v17 = vpack.c.bf16 %v3760_v14, %v3759_v13 }
 0x349   : > { %v3849_v18 = vpack.c.bf16 %v3758_v16, %v3757_v15  ;;  %v8040_v19 = vpop.f32.mrb[192].mxu0 }
 0x34a   : > { %v3487_v20 = vadd.f32 %v8040_v19, %v9449_v24  ;;  %v3478_v21 = vpop.f32.mrb[193].mxu0 }
 0x34b   : > { %v3479_v22 = vadd.f32 %v9449_v24, %v3478_v21  ;;  %v8041_v34 = vpop.f32.mrb[194].mxu0  ;;  %8170 = vmatprep.mubr.msk.bf16.mxu1 %vm1979_vm2, %v3849_v18 }
 0x34c   : > { %v3490_v27 = vadd.f32 %v8041_v34, %v9449_v24  ;;  %v3481_v28 = vpop.f32.mrb[195].mxu0  ;;  %8171 = vmatmul.mubr.msk.bf16.gmra.mrb[212].mxu1 %vm1979_vm2, %v3850_v17  ;;  %v3763_v23 = vmax.f32 %v3487_v20, 0.0 }
 0x34d   : > { %v3482_v29 = vadd.f32 %v9449_v24, %v3481_v28  ;;  %v3761_v32 = vmax.f32 %v3479_v22, 0.0 }
 0x34e   : > { %v3764_v30 = vmax.f32 %v3490_v27, 0.0 }
 0x34f   : > { %v3762_v33 = vmax.f32 %v3482_v29, 0.0 }
 0x350   : > { %v3852_v35 = vpack.c.bf16 %v3764_v30, %v3763_v23 }
 0x351   : > { %v3851_v36 = vpack.c.bf16 %v3762_v33, %v3761_v32  ;;  %v8044_v37 = vpop.f32.mrb[196].mxu0 }
 0x352   : > { %v3503_v38 = vadd.f32 %v8044_v37, %v9449_v24  ;;  %v3494_v39 = vpop.f32.mrb[197].mxu0 }
 0x353   : > { %v3495_v31 = vadd.f32 %v9449_v24, %v3494_v39  ;;  %v8045_v6 = vpop.f32.mrb[198].mxu0  ;;  %8174 = vmatprep.mubr.msk.bf16.mxu1 %vm1979_vm2, %v3851_v36 }
 0x354   : > { %v3506_v61 = vadd.f32 %v8045_v6, %v9449_v24  ;;  %v3497_v40 = vpop.f32.mrb[199].mxu0  ;;  %8175 = vmatmul.mubr.msk.bf16.gmra.mrb[216].mxu1 %vm1979_vm2, %v3852_v35  ;;  %v3767_v42 = vmax.f32 %v3503_v38, 0.0 }
 0x355   : > { %v3498_v41 = vadd.f32 %v9449_v24, %v3497_v40  ;;  %v3765_v44 = vmax.f32 %v3495_v31, 0.0 }
 0x356   : > { %v3768_v43 = vmax.f32 %v3506_v61, 0.0 }
 0x357   : > { %v3766_v45 = vmax.f32 %v3498_v41, 0.0 }
 0x358   : > { %v3854_v46 = vpack.c.bf16 %v3768_v43, %v3767_v42 }
 0x359   : > { %v3853_v47 = vpack.c.bf16 %v3766_v45, %v3765_v44  ;;  %v8048_v48 = vpop.f32.mrb[200].mxu0 }
 0x35a   : > { %v3519_v49 = vadd.f32 %v8048_v48, %v9449_v24  ;;  %v3510_v50 = vpop.f32.mrb[201].mxu0 }
 0x35b   : > { %v3511_v59 = vadd.f32 %v9449_v24, %v3510_v50  ;;  %v8049_v51 = vpop.f32.mrb[202].mxu0  ;;  %8178 = vmatprep.mubr.msk.bf16.mxu1 %vm1979_vm2, %v3853_v47 }
 0x35c   : > { %v3522_v26 = vadd.f32 %v8049_v51, %v9449_v24  ;;  %v3513_v52 = vpop.f32.mrb[203].mxu0  ;;  %8179 = vmatmul.mubr.msk.bf16.gmra.mrb[220].mxu1 %vm1979_vm2, %v3854_v46  ;;  %v3771_v54 = vmax.f32 %v3519_v49, 0.0 }
 0x35d   : > { %v3514_v53 = vadd.f32 %v9449_v24, %v3513_v52  ;;  %v3769_v56 = vmax.f32 %v3511_v59, 0.0 }
 0x35e   : > { %v3772_v55 = vmax.f32 %v3522_v26, 0.0 }
 0x35f   : > { %v3770_v57 = vmax.f32 %v3514_v53, 0.0 }
 0x360   : > { %v3856_v58 = vpack.c.bf16 %v3772_v55, %v3771_v54 }
 0x361   : > { %v3855_v60 = vpack.c.bf16 %v3770_v57, %v3769_v56  ;;  %v8052_v62 = vpop.f32.mrb[204].mxu0 }
 0x362   : > { %v3535_v63 = vadd.f32 %v8052_v62, %v9449_v24  ;;  %v3526_v0 = vpop.f32.mrb[205].mxu0 }
 0x363   : > { %v3527_v1 = vadd.f32 %v9449_v24, %v3526_v0  ;;  %v8053_v25 = vpop.f32.mrb[206].mxu0  ;;  %8182 = vmatprep.mubr.msk.bf16.mxu1 %vm1979_vm2, %v3855_v60 }
 0x364   : > { %v3538_v2 = vadd.f32 %v8053_v25, %v9449_v24  ;;  %v3529_v3 = vpop.f32.mrb[207].mxu0  ;;  %8183 = vmatmul.mubr.msk.bf16.gmra.mrb[224].mxu1 %vm1979_vm2, %v3856_v58  ;;  %v3775_v5 = vmax.f32 %v3535_v63, 0.0 }
 0x365   : > { %v3530_v4 = vadd.f32 %v9449_v24, %v3529_v3  ;;  %v3773_v8 = vmax.f32 %v3527_v1, 0.0 }
 0x366   : > { %v3776_v7 = vmax.f32 %v3538_v2, 0.0 }
 0x367   : > { %v3774_v9 = vmax.f32 %v3530_v4, 0.0 }
 0x368   : > { %v3858_v10 = vpack.c.bf16 %v3776_v7, %v3775_v5  ;;  %v9654_v5 = vld [vmem:[%s10399_s6] ss:$0 sm:$0xff] }
 0x369   : > { %v3857_v11 = vpack.c.bf16 %v3774_v9, %v3773_v8  ;;  %v8056_v12 = vpop.f32.mrb[208].mxu0 }
 0x36a   : > { %v3551_v13 = vadd.f32 %v8056_v12, %v9449_v24  ;;  %v3542_v14 = vpop.f32.mrb[209].mxu0 }
 0x36b   : > { %v3543_v15 = vadd.f32 %v9449_v24, %v3542_v14  ;;  %v8057_v16 = vpop.f32.mrb[210].mxu0  ;;  %8186 = vmatprep.mubr.msk.bf16.mxu1 %vm1979_vm2, %v3857_v11 }
 0x36c   : > { %v3554_v17 = vadd.f32 %v8057_v16, %v9449_v24  ;;  %v3545_v18 = vpop.f32.mrb[211].mxu0  ;;  %8187 = vmatmul.mubr.msk.bf16.gmra.mrb[228].mxu1 %vm1979_vm2, %v3858_v10  ;;  %v3779_v20 = vmax.f32 %v3551_v13, 0.0  ;;  %v9665_v13 = vld [vmem:[%s10401_s8] ss:$0 sm:$0xff] }
 0x36d   : > { %v3546_v19 = vadd.f32 %v9449_v24, %v3545_v18  ;;  %v3777_v22 = vmax.f32 %v3543_v15, 0.0 }
 0x36e   : > { %v3780_v21 = vmax.f32 %v3554_v17, 0.0 }
 0x36f   : > { %v3778_v34 = vmax.f32 %v3546_v19, 0.0 }
 0x370   : > { %v3860_v27 = vpack.c.bf16 %v3780_v21, %v3779_v20 }
 0x371   : > { %v3859_v28 = vpack.c.bf16 %v3778_v34, %v3777_v22  ;;  %v8060_v29 = vpop.f32.mrb[212].mxu0 }
 0x372   : > { %v3567_v23 = vadd.f32 %v8060_v29, %v9449_v24  ;;  %v3558_v30 = vpop.f32.mrb[213].mxu0 }
 0x373   : > { %v3559_v32 = vadd.f32 %v9449_v24, %v3558_v30  ;;  %v8061_v33 = vpop.f32.mrb[214].mxu0  ;;  %8190 = vmatprep.mubr.msk.bf16.mxu1 %vm1979_vm2, %v3859_v28 }
 0x374   : > { %v3570_v35 = vadd.f32 %v8061_v33, %v9449_v24  ;;  %v3561_v36 = vpop.f32.mrb[215].mxu0  ;;  %8191 = vmatmul.mubr.msk.bf16.gmra.mrb[232].mxu1 %vm1979_vm2, %v3860_v27  ;;  %v3783_v38 = vmax.f32 %v3567_v23, 0.0 }
 0x375   : > { %v3562_v37 = vadd.f32 %v9449_v24, %v3561_v36  ;;  %v3781_v31 = vmax.f32 %v3559_v32, 0.0 }
 0x376   : > { %v3784_v39 = vmax.f32 %v3570_v35, 0.0 }
 0x377   : > { %v3782_v6 = vmax.f32 %v3562_v37, 0.0 }
 0x378   : > { %v3862_v61 = vpack.c.bf16 %v3784_v39, %v3783_v38 }
 0x379   : > { %v3861_v40 = vpack.c.bf16 %v3782_v6, %v3781_v31  ;;  %v8064_v41 = vpop.f32.mrb[216].mxu0 }
 0x37a   : > { %v3583_v42 = vadd.f32 %v8064_v41, %v9449_v24  ;;  %v3574_v43 = vpop.f32.mrb[217].mxu0 }
 0x37b   : > { %v3575_v44 = vadd.f32 %v9449_v24, %v3574_v43  ;;  %v8065_v45 = vpop.f32.mrb[218].mxu0  ;;  %8194 = vmatprep.mubr.msk.bf16.mxu1 %vm1979_vm2, %v3861_v40 }
 0x37c   : > { %v3586_v46 = vadd.f32 %v8065_v45, %v9449_v24  ;;  %v3577_v47 = vpop.f32.mrb[219].mxu0  ;;  %8195 = vmatmul.mubr.msk.bf16.gmra.mrb[236].mxu1 %vm1979_vm2, %v3862_v61  ;;  %v3787_v49 = vmax.f32 %v3583_v42, 0.0 }
 0x37d   : > { %v3578_v48 = vadd.f32 %v9449_v24, %v3577_v47  ;;  %v3785_v59 = vmax.f32 %v3575_v44, 0.0 }
 0x37e   : > { %v3788_v50 = vmax.f32 %v3586_v46, 0.0 }
 0x37f   : > { %v3786_v51 = vmax.f32 %v3578_v48, 0.0 }
 0x380   : > { %v3864_v26 = vpack.c.bf16 %v3788_v50, %v3787_v49 }
 0x381   : > { %v3863_v52 = vpack.c.bf16 %v3786_v51, %v3785_v59  ;;  %v8068_v53 = vpop.f32.mrb[220].mxu0 }
 0x382   : > { %v3599_v54 = vadd.f32 %v8068_v53, %v9449_v24  ;;  %v3590_v55 = vpop.f32.mrb[221].mxu0 }
 0x383   : > { %v3591_v56 = vadd.f32 %v9449_v24, %v3590_v55  ;;  %v8069_v57 = vpop.f32.mrb[222].mxu0  ;;  %8198 = vmatprep.mubr.msk.bf16.mxu1 %vm1979_vm2, %v3863_v52 }
 0x384   : > { %v3602_v58 = vadd.f32 %v8069_v57, %v9449_v24  ;;  %v3593_v60 = vpop.f32.mrb[223].mxu0  ;;  %8199 = vmatmul.mubr.msk.bf16.gmra.mrb[240].mxu1 %vm1979_vm2, %v3864_v26  ;;  %v3791_v63 = vmax.f32 %v3599_v54, 0.0 }
 0x385   : > { %v3594_v62 = vadd.f32 %v9449_v24, %v3593_v60  ;;  %v3789_v1 = vmax.f32 %v3591_v56, 0.0 }
 0x386   : > { %v3792_v0 = vmax.f32 %v3602_v58, 0.0 }
 0x387   : > { %v3790_v25 = vmax.f32 %v3594_v62, 0.0 }
 0x388   : > { %v3866_v2 = vpack.c.bf16 %v3792_v0, %v3791_v63 }
 0x389   : > { %v3865_v3 = vpack.c.bf16 %v3790_v25, %v3789_v1  ;;  %v8072_v4 = vpop.f32.mrb[224].mxu0 }
 0x38a   : > { %v3615_v7 = vadd.f32 %v9654_v5, %v8072_v4  ;;  %v3606_v8 = vpop.f32.mrb[225].mxu0 }
 0x38b   : > { %v3607_v9 = vadd.f32 %v9654_v5, %v3606_v8  ;;  %v8073_v10 = vpop.f32.mrb[226].mxu0  ;;  %8202 = vmatprep.mubr.msk.bf16.mxu1 %vm1979_vm2, %v3865_v3 }
 0x38c   : > { %v3618_v24 = vadd.f32 %v9654_v5, %v8073_v10  ;;  %v3609_v11 = vpop.f32.mrb[227].mxu0  ;;  %8203 = vmatmul.mubr.msk.bf16.gmra.mrb[244].mxu1 %vm1979_vm2, %v3866_v2  ;;  %v3795_v14 = vmax.f32 %v3615_v7, 0.0 }
 0x38d   : > { %v3610_v12 = vadd.f32 %v9654_v5, %v3609_v11  ;;  %v3793_v16 = vmax.f32 %v3607_v9, 0.0 }
 0x38e   : > { %v3796_v15 = vmax.f32 %v3618_v24, 0.0 }
 0x38f   : > { %v3794_v17 = vmax.f32 %v3610_v12, 0.0  ;;  %v8100_v18 = vpop.f32.mrb[140].mxu1 }
 0x390   : > { %v3868_v19 = vpack.c.bf16 %v3796_v15, %v3795_v14  ;;  %v4151_v20 = vadd.f32 %v8100_v18, %v9665_v13  ;;  %v4142_v21 = vpop.f32.mrb[141].mxu1 }
 0x391   : > { %v3867_v22 = vpack.c.bf16 %v3794_v17, %v3793_v16  ;;  %v4143_v34 = vadd.f32 %v9665_v13, %v4142_v21  ;;  %v8076_v27 = vpop.f32.mrb[228].mxu0  ;;  %v8101_v28 = vpop.f32.mrb[142].mxu1 }
 0x392   : > { %v3631_v29 = vadd.f32 %v9654_v5, %v8076_v27  ;;  %v4154_v23 = vadd.f32 %v8101_v28, %v9665_v13  ;;  %v3622_v30 = vpop.f32.mrb[229].mxu0  ;;  %v4145_v32 = vpop.f32.mrb[143].mxu1  ;;  %v4655_v37 = vmax.f32 %v4151_v20, 0.0 }
 0x393   : > { %v3623_v33 = vadd.f32 %v9654_v5, %v3622_v30  ;;  %v4146_v35 = vadd.f32 %v9665_v13, %v4145_v32  ;;  %v8077_v36 = vpop.f32.mrb[230].mxu0  ;;  %8206 = vmatprep.mubr.msk.bf16.mxu1 %vm1979_vm2, %v3867_v22  ;;  %v4653_v6 = vmax.f32 %v4143_v34, 0.0 }
 0x394   : > { %v4656_v38 = vmax.f32 %v4154_v23, 0.0  ;;  %v3634_v39 = vadd.f32 %v9654_v5, %v8077_v36  ;;  %v3625_v31 = vpop.f32.mrb[231].mxu0  ;;  %8207 = vmatmul.mubr.msk.bf16.gmra.mrb[248].mxu1 %vm1979_vm2, %v3868_v19  ;;  %v3799_v41 = vmax.f32 %v3631_v29, 0.0 }
 0x395   : > { %v4654_v61 = vmax.f32 %v4146_v35, 0.0  ;;  %v3626_v40 = vadd.f32 %v9654_v5, %v3625_v31  ;;  %v3797_v44 = vmax.f32 %v3623_v33, 0.0 }
 0x396   : > { %v4782_v42 = vpack.c.bf16 %v4656_v38, %v4655_v37  ;;  %v3800_v43 = vmax.f32 %v3634_v39, 0.0 }
 0x397   : > { %v4781_v45 = vpack.c.bf16 %v4654_v61, %v4653_v6  ;;  %v3798_v46 = vmax.f32 %v3626_v40, 0.0  ;;  %v8104_v47 = vpop.f32.mrb[144].mxu1 }
 0x398   : > { %v3870_v48 = vpack.c.bf16 %v3800_v43, %v3799_v41  ;;  %v4167_v49 = vadd.f32 %v8104_v47, %v9665_v13  ;;  %v4158_v50 = vpop.f32.mrb[145].mxu1 }
 0x399   : > { %v3869_v59 = vpack.c.bf16 %v3798_v46, %v3797_v44  ;;  %v4159_v51 = vadd.f32 %v9665_v13, %v4158_v50  ;;  %v8080_v26 = vpop.f32.mrb[232].mxu0  ;;  %v8105_v52 = vpop.f32.mrb[146].mxu1  ;;  %8242 = vmatprep.mubr.bf16.mxu0 %v4781_v45 }
 0x39a   : > { %v3647_v53 = vadd.f32 %v9654_v5, %v8080_v26  ;;  %v4170_v54 = vadd.f32 %v8105_v52, %v9665_v13  ;;  %v3638_v55 = vpop.f32.mrb[233].mxu0  ;;  %v4161_v56 = vpop.f32.mrb[147].mxu1  ;;  %8243 = vmatmul.mubr.bf16.vlgmr.msra.gmra.mrb[244].mxu0 %v4782_v42  ;;  %v4659_v62 = vmax.f32 %v4167_v49, 0.0 }
 0x39b   : > { %v3639_v57 = vadd.f32 %v9654_v5, %v3638_v55  ;;  %v4162_v58 = vadd.f32 %v9665_v13, %v4161_v56  ;;  %v8081_v60 = vpop.f32.mrb[234].mxu0  ;;  %8210 = vmatprep.mubr.msk.bf16.mxu1 %vm1979_vm2, %v3869_v59  ;;  %v4657_v25 = vmax.f32 %v4159_v51, 0.0 }
 0x39c   : > { %v4660_v63 = vmax.f32 %v4170_v54, 0.0  ;;  %v3650_v0 = vadd.f32 %v9654_v5, %v8081_v60  ;;  %v3641_v1 = vpop.f32.mrb[235].mxu0  ;;  %8211 = vmatmul.mubr.msk.bf16.gmra.mrb[252].mxu1 %vm1979_vm2, %v3870_v48  ;;  %v3803_v4 = vmax.f32 %v3647_v53, 0.0 }
 0x39d   : > { %v4658_v2 = vmax.f32 %v4162_v58, 0.0  ;;  %v3642_v3 = vadd.f32 %v9654_v5, %v3641_v1  ;;  %v3801_v9 = vmax.f32 %v3639_v57, 0.0 }
 0x39e   : > { %v4784_v7 = vpack.c.bf16 %v4660_v63, %v4659_v62  ;;  %v3804_v8 = vmax.f32 %v3650_v0, 0.0 }
 0x39f   : > { %v4783_v10 = vpack.c.bf16 %v4658_v2, %v4657_v25  ;;  %v3802_v24 = vmax.f32 %v3642_v3, 0.0  ;;  %v8108_v11 = vpop.f32.mrb[148].mxu1 }
 0x3a0   : > { %v3872_v12 = vpack.c.bf16 %v3804_v8, %v3803_v4  ;;  %v4183_v14 = vadd.f32 %v8108_v11, %v9665_v13  ;;  %v4174_v15 = vpop.f32.mrb[149].mxu1 }
 0x3a1   : > { %v3871_v16 = vpack.c.bf16 %v3802_v24, %v3801_v9  ;;  %v4175_v17 = vadd.f32 %v9665_v13, %v4174_v15  ;;  %v8084_v18 = vpop.f32.mrb[236].mxu0  ;;  %v8109_v19 = vpop.f32.mrb[150].mxu1  ;;  %8246 = vmatprep.mubr.bf16.mxu0 %v4783_v10 }
 0x3a2   : > { %v3663_v20 = vadd.f32 %v9654_v5, %v8084_v18  ;;  %v4186_v21 = vadd.f32 %v8109_v19, %v9665_v13  ;;  %v3654_v22 = vpop.f32.mrb[237].mxu0  ;;  %v4177_v34 = vpop.f32.mrb[151].mxu1  ;;  %8247 = vmatmul.mubr.bf16.gmra.mrb[248].mxu0 %v4784_v7  ;;  %v4663_v23 = vmax.f32 %v4183_v14, 0.0 }
 0x3a3   : > { %v3655_v27 = vadd.f32 %v9654_v5, %v3654_v22  ;;  %v4178_v28 = vadd.f32 %v9665_v13, %v4177_v34  ;;  %v8085_v29 = vpop.f32.mrb[238].mxu0  ;;  %8214 = vmatprep.mubr.msk.bf16.mxu1 %vm1979_vm2, %v3871_v16  ;;  %v4661_v35 = vmax.f32 %v4175_v17, 0.0 }
 0x3a4   : > { %v4664_v30 = vmax.f32 %v4186_v21, 0.0  ;;  %v3666_v32 = vadd.f32 %v9654_v5, %v8085_v29  ;;  %v3657_v33 = vpop.f32.mrb[239].mxu0  ;;  %8215 = vmatmul.mubr.msk.bf16.gmra.mrb[0].mxu1 %vm1979_vm2, %v3872_v12  ;;  %v3807_v38 = vmax.f32 %v3663_v20, 0.0 }
 0x3a5   : > { %v4662_v36 = vmax.f32 %v4178_v28, 0.0  ;;  %v3658_v37 = vadd.f32 %v9654_v5, %v3657_v33  ;;  %v3805_v6 = vmax.f32 %v3655_v27, 0.0 }
 0x3a6   : > { %v4786_v39 = vpack.c.bf16 %v4664_v30, %v4663_v23  ;;  %v3808_v31 = vmax.f32 %v3666_v32, 0.0 }
 0x3a7   : > { %v4785_v61 = vpack.c.bf16 %v4662_v36, %v4661_v35  ;;  %v3806_v40 = vmax.f32 %v3658_v37, 0.0  ;;  %v8112_v41 = vpop.f32.mrb[152].mxu1 }
 0x3a8   : > { %v3874_v42 = vpack.c.bf16 %v3808_v31, %v3807_v38  ;;  %v4199_v43 = vadd.f32 %v8112_v41, %v9665_v13  ;;  %v4190_v44 = vpop.f32.mrb[153].mxu1 }
 0x3a9   : > { %v3873_v45 = vpack.c.bf16 %v3806_v40, %v3805_v6  ;;  %v4191_v46 = vadd.f32 %v9665_v13, %v4190_v44  ;;  %v8088_v47 = vpop.f32.mrb[240].mxu0  ;;  %v8113_v48 = vpop.f32.mrb[154].mxu1  ;;  %8250 = vmatprep.mubr.bf16.mxu0 %v4785_v61 }
 0x3aa   : > { %v3679_v49 = vadd.f32 %v9654_v5, %v8088_v47  ;;  %v4202_v50 = vadd.f32 %v8113_v48, %v9665_v13  ;;  %v3670_v59 = vpop.f32.mrb[241].mxu0  ;;  %v4193_v51 = vpop.f32.mrb[155].mxu1  ;;  %8251 = vmatmul.mubr.bf16.gmra.mrb[252].mxu0 %v4786_v39  ;;  %v4667_v54 = vmax.f32 %v4199_v43, 0.0 }
 0x3ab   : > { %v3671_v26 = vadd.f32 %v9654_v5, %v3670_v59  ;;  %v4194_v52 = vadd.f32 %v9665_v13, %v4193_v51  ;;  %v8089_v53 = vpop.f32.mrb[242].mxu0  ;;  %8218 = vmatprep.mubr.msk.bf16.mxu1 %vm1979_vm2, %v3873_v45  ;;  %v4665_v58 = vmax.f32 %v4191_v46, 0.0 }
 0x3ac   : > { %v4668_v55 = vmax.f32 %v4202_v50, 0.0  ;;  %v3682_v56 = vadd.f32 %v9654_v5, %v8089_v53  ;;  %v3673_v57 = vpop.f32.mrb[243].mxu0  ;;  %8219 = vmatmul.mubr.msk.bf16.gmra.mrb[4].mxu1 %vm1979_vm2, %v3874_v42  ;;  %v3811_v63 = vmax.f32 %v3679_v49, 0.0 }
 0x3ad   : > { %v4666_v60 = vmax.f32 %v4194_v52, 0.0  ;;  %v3674_v62 = vadd.f32 %v9654_v5, %v3673_v57  ;;  %v3809_v25 = vmax.f32 %v3671_v26, 0.0 }
 0x3ae   : > { %v4788_v0 = vpack.c.bf16 %v4668_v55, %v4667_v54  ;;  %v3812_v1 = vmax.f32 %v3682_v56, 0.0 }
 0x3af   : > { %v4787_v2 = vpack.c.bf16 %v4666_v60, %v4665_v58  ;;  %v3810_v3 = vmax.f32 %v3674_v62, 0.0  ;;  %v8116_v4 = vpop.f32.mrb[156].mxu1 }
 0x3b0   : > { %v3876_v7 = vpack.c.bf16 %v3812_v1, %v3811_v63  ;;  %v4215_v8 = vadd.f32 %v8116_v4, %v9665_v13  ;;  %v4206_v9 = vpop.f32.mrb[157].mxu1 }
 0x3b1   : > { %v3875_v10 = vpack.c.bf16 %v3810_v3, %v3809_v25  ;;  %v4207_v24 = vadd.f32 %v9665_v13, %v4206_v9  ;;  %v8117_v11 = vpop.f32.mrb[158].mxu1  ;;  %8254 = vmatprep.mubr.bf16.mxu0 %v4787_v2 }
 0x3b2   : > { %v4218_v12 = vadd.f32 %v8117_v11, %v9665_v13  ;;  %v4209_v14 = vpop.f32.mrb[159].mxu1  ;;  %8255 = vmatmul.mubr.bf16.gmra.mrb[0].mxu0 %v4788_v0  ;;  %v4671_v15 = vmax.f32 %v4215_v8, 0.0 }
 0x3b3   : > { %v4210_v5 = vadd.f32 %v9665_v13, %v4209_v14  ;;  %8222 = vmatprep.mubr.msk.bf16.mxu1 %vm1979_vm2, %v3875_v10  ;;  %v4669_v17 = vmax.f32 %v4207_v24, 0.0 }
 0x3b4   : > { %v4672_v16 = vmax.f32 %v4218_v12, 0.0  ;;  %8223 = vmatmul.mubr.msk.bf16.gmra.mrb[8].mxu1 %vm1979_vm2, %v3876_v7 }
 0x3b5   : > { %v4670_v18 = vmax.f32 %v4210_v5, 0.0 }
 0x3b6   : > { %v4790_v19 = vpack.c.bf16 %v4672_v16, %v4671_v15 }
 0x3b7   : > { %v4789_v20 = vpack.c.bf16 %v4670_v18, %v4669_v17  ;;  %v8120_v21 = vpop.f32.mrb[160].mxu1 }
 0x3b8   : > { %v4231_v22 = vadd.f32 %v8120_v21, %v9665_v13  ;;  %v4222_v34 = vpop.f32.mrb[161].mxu1 }
 0x3b9   : > { %v4223_v27 = vadd.f32 %v9665_v13, %v4222_v34  ;;  %v8121_v28 = vpop.f32.mrb[162].mxu1  ;;  %8258 = vmatprep.mubr.bf16.mxu0 %v4789_v20 }
 0x3ba   : > { %v4234_v29 = vadd.f32 %v8121_v28, %v9665_v13  ;;  %v4225_v23 = vpop.f32.mrb[163].mxu1  ;;  %8259 = vmatmul.mubr.bf16.gmra.mrb[4].mxu0 %v4790_v19  ;;  %v4675_v32 = vmax.f32 %v4231_v22, 0.0 }
 0x3bb   : > { %v4226_v30 = vadd.f32 %v9665_v13, %v4225_v23  ;;  %v4673_v35 = vmax.f32 %v4223_v27, 0.0 }
 0x3bc   : > { %v4676_v33 = vmax.f32 %v4234_v29, 0.0 }
 0x3bd   : > { %v4674_v36 = vmax.f32 %v4226_v30, 0.0 }
 0x3be   : > { %v4792_v37 = vpack.c.bf16 %v4676_v33, %v4675_v32 }
 0x3bf   : > { %v4791_v38 = vpack.c.bf16 %v4674_v36, %v4673_v35  ;;  %v8124_v39 = vpop.f32.mrb[164].mxu1 }
 0x3c0   : > { %v4247_v31 = vadd.f32 %v8124_v39, %v9665_v13  ;;  %v4238_v6 = vpop.f32.mrb[165].mxu1 }
 0x3c1   : > { %v4239_v61 = vadd.f32 %v9665_v13, %v4238_v6  ;;  %v8125_v40 = vpop.f32.mrb[166].mxu1  ;;  %8262 = vmatprep.mubr.bf16.mxu0 %v4791_v38 }
 0x3c2   : > { %v4250_v41 = vadd.f32 %v8125_v40, %v9665_v13  ;;  %v4241_v42 = vpop.f32.mrb[167].mxu1  ;;  %8263 = vmatmul.mubr.bf16.gmra.mrb[8].mxu0 %v4792_v37  ;;  %v4679_v44 = vmax.f32 %v4247_v31, 0.0 }
 0x3c3   : > { %v4242_v43 = vadd.f32 %v9665_v13, %v4241_v42  ;;  %v4677_v46 = vmax.f32 %v4239_v61, 0.0 }
 0x3c4   : > { %v4680_v45 = vmax.f32 %v4250_v41, 0.0 }
 0x3c5   : > { %v4678_v47 = vmax.f32 %v4242_v43, 0.0 }
 0x3c6   : > { %v4794_v48 = vpack.c.bf16 %v4680_v45, %v4679_v44 }
 0x3c7   : > { %v4793_v49 = vpack.c.bf16 %v4678_v47, %v4677_v46  ;;  %v8128_v50 = vpop.f32.mrb[168].mxu1 }
 0x3c8   : > { %v4263_v59 = vadd.f32 %v8128_v50, %v9665_v13  ;;  %v4254_v51 = vpop.f32.mrb[169].mxu1 }
 0x3c9   : > { %v4255_v26 = vadd.f32 %v9665_v13, %v4254_v51  ;;  %v8129_v52 = vpop.f32.mrb[170].mxu1  ;;  %8266 = vmatprep.mubr.bf16.mxu0 %v4793_v49 }
 0x3ca   : > { %v4266_v53 = vadd.f32 %v8129_v52, %v9665_v13  ;;  %v4257_v54 = vpop.f32.mrb[171].mxu1  ;;  %8267 = vmatmul.mubr.bf16.gmra.mrb[12].mxu0 %v4794_v48  ;;  %v4683_v56 = vmax.f32 %v4263_v59, 0.0 }
 0x3cb   : > { %v4258_v55 = vadd.f32 %v9665_v13, %v4257_v54  ;;  %v4681_v58 = vmax.f32 %v4255_v26, 0.0 }
 0x3cc   : > { %v4684_v57 = vmax.f32 %v4266_v53, 0.0 }
 0x3cd   : > { %v4682_v60 = vmax.f32 %v4258_v55, 0.0 }
 0x3ce   : > { %v4796_v62 = vpack.c.bf16 %v4684_v57, %v4683_v56 }
 0x3cf   : > { %v4795_v63 = vpack.c.bf16 %v4682_v60, %v4681_v58  ;;  %v8132_v0 = vpop.f32.mrb[172].mxu1 }
 0x3d0   : > { %v4279_v1 = vadd.f32 %v8132_v0, %v9665_v13  ;;  %v4270_v25 = vpop.f32.mrb[173].mxu1 }
 0x3d1   : > { %v4271_v2 = vadd.f32 %v9665_v13, %v4270_v25  ;;  %v8133_v3 = vpop.f32.mrb[174].mxu1  ;;  %8270 = vmatprep.mubr.bf16.mxu0 %v4795_v63 }
 0x3d2   : > { %v4282_v4 = vadd.f32 %v8133_v3, %v9665_v13  ;;  %v4273_v7 = vpop.f32.mrb[175].mxu1  ;;  %8271 = vmatmul.mubr.bf16.gmra.mrb[16].mxu0 %v4796_v62  ;;  %v4687_v9 = vmax.f32 %v4279_v1, 0.0 }
 0x3d3   : > { %v4274_v8 = vadd.f32 %v9665_v13, %v4273_v7  ;;  %v4685_v24 = vmax.f32 %v4271_v2, 0.0 }
 0x3d4   : > { %v4688_v10 = vmax.f32 %v4282_v4, 0.0 }
 0x3d5   : > { %v4686_v11 = vmax.f32 %v4274_v8, 0.0 }
 0x3d6   : > { %v4798_v12 = vpack.c.bf16 %v4688_v10, %v4687_v9 }
 0x3d7   : > { %v4797_v14 = vpack.c.bf16 %v4686_v11, %v4685_v24  ;;  %v8136_v5 = vpop.f32.mrb[176].mxu1 }
 0x3d8   : > { %v4295_v15 = vadd.f32 %v8136_v5, %v9665_v13  ;;  %v4286_v16 = vpop.f32.mrb[177].mxu1 }
 0x3d9   : > { %v4287_v17 = vadd.f32 %v9665_v13, %v4286_v16  ;;  %v8137_v18 = vpop.f32.mrb[178].mxu1  ;;  %8274 = vmatprep.mubr.bf16.mxu0 %v4797_v14 }
 0x3da   : > { %v4298_v19 = vadd.f32 %v8137_v18, %v9665_v13  ;;  %v4289_v20 = vpop.f32.mrb[179].mxu1  ;;  %8275 = vmatmul.mubr.bf16.gmra.mrb[20].mxu0 %v4798_v12  ;;  %v4691_v22 = vmax.f32 %v4295_v15, 0.0 }
 0x3db   : > { %v4290_v21 = vadd.f32 %v9665_v13, %v4289_v20  ;;  %v4689_v27 = vmax.f32 %v4287_v17, 0.0 }
 0x3dc   : > { %v4692_v34 = vmax.f32 %v4298_v19, 0.0 }
 0x3dd   : > { %v4690_v28 = vmax.f32 %v4290_v21, 0.0 }
 0x3de   : > { %v4800_v29 = vpack.c.bf16 %v4692_v34, %v4691_v22 }
 0x3df   : > { %v4799_v23 = vpack.c.bf16 %v4690_v28, %v4689_v27  ;;  %v8140_v30 = vpop.f32.mrb[180].mxu1 }
 0x3e0   : > { %v4311_v32 = vadd.f32 %v8140_v30, %v9665_v13  ;;  %v4302_v33 = vpop.f32.mrb[181].mxu1 }
 0x3e1   : > { %v4303_v35 = vadd.f32 %v9665_v13, %v4302_v33  ;;  %v8141_v36 = vpop.f32.mrb[182].mxu1  ;;  %8278 = vmatprep.mubr.bf16.mxu0 %v4799_v23 }
 0x3e2   : > { %v4314_v37 = vadd.f32 %v8141_v36, %v9665_v13  ;;  %v4305_v38 = vpop.f32.mrb[183].mxu1  ;;  %8279 = vmatmul.mubr.bf16.gmra.mrb[24].mxu0 %v4800_v29  ;;  %v4695_v31 = vmax.f32 %v4311_v32, 0.0 }
 0x3e3   : > { %v4306_v39 = vadd.f32 %v9665_v13, %v4305_v38  ;;  %v4693_v61 = vmax.f32 %v4303_v35, 0.0 }
 0x3e4   : > { %v4696_v6 = vmax.f32 %v4314_v37, 0.0 }
 0x3e5   : > { %v4694_v40 = vmax.f32 %v4306_v39, 0.0 }
 0x3e6   : > { %v4802_v41 = vpack.c.bf16 %v4696_v6, %v4695_v31 }
 0x3e7   : > { %v4801_v42 = vpack.c.bf16 %v4694_v40, %v4693_v61  ;;  %v8144_v43 = vpop.f32.mrb[184].mxu1 }
 0x3e8   : > { %v4327_v44 = vadd.f32 %v8144_v43, %v9665_v13  ;;  %v4318_v45 = vpop.f32.mrb[185].mxu1 }
 0x3e9   : > { %v4319_v46 = vadd.f32 %v9665_v13, %v4318_v45  ;;  %v8145_v47 = vpop.f32.mrb[186].mxu1  ;;  %8282 = vmatprep.mubr.bf16.mxu0 %v4801_v42 }
 0x3ea   : > { %v4330_v48 = vadd.f32 %v8145_v47, %v9665_v13  ;;  %v4321_v49 = vpop.f32.mrb[187].mxu1  ;;  %8283 = vmatmul.mubr.bf16.gmra.mrb[28].mxu0 %v4802_v41  ;;  %v4699_v59 = vmax.f32 %v4327_v44, 0.0 }
 0x3eb   : > { %v4322_v50 = vadd.f32 %v9665_v13, %v4321_v49  ;;  %v4697_v26 = vmax.f32 %v4319_v46, 0.0 }
 0x3ec   : > { %v4700_v51 = vmax.f32 %v4330_v48, 0.0 }
 0x3ed   : > { %v4698_v52 = vmax.f32 %v4322_v50, 0.0 }
 0x3ee   : > { %v4804_v53 = vpack.c.bf16 %v4700_v51, %v4699_v59 }
 0x3ef   : > { %v4803_v54 = vpack.c.bf16 %v4698_v52, %v4697_v26  ;;  %v8148_v55 = vpop.f32.mrb[188].mxu1 }
 0x3f0   : > { %v4343_v56 = vadd.f32 %v8148_v55, %v9665_v13  ;;  %v4334_v57 = vpop.f32.mrb[189].mxu1 }
 0x3f1   : > { %v4335_v58 = vadd.f32 %v9665_v13, %v4334_v57  ;;  %v8149_v60 = vpop.f32.mrb[190].mxu1  ;;  %8286 = vmatprep.mubr.bf16.mxu0 %v4803_v54 }
 0x3f2   : > { %v4346_v62 = vadd.f32 %v8149_v60, %v9665_v13  ;;  %v4337_v63 = vpop.f32.mrb[191].mxu1  ;;  %8287 = vmatmul.mubr.bf16.gmra.mrb[32].mxu0 %v4804_v53  ;;  %v4703_v1 = vmax.f32 %v4343_v56, 0.0 }
 0x3f3   : > { %v4338_v0 = vadd.f32 %v9665_v13, %v4337_v63  ;;  %v4701_v2 = vmax.f32 %v4335_v58, 0.0 }
 0x3f4   : > { %v4704_v25 = vmax.f32 %v4346_v62, 0.0 }
 0x3f5   : > { %v4702_v3 = vmax.f32 %v4338_v0, 0.0 }
 0x3f6   : > { %v4806_v4 = vpack.c.bf16 %v4704_v25, %v4703_v1 }
 0x3f7   : > { %v4805_v7 = vpack.c.bf16 %v4702_v3, %v4701_v2  ;;  %v8152_v8 = vpop.f32.mrb[192].mxu1 }
 0x3f8   : > { %v4359_v9 = vadd.f32 %v8152_v8, %v9665_v13  ;;  %v4350_v10 = vpop.f32.mrb[193].mxu1 }
 0x3f9   : > { %v4351_v24 = vadd.f32 %v9665_v13, %v4350_v10  ;;  %v8153_v11 = vpop.f32.mrb[194].mxu1  ;;  %8290 = vmatprep.mubr.bf16.mxu0 %v4805_v7 }
 0x3fa   : > { %v4362_v12 = vadd.f32 %v8153_v11, %v9665_v13  ;;  %v4353_v14 = vpop.f32.mrb[195].mxu1  ;;  %8291 = vmatmul.mubr.bf16.gmra.mrb[36].mxu0 %v4806_v4  ;;  %v4707_v15 = vmax.f32 %v4359_v9, 0.0 }
 0x3fb   : > { %v4354_v5 = vadd.f32 %v9665_v13, %v4353_v14  ;;  %v4705_v17 = vmax.f32 %v4351_v24, 0.0 }
 0x3fc   : > { %v4708_v16 = vmax.f32 %v4362_v12, 0.0 }
 0x3fd   : > { %v4706_v18 = vmax.f32 %v4354_v5, 0.0 }
 0x3fe   : > { %v4808_v19 = vpack.c.bf16 %v4708_v16, %v4707_v15 }
 0x3ff   : > { %v4807_v20 = vpack.c.bf16 %v4706_v18, %v4705_v17  ;;  %v8156_v21 = vpop.f32.mrb[196].mxu1 }
 0x400   : > { %v4375_v22 = vadd.f32 %v8156_v21, %v9665_v13  ;;  %v4366_v34 = vpop.f32.mrb[197].mxu1 }
 0x401   : > { %v4367_v27 = vadd.f32 %v9665_v13, %v4366_v34  ;;  %v8157_v28 = vpop.f32.mrb[198].mxu1  ;;  %8294 = vmatprep.mubr.bf16.mxu0 %v4807_v20 }
 0x402   : > { %v4378_v29 = vadd.f32 %v8157_v28, %v9665_v13  ;;  %v4369_v23 = vpop.f32.mrb[199].mxu1  ;;  %8295 = vmatmul.mubr.bf16.gmra.mrb[40].mxu0 %v4808_v19  ;;  %v4711_v32 = vmax.f32 %v4375_v22, 0.0 }
 0x403   : > { %v4370_v30 = vadd.f32 %v9665_v13, %v4369_v23  ;;  %v4709_v35 = vmax.f32 %v4367_v27, 0.0  ;;  %v8506_v23 = vld [vmem:[%s10404_s11 + $0x4] ss:$16 sps:$4 sm:$0xff]  }
 0x404   : > { %v4712_v33 = vmax.f32 %v4378_v29, 0.0  ;;  %v8504_v29 = vld [vmem:[%s10404_s11] ss:$16 sps:$4 sm:$0xff]   ;;  %6035 = vmatprep.subr.bf16.mxu1 %v8506_v23 }
 0x405   : > { %v4710_v36 = vmax.f32 %v4370_v30, 0.0  ;;  %6036 = vmatpush1.bf16.msra.mxu1 %v8504_v29 }
 0x406   : > { %v4810_v37 = vpack.c.bf16 %v4712_v33, %v4711_v32 }
 0x407   : > { %v4809_v38 = vpack.c.bf16 %v4710_v36, %v4709_v35  ;;  %v8160_v39 = vpop.f32.mrb[200].mxu1 }
 0x408   : > { %v4391_v31 = vadd.f32 %v8160_v39, %v9665_v13  ;;  %v4382_v6 = vpop.f32.mrb[201].mxu1 }
 0x409   : > { %v4383_v61 = vadd.f32 %v9665_v13, %v4382_v6  ;;  %v8161_v40 = vpop.f32.mrb[202].mxu1  ;;  %8298 = vmatprep.mubr.bf16.mxu0 %v4809_v38 }
 0x40a   : > { %v4394_v41 = vadd.f32 %v8161_v40, %v9665_v13  ;;  %v4385_v42 = vpop.f32.mrb[203].mxu1  ;;  %8299 = vmatmul.mubr.bf16.gmra.mrb[44].mxu0 %v4810_v37  ;;  %v4715_v44 = vmax.f32 %v4391_v31, 0.0 }
 0x40b   : > { %v4386_v43 = vadd.f32 %v9665_v13, %v4385_v42  ;;  %v4713_v46 = vmax.f32 %v4383_v61, 0.0 }
 0x40c   : > { %v4716_v45 = vmax.f32 %v4394_v41, 0.0 }
 0x40d   : > { %v4714_v47 = vmax.f32 %v4386_v43, 0.0 }
 0x40e   : > { %v4812_v48 = vpack.c.bf16 %v4716_v45, %v4715_v44 }
 0x40f   : > { %v4811_v49 = vpack.c.bf16 %v4714_v47, %v4713_v46  ;;  %v8164_v50 = vpop.f32.mrb[204].mxu1 }
 0x410   : > { %v4407_v59 = vadd.f32 %v8164_v50, %v9665_v13  ;;  %v4398_v51 = vpop.f32.mrb[205].mxu1 }
 0x411   : > { %v4399_v26 = vadd.f32 %v9665_v13, %v4398_v51  ;;  %v8165_v52 = vpop.f32.mrb[206].mxu1  ;;  %8302 = vmatprep.mubr.bf16.mxu0 %v4811_v49 }
 0x412   : > { %v4410_v53 = vadd.f32 %v8165_v52, %v9665_v13  ;;  %v4401_v54 = vpop.f32.mrb[207].mxu1  ;;  %8303 = vmatmul.mubr.bf16.gmra.mrb[48].mxu0 %v4812_v48  ;;  %v4719_v56 = vmax.f32 %v4407_v59, 0.0 }
 0x413   : > { %v4402_v55 = vadd.f32 %v9665_v13, %v4401_v54  ;;  %v4717_v58 = vmax.f32 %v4399_v26, 0.0 }
 0x414   : > { %v4720_v57 = vmax.f32 %v4410_v53, 0.0 }
 0x415   : > { %v4718_v60 = vmax.f32 %v4402_v55, 0.0 }
 0x416   : > { %v4814_v62 = vpack.c.bf16 %v4720_v57, %v4719_v56 }
 0x417   : > { %v4813_v63 = vpack.c.bf16 %v4718_v60, %v4717_v58  ;;  %v8168_v0 = vpop.f32.mrb[208].mxu1 }
 0x418   : > { %v4423_v1 = vadd.f32 %v8168_v0, %v9665_v13  ;;  %v4414_v25 = vpop.f32.mrb[209].mxu1 }
 0x419   : > { %v4415_v2 = vadd.f32 %v9665_v13, %v4414_v25  ;;  %v8169_v3 = vpop.f32.mrb[210].mxu1  ;;  %8306 = vmatprep.mubr.bf16.mxu0 %v4813_v63 }
 0x41a   : > { %v4426_v4 = vadd.f32 %v8169_v3, %v9665_v13  ;;  %v4417_v7 = vpop.f32.mrb[211].mxu1  ;;  %8307 = vmatmul.mubr.bf16.gmra.mrb[52].mxu0 %v4814_v62  ;;  %v4723_v9 = vmax.f32 %v4423_v1, 0.0 }
 0x41b   : > { %v4418_v8 = vadd.f32 %v9665_v13, %v4417_v7  ;;  %v4721_v24 = vmax.f32 %v4415_v2, 0.0 }
 0x41c   : > { %v4724_v10 = vmax.f32 %v4426_v4, 0.0 }
 0x41d   : > { %v4722_v11 = vmax.f32 %v4418_v8, 0.0 }
 0x41e   : > { %v4816_v12 = vpack.c.bf16 %v4724_v10, %v4723_v9 }
 0x41f   : > { %v4815_v14 = vpack.c.bf16 %v4722_v11, %v4721_v24  ;;  %v8172_v5 = vpop.f32.mrb[212].mxu1 }
 0x420   : > { %v4439_v15 = vadd.f32 %v8172_v5, %v9665_v13  ;;  %v4430_v16 = vpop.f32.mrb[213].mxu1 }
 0x421   : > { %v4431_v17 = vadd.f32 %v9665_v13, %v4430_v16  ;;  %v8173_v18 = vpop.f32.mrb[214].mxu1  ;;  %8310 = vmatprep.mubr.bf16.mxu0 %v4815_v14 }
 0x422   : > { %v4442_v19 = vadd.f32 %v8173_v18, %v9665_v13  ;;  %v4433_v20 = vpop.f32.mrb[215].mxu1  ;;  %8311 = vmatmul.mubr.bf16.gmra.mrb[56].mxu0 %v4816_v12  ;;  %v4727_v22 = vmax.f32 %v4439_v15, 0.0 }
 0x423   : > { %v4434_v21 = vadd.f32 %v9665_v13, %v4433_v20  ;;  %v4725_v27 = vmax.f32 %v4431_v17, 0.0 }
 0x424   : > { %v4728_v34 = vmax.f32 %v4442_v19, 0.0 }
 0x425   : > { %v4726_v28 = vmax.f32 %v4434_v21, 0.0 }
 0x426   : > { %v4818_v30 = vpack.c.bf16 %v4728_v34, %v4727_v22 }
 0x427   : > { %v4817_v32 = vpack.c.bf16 %v4726_v28, %v4725_v27  ;;  %v8176_v33 = vpop.f32.mrb[216].mxu1  ;;  %v8507_v27 = vld [vmem:[%s10404_s11 + $0x20] ss:$16 sps:$4 sm:$0xff]   ;;  %v8509_v28 = vld [vmem:[%s10404_s11 + $0x24] ss:$16 sps:$4 sm:$0xff]  }
 0x428   : > { %v4455_v35 = vadd.f32 %v8176_v33, %v9665_v13  ;;  %v4446_v36 = vpop.f32.mrb[217].mxu1  ;;  %6037 = vmatprep.subr.bf16.mxu1 %v8509_v28 }
 0x429   : > { %v4447_v37 = vadd.f32 %v9665_v13, %v4446_v36  ;;  %v8177_v38 = vpop.f32.mrb[218].mxu1  ;;  %8314 = vmatprep.mubr.bf16.mxu0 %v4817_v32  ;;  %6038 = vmatpush1.bf16.msra.mxu1 %v8507_v27 }
 0x42a   : > { %v4458_v39 = vadd.f32 %v8177_v38, %v9665_v13  ;;  %v4449_v31 = vpop.f32.mrb[219].mxu1  ;;  %8315 = vmatmul.mubr.bf16.gmra.mrb[60].mxu0 %v4818_v30  ;;  %v4731_v61 = vmax.f32 %v4455_v35, 0.0 }
 0x42b   : > { %v4450_v6 = vadd.f32 %v9665_v13, %v4449_v31  ;;  %v4729_v41 = vmax.f32 %v4447_v37, 0.0 }
 0x42c   : > { %v4732_v40 = vmax.f32 %v4458_v39, 0.0 }
 0x42d   : > { %v4730_v42 = vmax.f32 %v4450_v6, 0.0 }
 0x42e   : > { %v4820_v43 = vpack.c.bf16 %v4732_v40, %v4731_v61 }
 0x42f   : > { %v4819_v44 = vpack.c.bf16 %v4730_v42, %v4729_v41  ;;  %v8180_v45 = vpop.f32.mrb[220].mxu1 }
 0x430   : > { %v4471_v46 = vadd.f32 %v8180_v45, %v9665_v13  ;;  %v4462_v47 = vpop.f32.mrb[221].mxu1 }
 0x431   : > { %v4463_v48 = vadd.f32 %v9665_v13, %v4462_v47  ;;  %v8181_v49 = vpop.f32.mrb[222].mxu1  ;;  %8318 = vmatprep.mubr.bf16.mxu0 %v4819_v44 }
 0x432   : > { %v4474_v50 = vadd.f32 %v8181_v49, %v9665_v13  ;;  %v4465_v59 = vpop.f32.mrb[223].mxu1  ;;  %8319 = vmatmul.mubr.bf16.gmra.mrb[64].mxu0 %v4820_v43  ;;  %v4735_v26 = vmax.f32 %v4471_v46, 0.0 }
 0x433   : > { %v4466_v51 = vadd.f32 %v9665_v13, %v4465_v59  ;;  %v4733_v53 = vmax.f32 %v4463_v48, 0.0 }
 0x434   : > { %v4736_v52 = vmax.f32 %v4474_v50, 0.0 }
 0x435   : > { %v4734_v54 = vmax.f32 %v4466_v51, 0.0 }
 0x436   : > { %v4822_v55 = vpack.c.bf16 %v4736_v52, %v4735_v26 }
 0x437   : > { %v4821_v56 = vpack.c.bf16 %v4734_v54, %v4733_v53  ;;  %v8184_v57 = vpop.f32.mrb[224].mxu1 }
 0x438   : > { %v4487_v58 = vadd.f32 %v8184_v57, %v9665_v13  ;;  %v4478_v60 = vpop.f32.mrb[225].mxu1 }
 0x439   : > { %v4479_v62 = vadd.f32 %v9665_v13, %v4478_v60  ;;  %v8185_v63 = vpop.f32.mrb[226].mxu1  ;;  %8322 = vmatprep.mubr.bf16.mxu0 %v4821_v56 }
 0x43a   : > { %v4490_v0 = vadd.f32 %v8185_v63, %v9665_v13  ;;  %v4481_v1 = vpop.f32.mrb[227].mxu1  ;;  %8323 = vmatmul.mubr.bf16.gmra.mrb[68].mxu0 %v4822_v55  ;;  %v4739_v2 = vmax.f32 %v4487_v58, 0.0 }
 0x43b   : > { %v4482_v25 = vadd.f32 %v9665_v13, %v4481_v1  ;;  %v4737_v4 = vmax.f32 %v4479_v62, 0.0 }
 0x43c   : > { %v4740_v3 = vmax.f32 %v4490_v0, 0.0 }
 0x43d   : > { %v4738_v7 = vmax.f32 %v4482_v25, 0.0 }
 0x43e   : > { %v4824_v8 = vpack.c.bf16 %v4740_v3, %v4739_v2 }
 0x43f   : > { %v4823_v9 = vpack.c.bf16 %v4738_v7, %v4737_v4  ;;  %v8188_v10 = vpop.f32.mrb[228].mxu1 }
 0x440   : > { %v4503_v24 = vadd.f32 %v8188_v10, %v9665_v13  ;;  %v4494_v11 = vpop.f32.mrb[229].mxu1 }
 0x441   : > { %v4495_v12 = vadd.f32 %v9665_v13, %v4494_v11  ;;  %v8189_v14 = vpop.f32.mrb[230].mxu1  ;;  %8326 = vmatprep.mubr.bf16.mxu0 %v4823_v9 }
 0x442   : > { %v4506_v5 = vadd.f32 %v8189_v14, %v9665_v13  ;;  %v4497_v15 = vpop.f32.mrb[231].mxu1  ;;  %8327 = vmatmul.mubr.bf16.gmra.mrb[72].mxu0 %v4824_v8  ;;  %v4743_v17 = vmax.f32 %v4503_v24, 0.0 }
 0x443   : > { %v4498_v16 = vadd.f32 %v9665_v13, %v4497_v15  ;;  %v4741_v19 = vmax.f32 %v4495_v12, 0.0 }
 0x444   : > { %v4744_v18 = vmax.f32 %v4506_v5, 0.0 }
 0x445   : > { %v4742_v20 = vmax.f32 %v4498_v16, 0.0 }
 0x446   : > { %v4826_v21 = vpack.c.bf16 %v4744_v18, %v4743_v17 }
 0x447   : > { %v4825_v22 = vpack.c.bf16 %v4742_v20, %v4741_v19  ;;  %v8192_v34 = vpop.f32.mrb[232].mxu1  ;;  %v8510_v19 = vld [vmem:[%s10404_s11 + $0x40] ss:$16 sps:$4 sm:$0xff]   ;;  %v8512_v20 = vld [vmem:[%s10404_s11 + $0x44] ss:$16 sps:$4 sm:$0xff]  }
 0x448   : > { %v4519_v29 = vadd.f32 %v8192_v34, %v9665_v13  ;;  %v4510_v23 = vpop.f32.mrb[233].mxu1  ;;  %6039 = vmatprep.subr.bf16.mxu1 %v8512_v20 }
 0x449   : > { %v4511_v30 = vadd.f32 %v9665_v13, %v4510_v23  ;;  %v8193_v32 = vpop.f32.mrb[234].mxu1  ;;  %8330 = vmatprep.mubr.bf16.mxu0 %v4825_v22  ;;  %6040 = vmatpush1.bf16.msra.mxu1 %v8510_v19 }
 0x44a   : > { %v4522_v33 = vadd.f32 %v8193_v32, %v9665_v13  ;;  %v4513_v35 = vpop.f32.mrb[235].mxu1  ;;  %8331 = vmatmul.mubr.bf16.gmra.mrb[76].mxu0 %v4826_v21  ;;  %v4747_v37 = vmax.f32 %v4519_v29, 0.0  ;;  %v9822_v21 = vld [vmem:[%s10401_s8] ss:$0 sm:$0xff] }
 0x44b   : > { %v4514_v36 = vadd.f32 %v9665_v13, %v4513_v35  ;;  %v4745_v39 = vmax.f32 %v4511_v30, 0.0  ;;  %v9831_v30 = vld [vmem:[%s10403_s10] ss:$0 sm:$0xff] }
 0x44c   : > { %v4748_v38 = vmax.f32 %v4522_v33, 0.0 }
 0x44d   : > { %v4746_v31 = vmax.f32 %v4514_v36, 0.0 }
 0x44e   : > { %v4828_v6 = vpack.c.bf16 %v4748_v38, %v4747_v37 }
 0x44f   : > { %v4827_v61 = vpack.c.bf16 %v4746_v31, %v4745_v39  ;;  %v8196_v40 = vpop.f32.mrb[236].mxu1 }
 0x450   : > { %v4535_v41 = vadd.f32 %v8196_v40, %v9665_v13  ;;  %v4526_v42 = vpop.f32.mrb[237].mxu1 }
 0x451   : > { %v4527_v43 = vadd.f32 %v9665_v13, %v4526_v42  ;;  %v8197_v44 = vpop.f32.mrb[238].mxu1  ;;  %8334 = vmatprep.mubr.bf16.mxu0 %v4827_v61 }
 0x452   : > { %v4538_v45 = vadd.f32 %v8197_v44, %v9665_v13  ;;  %v4529_v46 = vpop.f32.mrb[239].mxu1  ;;  %8335 = vmatmul.mubr.bf16.gmra.mrb[80].mxu0 %v4828_v6  ;;  %v4751_v48 = vmax.f32 %v4535_v41, 0.0 }
 0x453   : > { %v4530_v47 = vadd.f32 %v9665_v13, %v4529_v46  ;;  %v4749_v50 = vmax.f32 %v4527_v43, 0.0 }
 0x454   : > { %v4752_v49 = vmax.f32 %v4538_v45, 0.0 }
 0x455   : > { %v4750_v59 = vmax.f32 %v4530_v47, 0.0 }
 0x456   : > { %v4830_v51 = vpack.c.bf16 %v4752_v49, %v4751_v48 }
 0x457   : > { %v4829_v26 = vpack.c.bf16 %v4750_v59, %v4749_v50  ;;  %v8200_v52 = vpop.f32.mrb[240].mxu1 }
 0x458   : > { %v4551_v53 = vadd.f32 %v8200_v52, %v9665_v13  ;;  %v4542_v54 = vpop.f32.mrb[241].mxu1 }
 0x459   : > { %v4543_v55 = vadd.f32 %v9665_v13, %v4542_v54  ;;  %v8201_v56 = vpop.f32.mrb[242].mxu1  ;;  %8338 = vmatprep.mubr.bf16.mxu0 %v4829_v26 }
 0x45a   : > { %v4554_v57 = vadd.f32 %v8201_v56, %v9665_v13  ;;  %v4545_v58 = vpop.f32.mrb[243].mxu1  ;;  %8339 = vmatmul.mubr.bf16.gmra.mrb[84].mxu0 %v4830_v51  ;;  %v4755_v62 = vmax.f32 %v4551_v53, 0.0 }
 0x45b   : > { %v4546_v60 = vadd.f32 %v9665_v13, %v4545_v58  ;;  %v4753_v0 = vmax.f32 %v4543_v55, 0.0 }
 0x45c   : > { %v4756_v63 = vmax.f32 %v4554_v57, 0.0 }
 0x45d   : > { %v4754_v1 = vmax.f32 %v4546_v60, 0.0 }
 0x45e   : > { %v4832_v25 = vpack.c.bf16 %v4756_v63, %v4755_v62 }
 0x45f   : > { %v4831_v2 = vpack.c.bf16 %v4754_v1, %v4753_v0  ;;  %v8204_v3 = vpop.f32.mrb[244].mxu1 }
 0x460   : > { %v4567_v4 = vadd.f32 %v8204_v3, %v9665_v13  ;;  %v4558_v7 = vpop.f32.mrb[245].mxu1 }
 0x461   : > { %v4559_v8 = vadd.f32 %v9665_v13, %v4558_v7  ;;  %v8205_v9 = vpop.f32.mrb[246].mxu1  ;;  %8342 = vmatprep.mubr.bf16.mxu0 %v4831_v2 }
 0x462   : > { %v4570_v10 = vadd.f32 %v8205_v9, %v9665_v13  ;;  %v4561_v24 = vpop.f32.mrb[247].mxu1  ;;  %8343 = vmatmul.mubr.bf16.gmra.mrb[88].mxu0 %v4832_v25  ;;  %v4759_v12 = vmax.f32 %v4567_v4, 0.0 }
 0x463   : > { %v4562_v11 = vadd.f32 %v9665_v13, %v4561_v24  ;;  %v4757_v5 = vmax.f32 %v4559_v8, 0.0 }
 0x464   : > { %v4760_v14 = vmax.f32 %v4570_v10, 0.0 }
 0x465   : > { %v4758_v15 = vmax.f32 %v4562_v11, 0.0 }
 0x466   : > { %v4834_v16 = vpack.c.bf16 %v4760_v14, %v4759_v12 }
 0x467   : > { %v4833_v17 = vpack.c.bf16 %v4758_v15, %v4757_v5  ;;  %v8208_v18 = vpop.f32.mrb[248].mxu1 }
 0x468   : > { %v4583_v13 = vadd.f32 %v9822_v21, %v8208_v18  ;;  %v4574_v22 = vpop.f32.mrb[249].mxu1 }
 0x469   : > { %v4575_v34 = vadd.f32 %v9822_v21, %v4574_v22  ;;  %v8209_v27 = vpop.f32.mrb[250].mxu1  ;;  %8346 = vmatprep.mubr.bf16.mxu0 %v4833_v17 }
 0x46a   : > { %v4586_v28 = vadd.f32 %v9822_v21, %v8209_v27  ;;  %v4577_v29 = vpop.f32.mrb[251].mxu1  ;;  %8347 = vmatmul.mubr.bf16.gmra.mrb[92].mxu0 %v4834_v16  ;;  %v4763_v32 = vmax.f32 %v4583_v13, 0.0 }
 0x46b   : > { %v4578_v23 = vadd.f32 %v9822_v21, %v4577_v29  ;;  %v4761_v35 = vmax.f32 %v4575_v34, 0.0 }
 0x46c   : > { %v4764_v33 = vmax.f32 %v4586_v28, 0.0 }
 0x46d   : > { %v4762_v36 = vmax.f32 %v4578_v23, 0.0  ;;  %v8244_v37 = vpop.f32.mrb[244].mxu0 }
 0x46e   : > { %v4836_v38 = vpack.c.bf16 %v4764_v33, %v4763_v32  ;;  %v4959_v39 = vadd.f32 %v8244_v37, %v9831_v30  ;;  %v4950_v31 = vpop.f32.mrb[245].mxu0 }
 0x46f   : > { %v4835_v6 = vpack.c.bf16 %v4762_v36, %v4761_v35  ;;  %v4951_v61 = vadd.f32 %v9831_v30, %v4950_v31  ;;  %v8212_v40 = vpop.f32.mrb[252].mxu1  ;;  %v8245_v41 = vpop.f32.mrb[246].mxu0 }
 0x470   : > { %v4599_v42 = vadd.f32 %v9822_v21, %v8212_v40  ;;  %v4962_v43 = vadd.f32 %v8245_v41, %v9831_v30  ;;  %v4590_v44 = vpop.f32.mrb[253].mxu1  ;;  %v4953_v45 = vpop.f32.mrb[247].mxu0  ;;  %v5463_v49 = vmax.f32 %v4959_v39, 0.0 }
 0x471   : > { %v4591_v46 = vadd.f32 %v9822_v21, %v4590_v44  ;;  %v4954_v47 = vadd.f32 %v9831_v30, %v4953_v45  ;;  %v8213_v48 = vpop.f32.mrb[254].mxu1  ;;  %8350 = vmatprep.mubr.bf16.mxu0 %v4835_v6  ;;  %v5461_v26 = vmax.f32 %v4951_v61, 0.0 }
 0x472   : > { %v5464_v50 = vmax.f32 %v4962_v43, 0.0  ;;  %v4602_v59 = vadd.f32 %v9822_v21, %v8213_v48  ;;  %v4593_v51 = vpop.f32.mrb[255].mxu1  ;;  %8351 = vmatmul.mubr.bf16.gmra.mrb[96].mxu0 %v4836_v38  ;;  %v4767_v54 = vmax.f32 %v4599_v42, 0.0 }
 0x473   : > { %v5462_v52 = vmax.f32 %v4954_v47, 0.0  ;;  %v4594_v53 = vadd.f32 %v9822_v21, %v4593_v51  ;;  %v4765_v57 = vmax.f32 %v4591_v46, 0.0 }
 0x474   : > { %v5590_v55 = vpack.c.bf16 %v5464_v50, %v5463_v49  ;;  %v4768_v56 = vmax.f32 %v4602_v59, 0.0 }
 0x475   : > { %v5589_v58 = vpack.c.bf16 %v5462_v52, %v5461_v26  ;;  %v4766_v60 = vmax.f32 %v4594_v53, 0.0  ;;  %v8248_v62 = vpop.f32.mrb[248].mxu0 }
 0x476   : > { %v4838_v63 = vpack.c.bf16 %v4768_v56, %v4767_v54  ;;  %v4975_v0 = vadd.f32 %v8248_v62, %v9831_v30  ;;  %v4966_v1 = vpop.f32.mrb[249].mxu0 }
 0x477   : > { %v5653_v25 = vmax.bf16 %v5590_v55, %v5589_v58  ;;  %v4837_v2 = vpack.c.bf16 %v4766_v60, %v4765_v57  ;;  %v4967_v3 = vadd.f32 %v9831_v30, %v4966_v1  ;;  %v8216_v4 = vpop.f32.mrb[0].mxu1  ;;  %v8249_v7 = vpop.f32.mrb[250].mxu0 }
 0x478   : > { %v4615_v8 = vadd.f32 %v9822_v21, %v8216_v4  ;;  %v4978_v9 = vadd.f32 %v8249_v7, %v9831_v30  ;;  %v4606_v10 = vpop.f32.mrb[1].mxu1  ;;  %v4969_v24 = vpop.f32.mrb[251].mxu0  ;;  %v5467_v5 = vmax.f32 %v4975_v0, 0.0  ;;  %v8515_v4 = vld [vmem:[%s10404_s11 + $0x64] ss:$16 sps:$4 sm:$0xff]  }
 0x479   : > { %v4607_v11 = vadd.f32 %v9822_v21, %v4606_v10  ;;  %v4970_v12 = vadd.f32 %v9831_v30, %v4969_v24  ;;  %v8217_v14 = vpop.f32.mrb[2].mxu1  ;;  %8354 = vmatprep.mubr.bf16.mxu0 %v4837_v2  ;;  %v5465_v18 = vmax.f32 %v4967_v3, 0.0  ;;  %v8513_v3 = vld [vmem:[%s10404_s11 + $0x60] ss:$16 sps:$4 sm:$0xff]   ;;  %6041 = vmatprep.subr.bf16.mxu1 %v8515_v4 }
 0x47a   : > { %v5468_v15 = vmax.f32 %v4978_v9, 0.0  ;;  %v4618_v16 = vadd.f32 %v9822_v21, %v8217_v14  ;;  %v4609_v17 = vpop.f32.mrb[3].mxu1  ;;  %8355 = vmatmul.mubr.bf16.gmra.mrb[100].mxu0 %v4838_v63  ;;  %v4771_v13 = vmax.f32 %v4615_v8, 0.0  ;;  %6042 = vmatpush1.bf16.msra.mxu1 %v8513_v3 }
 0x47b   : > { %v5466_v19 = vmax.f32 %v4970_v12, 0.0  ;;  %v4610_v20 = vadd.f32 %v9822_v21, %v4609_v17  ;;  %v4769_v27 = vmax.f32 %v4607_v11, 0.0 }
 0x47c   : > { %v5592_v22 = vpack.c.bf16 %v5468_v15, %v5467_v5  ;;  %v4772_v34 = vmax.f32 %v4618_v16, 0.0 }
 0x47d   : > { %v5591_v28 = vpack.c.bf16 %v5466_v19, %v5465_v18  ;;  %v4770_v29 = vmax.f32 %v4610_v20, 0.0  ;;  %v8252_v23 = vpop.f32.mrb[252].mxu0 }
 0x47e   : > { %v4840_v32 = vpack.c.bf16 %v4772_v34, %v4771_v13  ;;  %v4991_v33 = vadd.f32 %v8252_v23, %v9831_v30  ;;  %v4982_v35 = vpop.f32.mrb[253].mxu0 }
 0x47f   : > { %v5654_v36 = vmax.bf16 %v5653_v25, %v5591_v28  ;;  %v4839_v37 = vpack.c.bf16 %v4770_v29, %v4769_v27  ;;  %v4983_v38 = vadd.f32 %v9831_v30, %v4982_v35  ;;  %v8220_v39 = vpop.f32.mrb[4].mxu1  ;;  %v8253_v31 = vpop.f32.mrb[254].mxu0 }
 0x480   : > { %v4631_v6 = vadd.f32 %v9822_v21, %v8220_v39  ;;  %v4994_v61 = vadd.f32 %v8253_v31, %v9831_v30  ;;  %v4622_v40 = vpop.f32.mrb[5].mxu1  ;;  %v4985_v41 = vpop.f32.mrb[255].mxu0  ;;  %v5471_v46 = vmax.f32 %v4991_v33, 0.0 }
 0x481   : > { %v4623_v42 = vadd.f32 %v9822_v21, %v4622_v40  ;;  %v4986_v43 = vadd.f32 %v9831_v30, %v4985_v41  ;;  %v5655_v44 = vmax.bf16 %v5654_v36, %v5592_v22  ;;  %v8221_v45 = vpop.f32.mrb[6].mxu1  ;;  %8358 = vmatprep.mubr.bf16.mxu0 %v4839_v37  ;;  %v5469_v50 = vmax.f32 %v4983_v38, 0.0 }
 0x482   : > { %v5472_v47 = vmax.f32 %v4994_v61, 0.0  ;;  %v4634_v48 = vadd.f32 %v9822_v21, %v8221_v45  ;;  %v4625_v49 = vpop.f32.mrb[7].mxu1  ;;  %8359 = vmatmul.mubr.bf16.gmra.mrb[104].mxu0 %v4840_v32  ;;  %v4775_v26 = vmax.f32 %v4631_v6, 0.0 }
 0x483   : > { %v5470_v59 = vmax.f32 %v4986_v43, 0.0  ;;  %v4626_v51 = vadd.f32 %v9822_v21, %v4625_v49  ;;  %v4773_v54 = vmax.f32 %v4623_v42, 0.0 }
 0x484   : > { %v5594_v52 = vpack.c.bf16 %v5472_v47, %v5471_v46  ;;  %v4776_v53 = vmax.f32 %v4634_v48, 0.0 }
 0x485   : > { %v5593_v55 = vpack.c.bf16 %v5470_v59, %v5469_v50  ;;  %v4774_v56 = vmax.f32 %v4626_v51, 0.0  ;;  %v8256_v57 = vpop.f32.mrb[0].mxu0 }
 0x486   : > { %v4842_v58 = vpack.c.bf16 %v4776_v53, %v4775_v26  ;;  %v5007_v60 = vadd.f32 %v8256_v57, %v9831_v30  ;;  %v4998_v62 = vpop.f32.mrb[1].mxu0 }
 0x487   : > { %v5656_v63 = vmax.bf16 %v5655_v44, %v5593_v55  ;;  %v4841_v0 = vpack.c.bf16 %v4774_v56, %v4773_v54  ;;  %v4999_v1 = vadd.f32 %v9831_v30, %v4998_v62  ;;  %v8224_v25 = vpop.f32.mrb[8].mxu1  ;;  %v8257_v2 = vpop.f32.mrb[2].mxu0 }
 0x488   : > { %v4647_v7 = vadd.f32 %v9822_v21, %v8224_v25  ;;  %v5010_v8 = vadd.f32 %v8257_v2, %v9831_v30  ;;  %v4638_v9 = vpop.f32.mrb[9].mxu1  ;;  %v5001_v10 = vpop.f32.mrb[3].mxu0  ;;  %v5475_v5 = vmax.f32 %v5007_v60, 0.0 }
 0x489   : > { %v4639_v24 = vadd.f32 %v9822_v21, %v4638_v9  ;;  %v5002_v11 = vadd.f32 %v9831_v30, %v5001_v10  ;;  %v5657_v12 = vmax.bf16 %v5656_v63, %v5594_v52  ;;  %v8225_v14 = vpop.f32.mrb[10].mxu1  ;;  %8362 = vmatprep.mubr.bf16.mxu0 %v4841_v0  ;;  %v5473_v18 = vmax.f32 %v4999_v1, 0.0 }
 0x48a   : > { %v5476_v15 = vmax.f32 %v5010_v8, 0.0  ;;  %v4650_v16 = vadd.f32 %v9822_v21, %v8225_v14  ;;  %v4641_v17 = vpop.f32.mrb[11].mxu1  ;;  %8363 = vmatmul.mubr.bf16.gmra.mrb[108].mxu0 %v4842_v58  ;;  %v4779_v13 = vmax.f32 %v4647_v7, 0.0 }
 0x48b   : > { %v5474_v19 = vmax.f32 %v5002_v11, 0.0  ;;  %v4642_v20 = vadd.f32 %v9822_v21, %v4641_v17  ;;  %v4777_v27 = vmax.f32 %v4639_v24, 0.0 }
 0x48c   : > { %v5596_v22 = vpack.c.bf16 %v5476_v15, %v5475_v5  ;;  %v4780_v34 = vmax.f32 %v4650_v16, 0.0 }
 0x48d   : > { %v5595_v28 = vpack.c.bf16 %v5474_v19, %v5473_v18  ;;  %v4778_v29 = vmax.f32 %v4642_v20, 0.0  ;;  %v8260_v23 = vpop.f32.mrb[4].mxu0 }
 0x48e   : > { %v4844_v32 = vpack.c.bf16 %v4780_v34, %v4779_v13  ;;  %v5023_v33 = vadd.f32 %v8260_v23, %v9831_v30  ;;  %v5014_v35 = vpop.f32.mrb[5].mxu0  ;;  %v8518_v34 = vld [vmem:[%s10404_s11 + $0x84] ss:$16 sps:$4 sm:$0xff]  }
 0x48f   : > { %v5658_v36 = vmax.bf16 %v5657_v12, %v5595_v28  ;;  %v4843_v37 = vpack.c.bf16 %v4778_v29, %v4777_v27  ;;  %v5015_v38 = vadd.f32 %v9831_v30, %v5014_v35  ;;  %v8261_v39 = vpop.f32.mrb[6].mxu0  ;;  %6043 = vmatprep.subr.bf16.mxu1 %v8518_v34 }
 0x490   : > { %v5026_v31 = vadd.f32 %v8261_v39, %v9831_v30  ;;  %v5017_v6 = vpop.f32.mrb[7].mxu0  ;;  %v5479_v40 = vmax.f32 %v5023_v33, 0.0 }
 0x491   : > { %v5659_v21 = vmax.bf16 %v5658_v36, %v5596_v22  ;;  %v5018_v61 = vadd.f32 %v9831_v30, %v5017_v6  ;;  %8366 = vmatprep.mubr.bf16.mxu0 %v4843_v37  ;;  %v5477_v42 = vmax.f32 %v5015_v38, 0.0  ;;  %v8516_v22 = vld [vmem:[%s10404_s11 + $0x80] ss:$16 sps:$4 sm:$0xff]  }
 0x492   : > { %v5480_v41 = vmax.f32 %v5026_v31, 0.0  ;;  %8367 = vmatmul.mubr.bf16.gmra.mrb[112].mxu0 %v4844_v32  ;;  %6044 = vmatpush1.bf16.msra.mxu1 %v8516_v22 }
 0x493   : > { %v5478_v43 = vmax.f32 %v5018_v61, 0.0  ;;  %v5660_v4 = vunpack.i.l.bf16 %v5659_v21  ;;  %v5661_v7 = vunpack.i.h.bf16 %v5659_v21 }
 0x494   : > { %v5598_v44 = vpack.c.bf16 %v5480_v41, %v5479_v40 }
 0x495   : > { %v5597_v45 = vpack.c.bf16 %v5478_v43, %v5477_v42  ;;  %v8264_v46 = vpop.f32.mrb[8].mxu0  ;;  %v5662_v5 = vmax.f32 %v5660_v4, %v5661_v7 }
 0x496   : > { %v5039_v47 = vadd.f32 %v8264_v46, %v9831_v30  ;;  %v5030_v48 = vpop.f32.mrb[9].mxu0 }
 0x497   : > { %v5670_v49 = vmax.bf16 %v5598_v44, %v5597_v45  ;;  %v5031_v50 = vadd.f32 %v9831_v30, %v5030_v48  ;;  %v8265_v59 = vpop.f32.mrb[10].mxu0  ;;  %v5663_v29 = vrot.slane %v5662_v5, 4 }
 0x498   : > { %v5042_v51 = vadd.f32 %v8265_v59, %v9831_v30  ;;  %v5033_v26 = vpop.f32.mrb[11].mxu0  ;;  %v5483_v53 = vmax.f32 %v5039_v47, 0.0 }
 0x499   : > { %v5034_v52 = vadd.f32 %v9831_v30, %v5033_v26  ;;  %v5481_v55 = vmax.f32 %v5031_v50, 0.0  ;;  %v5664_v39 = vmax.f32 %v5662_v5, %v5663_v29 }
 0x49a   : > { %v5484_v54 = vmax.f32 %v5042_v51, 0.0 }
 0x49b   : > { %v5482_v56 = vmax.f32 %v5034_v52, 0.0  ;;  %v5665_v45 = vrot.slane %v5664_v39, 2 }
 0x49c   : > { %v5600_v57 = vpack.c.bf16 %v5484_v54, %v5483_v53 }
 0x49d   : > { %v5599_v58 = vpack.c.bf16 %v5482_v56, %v5481_v55  ;;  %v8268_v60 = vpop.f32.mrb[12].mxu0  ;;  %v5666_v53 = vmax.f32 %v5664_v39, %v5665_v45  ;;  %v8519_v45 = vld [vmem:[%s10404_s11 + $0xa0] ss:$16 sps:$4 sm:$0xff]  }
 0x49e   : > { %v5055_v62 = vadd.f32 %v8268_v60, %v9831_v30  ;;  %v5046_v63 = vpop.f32.mrb[13].mxu0 }
 0x49f   : > { %v5671_v0 = vmax.bf16 %v5670_v49, %v5599_v58  ;;  %v5047_v1 = vadd.f32 %v9831_v30, %v5046_v63  ;;  %v8269_v25 = vpop.f32.mrb[14].mxu0 }
 0x4a0   : > { %v5058_v2 = vadd.f32 %v8269_v25, %v9831_v30  ;;  %v5049_v3 = vpop.f32.mrb[15].mxu0  ;;  %v5487_v10 = vmax.f32 %v5055_v62, 0.0 }
 0x4a1   : > { %v5050_v8 = vadd.f32 %v9831_v30, %v5049_v3  ;;  %v5672_v9 = vmax.bf16 %v5671_v0, %v5600_v57  ;;  %v5485_v11 = vmax.f32 %v5047_v1, 0.0 }
 0x4a2   : > { %v5488_v24 = vmax.f32 %v5058_v2, 0.0  ;;  %v5667_v2 = vrot.slane %v5666_v53, 1 }
 0x4a3   : > { %v5486_v12 = vmax.f32 %v5050_v8, 0.0 }
 0x4a4   : > { %v5602_v14 = vpack.c.bf16 %v5488_v24, %v5487_v10 }
 0x4a5   : > { %v5601_v15 = vpack.c.bf16 %v5486_v12, %v5485_v11  ;;  %v8272_v16 = vpop.f32.mrb[16].mxu0  ;;  %v5668_v12 = vmax.f32 %v5666_v53, %v5667_v2 }
 0x4a6   : > { %v5071_v17 = vadd.f32 %v8272_v16, %v9831_v30  ;;  %v5062_v18 = vpop.f32.mrb[17].mxu0 }
 0x4a7   : > { %v5673_v19 = vmax.bf16 %v5672_v9, %v5601_v15  ;;  %v5063_v20 = vadd.f32 %v9831_v30, %v5062_v18  ;;  %v8273_v13 = vpop.f32.mrb[18].mxu0 }
 0x4a8   : > { %v5074_v27 = vadd.f32 %v8273_v13, %v9831_v30  ;;  %v5065_v28 = vpop.f32.mrb[19].mxu0  ;;  %v5491_v33 = vmax.f32 %v5071_v17, 0.0 }
 0x4a9   : > { %v5066_v23 = vadd.f32 %v9831_v30, %v5065_v28  ;;  %v5674_v32 = vmax.bf16 %v5673_v19, %v5602_v14  ;;  %v5489_v36 = vmax.f32 %v5063_v20, 0.0 }
 0x4aa   : > { %v5492_v35 = vmax.f32 %v5074_v27, 0.0  ;;  %v5669_v27 = vpack.i.bf16 %v5668_v12, %v5668_v12 }
 0x4ab   : > { %v5490_v37 = vmax.f32 %v5066_v23, 0.0 }
 0x4ac   : > { %v5604_v38 = vpack.c.bf16 %v5492_v35, %v5491_v33  ;;  %v5851_v39 = vunpack.c.l.b16 %v5669_v27 }
 0x4ad   : > { %v5603_v31 = vpack.c.bf16 %v5490_v37, %v5489_v36  ;;  %v8276_v6 = vpop.f32.mrb[20].mxu0 }
 0x4ae   : > { %v5087_v21 = vadd.f32 %v8276_v6, %v9831_v30  ;;  %v5078_v61 = vpop.f32.mrb[21].mxu0 }
 0x4af   : > { %v5675_v40 = vmax.bf16 %v5674_v32, %v5603_v31  ;;  %v5079_v41 = vadd.f32 %v9831_v30, %v5078_v61  ;;  %v8277_v42 = vpop.f32.mrb[22].mxu0 }
 0x4b0   : > { %v5090_v43 = vadd.f32 %v8277_v42, %v9831_v30  ;;  %v5081_v44 = vpop.f32.mrb[23].mxu0  ;;  %v5495_v48 = vmax.f32 %v5087_v21, 0.0 }
 0x4b1   : > { %v5676_v46 = vmax.bf16 %v5675_v40, %v5604_v38  ;;  %v5082_v47 = vadd.f32 %v9831_v30, %v5081_v44  ;;  %v5493_v51 = vmax.f32 %v5079_v41, 0.0 }
 0x4b2   : > { %v5496_v49 = vmax.f32 %v5090_v43, 0.0 }
 0x4b3   : > { %v5677_v50 = vunpack.i.l.bf16 %v5676_v46  ;;  %v5678_v59 = vunpack.i.h.bf16 %v5676_v46  ;;  %v5494_v26 = vmax.f32 %v5082_v47, 0.0  ;;  %v8521_v46 = vld [vmem:[%s10404_s11 + $0xa4] ss:$16 sps:$4 sm:$0xff]  }
 0x4b4   : > { %v5606_v52 = vpack.c.bf16 %v5496_v49, %v5495_v48  ;;  %6045 = vmatprep.subr.bf16.mxu1 %v8521_v46 }
 0x4b5   : > { %v5679_v54 = vmax.f32 %v5677_v50, %v5678_v59  ;;  %v5605_v55 = vpack.c.bf16 %v5494_v26, %v5493_v51  ;;  %v8280_v56 = vpop.f32.mrb[24].mxu0  ;;  %6046 = vmatpush1.bf16.msra.mxu1 %v8519_v45 }
 0x4b6   : > { %v5103_v57 = vadd.f32 %v8280_v56, %v9831_v30  ;;  %v5094_v58 = vpop.f32.mrb[25].mxu0 }
 0x4b7   : > { %v5680_v60 = vrot.slane %v5679_v54, 4  ;;  %v5687_v62 = vmax.bf16 %v5606_v52, %v5605_v55  ;;  %v5095_v63 = vadd.f32 %v9831_v30, %v5094_v58  ;;  %v8281_v0 = vpop.f32.mrb[26].mxu0 }
 0x4b8   : > { %v5106_v1 = vadd.f32 %v8281_v0, %v9831_v30  ;;  %v5097_v25 = vpop.f32.mrb[27].mxu0  ;;  %v5499_v7 = vmax.f32 %v5103_v57, 0.0 }
 0x4b9   : > { %v5681_v3 = vmax.f32 %v5679_v54, %v5680_v60  ;;  %v5098_v4 = vadd.f32 %v9831_v30, %v5097_v25  ;;  %v5497_v10 = vmax.f32 %v5095_v63, 0.0 }
 0x4ba   : > { %v5500_v8 = vmax.f32 %v5106_v1, 0.0 }
 0x4bb   : > { %v5682_v9 = vrot.slane %v5681_v3, 2  ;;  %v5498_v24 = vmax.f32 %v5098_v4, 0.0 }
 0x4bc   : > { %v5608_v11 = vpack.c.bf16 %v5500_v8, %v5499_v7 }
 0x4bd   : > { %v5683_v14 = vmax.f32 %v5681_v3, %v5682_v9  ;;  %v5607_v5 = vpack.c.bf16 %v5498_v24, %v5497_v10  ;;  %v8284_v15 = vpop.f32.mrb[28].mxu0 }
 0x4be   : > { %v5119_v16 = vadd.f32 %v8284_v15, %v9831_v30  ;;  %v5110_v17 = vpop.f32.mrb[29].mxu0 }
 0x4bf   : > { %v5684_v18 = vrot.slane %v5683_v14, 1  ;;  %v5688_v19 = vmax.bf16 %v5687_v62, %v5607_v5  ;;  %v5111_v20 = vadd.f32 %v9831_v30, %v5110_v17  ;;  %v8285_v13 = vpop.f32.mrb[30].mxu0 }
 0x4c0   : > { %v5122_v22 = vadd.f32 %v8285_v13, %v9831_v30  ;;  %v5113_v34 = vpop.f32.mrb[31].mxu0  ;;  %v5503_v32 = vmax.f32 %v5119_v16, 0.0 }
 0x4c1   : > { %v5685_v28 = vmax.f32 %v5683_v14, %v5684_v18  ;;  %v5114_v29 = vadd.f32 %v9831_v30, %v5113_v34  ;;  %v5689_v23 = vmax.bf16 %v5688_v19, %v5608_v11  ;;  %v5501_v36 = vmax.f32 %v5111_v20, 0.0 }
 0x4c2   : > { %v5504_v33 = vmax.f32 %v5122_v22, 0.0 }
 0x4c3   : > { %v5686_v35 = vpack.i.bf16 %v5685_v28, %v5685_v28  ;;  %v5502_v37 = vmax.f32 %v5114_v29, 0.0 }
 0x4c4   : > { %v5610_v38 = vpack.c.bf16 %v5504_v33, %v5503_v32 }
 0x4c5   : > { %v5852_v31 = vunpack.c.l.b16 %v5686_v35  ;;  %v5609_v6 = vpack.c.bf16 %v5502_v37, %v5501_v36  ;;  %v8288_v21 = vpop.f32.mrb[32].mxu0 }
 0x4c6   : > { %v5135_v61 = vadd.f32 %v8288_v21, %v9831_v30  ;;  %v5126_v40 = vpop.f32.mrb[33].mxu0 }
 0x4c7   : > { %v9906_v41 = vsel %vm5859_vm3, %v5852_v31, %v5851_v39  ;;  %v5690_v42 = vmax.bf16 %v5689_v23, %v5609_v6  ;;  %v5127_v43 = vadd.f32 %v9831_v30, %v5126_v40  ;;  %v8289_v44 = vpop.f32.mrb[34].mxu0 }
 0x4c8   : > { %v5138_v47 = vadd.f32 %v8289_v44, %v9831_v30  ;;  %v5129_v48 = vpop.f32.mrb[35].mxu0  ;;  %v5507_v59 = vmax.f32 %v5135_v61, 0.0 }
 0x4c9   : > { %v5130_v49 = vadd.f32 %v9831_v30, %v5129_v48  ;;  %v5691_v50 = vmax.bf16 %v5690_v42, %v5610_v38  ;;  %v5505_v26 = vmax.f32 %v5127_v43, 0.0 }
 0x4ca   : > { %v5508_v51 = vmax.f32 %v5138_v47, 0.0 }
 0x4cb   : > { %v5506_v52 = vmax.f32 %v5130_v49, 0.0 }
 0x4cc   : > { %v5612_v53 = vpack.c.bf16 %v5508_v51, %v5507_v59 }
 0x4cd   : > { %v5611_v54 = vpack.c.bf16 %v5506_v52, %v5505_v26  ;;  %v8292_v55 = vpop.f32.mrb[36].mxu0 }
 0x4ce   : > { %v5151_v56 = vadd.f32 %v8292_v55, %v9831_v30  ;;  %v5142_v57 = vpop.f32.mrb[37].mxu0 }
 0x4cf   : > { %v5692_v58 = vmax.bf16 %v5691_v50, %v5611_v54  ;;  %v5143_v60 = vadd.f32 %v9831_v30, %v5142_v57  ;;  %v8293_v62 = vpop.f32.mrb[38].mxu0 }
 0x4d0   : > { %v5154_v63 = vadd.f32 %v8293_v62, %v9831_v30  ;;  %v5145_v0 = vpop.f32.mrb[39].mxu0  ;;  %v5511_v2 = vmax.f32 %v5151_v56, 0.0 }
 0x4d1   : > { %v5693_v1 = vmax.bf16 %v5692_v58, %v5612_v53  ;;  %v5146_v25 = vadd.f32 %v9831_v30, %v5145_v0  ;;  %v5509_v8 = vmax.f32 %v5143_v60, 0.0  ;;  %v8522_v58 = vld [vmem:[%s10404_s11 + $0xc0] ss:$16 sps:$4 sm:$0xff]   ;;  %v8524_v60 = vld [vmem:[%s10404_s11 + $0xc4] ss:$16 sps:$4 sm:$0xff]  }
 0x4d2   : > { %v5512_v3 = vmax.f32 %v5154_v63, 0.0  ;;  %6047 = vmatprep.subr.bf16.mxu1 %v8524_v60 }
 0x4d3   : > { %v5694_v4 = vunpack.i.l.bf16 %v5693_v1  ;;  %v5695_v7 = vunpack.i.h.bf16 %v5693_v1  ;;  %v5510_v9 = vmax.f32 %v5146_v25, 0.0  ;;  %6048 = vmatpush1.bf16.msra.mxu1 %v8522_v58 }
 0x4d4   : > { %v5614_v10 = vpack.c.bf16 %v5512_v3, %v5511_v2 }
 0x4d5   : > { %v5696_v24 = vmax.f32 %v5694_v4, %v5695_v7  ;;  %v5613_v11 = vpack.c.bf16 %v5510_v9, %v5509_v8  ;;  %v8296_v12 = vpop.f32.mrb[40].mxu0 }
 0x4d6   : > { %v5167_v14 = vadd.f32 %v8296_v12, %v9831_v30  ;;  %v5158_v5 = vpop.f32.mrb[41].mxu0 }
 0x4d7   : > { %v5697_v15 = vrot.slane %v5696_v24, 4  ;;  %v5704_v16 = vmax.bf16 %v5614_v10, %v5613_v11  ;;  %v5159_v17 = vadd.f32 %v9831_v30, %v5158_v5  ;;  %v8297_v18 = vpop.f32.mrb[42].mxu0 }
 0x4d8   : > { %v5170_v19 = vadd.f32 %v8297_v18, %v9831_v30  ;;  %v5161_v20 = vpop.f32.mrb[43].mxu0  ;;  %v5515_v34 = vmax.f32 %v5167_v14, 0.0 }
 0x4d9   : > { %v5698_v13 = vmax.f32 %v5696_v24, %v5697_v15  ;;  %v5162_v22 = vadd.f32 %v9831_v30, %v5161_v20  ;;  %v5513_v29 = vmax.f32 %v5159_v17, 0.0 }
 0x4da   : > { %v5516_v27 = vmax.f32 %v5170_v19, 0.0 }
 0x4db   : > { %v5699_v28 = vrot.slane %v5698_v13, 2  ;;  %v5514_v23 = vmax.f32 %v5162_v22, 0.0 }
 0x4dc   : > { %v5616_v32 = vpack.c.bf16 %v5516_v27, %v5515_v34 }
 0x4dd   : > { %v5700_v33 = vmax.f32 %v5698_v13, %v5699_v28  ;;  %v5615_v35 = vpack.c.bf16 %v5514_v23, %v5513_v29  ;;  %v8300_v36 = vpop.f32.mrb[44].mxu0 }
 0x4de   : > { %v5183_v37 = vadd.f32 %v8300_v36, %v9831_v30  ;;  %v5174_v38 = vpop.f32.mrb[45].mxu0 }
 0x4df   : > { %v5701_v39 = vrot.slane %v5700_v33, 1  ;;  %v5705_v31 = vmax.bf16 %v5704_v16, %v5615_v35  ;;  %v5175_v6 = vadd.f32 %v9831_v30, %v5174_v38  ;;  %v8301_v21 = vpop.f32.mrb[46].mxu0 }
 0x4e0   : > { %v5186_v61 = vadd.f32 %v8301_v21, %v9831_v30  ;;  %v5177_v40 = vpop.f32.mrb[47].mxu0  ;;  %v5519_v45 = vmax.f32 %v5183_v37, 0.0 }
 0x4e1   : > { %v5702_v42 = vmax.f32 %v5700_v33, %v5701_v39  ;;  %v5178_v43 = vadd.f32 %v9831_v30, %v5177_v40  ;;  %v5706_v44 = vmax.bf16 %v5705_v31, %v5616_v32  ;;  %v5517_v48 = vmax.f32 %v5175_v6, 0.0 }
 0x4e2   : > { %v5520_v46 = vmax.f32 %v5186_v61, 0.0 }
 0x4e3   : > { %v5703_v47 = vpack.i.bf16 %v5702_v42, %v5702_v42  ;;  %v5518_v49 = vmax.f32 %v5178_v43, 0.0 }
 0x4e4   : > { %v5618_v50 = vpack.c.bf16 %v5520_v46, %v5519_v45 }
 0x4e5   : > { %v5853_v59 = vunpack.c.l.b16 %v5703_v47  ;;  %v5617_v51 = vpack.c.bf16 %v5518_v49, %v5517_v48  ;;  %v8304_v26 = vpop.f32.mrb[48].mxu0 }
 0x4e6   : > { %v5199_v52 = vadd.f32 %v8304_v26, %v9831_v30  ;;  %v5190_v53 = vpop.f32.mrb[49].mxu0 }
 0x4e7   : > { %v9931_v54 = vsel %vm5861_vm4, %v5853_v59, %v9906_v41  ;;  %v5707_v55 = vmax.bf16 %v5706_v44, %v5617_v51  ;;  %v5191_v56 = vadd.f32 %v9831_v30, %v5190_v53  ;;  %v8305_v57 = vpop.f32.mrb[50].mxu0 }
 0x4e8   : > { %v5202_v62 = vadd.f32 %v8305_v57, %v9831_v30  ;;  %v5193_v63 = vpop.f32.mrb[51].mxu0  ;;  %v5523_v41 = vmax.f32 %v5199_v52, 0.0 }
 0x4e9   : > { %v5194_v0 = vadd.f32 %v9831_v30, %v5193_v63  ;;  %v5708_v1 = vmax.bf16 %v5707_v55, %v5618_v50  ;;  %v5521_v2 = vmax.f32 %v5191_v56, 0.0 }
 0x4ea   : > { %v5524_v25 = vmax.f32 %v5202_v62, 0.0 }
 0x4eb   : > { %v5522_v3 = vmax.f32 %v5194_v0, 0.0 }
 0x4ec   : > { %v5620_v4 = vpack.c.bf16 %v5524_v25, %v5523_v41  ;;  %v8525_v25 = vld [vmem:[%s10404_s11 + $0xe0] ss:$16 sps:$4 sm:$0xff]  }
 0x4ed   : > { %v5619_v7 = vpack.c.bf16 %v5522_v3, %v5521_v2  ;;  %v8308_v8 = vpop.f32.mrb[52].mxu0 }
 0x4ee   : > { %v5215_v9 = vadd.f32 %v8308_v8, %v9831_v30  ;;  %v5206_v10 = vpop.f32.mrb[53].mxu0 }
 0x4ef   : > { %v5709_v24 = vmax.bf16 %v5708_v1, %v5619_v7  ;;  %v5207_v11 = vadd.f32 %v9831_v30, %v5206_v10  ;;  %v8309_v12 = vpop.f32.mrb[54].mxu0  ;;  %v8527_v1 = vld [vmem:[%s10404_s11 + $0xe4] ss:$16 sps:$4 sm:$0xff]  }
 0x4f0   : > { %v5218_v14 = vadd.f32 %v8309_v12, %v9831_v30  ;;  %v5209_v5 = vpop.f32.mrb[55].mxu0  ;;  %v5527_v17 = vmax.f32 %v5215_v9, 0.0  ;;  %6049 = vmatprep.subr.bf16.mxu1 %v8527_v1  ;;  %v8530_v12 = vld [vmem:[%s10404_s11 + $0xc] ss:$16 sps:$4 sm:$0xff]  }
 0x4f1   : > { %v5710_v15 = vmax.bf16 %v5709_v24, %v5620_v4  ;;  %v5210_v16 = vadd.f32 %v9831_v30, %v5209_v5  ;;  %v5525_v13 = vmax.f32 %v5207_v11, 0.0  ;;  %6050 = vmatpush1.bf16.msra.mxu1 %v8525_v25 }
 0x4f2   : > { %v5528_v18 = vmax.f32 %v5218_v14, 0.0  ;;  %6076 = vmatprep.subr.bf16.mxu1 %v8530_v12 }
 0x4f3   : > { %v5711_v19 = vunpack.i.l.bf16 %v5710_v15  ;;  %v5712_v20 = vunpack.i.h.bf16 %v5710_v15  ;;  %v5526_v22 = vmax.f32 %v5210_v16, 0.0 }
 0x4f4   : > { %v5622_v34 = vpack.c.bf16 %v5528_v18, %v5527_v17  ;;  %v8733_v17 = vmov 0  }
 0x4f5   : > { %v5713_v27 = vmax.f32 %v5711_v19, %v5712_v20  ;;  %v5621_v28 = vpack.c.bf16 %v5526_v22, %v5525_v13  ;;  %v8312_v29 = vpop.f32.mrb[56].mxu0  ;;  %6067 = vmatprep.mubr.bf16.mxu1 %v8733_v17 }
 0x4f6   : > { %v5231_v23 = vadd.f32 %v8312_v29, %v9831_v30  ;;  %v5222_v32 = vpop.f32.mrb[57].mxu0 }
 0x4f7   : > { %v5714_v33 = vrot.slane %v5713_v27, 4  ;;  %v5721_v35 = vmax.bf16 %v5622_v34, %v5621_v28  ;;  %v5223_v36 = vadd.f32 %v9831_v30, %v5222_v32  ;;  %v8313_v37 = vpop.f32.mrb[58].mxu0 }
 0x4f8   : > { %v5234_v38 = vadd.f32 %v8313_v37, %v9831_v30  ;;  %v5225_v39 = vpop.f32.mrb[59].mxu0  ;;  %v5531_v21 = vmax.f32 %v5231_v23, 0.0 }
 0x4f9   : > { %v5715_v31 = vmax.f32 %v5713_v27, %v5714_v33  ;;  %v5226_v6 = vadd.f32 %v9831_v30, %v5225_v39  ;;  %v5529_v42 = vmax.f32 %v5223_v36, 0.0 }
 0x4fa   : > { %v5532_v61 = vmax.f32 %v5234_v38, 0.0 }
 0x4fb   : > { %v5716_v40 = vrot.slane %v5715_v31, 2  ;;  %v5530_v43 = vmax.f32 %v5226_v6, 0.0 }
 0x4fc   : > { %v5624_v44 = vpack.c.bf16 %v5532_v61, %v5531_v21 }
 0x4fd   : > { %v5717_v45 = vmax.f32 %v5715_v31, %v5716_v40  ;;  %v5623_v46 = vpack.c.bf16 %v5530_v43, %v5529_v42  ;;  %v8316_v47 = vpop.f32.mrb[60].mxu0 }
 0x4fe   : > { %v5247_v48 = vadd.f32 %v8316_v47, %v9831_v30  ;;  %v5238_v49 = vpop.f32.mrb[61].mxu0 }
 0x4ff   : > { %v5718_v50 = vrot.slane %v5717_v45, 1  ;;  %v5722_v59 = vmax.bf16 %v5721_v35, %v5623_v46  ;;  %v5239_v51 = vadd.f32 %v9831_v30, %v5238_v49  ;;  %v8317_v26 = vpop.f32.mrb[62].mxu0 }
 0x500   : > { %v5250_v52 = vadd.f32 %v8317_v26, %v9831_v30  ;;  %v5241_v53 = vpop.f32.mrb[63].mxu0  ;;  %v5535_v58 = vmax.f32 %v5247_v48, 0.0 }
 0x501   : > { %v5719_v55 = vmax.f32 %v5717_v45, %v5718_v50  ;;  %v5242_v56 = vadd.f32 %v9831_v30, %v5241_v53  ;;  %v5723_v57 = vmax.bf16 %v5722_v59, %v5624_v44  ;;  %v5533_v63 = vmax.f32 %v5239_v51, 0.0 }
 0x502   : > { %v5536_v60 = vmax.f32 %v5250_v52, 0.0 }
 0x503   : > { %v5720_v62 = vpack.i.bf16 %v5719_v55, %v5719_v55  ;;  %v5534_v0 = vmax.f32 %v5242_v56, 0.0 }
 0x504   : > { %v5626_v41 = vpack.c.bf16 %v5536_v60, %v5535_v58 }
 0x505   : > { %v5854_v2 = vunpack.c.l.b16 %v5720_v62  ;;  %v5625_v3 = vpack.c.bf16 %v5534_v0, %v5533_v63  ;;  %v8320_v4 = vpop.f32.mrb[64].mxu0 }
 0x506   : > { %v5263_v7 = vadd.f32 %v8320_v4, %v9831_v30  ;;  %v5254_v8 = vpop.f32.mrb[65].mxu0 }
 0x507   : > { %v9962_v9 = vsel %vm5863_vm5, %v5854_v2, %v9931_v54  ;;  %v5724_v10 = vmax.bf16 %v5723_v57, %v5625_v3  ;;  %v5255_v24 = vadd.f32 %v9831_v30, %v5254_v8  ;;  %v8321_v11 = vpop.f32.mrb[66].mxu0 }
 0x508   : > { %v5266_v14 = vadd.f32 %v8321_v11, %v9831_v30  ;;  %v5257_v5 = vpop.f32.mrb[67].mxu0  ;;  %v5539_v54 = vmax.f32 %v5263_v7, 0.0 }
 0x509   : > { %v5258_v15 = vadd.f32 %v9831_v30, %v5257_v5  ;;  %v5725_v16 = vmax.bf16 %v5724_v10, %v5626_v41  ;;  %v5537_v19 = vmax.f32 %v5255_v24, 0.0 }
 0x50a   : > { %v5540_v18 = vmax.f32 %v5266_v14, 0.0 }
 0x50b   : > { %v5538_v20 = vmax.f32 %v5258_v15, 0.0 }
 0x50c   : > { %v5628_v13 = vpack.c.bf16 %v5540_v18, %v5539_v54 }
 0x50d   : > { %v5627_v22 = vpack.c.bf16 %v5538_v20, %v5537_v19  ;;  %v8324_v34 = vpop.f32.mrb[68].mxu0 }
 0x50e   : > { %v5279_v27 = vadd.f32 %v8324_v34, %v9831_v30  ;;  %v5270_v28 = vpop.f32.mrb[69].mxu0 }
 0x50f   : > { %v5726_v29 = vmax.bf16 %v5725_v16, %v5627_v22  ;;  %v5271_v23 = vadd.f32 %v9831_v30, %v5270_v28  ;;  %v8325_v32 = vpop.f32.mrb[70].mxu0 }
 0x510   : > { %v5282_v33 = vadd.f32 %v8325_v32, %v9831_v30  ;;  %v5273_v35 = vpop.f32.mrb[71].mxu0  ;;  %v5543_v38 = vmax.f32 %v5279_v27, 0.0 }
 0x511   : > { %v5727_v36 = vmax.bf16 %v5726_v29, %v5628_v13  ;;  %v5274_v37 = vadd.f32 %v9831_v30, %v5273_v35  ;;  %v5541_v21 = vmax.f32 %v5271_v23, 0.0  ;;  %v9986_v13 = vld [vmem:[%s10403_s10] ss:$0 sm:$0xff] }
 0x512   : > { %v5544_v39 = vmax.f32 %v5282_v33, 0.0 }
 0x513   : > { %v5728_v31 = vunpack.i.l.bf16 %v5727_v36  ;;  %v5729_v6 = vunpack.i.h.bf16 %v5727_v36  ;;  %v5542_v61 = vmax.f32 %v5274_v37, 0.0 }
 0x514   : > { %v5630_v40 = vpack.c.bf16 %v5544_v39, %v5543_v38 }
 0x515   : > { %v5730_v42 = vmax.f32 %v5728_v31, %v5729_v6  ;;  %v5629_v43 = vpack.c.bf16 %v5542_v61, %v5541_v21  ;;  %v8328_v44 = vpop.f32.mrb[72].mxu0 }
 0x516   : > { %v5295_v45 = vadd.f32 %v8328_v44, %v9831_v30  ;;  %v5286_v46 = vpop.f32.mrb[73].mxu0 }
 0x517   : > { %v5731_v47 = vrot.slane %v5730_v42, 4  ;;  %v5738_v48 = vmax.bf16 %v5630_v40, %v5629_v43  ;;  %v5287_v49 = vadd.f32 %v9831_v30, %v5286_v46  ;;  %v8329_v50 = vpop.f32.mrb[74].mxu0 }
 0x518   : > { %v5298_v59 = vadd.f32 %v8329_v50, %v9831_v30  ;;  %v5289_v51 = vpop.f32.mrb[75].mxu0  ;;  %v5547_v53 = vmax.f32 %v5295_v45, 0.0 }
 0x519   : > { %v5732_v26 = vmax.f32 %v5730_v42, %v5731_v47  ;;  %v5290_v52 = vadd.f32 %v9831_v30, %v5289_v51  ;;  %v5545_v57 = vmax.f32 %v5287_v49, 0.0 }
 0x51a   : > { %v5548_v55 = vmax.f32 %v5298_v59, 0.0 }
 0x51b   : > { %v5733_v56 = vrot.slane %v5732_v26, 2  ;;  %v5546_v58 = vmax.f32 %v5290_v52, 0.0 }
 0x51c   : > { %v5632_v60 = vpack.c.bf16 %v5548_v55, %v5547_v53 }
 0x51d   : > { %v5734_v62 = vmax.f32 %v5732_v26, %v5733_v56  ;;  %v5631_v63 = vpack.c.bf16 %v5546_v58, %v5545_v57  ;;  %v8332_v0 = vpop.f32.mrb[76].mxu0 }
 0x51e   : > { %v5311_v1 = vadd.f32 %v8332_v0, %v9831_v30  ;;  %v5302_v41 = vpop.f32.mrb[77].mxu0 }
 0x51f   : > { %v5735_v25 = vrot.slane %v5734_v62, 1  ;;  %v5739_v2 = vmax.bf16 %v5738_v48, %v5631_v63  ;;  %v5303_v3 = vadd.f32 %v9831_v30, %v5302_v41  ;;  %v8333_v4 = vpop.f32.mrb[78].mxu0 }
 0x520   : > { %v5314_v7 = vadd.f32 %v8333_v4, %v9831_v30  ;;  %v5305_v8 = vpop.f32.mrb[79].mxu0  ;;  %v5551_v12 = vmax.f32 %v5311_v1, 0.0 }
 0x521   : > { %v5736_v10 = vmax.f32 %v5734_v62, %v5735_v25  ;;  %v5306_v24 = vadd.f32 %v9831_v30, %v5305_v8  ;;  %v5740_v11 = vmax.bf16 %v5739_v2, %v5632_v60  ;;  %v5549_v15 = vmax.f32 %v5303_v3, 0.0 }
 0x522   : > { %v5552_v14 = vmax.f32 %v5314_v7, 0.0 }
 0x523   : > { %v5737_v5 = vpack.i.bf16 %v5736_v10, %v5736_v10  ;;  %v5550_v16 = vmax.f32 %v5306_v24, 0.0 }
 0x524   : > { %v5634_v54 = vpack.c.bf16 %v5552_v14, %v5551_v12 }
 0x525   : > { %v5855_v18 = vunpack.c.l.b16 %v5737_v5  ;;  %v5633_v19 = vpack.c.bf16 %v5550_v16, %v5549_v15  ;;  %v8336_v20 = vpop.f32.mrb[80].mxu0 }
 0x526   : > { %v5327_v22 = vadd.f32 %v9986_v13, %v8336_v20  ;;  %v5318_v34 = vpop.f32.mrb[81].mxu0 }
 0x527   : > { %v9990_v30 = vsel %vm5865_vm6, %v5855_v18, %v9962_v9  ;;  %v5741_v27 = vmax.bf16 %v5740_v11, %v5633_v19  ;;  %v5319_v28 = vadd.f32 %v9986_v13, %v5318_v34  ;;  %v8337_v29 = vpop.f32.mrb[82].mxu0 }
 0x528   : > { %v5330_v23 = vadd.f32 %v9986_v13, %v8337_v29  ;;  %v5321_v32 = vpop.f32.mrb[83].mxu0  ;;  %v5555_v36 = vmax.f32 %v5327_v22, 0.0 }
 0x529   : > { %v5322_v33 = vadd.f32 %v9986_v13, %v5321_v32  ;;  %v5742_v35 = vmax.bf16 %v5741_v27, %v5634_v54  ;;  %v5553_v38 = vmax.f32 %v5319_v28, 0.0 }
 0x52a   : > { %v5556_v37 = vmax.f32 %v5330_v23, 0.0 }
 0x52b   : > { %v5554_v39 = vmax.f32 %v5322_v33, 0.0 }
 0x52c   : > { %v5636_v31 = vpack.c.bf16 %v5556_v37, %v5555_v36 }
 0x52d   : > { %v5635_v6 = vpack.c.bf16 %v5554_v39, %v5553_v38  ;;  %v8340_v21 = vpop.f32.mrb[84].mxu0 }
 0x52e   : > { %v5343_v9 = vadd.f32 %v9986_v13, %v8340_v21  ;;  %v5334_v61 = vpop.f32.mrb[85].mxu0 }
 0x52f   : > { %v5743_v40 = vmax.bf16 %v5742_v35, %v5635_v6  ;;  %v5335_v42 = vadd.f32 %v9986_v13, %v5334_v61  ;;  %v8341_v43 = vpop.f32.mrb[86].mxu0 }
 0x530   : > { %v5346_v44 = vadd.f32 %v9986_v13, %v8341_v43  ;;  %v5337_v45 = vpop.f32.mrb[87].mxu0  ;;  %v5559_v48 = vmax.f32 %v5343_v9, 0.0 }
 0x531   : > { %v5744_v46 = vmax.bf16 %v5743_v40, %v5636_v31  ;;  %v5338_v47 = vadd.f32 %v9986_v13, %v5337_v45  ;;  %v5557_v51 = vmax.f32 %v5335_v42, 0.0 }
 0x532   : > { %v5560_v49 = vmax.f32 %v5346_v44, 0.0 }
 0x533   : > { %v5745_v50 = vunpack.i.l.bf16 %v5744_v46  ;;  %v5746_v59 = vunpack.i.h.bf16 %v5744_v46  ;;  %v5558_v26 = vmax.f32 %v5338_v47, 0.0 }
 0x534   : > { %v5638_v52 = vpack.c.bf16 %v5560_v49, %v5559_v48 }
 0x535   : > { %v5747_v53 = vmax.f32 %v5745_v50, %v5746_v59  ;;  %v5637_v55 = vpack.c.bf16 %v5558_v26, %v5557_v51  ;;  %v8344_v56 = vpop.f32.mrb[88].mxu0 }
 0x536   : > { %v5359_v57 = vadd.f32 %v9986_v13, %v8344_v56  ;;  %v5350_v58 = vpop.f32.mrb[89].mxu0 }
 0x537   : > { %v5748_v60 = vrot.slane %v5747_v53, 4  ;;  %v5755_v62 = vmax.bf16 %v5638_v52, %v5637_v55  ;;  %v5351_v63 = vadd.f32 %v9986_v13, %v5350_v58  ;;  %v8345_v0 = vpop.f32.mrb[90].mxu0 }
 0x538   : > { %v5362_v1 = vadd.f32 %v9986_v13, %v8345_v0  ;;  %v5353_v41 = vpop.f32.mrb[91].mxu0  ;;  %v5563_v3 = vmax.f32 %v5359_v57, 0.0 }
 0x539   : > { %v5749_v25 = vmax.f32 %v5747_v53, %v5748_v60  ;;  %v5354_v2 = vadd.f32 %v9986_v13, %v5353_v41  ;;  %v5561_v8 = vmax.f32 %v5351_v63, 0.0 }
 0x53a   : > { %v5564_v4 = vmax.f32 %v5362_v1, 0.0 }
 0x53b   : > { %v5750_v7 = vrot.slane %v5749_v25, 2  ;;  %v5562_v10 = vmax.f32 %v5354_v2, 0.0 }
 0x53c   : > { %v5640_v24 = vpack.c.bf16 %v5564_v4, %v5563_v3 }
 0x53d   : > { %v5751_v11 = vmax.f32 %v5749_v25, %v5750_v7  ;;  %v5639_v12 = vpack.c.bf16 %v5562_v10, %v5561_v8  ;;  %v8348_v14 = vpop.f32.mrb[92].mxu0 }
 0x53e   : > { %v5375_v5 = vadd.f32 %v9986_v13, %v8348_v14  ;;  %v5366_v15 = vpop.f32.mrb[93].mxu0 }
 0x53f   : > { %v5752_v16 = vrot.slane %v5751_v11, 1  ;;  %v5756_v54 = vmax.bf16 %v5755_v62, %v5639_v12  ;;  %v5367_v18 = vadd.f32 %v9986_v13, %v5366_v15  ;;  %v8349_v19 = vpop.f32.mrb[94].mxu0 }
 0x540   : > { %v5378_v20 = vadd.f32 %v9986_v13, %v8349_v19  ;;  %v5369_v22 = vpop.f32.mrb[95].mxu0  ;;  %v5567_v29 = vmax.f32 %v5375_v5, 0.0 }
 0x541   : > { %v5753_v34 = vmax.f32 %v5751_v11, %v5752_v16  ;;  %v5370_v27 = vadd.f32 %v9986_v13, %v5369_v22  ;;  %v5757_v28 = vmax.bf16 %v5756_v54, %v5640_v24  ;;  %v5565_v33 = vmax.f32 %v5367_v18, 0.0 }
 0x542   : > { %v5568_v23 = vmax.f32 %v5378_v20, 0.0 }
 0x543   : > { %v5754_v32 = vpack.i.bf16 %v5753_v34, %v5753_v34  ;;  %v5566_v35 = vmax.f32 %v5370_v27, 0.0 }
 0x544   : > { %v5642_v36 = vpack.c.bf16 %v5568_v23, %v5567_v29 }
 0x545   : > { %v5856_v37 = vunpack.c.l.b16 %v5754_v32  ;;  %v5641_v38 = vpack.c.bf16 %v5566_v35, %v5565_v33  ;;  %v8352_v39 = vpop.f32.mrb[96].mxu0 }
 0x546   : > { %v5391_v31 = vadd.f32 %v9986_v13, %v8352_v39  ;;  %v5382_v6 = vpop.f32.mrb[97].mxu0 }
 0x547   : > { %v10009_v21 = vsel %vm5867_vm7, %v5856_v37, %v9990_v30  ;;  %v5758_v9 = vmax.bf16 %v5757_v28, %v5641_v38  ;;  %v5383_v61 = vadd.f32 %v9986_v13, %v5382_v6  ;;  %v8353_v40 = vpop.f32.mrb[98].mxu0 }
 0x548   : > { %v5394_v42 = vadd.f32 %v9986_v13, %v8353_v40  ;;  %v5385_v43 = vpop.f32.mrb[99].mxu0  ;;  %v5571_v46 = vmax.f32 %v5391_v31, 0.0 }
 0x549   : > { %v5386_v44 = vadd.f32 %v9986_v13, %v5385_v43  ;;  %v5759_v45 = vmax.bf16 %v5758_v9, %v5642_v36  ;;  %v5569_v48 = vmax.f32 %v5383_v61, 0.0 }
 0x54a   : > { %v5572_v47 = vmax.f32 %v5394_v42, 0.0 }
 0x54b   : > { %v5570_v49 = vmax.f32 %v5386_v44, 0.0 }
 0x54c   : > { %v5644_v50 = vpack.c.bf16 %v5572_v47, %v5571_v46 }
 0x54d   : > { %v5643_v59 = vpack.c.bf16 %v5570_v49, %v5569_v48  ;;  %v8356_v51 = vpop.f32.mrb[100].mxu0 }
 0x54e   : > { %v5407_v30 = vadd.f32 %v9986_v13, %v8356_v51  ;;  %v5398_v26 = vpop.f32.mrb[101].mxu0 }
 0x54f   : > { %v5760_v52 = vmax.bf16 %v5759_v45, %v5643_v59  ;;  %v5399_v53 = vadd.f32 %v9986_v13, %v5398_v26  ;;  %v8357_v55 = vpop.f32.mrb[102].mxu0 }
 0x550   : > { %v5410_v56 = vadd.f32 %v9986_v13, %v8357_v55  ;;  %v5401_v57 = vpop.f32.mrb[103].mxu0  ;;  %v5575_v62 = vmax.f32 %v5407_v30, 0.0 }
 0x551   : > { %v5761_v58 = vmax.bf16 %v5760_v52, %v5644_v50  ;;  %v5402_v60 = vadd.f32 %v9986_v13, %v5401_v57  ;;  %v5573_v41 = vmax.f32 %v5399_v53, 0.0 }
 0x552   : > { %v5576_v63 = vmax.f32 %v5410_v56, 0.0 }
 0x553   : > { %v5762_v0 = vunpack.i.l.bf16 %v5761_v58  ;;  %v5763_v1 = vunpack.i.h.bf16 %v5761_v58  ;;  %v5574_v25 = vmax.f32 %v5402_v60, 0.0 }
 0x554   : > { %v5646_v2 = vpack.c.bf16 %v5576_v63, %v5575_v62 }
 0x555   : > { %v5764_v3 = vmax.f32 %v5762_v0, %v5763_v1  ;;  %v5645_v4 = vpack.c.bf16 %v5574_v25, %v5573_v41  ;;  %v8360_v7 = vpop.f32.mrb[104].mxu0 }
 0x556   : > { %v5423_v8 = vadd.f32 %v9986_v13, %v8360_v7  ;;  %v5414_v10 = vpop.f32.mrb[105].mxu0 }
 0x557   : > { %v5765_v24 = vrot.slane %v5764_v3, 4  ;;  %v5772_v11 = vmax.bf16 %v5646_v2, %v5645_v4  ;;  %v5415_v12 = vadd.f32 %v9986_v13, %v5414_v10  ;;  %v8361_v14 = vpop.f32.mrb[106].mxu0 }
 0x558   : > { %v5426_v5 = vadd.f32 %v9986_v13, %v8361_v14  ;;  %v5417_v15 = vpop.f32.mrb[107].mxu0  ;;  %v5579_v18 = vmax.f32 %v5423_v8, 0.0 }
 0x559   : > { %v5766_v16 = vmax.f32 %v5764_v3, %v5765_v24  ;;  %v5418_v54 = vadd.f32 %v9986_v13, %v5417_v15  ;;  %v5577_v22 = vmax.f32 %v5415_v12, 0.0 }
 0x55a   : > { %v5580_v19 = vmax.f32 %v5426_v5, 0.0  ;;  %v8528_v5 = vld [vmem:[%s10404_s11 + $0x8] ss:$16 sps:$4 sm:$0xff]  }
 0x55b   : > { %v5767_v20 = vrot.slane %v5766_v16, 2  ;;  %v5578_v34 = vmax.f32 %v5418_v54, 0.0  ;;  %v8531_v54 = vld [vmem:[%s10404_s11 + $0x28] ss:$16 sps:$4 sm:$0xff]  }
 0x55c   : > { %v5648_v27 = vpack.c.bf16 %v5580_v19, %v5579_v18  ;;  %v8536_v18 = vld [vmem:[%s10404_s11 + $0x4c] ss:$16 sps:$4 sm:$0xff]   ;;  %v8534_v19 = vld [vmem:[%s10404_s11 + $0x48] ss:$16 sps:$4 sm:$0xff]  }
 0x55d   : > { %v5768_v28 = vmax.f32 %v5766_v16, %v5767_v20  ;;  %v5647_v29 = vpack.c.bf16 %v5578_v34, %v5577_v22  ;;  %v8364_v23 = vpop.f32.mrb[108].mxu0  ;;  %v8533_v16 = vld [vmem:[%s10404_s11 + $0x2c] ss:$16 sps:$4 sm:$0xff]   ;;  %v8540_v34 = vld [vmem:[%s10404_s11 + $0x88] ss:$16 sps:$4 sm:$0xff]  }
 0x55e   : > { %v5439_v32 = vadd.f32 %v9986_v13, %v8364_v23  ;;  %v5430_v33 = vpop.f32.mrb[109].mxu0  ;;  %v8539_v20 = vld [vmem:[%s10404_s11 + $0x6c] ss:$16 sps:$4 sm:$0xff]   ;;  %v8546_v23 = vld [vmem:[%s10404_s11 + $0xc8] ss:$16 sps:$4 sm:$0xff]  }
 0x55f   : > { %v5769_v35 = vrot.slane %v5768_v28, 1  ;;  %v5773_v36 = vmax.bf16 %v5772_v11, %v5647_v29  ;;  %v5431_v37 = vadd.f32 %v9986_v13, %v5430_v33  ;;  %v8365_v38 = vpop.f32.mrb[110].mxu0  ;;  %v8542_v22 = vld [vmem:[%s10404_s11 + $0x8c] ss:$16 sps:$4 sm:$0xff]   ;;  %v8549_v33 = vld [vmem:[%s10404_s11 + $0xe8] ss:$16 sps:$4 sm:$0xff]  }
 0x560   : > { %v5442_v39 = vadd.f32 %v9986_v13, %v8365_v38  ;;  %v5433_v31 = vpop.f32.mrb[111].mxu0  ;;  %v5583_v40 = vmax.f32 %v5439_v32, 0.0  ;;  %v8548_v29 = vld [vmem:[%s10404_s11 + $0xcc] ss:$16 sps:$4 sm:$0xff]   ;;  %v8555_v38 = vld [vmem:[%s10406_s13 + $0x10] ss:$8 sps:$4 sm:$0xff]  }
 0x561   : > { %v5770_v6 = vmax.f32 %v5768_v28, %v5769_v35  ;;  %v5434_v9 = vadd.f32 %v9986_v13, %v5433_v31  ;;  %v5774_v61 = vmax.bf16 %v5773_v36, %v5648_v27  ;;  %v5581_v44 = vmax.f32 %v5431_v37, 0.0  ;;  %v8545_v27 = vld [vmem:[%s10404_s11 + $0xac] ss:$16 sps:$4 sm:$0xff]   ;;  %v8543_v28 = vld [vmem:[%s10404_s11 + $0xa8] ss:$16 sps:$4 sm:$0xff]  }
 0x562   : > { %v5584_v42 = vmax.f32 %v5442_v39, 0.0  ;;  %v8551_v32 = vld [vmem:[%s10404_s11 + $0xec] ss:$16 sps:$4 sm:$0xff]   ;;  %v8552_v36 = vld [vmem:[%s10406_s13] ss:$8 sps:$4 sm:$0xff]  }
 0x563   : > { %v5771_v43 = vpack.i.bf16 %v5770_v6, %v5770_v6  ;;  %v5582_v45 = vmax.f32 %v5434_v9, 0.0  ;;  %v8554_v35 = vld [vmem:[%s10406_s13 + $0x4] ss:$8 sps:$4 sm:$0xff]   ;;  %v8557_v37 = vld [vmem:[%s10406_s13 + $0x14] ss:$8 sps:$4 sm:$0xff]  }
 0x564   : > { %v5650_v46 = vpack.c.bf16 %v5584_v42, %v5583_v40  ;;  %v8560_v39 = vld [vmem:[%s10406_s13 + $0x24] ss:$8 sps:$4 sm:$0xff]   ;;  %v8558_v31 = vld [vmem:[%s10406_s13 + $0x20] ss:$8 sps:$4 sm:$0xff]   ;;  %v8563_v6 = vld [vmem:[%s10406_s13 + $0x34] ss:$8 sps:$4 sm:$0xff]  }
 0x565   : > { %v5857_v47 = vunpack.c.l.b16 %v5771_v43  ;;  %v5649_v48 = vpack.c.bf16 %v5582_v45, %v5581_v44  ;;  %v8368_v49 = vpop.f32.mrb[112].mxu0  ;;  %v8561_v9 = vld [vmem:[%s10406_s13 + $0x30] ss:$8 sps:$4 sm:$0xff]   ;;  %v8564_v40 = vld [vmem:[%s10406_s13 + $0x40] ss:$8 sps:$4 sm:$0xff]  }
 0x566   : > { %v5455_v50 = vadd.f32 %v9986_v13, %v8368_v49  ;;  %v5446_v59 = vpop.f32.mrb[113].mxu0  ;;  %v8569_v42 = vld [vmem:[%s10406_s13 + $0x54] ss:$8 sps:$4 sm:$0xff]   ;;  %v8567_v43 = vld [vmem:[%s10406_s13 + $0x50] ss:$8 sps:$4 sm:$0xff]  }
 0x567   : > { %v5870_v51 = vsel %vm5869_vm8, %v5857_v47, %v10009_v21  ;;  %v5775_v30 = vmax.bf16 %v5774_v61, %v5649_v48  ;;  %v5447_v26 = vadd.f32 %v9986_v13, %v5446_v59  ;;  %v8369_v52 = vpop.f32.mrb[114].mxu0  ;;  %v8566_v61 = vld [vmem:[%s10406_s13 + $0x44] ss:$8 sps:$4 sm:$0xff]   ;;  %v8570_v45 = vld [vmem:[%s10406_s13 + $0x60] ss:$8 sps:$4 sm:$0xff]  }
 0x568   : > { %v5458_v53 = vadd.f32 %v9986_v13, %v8369_v52  ;;  %v5449_v55 = vpop.f32.mrb[115].mxu0  ;;  %v5587_v58 = vmax.f32 %v5455_v50, 0.0  ;;  %v8572_v44 = vld [vmem:[%s10406_s13 + $0x64] ss:$8 sps:$4 sm:$0xff]   ;;  %v8573_v47 = vld [vmem:[%s10406_s13 + $0x70] ss:$8 sps:$4 sm:$0xff]  }
 0x569   : > { %v5450_v56 = vadd.f32 %v9986_v13, %v5449_v55  ;;  %v5776_v57 = vmax.bf16 %v5775_v30, %v5650_v46  ;;  %v5585_v62 = vmax.f32 %v5447_v26, 0.0  ;;  %v8575_v46 = vld [vmem:[%s10406_s13 + $0x74] ss:$8 sps:$4 sm:$0xff]   ;;  %v8578_v48 = vld [vmem:[%s10406_s13 + $0x84] ss:$8 sps:$4 sm:$0xff]  }
 0x56a   : > { %v5588_v60 = vmax.f32 %v5458_v53, 0.0  ;;  %v8576_v49 = vld [vmem:[%s10406_s13 + $0x80] ss:$8 sps:$4 sm:$0xff]   ;;  %v8581_v50 = vld [vmem:[%s10406_s13 + $0x94] ss:$8 sps:$4 sm:$0xff]  }
 0x56b   : > { %v5586_v63 = vmax.f32 %v5450_v56, 0.0  ;;  %v8579_v59 = vld [vmem:[%s10406_s13 + $0x90] ss:$8 sps:$4 sm:$0xff]   ;;  %v8582_v30 = vld [vmem:[%s10406_s13 + $0xa0] ss:$8 sps:$4 sm:$0xff]  }
 0x56c   : > { %v5652_v0 = vpack.c.bf16 %v5588_v60, %v5587_v58  ;;  %v8587_v26 = vld [vmem:[%s10406_s13 + $0xb4] ss:$8 sps:$4 sm:$0xff]   ;;  %v8585_v52 = vld [vmem:[%s10406_s13 + $0xb0] ss:$8 sps:$4 sm:$0xff]   ;;  %v8590_v53 = vld [vmem:[%s10406_s13 + $0xc4] ss:$8 sps:$4 sm:$0xff]  }
 0x56d   : > { %v5651_v1 = vpack.c.bf16 %v5586_v63, %v5585_v62  ;;  %v8588_v55 = vld [vmem:[%s10406_s13 + $0xc0] ss:$8 sps:$4 sm:$0xff]   ;;  %v8593_v56 = vld [vmem:[%s10406_s13 + $0xd4] ss:$8 sps:$4 sm:$0xff]   ;;  %v8596_v58 = vld [vmem:[%s10406_s13 + $0xe4] ss:$8 sps:$4 sm:$0xff]  }
 0x56e   : > { %v8594_v60 = vld [vmem:[%s10406_s13 + $0xe0] ss:$8 sps:$4 sm:$0xff]   ;;  %v8599_v62 = vld [vmem:[%s10406_s13 + $0xf4] ss:$8 sps:$4 sm:$0xff]   ;;  %v8597_v63 = vld [vmem:[%s10406_s13 + $0xf0] ss:$8 sps:$4 sm:$0xff]  }
 0x56f   : > { %v5777_v41 = vmax.bf16 %v5776_v57, %v5651_v1  ;;  %v8591_v57 = vld [vmem:[%s10406_s13 + $0xd0] ss:$8 sps:$4 sm:$0xff]   ;;  %v5823_v1 = vlaneseq }
 0x571   : > { %v5778_v25 = vmax.bf16 %v5777_v41, %v5652_v0  ;;  %v8602_v0 = vld [vmem:[%s10406_s13 + $0x104] ss:$8 sps:$4 sm:$0xff]   ;;  %v10176_v41 = vshrl.u32 %v5823_v1, 7 }
 0x572   : > { %v8650_v1 = vld [vmem:[%s10408_s15 + $0x48] sm:$0xff]  }
 0x573   : > { %v5779_v2 = vunpack.i.l.bf16 %v5778_v25  ;;  %v5780_v21 = vunpack.i.h.bf16 %v5778_v25  ;;  %v5825_v25 = vsub.s32 0, %v10176_v41 }
 0x575   : > { %v5781_v3 = vmax.f32 %v5779_v2, %v5780_v21  ;;  %v10182_v2 = vld [vmem:[%s10405_s12] sm:$0xf]  ;;  %v5829_v21 = vsub.s32 1, %v10176_v41 }
 0x577   : > { %v5782_v4 = vrot.slane %v5781_v3, 4 }
 0x579   : > { %v5783_v7 = vmax.f32 %v5781_v3, %v5782_v4  ;;  %v5826_v3 = vrot.slane %v10182_v2, %v5825_v25  ;;  %v5830_v4 = vrot.slane %v10182_v2, %v5829_v21 }
 0x57b   : > { %v5784_v8 = vrot.slane %v5783_v7, 2 }
 0x57d   : > { %v5785_v10 = vmax.f32 %v5783_v7, %v5784_v8 }
 0x57f   : > { %v5786_v24 = vrot.slane %v5785_v10, 1 }
 0x581   : > { %v5787_v11 = vmax.f32 %v5785_v10, %v5786_v24 }
 0x583   : > { %v5788_v12 = vpack.i.bf16 %v5787_v11, %v5787_v11 }
 0x585   : > { %v5858_v13 = vunpack.c.l.b16 %v5788_v12 }
 0x587   : > { %v5872_v14 = vsel %vm5871_vm9, %v5858_v13, %v5870_v51  ;;  %v8584_v51 = vld [vmem:[%s10406_s13 + $0xa4] ss:$8 sps:$4 sm:$0xff]  }
 0x588   : > { %v5873_v15 = vpack.c.b16 %v5872_v14, %v5872_v14 }
 0x58a   : > { %6068 = vmatmul.mubr.bf16.vlgmr.msra.gmra.mrb[12].mxu1 %v5873_v15 }
 0x58b   : > { %6077 = vmatpush1.bf16.msra.mxu1 %v8528_v5  ;;  %6108 = vmatprep.mubr.bf16.mxu1 %v8733_v17  ;;  %v8537_v17 = vld [vmem:[%s10404_s11 + $0x68] ss:$16 sps:$4 sm:$0xff]  }
 0x58c   : > { %6078 = vmatprep.subr.bf16.mxu1 %v8533_v16 }
 0x58f   : > { %6079 = vmatpush1.bf16.msra.mxu1 %v8531_v54  ;;  %v8605_v54 = vld [vmem:[%s10406_s13 + $0x114] ss:$8 sps:$4 sm:$0xff]  }
 0x590   : > { %6080 = vmatprep.subr.bf16.mxu1 %v8536_v18  ;;  %v8603_v18 = vld [vmem:[%s10406_s13 + $0x110] ss:$8 sps:$4 sm:$0xff]  }
 0x593   : > { %6081 = vmatpush1.bf16.msra.mxu1 %v8534_v19  ;;  %v8608_v19 = vld [vmem:[%s10406_s13 + $0x124] ss:$8 sps:$4 sm:$0xff]  }
 0x594   : > { %6082 = vmatprep.subr.bf16.mxu1 %v8539_v20  ;;  %v8606_v20 = vld [vmem:[%s10406_s13 + $0x120] ss:$8 sps:$4 sm:$0xff]  }
 0x597   : > { %6083 = vmatpush1.bf16.msra.mxu1 %v8537_v17  ;;  %v8611_v17 = vld [vmem:[%s10406_s13 + $0x134] ss:$8 sps:$4 sm:$0xff]  }
 0x598   : > { %6084 = vmatprep.subr.bf16.mxu1 %v8542_v22  ;;  %v8609_v22 = vld [vmem:[%s10406_s13 + $0x130] ss:$8 sps:$4 sm:$0xff]  }
 0x59b   : > { %6085 = vmatpush1.bf16.msra.mxu1 %v8540_v34  ;;  %v8614_v34 = vld [vmem:[%s10406_s13 + $0x144] ss:$8 sps:$4 sm:$0xff]  }
 0x59c   : > { %6086 = vmatprep.subr.bf16.mxu1 %v8545_v27  ;;  %v8612_v27 = vld [vmem:[%s10406_s13 + $0x140] ss:$8 sps:$4 sm:$0xff]  }
 0x59f   : > { %6087 = vmatpush1.bf16.msra.mxu1 %v8543_v28  ;;  %v8617_v28 = vld [vmem:[%s10406_s13 + $0x154] ss:$8 sps:$4 sm:$0xff]  }
 0x5a0   : > { %6088 = vmatprep.subr.bf16.mxu1 %v8548_v29  ;;  %v8615_v29 = vld [vmem:[%s10406_s13 + $0x150] ss:$8 sps:$4 sm:$0xff]  }
 0x5a3   : > { %6089 = vmatpush1.bf16.msra.mxu1 %v8546_v23  ;;  %v5837_v23 = vsub.s32 3, %v10176_v41 }
 0x5a4   : > { %6090 = vmatprep.subr.bf16.mxu1 %v8551_v32  ;;  %v8620_v32 = vld [vmem:[%s10406_s13 + $0x164] ss:$8 sps:$4 sm:$0xff]  }
 0x5a7   : > { %6091 = vmatpush1.bf16.msra.mxu1 %v8549_v33  ;;  %v5838_v33 = vrot.slane %v10182_v2, %v5837_v23 }
 0x5a8   : > { %6521 = vmatprep.subr.bf16.mxu1 %v8554_v35  ;;  %v8618_v35 = vld [vmem:[%s10406_s13 + $0x160] ss:$8 sps:$4 sm:$0xff]  }
 0x5aa   : > { %6109 = vmatmul.mubr.bf16.vlgmr.msra.gmra.mrb[16].mxu1 %v5873_v15  ;;  %v8600_v15 = vld [vmem:[%s10406_s13 + $0x100] ss:$8 sps:$4 sm:$0xff]  }
 0x5ab   : > { %6522 = vmatpush1.bf16.msra.mxu1 %v8552_v36  ;;  %v8623_v36 = vld [vmem:[%s10406_s13 + $0x174] ss:$8 sps:$4 sm:$0xff]  }
 0x5ac   : > { %6523 = vmatprep.subr.bf16.mxu1 %v8557_v37 }
 0x5af   : > { %6524 = vmatpush1.bf16.msra.mxu1 %v8555_v38 }
 0x5b0   : > { %6525 = vmatprep.subr.bf16.mxu1 %v8560_v39 }
 0x5b3   : > { %6526 = vmatpush1.bf16.msra.mxu1 %v8558_v31 }
 0x5b4   : > { %6527 = vmatprep.subr.bf16.mxu1 %v8563_v6  ;;  %v8621_v6 = vld [vmem:[%s10406_s13 + $0x170] ss:$8 sps:$4 sm:$0xff]  }
 0x5b7   : > { %6528 = vmatpush1.bf16.msra.mxu1 %v8561_v9 }
 0x5b8   : > { %6529 = vmatprep.subr.bf16.mxu1 %v8566_v61  ;;  %v8626_v61 = vld [vmem:[%s10406_s13 + $0x184] ss:$8 sps:$4 sm:$0xff]  }
 0x5bb   : > { %6530 = vmatpush1.bf16.msra.mxu1 %v8564_v40 }
 0x5bc   : > { %6531 = vmatprep.subr.bf16.mxu1 %v8569_v42 }
 0x5bf   : > { %6532 = vmatpush1.bf16.msra.mxu1 %v8567_v43  ;;  %v8624_v43 = vld [vmem:[%s10406_s13 + $0x180] ss:$8 sps:$4 sm:$0xff]  }
 0x5c0   : > { %6533 = vmatprep.subr.bf16.mxu1 %v8572_v44  ;;  %v8629_v44 = vld [vmem:[%s10406_s13 + $0x194] ss:$8 sps:$4 sm:$0xff]  }
 0x5c3   : > { %6534 = vmatpush1.bf16.msra.mxu1 %v8570_v45  ;;  %v8627_v45 = vld [vmem:[%s10406_s13 + $0x190] ss:$8 sps:$4 sm:$0xff]  }
 0x5c4   : > { %6535 = vmatprep.subr.bf16.mxu1 %v8575_v46  ;;  %v8632_v46 = vld [vmem:[%s10406_s13 + $0x1a4] ss:$8 sps:$4 sm:$0xff]  }
 0x5c7   : > { %6536 = vmatpush1.bf16.msra.mxu1 %v8573_v47  ;;  %v8630_v47 = vld [vmem:[%s10406_s13 + $0x1a0] ss:$8 sps:$4 sm:$0xff]  }
 0x5c8   : > { %6537 = vmatprep.subr.bf16.mxu1 %v8578_v48  ;;  %v8635_v48 = vld [vmem:[%s10406_s13 + $0x1b4] ss:$8 sps:$4 sm:$0xff]  }
 0x5cb   : > { %6538 = vmatpush1.bf16.msra.mxu1 %v8576_v49  ;;  %v8633_v49 = vld [vmem:[%s10406_s13 + $0x1b0] ss:$8 sps:$4 sm:$0xff]  }
 0x5cc   : > { %6539 = vmatprep.subr.bf16.mxu1 %v8581_v50  ;;  %v8638_v50 = vld [vmem:[%s10406_s13 + $0x1c4] ss:$8 sps:$4 sm:$0xff]  }
 0x5cf   : > { %6540 = vmatpush1.bf16.msra.mxu1 %v8579_v59  ;;  %v8636_v59 = vld [vmem:[%s10406_s13 + $0x1c0] ss:$8 sps:$4 sm:$0xff]  }
 0x5d0   : > { %6541 = vmatprep.subr.bf16.mxu1 %v8584_v51  ;;  %v5833_v51 = vsub.s32 2, %v10176_v41  ;;  %v7304_v41 = vld [vmem:[%s10409_s16] ss:$0 sm:$0xff] }
 0x5d3   : > { %6542 = vmatpush1.bf16.msra.mxu1 %v8582_v30  ;;  %v8641_v30 = vld [vmem:[%s10406_s13 + $0x1d4] ss:$8 sps:$4 sm:$0xff]  }
 0x5d4   : > { %6543 = vmatprep.subr.bf16.mxu1 %v8587_v26  ;;  %v8639_v26 = vld [vmem:[%s10406_s13 + $0x1d0] ss:$8 sps:$4 sm:$0xff]  }
 0x5d7   : > { %6544 = vmatpush1.bf16.msra.mxu1 %v8585_v52  ;;  %v5834_v52 = vrot.slane %v10182_v2, %v5833_v51  ;;  %v8651_v2 = vld [vmem:[%s10408_s15 + $0x8] sm:$0xff]  }
 0x5d8   : > { %6545 = vmatprep.subr.bf16.mxu1 %v8590_v53  ;;  %v8644_v53 = vld [vmem:[%s10406_s13 + $0x1e4] ss:$8 sps:$4 sm:$0xff]  }
 0x5db   : > { %6546 = vmatpush1.bf16.msra.mxu1 %v8588_v55  ;;  %v8642_v55 = vld [vmem:[%s10406_s13 + $0x1e0] ss:$8 sps:$4 sm:$0xff]  }
 0x5dc   : > { %6547 = vmatprep.subr.bf16.mxu1 %v8593_v56 }
 0x5df   : > { %6548 = vmatpush1.bf16.msra.mxu1 %v8591_v57  ;;  %v8647_v57 = vld [vmem:[%s10406_s13 + $0x1f4] ss:$8 sps:$4 sm:$0xff]  }
 0x5e0   : > { %6549 = vmatprep.subr.bf16.mxu1 %v8596_v58  ;;  %v8645_v58 = vld [vmem:[%s10406_s13 + $0x1f0] ss:$8 sps:$4 sm:$0xff]  }
 0x5e3   : > { %6550 = vmatpush1.bf16.msra.mxu1 %v8594_v60 }
 0x5e4   : > { %6551 = vmatprep.subr.bf16.mxu1 %v8599_v62  ;;  %v8648_v62 = vld [vmem:[%s10408_s15 + $0x40] sm:$0xff]  }
 0x5e7   : > { %6552 = vmatpush1.bf16.msra.mxu1 %v8597_v63  ;;  %v8649_v63 = vld [vmem:[%s10408_s15] sm:$0xff]  }
 0x5e8   : > { %6562 = vmatprep.subr.bf16.mxu1 %v8602_v0 }
 0x65d   : > { %v6069_v7 = vpop.f32.mrb[12].mxu1 }
 0x65e   : > { %v6070_v8 = vadd.f32 %v6069_v7, %v5826_v3  ;;  %v6071_v10 = vpop.f32.mrb[13].mxu1  ;;  %v8652_v3 = vld [vmem:[%s10408_s15 + $0x50] sm:$0xff]   ;;  %v8654_v7 = vld [vmem:[%s10408_s15 + $0x58] sm:$0xff]  }
 0x65f   : > { %v6072_v24 = vadd.f32 %v6071_v10, %v5830_v4  ;;  %v6073_v11 = vpop.f32.mrb[14].mxu1  ;;  %v8653_v4 = vld [vmem:[%s10408_s15 + $0x10] sm:$0xff]   ;;  %v8656_v10 = vld [vmem:[%s10408_s15 + $0x60] sm:$0xff]  }
 0x660   : > { %v6117_v12 = vmax.f32 %v6070_v8, 0.0  ;;  %v6074_v13 = vpop.f32.mrb[15].mxu1  ;;  %v8655_v8 = vld [vmem:[%s10408_s15 + $0x18] sm:$0xff]   ;;  %v8658_v11 = vld [vmem:[%s10408_s15 + $0x68] sm:$0xff]  }
 0x661   : > { %v6118_v14 = vmax.f32 %v6072_v24, 0.0  ;;  %v8657_v24 = vld [vmem:[%s10408_s15 + $0x20] sm:$0xff]   ;;  %v8660_v13 = vld [vmem:[%s10408_s15 + $0x70] sm:$0xff]  }
 0x662   : > { %v6121_v16 = vpack.c.bf16 %v6117_v12, %v6117_v12  ;;  %v8659_v12 = vld [vmem:[%s10408_s15 + $0x28] sm:$0xff]  }
 0x663   : > { %v6122_v5 = vpack.c.bf16 %v6118_v14, %v6118_v14  ;;  %v8661_v14 = vld [vmem:[%s10408_s15 + $0x30] sm:$0xff]  }
 0x665   : > { %6553 = vmatprep.mubr.bf16.mxu1 %v6122_v5  ;;  %v8662_v5 = vld [vmem:[%s10408_s15 + $0x78] sm:$0xff]  }
 0x666   : > { %6554 = vmatmul.mubr.bf16.vlgmr.msra.gmra.mrb[20].mxu1 %v6121_v16  ;;  %v6189_v16 = vld [vmem:[%s10407_s14] sm:$0x3] }
 0x667   : > { %6563 = vmatpush1.bf16.msra.mxu1 %v8600_v15  ;;  %v8663_v15 = vld [vmem:[%s10408_s15 + $0x38] sm:$0xff]  }
 0x668   : > { %6564 = vmatprep.subr.bf16.mxu1 %v8605_v54  ;;  %v6194_v54 = vrot.slane %v6189_v16, %v5825_v25 }
 0x66b   : > { %6565 = vmatpush1.bf16.msra.mxu1 %v8603_v18  ;;  %v6198_v18 = vrot.slane %v6189_v16, %v5829_v21 }
 0x66c   : > { %6566 = vmatprep.subr.bf16.mxu1 %v8608_v19 }
 0x66f   : > { %6567 = vmatpush1.bf16.msra.mxu1 %v8606_v20 }
 0x670   : > { %6568 = vmatprep.subr.bf16.mxu1 %v8611_v17 }
 0x673   : > { %6569 = vmatpush1.bf16.msra.mxu1 %v8609_v22 }
 0x674   : > { %6570 = vmatprep.subr.bf16.mxu1 %v8614_v34 }
 0x677   : > { %6571 = vmatpush1.bf16.msra.mxu1 %v8612_v27 }
 0x678   : > { %6572 = vmatprep.subr.bf16.mxu1 %v8617_v28 }
 0x67b   : > { %6573 = vmatpush1.bf16.msra.mxu1 %v8615_v29 }
 0x67c   : > { %6574 = vmatprep.subr.bf16.mxu1 %v8620_v32 }
 0x67d   : > { %v6110_v37 = vpop.f32.mrb[16].mxu1 }
 0x67e   : > { %v6112_v38 = vpop.f32.mrb[17].mxu1  ;;  %v6111_v56 = vadd.f32 %v6110_v37, %v5834_v52 }
 0x67f   : > { %v6113_v39 = vadd.f32 %v6112_v38, %v5838_v33  ;;  %v6114_v31 = vpop.f32.mrb[18].mxu1  ;;  %6575 = vmatpush1.bf16.msra.mxu1 %v8618_v35 }
 0x680   : > { %v6115_v9 = vpop.f32.mrb[19].mxu1  ;;  %6576 = vmatprep.subr.bf16.mxu1 %v8623_v36  ;;  %v6119_v60 = vmax.f32 %v6111_v56, 0.0 }
 0x681   : > { %v6120_v40 = vmax.f32 %v6113_v39, 0.0 }
 0x682   : > { %v6123_v0 = vpack.c.bf16 %v6119_v60, %v6119_v60 }
 0x683   : > { %v6124_v42 = vpack.c.bf16 %v6120_v40, %v6120_v40  ;;  %6577 = vmatpush1.bf16.msra.mxu1 %v8621_v6 }
 0x684   : > { %6578 = vmatprep.subr.bf16.mxu1 %v8626_v61 }
 0x685   : > { %6594 = vmatprep.mubr.bf16.mxu1 %v6124_v42 }
 0x687   : > { %6579 = vmatpush1.bf16.msra.mxu1 %v8624_v43 }
 0x688   : > { %6580 = vmatprep.subr.bf16.mxu1 %v8629_v44 }
 0x68b   : > { %6581 = vmatpush1.bf16.msra.mxu1 %v8627_v45 }
 0x68c   : > { %6582 = vmatprep.subr.bf16.mxu1 %v8632_v46 }
 0x68f   : > { %6583 = vmatpush1.bf16.msra.mxu1 %v8630_v47 }
 0x690   : > { %6584 = vmatprep.subr.bf16.mxu1 %v8635_v48 }
 0x693   : > { %6585 = vmatpush1.bf16.msra.mxu1 %v8633_v49 }
 0x694   : > { %6586 = vmatprep.subr.bf16.mxu1 %v8638_v50 }
 0x697   : > { %6587 = vmatpush1.bf16.msra.mxu1 %v8636_v59 }
 0x698   : > { %6588 = vmatprep.subr.bf16.mxu1 %v8641_v30 }
 0x69b   : > { %6589 = vmatpush1.bf16.msra.mxu1 %v8639_v26 }
 0x69c   : > { %6590 = vmatprep.subr.bf16.mxu1 %v8644_v53 }
 0x69f   : > { %6591 = vmatpush1.bf16.msra.mxu1 %v8642_v55 }
 0x6a0   : > { %6592 = vmatprep.subr.bf16.mxu1 %v8647_v57 }
 0x6a3   : > { %6593 = vmatpush1.bf16.msra.mxu1 %v8645_v58 }
 0x6a4   : > { %7666 = vmatprep.subr.bf16.mxu1 %v8648_v62 }
 0x6a6   : > { %6595 = vmatmul.mubr.bf16.vlgmr.msra.gmra.mrb[20].mxu1 %v6123_v0 }
 0x6a7   : > { %7667 = vmatpush3.bf16.msra.mxu1 %v8649_v63 }
 0x6a8   : > { %7668 = vmatprep.subr.bf16.mxu1 %v8650_v1 }
 0x6ab   : > { %7669 = vmatpush3.bf16.msra.mxu1 %v8651_v2 }
 0x6ac   : > { %7670 = vmatprep.subr.bf16.mxu1 %v8652_v3 }
 0x6af   : > { %7671 = vmatpush3.bf16.msra.mxu1 %v8653_v4 }
 0x6b0   : > { %7672 = vmatprep.subr.bf16.mxu1 %v8654_v7 }
 0x6b3   : > { %7673 = vmatpush3.bf16.msra.mxu1 %v8655_v8 }
 0x6b4   : > { %7674 = vmatprep.subr.bf16.mxu1 %v8656_v10 }
 0x6b7   : > { %7675 = vmatpush3.bf16.msra.mxu1 %v8657_v24 }
 0x6b8   : > { %7676 = vmatprep.subr.bf16.mxu1 %v8658_v11 }
 0x6bb   : > { %7677 = vmatpush3.bf16.msra.mxu1 %v8659_v12 }
 0x6bc   : > { %7678 = vmatprep.subr.bf16.mxu1 %v8660_v13 }
 0x6bf   : > { %7679 = vmatpush3.bf16.msra.mxu1 %v8661_v14 }
 0x6c0   : > { %7680 = vmatprep.subr.bf16.mxu1 %v8662_v5 }
 0x6c3   : > { %7681 = vmatpush3.bf16.msra.mxu1 %v8663_v15 }
 0x779   : > { %v6596_v19 = vpop.f32.mrb[20].mxu1 }
 0x77a   : > { %v8372_v20 = vadd.f32 %v6596_v19, %v6194_v54  ;;  %v6598_v17 = vpop.f32.mrb[21].mxu1 }
 0x77b   : > { %v8373_v22 = vadd.f32 %v6598_v17, %v6198_v18  ;;  %v6600_v34 = vpop.f32.mrb[22].mxu1 }
 0x77c   : > { %v6603_v27 = vmax.f32 %v8372_v20, 0.0  ;;  %v6601_v28 = vpop.f32.mrb[23].mxu1 }
 0x77d   : > { %v6604_v29 = vmax.f32 %v8373_v22, 0.0 }
 0x77e   : > { %v6605_v32 = vpack.c.bf16 %v6603_v27, %v6603_v27 }
 0x77f   : > { %v6606_v23 = vpack.c.bf16 %v6604_v29, %v6604_v29 }
 0x781   : > { %6774 = vmatprep.mubr.bf16.mxu1 %v6606_v23 }
 0x782   : > { %6775 = vmatmul.mubr.bf16.vlgmr.msra.gmra.mrb[24].mxu1 %v6605_v32 }
 0x855   : > { %v7682_v25 = vpop.f32.mrb[24].mxu1 }
 0x856   : > { %v7683_v21 = vpop.f32.mrb[25].mxu1 }
 0x857   : > { %v7684_v33 = vadd.f32 %v7683_v21, %v7682_v25  ;;  %v7685_v35 = vpop.f32.mrb[26].mxu1 }
 0x858   : > { %v7686_v36 = vpop.f32.mrb[27].mxu1 }
 0x859   : > { %v6777_v37 = vadd.f32 %v7684_v33, %v7304_v41 }
 0x85b   : > { %6782 = vst [vmem:[%s542_s19] sm:$0xff] %v6777_v37 }
 0x85c   : > { %8682 = shalt.err (!%p8679_p3)
}
 0x85d   : > { %s8683_s29 = scalar_lea.hbm %s10351_s20, 128  ;;  %s8687_s22 = scalar_lea.hbm %s10410_s17, 256 }
 0x85e   : > { %p8684_p4 = scmp.ne.s32.totalorder %s10351_s20, %s8683_s29  ;;  %p8688_p9 = scmp.lt.u32.totalorder %s10351_s20, %s10410_s17 }
 0x85f   : > { %p8689_p10 = scmp.lt.u32.totalorder %s8687_s22, %s8683_s29  ;;  %p8691_p12 = scmp.lt.u32.totalorder %s8683_s29, %s10351_s20 }
 0x860   : > { %p8685_p7 = pnand %p8684_p4, %p8860_p5 }
 0x861   : > { %p8690_p11 = por %p8689_p10, %p8688_p9 }
 0x862   : > { %p8686_p8 = pneg %p8685_p7 }
 0x863   : > { %p8692_p13 = por %p8691_p12, %p8690_p11 }
 0x865   : > { %p8693_p0 = pnand %p8692_p13, %p8686_p8 }
 0x867   : > { %8696 = shalt.err (!%p8693_p0)
}
 0x868   : > { %8380 = dma.vmem_to_hbm [thread:$0]  (%p8860_p5), %s10353_s21, 128, %s10351_s20, %s6784_s30  }
 0x869 PF: > { %p8386_p1 = scmp.ge.s32.totalorder %s8731_s27, 2  ;;  %s6809_s28 = sand.u32 1, %s8719_s24  }
 0x86a   : > { %s6810_s0 = scalar_lea.sflag [#allocation3], %s6809_s28 }
 0x86b   : > { %p8383_p2 = pnand %p8386_p1, %p8864_p6 }
 0x86d   : > { %8714 = dma.done.wait (!%p8383_p2), %s6810_s0, 128  }
 0x86e   : > { %8716 = vsyncadd (!%p8383_p2), %s6810_s0, 4294967168  ;;  %s10428_s27 = sld [smem:[#allocation6_spill]]  ;;  %s10429_s29 = sld [smem:[#allocation5_spill]] }
 0x86f   : > { %s10430_s26 = sld [smem:[#allocation7_spill]]  ;;  %s10431_s24 = smov %s8723_s25 }
 0x874   : > { %p27_p3 = scmp.ge.s32.totalorder %s10428_s27, 4   ;;  %s10432_s25 = smov %s10429_s29 }
 0x876   :  { %29 = sbr.rel (!%p27_p3) target bundleno = 7 (0x7), region = 123 }
 0x87d   :  { %6815 = vsyncpa [#allocation3], 1 }
 0x87e   :  { %6817 = vsyncpa [#allocation3 + $0x1], 1 }

// kernel: tpu_custom_call.1
= control target key start
LH: loop header
LB: loop body
LE: loop exit
PB: predicated region body
PF: predicated region fallthrough
CT: control target
= control target key end

     0   :  { %s10393_s0 = inlined_call_operand.vmem [shape: bf16[2048,8], index: 0, kind: input, shape index: {}]   ;;  %s10394_s1 = inlined_call_operand.vmem [shape: bf16[8,64], index: 1, kind: input, shape index: {}]   ;;  %s10395_s2 = inlined_call_operand.vmem [shape: f32[1,64], index: 2, kind: input, shape index: {}]   ;;  %s10396_s3 = inlined_call_operand.vmem [shape: bf16[64,64], index: 3, kind: input, shape index: {}]   ;;  %s10397_s4 = inlined_call_operand.vmem [shape: f32[1,64], index: 4, kind: input, shape index: {}]   ;;  %s10398_s5 = inlined_call_operand.vmem [shape: bf16[64,64], index: 5, kind: input, shape index: {}]   ;;  %s10399_s6 = inlined_call_operand.vmem [shape: f32[1,64], index: 6, kind: input, shape index: {}]   ;;  %s10400_s7 = inlined_call_operand.vmem [shape: bf16[64,128], index: 7, kind: input, shape index: {}]   ;;  %s10401_s8 = inlined_call_operand.vmem [shape: f32[1,128], index: 8, kind: input, shape index: {}]   ;;  %s10402_s9 = inlined_call_operand.vmem [shape: bf16[128,128], index: 9, kind: input, shape index: {}]   ;;  %s10403_s10 = inlined_call_operand.vmem [shape: f32[1,128], index: 10, kind: input, shape index: {}]   ;;  %s10404_s11 = inlined_call_operand.vmem [shape: bf16[128,512], index: 11, kind: input, shape index: {}]   ;;  %s10405_s12 = inlined_call_operand.vmem [shape: f32[1,512], index: 12, kind: input, shape index: {}]   ;;  %s10406_s13 = inlined_call_operand.vmem [shape: bf16[512,256], index: 13, kind: input, shape index: {}]   ;;  %s10407_s14 = inlined_call_operand.vmem [shape: f32[1,256], index: 14, kind: input, shape index: {}]   ;;  %s10408_s15 = inlined_call_operand.vmem [shape: bf16[256,128], index: 15, kind: input, shape index: {}]   ;;  %s10409_s16 = inlined_call_operand.vmem [shape: f32[1,128], index: 16, kind: input, shape index: {}]   ;;  %s10410_s17 = inlined_call_operand.hbm [shape: f32[16,128], index: 17, kind: output, shape index: {}]  }
   0x1   :  { %10415 = sst [smem:[#allocation9_spill]] %s10393_s0 }
   0x2   :  { %10416 = sst [smem:[#allocation10_spill]] %s10394_s1 }
   0x3   :  { %10417 = sst [smem:[#allocation11_spill]] %s10395_s2 }
   0x4   :  { %22 = vsyncpa [#allocation3], 0 }
   0x5   :  { %24 = vsyncpa [#allocation3 + $0x1], 0  ;;  %s8825_s24 = smov 0   ;;  %s8827_s25 = smov 0  }
   0x6   :  { %s8829_s26 = smov 0   ;;  %s8831_s27 = smov 0  }
   0x7 LB: > { %10418 = sst [smem:[#allocation5_spill]] %s8727_s26  ;;  %s6855_s28 = sadd.s32 4294967295, %s8731_s27   ;;  %s8731_s27 = sphi %s8831_s27, %s10428_s27   ;;  %s8727_s26 = sphi %s8829_s26, %s10430_s26   ;;  %s8723_s25 = sphi %s8827_s25, %s10432_s25   ;;  %s8719_s24 = sphi %s8825_s24, %s10431_s24  }
   0x8   : > { %s6856_s29 = sadd.s32 4294967294, %s8731_s27   ;;  %s8848_s0 = sadd.s32 1, %s8731_s27  }
   0x9   : > { %10419 = sst [smem:[#allocation6_spill]] %s8848_s0  ;;  %s399_s30 = sadd.s32 1, %s8727_s26 }
   0xa   : > { %s396_s18 = ssub.s32 %s8731_s27, %s8848_s0  ;;  %p409_p0 = scmp.ne.s32.totalorder %s8727_s26, %s8723_s25 }
   0xb   : > { %p397_p1 = scmp.eq.s32.totalorder %s396_s18, 0  ;;  %p410_p2 = scmp.eq.s32.totalorder %s6855_s28, 1 }
   0xc   : > { %p415_p3 = scmp.ne.s32.totalorder %s8723_s25, %s8719_s24  ;;  %p416_p4 = scmp.eq.s32.totalorder %s6856_s29, 1 }
   0xd   : > { %s8858_s19 = scalar_select %p397_p1, %s8727_s26, %s399_s30  }
   0xe   : > { %p8860_p5 = por %p410_p2, %p409_p0  ;;  %p8864_p6 = por %p416_p4, %p415_p3 }
   0xf   : > { %10420 = sst [smem:[#allocation7_spill]] %s8858_s19  ;;  %p6859_p7 = scmp.ge.s32.totalorder %s8731_s27, 1 }
  0x10   : > { %s10422_s20 = scalar_select %p8864_p6, 1, 0 }
  0x11   : > { %p491_p8 = scmp.lt.s32.totalorder %s8731_s27, 3 }
  0x12   : > { %10423 = sst [smem:[#allocation8_spill]] %s10422_s20 }
  0x13   : > { %p492_p9 = pnand %p6859_p7, %p491_p8 }
  0x14   : > { %s10424_s23 = sld [smem:[#allocation10_spill]] (!%p492_p9)  ;;  %vm1199_vm0 = vcmask (!%p492_p9), 1043456   ;;  %s8873_s29 = sshll.u32 (!%p492_p9), %s6855_s28, 7  ;;  %vm1006_vm1 = vcmask (!%p492_p9), 64512   ;;  %v8472_v23 = vld [vmem:[%s10396_s3] sm:$0xff] (!%p492_p9)   ;;  %v8477_v28 = vld [vmem:[%s10396_s3 + $0x8] sm:$0xff] (!%p492_p9)  }
  0x15   : > { %495 = sbr.rel (%p492_p9) target bundleno = 2153 (0x869), region = 88  ;;  %p544_p10 = scmp.lt.s32.totalorder (!%p492_p9), %s8873_s29, 255  ;;  %v8480_v31 = vld [vmem:[%s10396_s3 + $0x10] sm:$0xff] (!%p492_p9)   ;;  %v8483_v36 = vld [vmem:[%s10398_s5] sm:$0xff] (!%p492_p9)   ;;  %v8485_v37 = vld [vmem:[%s10396_s3 + $0x18] sm:$0xff] (!%p492_p9)   ;;  %vm1979_vm2 = vcmask (!%p492_p9), 523264  }
  0x16   : > { %s10425_s0 = sld [smem:[#allocation9_spill]] (!%p492_p9)  ;;  %v8489_v52 = vld [vmem:[%s10398_s5 + $0x8] sm:$0xff] (!%p492_p9)   ;;  %s10426_s2 = sld [smem:[#allocation11_spill]] (!%p492_p9)  ;;  %vm5859_vm3 = vcmask (!%p492_p9), 1041409   ;;  %vm5861_vm4 = vcmask (!%p492_p9), 1042434   ;;  %vm5863_vm5 = vcmask (!%p492_p9), 1043459  }
  0x17   : > { %vm5865_vm6 = vcmask (!%p492_p9), 1044484   ;;  %vm5867_vm7 = vcmask (!%p492_p9), 1045509   ;;  %vm5869_vm8 = vcmask (!%p492_p9), 1046534   ;;  %vm5871_vm9 = vcmask (!%p492_p9), 1047559  }
  0x1a   : > { %v678_v0 = vld [vmem:[%s10424_s23] sm:$0xf] (!%p492_p9) }
  0x1b   : > { %8378 = vmatprep.subr.msk.bf16.mxu0 (!%p492_p9), %vm1199_vm0, %v678_v0  ;;  %v1201_v1 = vsel (!%p492_p9), %vm1199_vm0, %v678_v0, 0  ;;  %8379 = vmatprep.subr.msk.bf16.mxu1 (!%p492_p9), %vm1199_vm0, %v678_v0 }
  0x1c   : > { %7689 = vmatpush3.bf16.msra.mxu0 %v1201_v1  ;;  %8371 = vmatpush3.bf16.msra.mxu1 %v1201_v1  ;;  %s545_s30 = scalar_select %p544_p10, %s8873_s29, 255 }
  0x1d   : > { %7818 = vmatprep.subr.bf16.mxu1 %v8472_v23  ;;  %7954 = vmatprep.subr.bf16.mxu0 %v8483_v36 }
  0x1e   : > { %s6862_s18 = sshll.u32 %s545_s30, 2 }
  0x1f   : > { %s8880_s20 = scalar_lea.vmem %s10425_s0, %s6862_s18  ;;  %s540_s18 = sand.u32 1, %s8723_s25  }
  0x20   : > { %v8420_v2 = vld [vmem:[%s8880_s20] sm:$0xff]   ;;  %v8421_v3 = vld [vmem:[%s8880_s20 + $0x8] sm:$0xff]   ;;  %v8422_v4 = vld [vmem:[%s8880_s20 + $0x10] sm:$0xff]   ;;  %s6860_s26 = sshll.u32 %s540_s18, 3  ;;  %s6784_s30 = scalar_lea.sflag [#allocation3], %s540_s18 }
  0x21   : > { %7690 = vmatprep.mubr.msk.bf16.mxu0 %vm1006_vm1, %v8420_v2  ;;  %v8423_v5 = vld [vmem:[%s8880_s20 + $0x18] sm:$0xff]   ;;  %v8424_v6 = vld [vmem:[%s8880_s20 + $0x20] sm:$0xff]   ;;  %v8425_v7 = vld [vmem:[%s8880_s20 + $0x28] sm:$0xff]   ;;  %s542_s19 = scalar_lea.vmem [#allocation2], %s6860_s26  ;;  %s8734_s26 = smov [#allocation2]  }
  0x22   : > { %7691 = vmatmul.mubr.msk.bf16.vlgmr.msra.gmra.mrb[0].mxu0 %vm1006_vm1, %v8421_v3  ;;  %v8426_v8 = vld [vmem:[%s8880_s20 + $0x30] sm:$0xff]   ;;  %v8427_v9 = vld [vmem:[%s8880_s20 + $0x38] sm:$0xff]   ;;  %v8428_v10 = vld [vmem:[%s8880_s20 + $0x40] sm:$0xff]   ;;  %s6797_s21 = sshll.u32 %s542_s19, 4  ;;  %s8673_s0 = sshll.u32 %s8734_s26, 4  ;;  %s10353_s21 = int_to_ptr.vmem [resolvable:$true] %s6797_s21  ;;  %s8674_s0 = int_to_ptr.vmem [resolvable:$false] %s8673_s0 }
  0x23   : > { %7694 = vmatprep.mubr.msk.bf16.mxu0 %vm1006_vm1, %v8422_v4  ;;  %v8429_v11 = vld [vmem:[%s8880_s20 + $0x48] sm:$0xff]   ;;  %v8430_v12 = vld [vmem:[%s8880_s20 + $0x50] sm:$0xff]   ;;  %v8431_v13 = vld [vmem:[%s8880_s20 + $0x58] sm:$0xff]   ;;  %7955 = vmatpush3.bf16.msra.mxu0 %v8483_v36  ;;  %s8669_s28 = scalar_lea.vmem %s10353_s21, 128  ;;  %p8676_p0 = scmp.lt.s32.totalorder %s10353_s21, %s8674_s0 }
  0x24   : > { %v8432_v14 = vld [vmem:[%s8880_s20 + $0x60] sm:$0xff]   ;;  %v8433_v15 = vld [vmem:[%s8880_s20 + $0x68] sm:$0xff]   ;;  %v8434_v16 = vld [vmem:[%s8880_s20 + $0x70] sm:$0xff]   ;;  %7956 = vmatprep.subr.bf16.mxu0 %v8489_v52  ;;  %p8670_p11 = scmp.ne.s32.totalorder %s10353_s21, %s8669_s28 }
  0x25   : > { %v8435_v17 = vld [vmem:[%s8880_s20 + $0x78] sm:$0xff]   ;;  %v8436_v18 = vld [vmem:[%s8880_s20 + $0x80] sm:$0xff]   ;;  %v8437_v19 = vld [vmem:[%s8880_s20 + $0x88] sm:$0xff]  }
  0x26   : > { %v8438_v20 = vld [vmem:[%s8880_s20 + $0x90] sm:$0xff]   ;;  %v8471_v22 = vld [vmem:[%s8880_s20 + $0x1d8] sm:$0xff]   ;;  %v8440_v25 = vld [vmem:[%s8880_s20 + $0xa0] sm:$0xff]   ;;  %p8671_p12 = pnand %p8670_p11, %p8860_p5 }
  0x27   : > { %v8470_v21 = vld [vmem:[%s8880_s20 + $0x1d0] sm:$0xff]   ;;  %v8439_v24 = vld [vmem:[%s8880_s20 + $0x98] sm:$0xff]   ;;  %v8475_v26 = vld [vmem:[%s8880_s20 + $0x1e0] sm:$0xff]   ;;  %7957 = vmatpush3.bf16.msra.mxu0 %v8489_v52 }
  0x28   : > { %7806 = vmatprep.mubr.msk.bf16.mxu1 %vm1006_vm1, %v8470_v21  ;;  %v8476_v27 = vld [vmem:[%s8880_s20 + $0x1e8] sm:$0xff]   ;;  %v8442_v30 = vld [vmem:[%s8880_s20 + $0xb0] sm:$0xff]   ;;  %v8482_v33 = vld [vmem:[%s8880_s20 + $0x1f8] sm:$0xff]   ;;  %p8672_p13 = pneg %p8671_p12 }
  0x29   : > { %7807 = vmatmul.mubr.msk.bf16.vlgmr.msra.gmra.mrb[0].mxu1 %vm1006_vm1, %v8471_v22  ;;  %v8441_v29 = vld [vmem:[%s8880_s20 + $0xa8] sm:$0xff]   ;;  %v8481_v32 = vld [vmem:[%s8880_s20 + $0x1f0] sm:$0xff]   ;;  %v8443_v34 = vld [vmem:[%s8880_s20 + $0xb8] sm:$0xff]  }
  0x2a   : > { %7695 = vmatmul.mubr.msk.bf16.gmra.mrb[4].mxu0 %vm1006_vm1, %v8423_v5  ;;  %7819 = vmatpush3.bf16.msra.mxu1 %v8472_v23  ;;  %v8444_v35 = vld [vmem:[%s8880_s20 + $0xc0] sm:$0xff]   ;;  %v8445_v38 = vld [vmem:[%s8880_s20 + $0xc8] sm:$0xff]   ;;  %v8446_v39 = vld [vmem:[%s8880_s20 + $0xd0] sm:$0xff]  }
  0x2b   : > { %7698 = vmatprep.mubr.msk.bf16.mxu0 %vm1006_vm1, %v8424_v6  ;;  %7810 = vmatprep.mubr.msk.bf16.mxu1 %vm1006_vm1, %v8475_v26  ;;  %v8447_v40 = vld [vmem:[%s8880_s20 + $0xd8] sm:$0xff]   ;;  %v8448_v41 = vld [vmem:[%s8880_s20 + $0xe0] sm:$0xff]   ;;  %v8449_v42 = vld [vmem:[%s8880_s20 + $0xe8] sm:$0xff]  }
  0x2c   : > { %7820 = vmatprep.subr.bf16.mxu1 %v8477_v28  ;;  %v8450_v43 = vld [vmem:[%s8880_s20 + $0xf0] sm:$0xff]   ;;  %v8451_v44 = vld [vmem:[%s8880_s20 + $0xf8] sm:$0xff]   ;;  %v8452_v45 = vld [vmem:[%s8880_s20 + $0x100] sm:$0xff]  }
  0x2d   : > { %v8453_v46 = vld [vmem:[%s8880_s20 + $0x108] sm:$0xff]   ;;  %v8454_v47 = vld [vmem:[%s8880_s20 + $0x110] sm:$0xff]   ;;  %v8455_v48 = vld [vmem:[%s8880_s20 + $0x118] sm:$0xff]  }
  0x2e   : > { %7821 = vmatpush3.bf16.msra.mxu1 %v8477_v28  ;;  %v8456_v49 = vld [vmem:[%s8880_s20 + $0x120] sm:$0xff]   ;;  %v8457_v50 = vld [vmem:[%s8880_s20 + $0x128] sm:$0xff]   ;;  %v8458_v51 = vld [vmem:[%s8880_s20 + $0x130] sm:$0xff]  }
  0x2f   : > { %7822 = vmatprep.subr.bf16.mxu1 %v8480_v31  ;;  %v8459_v53 = vld [vmem:[%s8880_s20 + $0x138] sm:$0xff]   ;;  %v8460_v54 = vld [vmem:[%s8880_s20 + $0x140] sm:$0xff]   ;;  %v8461_v55 = vld [vmem:[%s8880_s20 + $0x148] sm:$0xff]  }
  0x30   : > { %v8462_v56 = vld [vmem:[%s8880_s20 + $0x150] sm:$0xff]   ;;  %v8463_v57 = vld [vmem:[%s8880_s20 + $0x158] sm:$0xff]   ;;  %v8464_v58 = vld [vmem:[%s8880_s20 + $0x160] sm:$0xff]  }
  0x31   : > { %7811 = vmatmul.mubr.msk.bf16.gmra.mrb[4].mxu1 %vm1006_vm1, %v8476_v27  ;;  %v8465_v59 = vld [vmem:[%s8880_s20 + $0x168] sm:$0xff]   ;;  %v8466_v60 = vld [vmem:[%s8880_s20 + $0x170] sm:$0xff]   ;;  %v8467_v61 = vld [vmem:[%s8880_s20 + $0x178] sm:$0xff]  }
  0x32   : > { %7699 = vmatmul.mubr.msk.bf16.gmra.mrb[8].mxu0 %vm1006_vm1, %v8425_v7  ;;  %7814 = vmatprep.mubr.msk.bf16.mxu1 %vm1006_vm1, %v8481_v32  ;;  %v8468_v62 = vld [vmem:[%s8880_s20 + $0x180] sm:$0xff]   ;;  %v8469_v63 = vld [vmem:[%s8880_s20 + $0x188] sm:$0xff]   ;;  %v8473_v0 = vld [vmem:[%s8880_s20 + $0x190] sm:$0xff]  }
  0x33   : > { %7702 = vmatprep.mubr.msk.bf16.mxu0 %vm1006_vm1, %v8426_v8  ;;  %7823 = vmatpush3.bf16.msra.mxu1 %v8480_v31  ;;  %v8474_v1 = vld [vmem:[%s8880_s20 + $0x198] sm:$0xff]   ;;  %v8478_v2 = vld [vmem:[%s8880_s20 + $0x1a0] sm:$0xff]   ;;  %v8490_v3 = vld [vmem:[%s10398_s5 + $0x10] sm:$0xff]  }
  0x34   : > { %7824 = vmatprep.subr.bf16.mxu1 %v8485_v37  ;;  %v8479_v4 = vld [vmem:[%s8880_s20 + $0x1a8] sm:$0xff]   ;;  %v8484_v5 = vld [vmem:[%s8880_s20 + $0x1b0] sm:$0xff]   ;;  %7958 = vmatprep.subr.bf16.mxu0 %v8490_v3  ;;  %v9027_v6 = vld [vmem:[%s10426_s2] ss:$0 sm:$0xff] }
  0x35   : > { %7959 = vmatpush3.bf16.msra.mxu0 %v8490_v3  ;;  %v8488_v26 = vld [vmem:[%s8880_s20 + $0x1c8] sm:$0xff]  }
  0x37   : > { %7825 = vmatpush3.bf16.msra.mxu1 %v8485_v37 }
  0x39   : > { %7815 = vmatmul.mubr.msk.bf16.gmra.mrb[8].mxu1 %vm1006_vm1, %v8482_v33 }
  0x3a   : > { %7703 = vmatmul.mubr.msk.bf16.gmra.mrb[12].mxu0 %vm1006_vm1, %v8427_v9 }
  0x3b   : > { %7706 = vmatprep.mubr.msk.bf16.mxu0 %vm1006_vm1, %v8428_v10  ;;  %v8486_v10 = vld [vmem:[%s8880_s20 + $0x1b8] sm:$0xff]  }
  0x42   : > { %7707 = vmatmul.mubr.msk.bf16.gmra.mrb[16].mxu0 %vm1006_vm1, %v8429_v11 }
  0x43   : > { %7710 = vmatprep.mubr.msk.bf16.mxu0 %vm1006_vm1, %v8430_v12 }
  0x4a   : > { %7711 = vmatmul.mubr.msk.bf16.gmra.mrb[20].mxu0 %vm1006_vm1, %v8431_v13  ;;  %v8487_v13 = vld [vmem:[%s8880_s20 + $0x1c0] sm:$0xff]   ;;  %s10351_s20 = scalar_lea.hbm %s10410_s17, %s8873_s29 }
  0x4b   : > { %7714 = vmatprep.mubr.msk.bf16.mxu0 %vm1006_vm1, %v8432_v14 }
  0x52   : > { %7715 = vmatmul.mubr.msk.bf16.gmra.mrb[24].mxu0 %vm1006_vm1, %v8433_v15 }
  0x53   : > { %7718 = vmatprep.mubr.msk.bf16.mxu0 %vm1006_vm1, %v8434_v16 }
  0x5a   : > { %7719 = vmatmul.mubr.msk.bf16.gmra.mrb[28].mxu0 %vm1006_vm1, %v8435_v17 }
  0x5b   : > { %7722 = vmatprep.mubr.msk.bf16.mxu0 %vm1006_vm1, %v8436_v18 }
  0x62   : > { %7723 = vmatmul.mubr.msk.bf16.gmra.mrb[32].mxu0 %vm1006_vm1, %v8437_v19 }
  0x63   : > { %7726 = vmatprep.mubr.msk.bf16.mxu0 %vm1006_vm1, %v8438_v20 }
  0x6a   : > { %7727 = vmatmul.mubr.msk.bf16.gmra.mrb[36].mxu0 %vm1006_vm1, %v8439_v24 }
  0x6b   : > { %7730 = vmatprep.mubr.msk.bf16.mxu0 %vm1006_vm1, %v8440_v25 }
  0x72   : > { %7731 = vmatmul.mubr.msk.bf16.gmra.mrb[40].mxu0 %vm1006_vm1, %v8441_v29 }
  0x73   : > { %7734 = vmatprep.mubr.msk.bf16.mxu0 %vm1006_vm1, %v8442_v30 }
  0x7a   : > { %7735 = vmatmul.mubr.msk.bf16.gmra.mrb[44].mxu0 %vm1006_vm1, %v8443_v34 }
  0x7b   : > { %7738 = vmatprep.mubr.msk.bf16.mxu0 %vm1006_vm1, %v8444_v35 }
  0x82   : > { %7739 = vmatmul.mubr.msk.bf16.gmra.mrb[48].mxu0 %vm1006_vm1, %v8445_v38 }
  0x83   : > { %7742 = vmatprep.mubr.msk.bf16.mxu0 %vm1006_vm1, %v8446_v39 }
  0x8a   : > { %7743 = vmatmul.mubr.msk.bf16.gmra.mrb[52].mxu0 %vm1006_vm1, %v8447_v40 }
  0x8b   : > { %7746 = vmatprep.mubr.msk.bf16.mxu0 %vm1006_vm1, %v8448_v41 }
  0x92   : > { %7747 = vmatmul.mubr.msk.bf16.gmra.mrb[56].mxu0 %vm1006_vm1, %v8449_v42 }
  0x93   : > { %7750 = vmatprep.mubr.msk.bf16.mxu0 %vm1006_vm1, %v8450_v43 }
  0x9a   : > { %7751 = vmatmul.mubr.msk.bf16.gmra.mrb[60].mxu0 %vm1006_vm1, %v8451_v44 }
  0x9b   : > { %7754 = vmatprep.mubr.msk.bf16.mxu0 %vm1006_vm1, %v8452_v45 }
  0xa2   : > { %7755 = vmatmul.mubr.msk.bf16.gmra.mrb[64].mxu0 %vm1006_vm1, %v8453_v46 }
  0xa3   : > { %7758 = vmatprep.mubr.msk.bf16.mxu0 %vm1006_vm1, %v8454_v47 }
  0xaa   : > { %7759 = vmatmul.mubr.msk.bf16.gmra.mrb[68].mxu0 %vm1006_vm1, %v8455_v48 }
  0xab   : > { %7762 = vmatprep.mubr.msk.bf16.mxu0 %vm1006_vm1, %v8456_v49 }
  0xb2   : > { %7763 = vmatmul.mubr.msk.bf16.gmra.mrb[72].mxu0 %vm1006_vm1, %v8457_v50 }
  0xb3   : > { %7766 = vmatprep.mubr.msk.bf16.mxu0 %vm1006_vm1, %v8458_v51 }
  0xba   : > { %7767 = vmatmul.mubr.msk.bf16.gmra.mrb[76].mxu0 %vm1006_vm1, %v8459_v53 }
  0xbb   : > { %7770 = vmatprep.mubr.msk.bf16.mxu0 %vm1006_vm1, %v8460_v54 }
  0xc2   : > { %7771 = vmatmul.mubr.msk.bf16.gmra.mrb[80].mxu0 %vm1006_vm1, %v8461_v55 }
  0xc3   : > { %7774 = vmatprep.mubr.msk.bf16.mxu0 %vm1006_vm1, %v8462_v56 }
  0xca   : > { %7775 = vmatmul.mubr.msk.bf16.gmra.mrb[84].mxu0 %vm1006_vm1, %v8463_v57 }
  0xcb   : > { %7778 = vmatprep.mubr.msk.bf16.mxu0 %vm1006_vm1, %v8464_v58 }
  0xd2   : > { %7779 = vmatmul.mubr.msk.bf16.gmra.mrb[88].mxu0 %vm1006_vm1, %v8465_v59 }
  0xd3   : > { %7782 = vmatprep.mubr.msk.bf16.mxu0 %vm1006_vm1, %v8466_v60 }
  0xda   : > { %7783 = vmatmul.mubr.msk.bf16.gmra.mrb[92].mxu0 %vm1006_vm1, %v8467_v61 }
  0xdb   : > { %7786 = vmatprep.mubr.msk.bf16.mxu0 %vm1006_vm1, %v8468_v62 }
  0xe2   : > { %7787 = vmatmul.mubr.msk.bf16.gmra.mrb[96].mxu0 %vm1006_vm1, %v8469_v63 }
  0xe3   : > { %7790 = vmatprep.mubr.msk.bf16.mxu0 %vm1006_vm1, %v8473_v0 }
  0xea   : > { %7791 = vmatmul.mubr.msk.bf16.gmra.mrb[100].mxu0 %vm1006_vm1, %v8474_v1 }
  0xeb   : > { %7794 = vmatprep.mubr.msk.bf16.mxu0 %vm1006_vm1, %v8478_v2 }
  0xf2   : > { %7795 = vmatmul.mubr.msk.bf16.gmra.mrb[104].mxu0 %vm1006_vm1, %v8479_v4 }
  0xf3   : > { %7798 = vmatprep.mubr.msk.bf16.mxu0 %vm1006_vm1, %v8484_v5 }
  0xf5   : > { %v7692_v7 = vpop.f32.mrb[0].mxu0 }
  0xf6   : > { %v1246_v8 = vadd.f32 %v7692_v7, %v9027_v6  ;;  %v1237_v9 = vpop.f32.mrb[1].mxu0 }
  0xf7   : > { %v1238_v11 = vadd.f32 %v9027_v6, %v1237_v9  ;;  %v7693_v12 = vpop.f32.mrb[2].mxu0 }
  0xf8   : > { %v1249_v14 = vadd.f32 %v7693_v12, %v9027_v6  ;;  %v1240_v15 = vpop.f32.mrb[3].mxu0  ;;  %v1750_v17 = vmax.f32 %v1246_v8, 0.0 }
  0xf9   : > { %v1241_v16 = vadd.f32 %v9027_v6, %v1240_v15  ;;  %v1748_v19 = vmax.f32 %v1238_v11, 0.0 }
  0xfa   : > { %v1751_v18 = vmax.f32 %v1249_v14, 0.0  ;;  %7799 = vmatmul.mubr.msk.bf16.gmra.mrb[108].mxu0 %vm1006_vm1, %v8486_v10 }
  0xfb   : > { %v1749_v20 = vmax.f32 %v1241_v16, 0.0  ;;  %7802 = vmatprep.mubr.msk.bf16.mxu0 %vm1006_vm1, %v8487_v13 }
  0xfc   : > { %v1877_v21 = vpack.c.bf16 %v1751_v18, %v1750_v17 }
  0xfd   : > { %v1876_v22 = vpack.c.bf16 %v1749_v20, %v1748_v19  ;;  %v7696_v23 = vpop.f32.mrb[4].mxu0 }
  0xfe   : > { %v1262_v24 = vadd.f32 %v7696_v23, %v9027_v6  ;;  %v1253_v25 = vpop.f32.mrb[5].mxu0 }
  0xff   : > { %v1254_v27 = vadd.f32 %v9027_v6, %v1253_v25  ;;  %v7697_v28 = vpop.f32.mrb[6].mxu0  ;;  %7826 = vmatprep.mubr.msk.bf16.mxu1 %vm1979_vm2, %v1876_v22 }
 0x100   : > { %v1265_v29 = vadd.f32 %v7697_v28, %v9027_v6  ;;  %v1256_v30 = vpop.f32.mrb[7].mxu0  ;;  %7827 = vmatmul.mubr.msk.bf16.vlgmr.msra.gmra.mrb[12].mxu1 %vm1979_vm2, %v1877_v21  ;;  %v1754_v32 = vmax.f32 %v1262_v24, 0.0 }
 0x101   : > { %v1257_v31 = vadd.f32 %v9027_v6, %v1256_v30  ;;  %v1752_v34 = vmax.f32 %v1254_v27, 0.0 }
 0x102   : > { %v1755_v33 = vmax.f32 %v1265_v29, 0.0  ;;  %7803 = vmatmul.mubr.msk.bf16.gmra.mrb[112].mxu0 %vm1006_vm1, %v8488_v26 }
 0x103   : > { %v1753_v35 = vmax.f32 %v1257_v31, 0.0 }
 0x104   : > { %v1879_v36 = vpack.c.bf16 %v1755_v33, %v1754_v32  ;;  %v8491_v32 = vld [vmem:[%s10398_s5 + $0x18] sm:$0xff]  }
 0x105   : > { %v1878_v37 = vpack.c.bf16 %v1753_v35, %v1752_v34  ;;  %v7700_v38 = vpop.f32.mrb[8].mxu0  ;;  %7960 = vmatprep.subr.bf16.mxu0 %v8491_v32 }
 0x106   : > { %v1278_v39 = vadd.f32 %v7700_v38, %v9027_v6  ;;  %v1269_v40 = vpop.f32.mrb[9].mxu0  ;;  %7961 = vmatpush3.bf16.msra.mxu0 %v8491_v32 }
 0x107   : > { %v1270_v41 = vadd.f32 %v9027_v6, %v1269_v40  ;;  %v7701_v42 = vpop.f32.mrb[10].mxu0  ;;  %7830 = vmatprep.mubr.msk.bf16.mxu1 %vm1979_vm2, %v1878_v37 }
 0x108   : > { %v1281_v43 = vadd.f32 %v7701_v42, %v9027_v6  ;;  %v1272_v44 = vpop.f32.mrb[11].mxu0  ;;  %7831 = vmatmul.mubr.msk.bf16.gmra.mrb[16].mxu1 %vm1979_vm2, %v1879_v36  ;;  %v1758_v46 = vmax.f32 %v1278_v39, 0.0 }
 0x109   : > { %v1273_v45 = vadd.f32 %v9027_v6, %v1272_v44  ;;  %v1756_v48 = vmax.f32 %v1270_v41, 0.0 }
 0x10a   : > { %v1759_v47 = vmax.f32 %v1281_v43, 0.0 }
 0x10b   : > { %v1757_v49 = vmax.f32 %v1273_v45, 0.0 }
 0x10c   : > { %v1881_v50 = vpack.c.bf16 %v1759_v47, %v1758_v46 }
 0x10d   : > { %v1880_v51 = vpack.c.bf16 %v1757_v49, %v1756_v48  ;;  %v7704_v52 = vpop.f32.mrb[12].mxu0 }
 0x10e   : > { %v1294_v53 = vadd.f32 %v7704_v52, %v9027_v6  ;;  %v1285_v54 = vpop.f32.mrb[13].mxu0 }
 0x10f   : > { %v1286_v55 = vadd.f32 %v9027_v6, %v1285_v54  ;;  %v7705_v56 = vpop.f32.mrb[14].mxu0  ;;  %7834 = vmatprep.mubr.msk.bf16.mxu1 %vm1979_vm2, %v1880_v51 }
 0x110   : > { %v1297_v57 = vadd.f32 %v7705_v56, %v9027_v6  ;;  %v1288_v58 = vpop.f32.mrb[15].mxu0  ;;  %7835 = vmatmul.mubr.msk.bf16.gmra.mrb[20].mxu1 %vm1979_vm2, %v1881_v50  ;;  %v1762_v60 = vmax.f32 %v1294_v53, 0.0 }
 0x111   : > { %v1289_v59 = vadd.f32 %v9027_v6, %v1288_v58  ;;  %v1760_v62 = vmax.f32 %v1286_v55, 0.0 }
 0x112   : > { %v1763_v61 = vmax.f32 %v1297_v57, 0.0 }
 0x113   : > { %v1761_v63 = vmax.f32 %v1289_v59, 0.0 }
 0x114   : > { %v1883_v0 = vpack.c.bf16 %v1763_v61, %v1762_v60 }
 0x115   : > { %v1882_v1 = vpack.c.bf16 %v1761_v63, %v1760_v62  ;;  %v7708_v2 = vpop.f32.mrb[16].mxu0 }
 0x116   : > { %v1310_v3 = vadd.f32 %v7708_v2, %v9027_v6  ;;  %v1301_v4 = vpop.f32.mrb[17].mxu0 }
 0x117   : > { %v1302_v5 = vadd.f32 %v9027_v6, %v1301_v4  ;;  %v7709_v7 = vpop.f32.mrb[18].mxu0  ;;  %7838 = vmatprep.mubr.msk.bf16.mxu1 %vm1979_vm2, %v1882_v1 }
 0x118   : > { %v1313_v8 = vadd.f32 %v7709_v7, %v9027_v6  ;;  %v1304_v9 = vpop.f32.mrb[19].mxu0  ;;  %7839 = vmatmul.mubr.msk.bf16.gmra.mrb[24].mxu1 %vm1979_vm2, %v1883_v0  ;;  %v1766_v11 = vmax.f32 %v1310_v3, 0.0  ;;  %v7808_v3 = vpop.f32.mrb[0].mxu1 }
 0x119   : > { %v1305_v10 = vadd.f32 %v9027_v6, %v1304_v9  ;;  %v1764_v13 = vmax.f32 %v1302_v5, 0.0  ;;  %v1701_v5 = vpop.f32.mrb[1].mxu1 }
 0x11a   : > { %v1767_v12 = vmax.f32 %v1313_v8, 0.0  ;;  %v7809_v9 = vpop.f32.mrb[2].mxu1 }
 0x11b   : > { %v1765_v14 = vmax.f32 %v1305_v10, 0.0 }
 0x11c   : > { %v1885_v15 = vpack.c.bf16 %v1767_v12, %v1766_v11  ;;  %v1704_v12 = vpop.f32.mrb[3].mxu1 }
 0x11d   : > { %v1884_v16 = vpack.c.bf16 %v1765_v14, %v1764_v13  ;;  %v7712_v17 = vpop.f32.mrb[20].mxu0  ;;  %v1710_v14 = vadd.f32 %v7808_v3, %v9027_v6  ;;  %v7812_v32 = vpop.f32.mrb[4].mxu1 }
 0x11e   : > { %v1326_v18 = vadd.f32 %v7712_v17, %v9027_v6  ;;  %v1317_v19 = vpop.f32.mrb[21].mxu0 }
 0x11f   : > { %v1318_v20 = vadd.f32 %v9027_v6, %v1317_v19  ;;  %v7713_v21 = vpop.f32.mrb[22].mxu0  ;;  %7842 = vmatprep.mubr.msk.bf16.mxu1 %vm1979_vm2, %v1884_v16  ;;  %v1713_v16 = vadd.f32 %v7809_v9, %v9027_v6  ;;  %v1705_v19 = vadd.f32 %v9027_v6, %v1704_v12 }
 0x120   : > { %v1329_v22 = vadd.f32 %v7713_v21, %v9027_v6  ;;  %v1320_v23 = vpop.f32.mrb[23].mxu0  ;;  %7843 = vmatmul.mubr.msk.bf16.gmra.mrb[28].mxu1 %vm1979_vm2, %v1885_v15  ;;  %v1770_v25 = vmax.f32 %v1326_v18, 0.0  ;;  %v1702_v15 = vadd.f32 %v9027_v6, %v1701_v5 }
 0x121   : > { %v1321_v24 = vadd.f32 %v9027_v6, %v1320_v23  ;;  %v1768_v27 = vmax.f32 %v1318_v20, 0.0  ;;  %v8492_v20 = vld [vmem:[%s10400_s7] sm:$0xff]   ;;  %v1866_v23 = vmax.f32 %v1710_v14, 0.0 }
 0x122   : > { %v1771_v26 = vmax.f32 %v1329_v22, 0.0  ;;  %8090 = vmatprep.subr.bf16.mxu1 %v8492_v20 }
 0x123   : > { %v1769_v28 = vmax.f32 %v1321_v24, 0.0  ;;  %v1864_v24 = vmax.f32 %v1702_v15, 0.0  ;;  %8091 = vmatpush3.bf16.msra.mxu1 %v8492_v20 }
 0x124   : > { %v1887_v29 = vpack.c.bf16 %v1771_v26, %v1770_v25  ;;  %v1867_v25 = vmax.f32 %v1713_v16, 0.0 }
 0x125   : > { %v1886_v30 = vpack.c.bf16 %v1769_v28, %v1768_v27  ;;  %v7716_v31 = vpop.f32.mrb[24].mxu0  ;;  %v1865_v28 = vmax.f32 %v1705_v19, 0.0 }
 0x126   : > { %v1342_v33 = vadd.f32 %v7716_v31, %v9027_v6  ;;  %v1333_v34 = vpop.f32.mrb[25].mxu0  ;;  %v9103_v31 = vpack.c.bf16 %v1867_v25, %v1866_v23 }
 0x127   : > { %v1334_v35 = vadd.f32 %v9027_v6, %v1333_v34  ;;  %v7717_v36 = vpop.f32.mrb[26].mxu0  ;;  %7846 = vmatprep.mubr.msk.bf16.mxu1 %vm1979_vm2, %v1886_v30  ;;  %v9106_v34 = vpack.c.bf16 %v1865_v28, %v1864_v24 }
 0x128   : > { %v1345_v37 = vadd.f32 %v7717_v36, %v9027_v6  ;;  %v1336_v38 = vpop.f32.mrb[27].mxu0  ;;  %7847 = vmatmul.mubr.msk.bf16.gmra.mrb[32].mxu1 %vm1979_vm2, %v1887_v29  ;;  %v1774_v40 = vmax.f32 %v1342_v33, 0.0 }
 0x129   : > { %v1337_v39 = vadd.f32 %v9027_v6, %v1336_v38  ;;  %v1772_v42 = vmax.f32 %v1334_v35, 0.0  ;;  %v1717_v35 = vpop.f32.mrb[5].mxu1 }
 0x12a   : > { %v1775_v41 = vmax.f32 %v1345_v37, 0.0  ;;  %v7813_v38 = vpop.f32.mrb[6].mxu1 }
 0x12b   : > { %v1773_v43 = vmax.f32 %v1337_v39, 0.0 }
 0x12c   : > { %v1889_v44 = vpack.c.bf16 %v1775_v41, %v1774_v40  ;;  %v1720_v41 = vpop.f32.mrb[7].mxu1 }
 0x12d   : > { %v1888_v45 = vpack.c.bf16 %v1773_v43, %v1772_v42  ;;  %v7720_v46 = vpop.f32.mrb[28].mxu0  ;;  %v1726_v43 = vadd.f32 %v7812_v32, %v9027_v6 }
 0x12e   : > { %v1358_v47 = vadd.f32 %v7720_v46, %v9027_v6  ;;  %v1349_v48 = vpop.f32.mrb[29].mxu0 }
 0x12f   : > { %v1350_v49 = vadd.f32 %v9027_v6, %v1349_v48  ;;  %v7721_v50 = vpop.f32.mrb[30].mxu0  ;;  %7850 = vmatprep.mubr.msk.bf16.mxu1 %vm1979_vm2, %v1888_v45  ;;  %v1729_v45 = vadd.f32 %v7813_v38, %v9027_v6  ;;  %v1721_v48 = vadd.f32 %v9027_v6, %v1720_v41 }
 0x130   : > { %v1361_v51 = vadd.f32 %v7721_v50, %v9027_v6  ;;  %v1352_v52 = vpop.f32.mrb[31].mxu0  ;;  %7851 = vmatmul.mubr.msk.bf16.gmra.mrb[36].mxu1 %vm1979_vm2, %v1889_v44  ;;  %v1778_v54 = vmax.f32 %v1358_v47, 0.0  ;;  %v1718_v44 = vadd.f32 %v9027_v6, %v1717_v35 }
 0x131   : > { %v1353_v53 = vadd.f32 %v9027_v6, %v1352_v52  ;;  %v1776_v56 = vmax.f32 %v1350_v49, 0.0 }
 0x132   : > { %v1779_v55 = vmax.f32 %v1361_v51, 0.0  ;;  %v1870_v51 = vmax.f32 %v1726_v43, 0.0  ;;  %v1868_v52 = vmax.f32 %v1718_v44, 0.0 }
 0x133   : > { %v1777_v57 = vmax.f32 %v1353_v53, 0.0  ;;  %v1871_v53 = vmax.f32 %v1729_v45, 0.0 }
 0x134   : > { %v1891_v58 = vpack.c.bf16 %v1779_v55, %v1778_v54 }
 0x135   : > { %v1890_v59 = vpack.c.bf16 %v1777_v57, %v1776_v56  ;;  %v7724_v60 = vpop.f32.mrb[32].mxu0  ;;  %v1869_v56 = vmax.f32 %v1721_v48, 0.0 }
 0x136   : > { %v1374_v61 = vadd.f32 %v7724_v60, %v9027_v6  ;;  %v1365_v62 = vpop.f32.mrb[33].mxu0 }
 0x137   : > { %v1366_v63 = vadd.f32 %v9027_v6, %v1365_v62  ;;  %v7725_v0 = vpop.f32.mrb[34].mxu0  ;;  %7854 = vmatprep.mubr.msk.bf16.mxu1 %vm1979_vm2, %v1890_v59  ;;  %v9117_v59 = vpack.c.bf16 %v1871_v53, %v1870_v51  ;;  %v7816_v62 = vpop.f32.mrb[8].mxu1 }
 0x138   : > { %v1377_v1 = vadd.f32 %v7725_v0, %v9027_v6  ;;  %v1368_v2 = vpop.f32.mrb[35].mxu0  ;;  %7855 = vmatmul.mubr.msk.bf16.gmra.mrb[40].mxu1 %vm1979_vm2, %v1891_v58  ;;  %v1782_v7 = vmax.f32 %v1374_v61, 0.0  ;;  %v9120_v61 = vpack.c.bf16 %v1869_v56, %v1868_v52 }
 0x139   : > { %v1369_v4 = vadd.f32 %v9027_v6, %v1368_v2  ;;  %v1780_v10 = vmax.f32 %v1366_v63, 0.0 }
 0x13a   : > { %v1783_v8 = vmax.f32 %v1377_v1, 0.0  ;;  %v1733_v1 = vpop.f32.mrb[9].mxu1 }
 0x13b   : > { %v1781_v11 = vmax.f32 %v1369_v4, 0.0  ;;  %v7817_v4 = vpop.f32.mrb[10].mxu1 }
 0x13c   : > { %v1893_v13 = vpack.c.bf16 %v1783_v8, %v1782_v7  ;;  %v1742_v7 = vadd.f32 %v7816_v62, %v9027_v6  ;;  %v1734_v8 = vadd.f32 %v9027_v6, %v1733_v1  ;;  %v1745_v9 = vadd.f32 %v7817_v4, %v9027_v6 }
 0x13d   : > { %v1892_v17 = vpack.c.bf16 %v1781_v11, %v1780_v10  ;;  %v7728_v18 = vpop.f32.mrb[36].mxu0  ;;  %v1736_v10 = vpop.f32.mrb[11].mxu1 }
 0x13e   : > { %v1390_v21 = vadd.f32 %v7728_v18, %v9027_v6  ;;  %v1381_v22 = vpop.f32.mrb[37].mxu0  ;;  %v1874_v16 = vmax.f32 %v1742_v7, 0.0  ;;  %v1875_v18 = vmax.f32 %v1745_v9, 0.0 }
 0x13f   : > { %v1382_v26 = vadd.f32 %v9027_v6, %v1381_v22  ;;  %v7729_v27 = vpop.f32.mrb[38].mxu0  ;;  %7858 = vmatprep.mubr.msk.bf16.mxu1 %vm1979_vm2, %v1892_v17  ;;  %v1872_v17 = vmax.f32 %v1734_v8, 0.0 }
 0x140   : > { %v1393_v29 = vadd.f32 %v7729_v27, %v9027_v6  ;;  %v1384_v30 = vpop.f32.mrb[39].mxu0  ;;  %7859 = vmatmul.mubr.msk.bf16.gmra.mrb[44].mxu1 %vm1979_vm2, %v1893_v13  ;;  %v1786_v36 = vmax.f32 %v1390_v21, 0.0  ;;  %v1737_v13 = vadd.f32 %v9027_v6, %v1736_v10  ;;  %v9131_v24 = vpack.c.bf16 %v1875_v18, %v1874_v16 }
 0x141   : > { %v1385_v33 = vadd.f32 %v9027_v6, %v1384_v30  ;;  %v1784_v39 = vmax.f32 %v1382_v26, 0.0 }
 0x142   : > { %v1787_v37 = vmax.f32 %v1393_v29, 0.0  ;;  %v1873_v21 = vmax.f32 %v1737_v13, 0.0 }
 0x143   : > { %v1785_v40 = vmax.f32 %v1385_v33, 0.0 }
 0x144   : > { %v1895_v42 = vpack.c.bf16 %v1787_v37, %v1786_v36  ;;  %v9134_v26 = vpack.c.bf16 %v1873_v21, %v1872_v17 }
 0x145   : > { %v1894_v46 = vpack.c.bf16 %v1785_v40, %v1784_v39  ;;  %v7732_v47 = vpop.f32.mrb[40].mxu0 }
 0x146   : > { %v1406_v49 = vadd.f32 %v7732_v47, %v9027_v6  ;;  %v1397_v50 = vpop.f32.mrb[41].mxu0 }
 0x147   : > { %v1398_v54 = vadd.f32 %v9027_v6, %v1397_v50  ;;  %v7733_v55 = vpop.f32.mrb[42].mxu0  ;;  %7862 = vmatprep.mubr.msk.bf16.mxu1 %vm1979_vm2, %v1894_v46 }
 0x148   : > { %v1409_v57 = vadd.f32 %v7733_v55, %v9027_v6  ;;  %v1400_v58 = vpop.f32.mrb[43].mxu0  ;;  %7863 = vmatmul.mubr.msk.bf16.gmra.mrb[48].mxu1 %vm1979_vm2, %v1895_v42  ;;  %v1790_v63 = vmax.f32 %v1406_v49, 0.0 }
 0x149   : > { %v1401_v60 = vadd.f32 %v9027_v6, %v1400_v58  ;;  %v1788_v2 = vmax.f32 %v1398_v54, 0.0 }
 0x14a   : > { %v1791_v0 = vmax.f32 %v1409_v57, 0.0 }
 0x14b   : > { %v1789_v3 = vmax.f32 %v1401_v60, 0.0 }
 0x14c   : > { %v1897_v5 = vpack.c.bf16 %v1791_v0, %v1790_v63 }
 0x14d   : > { %v1896_v11 = vpack.c.bf16 %v1789_v3, %v1788_v2  ;;  %v7736_v12 = vpop.f32.mrb[44].mxu0 }
 0x14e   : > { %v1422_v14 = vadd.f32 %v7736_v12, %v9027_v6  ;;  %v1413_v15 = vpop.f32.mrb[45].mxu0 }
 0x14f   : > { %v1414_v19 = vadd.f32 %v9027_v6, %v1413_v15  ;;  %v7737_v20 = vpop.f32.mrb[46].mxu0  ;;  %7866 = vmatprep.mubr.msk.bf16.mxu1 %vm1979_vm2, %v1896_v11 }
 0x150   : > { %v1425_v22 = vadd.f32 %v7737_v20, %v9027_v6  ;;  %v1416_v23 = vpop.f32.mrb[47].mxu0  ;;  %7867 = vmatmul.mubr.msk.bf16.gmra.mrb[52].mxu1 %vm1979_vm2, %v1897_v5  ;;  %v1794_v27 = vmax.f32 %v1422_v14, 0.0 }
 0x151   : > { %v1417_v25 = vadd.f32 %v9027_v6, %v1416_v23  ;;  %v1792_v29 = vmax.f32 %v1414_v19, 0.0 }
 0x152   : > { %v1795_v28 = vmax.f32 %v1425_v22, 0.0 }
 0x153   : > { %v1793_v30 = vmax.f32 %v1417_v25, 0.0 }
 0x154   : > { %v1899_v32 = vpack.c.bf16 %v1795_v28, %v1794_v27 }
 0x155   : > { %v1898_v33 = vpack.c.bf16 %v1793_v30, %v1792_v29  ;;  %v7740_v35 = vpop.f32.mrb[48].mxu0 }
 0x156   : > { %v1438_v36 = vadd.f32 %v7740_v35, %v9027_v6  ;;  %v1429_v37 = vpop.f32.mrb[49].mxu0 }
 0x157   : > { %v1430_v38 = vadd.f32 %v9027_v6, %v1429_v37  ;;  %v7741_v39 = vpop.f32.mrb[50].mxu0  ;;  %7870 = vmatprep.mubr.msk.bf16.mxu1 %vm1979_vm2, %v1898_v33 }
 0x158   : > { %v1441_v40 = vadd.f32 %v7741_v39, %v9027_v6  ;;  %v1432_v41 = vpop.f32.mrb[51].mxu0  ;;  %7871 = vmatmul.mubr.msk.bf16.gmra.mrb[56].mxu1 %vm1979_vm2, %v1899_v32  ;;  %v1798_v43 = vmax.f32 %v1438_v36, 0.0 }
 0x159   : > { %v1433_v42 = vadd.f32 %v9027_v6, %v1432_v41  ;;  %v1796_v45 = vmax.f32 %v1430_v38, 0.0 }
 0x15a   : > { %v1799_v44 = vmax.f32 %v1441_v40, 0.0 }
 0x15b   : > { %v1797_v46 = vmax.f32 %v1433_v42, 0.0 }
 0x15c   : > { %v1901_v47 = vpack.c.bf16 %v1799_v44, %v1798_v43 }
 0x15d   : > { %v1900_v48 = vpack.c.bf16 %v1797_v46, %v1796_v45  ;;  %v7744_v49 = vpop.f32.mrb[52].mxu0 }
 0x15e   : > { %v1454_v50 = vadd.f32 %v7744_v49, %v9027_v6  ;;  %v1445_v51 = vpop.f32.mrb[53].mxu0 }
 0x15f   : > { %v1446_v52 = vadd.f32 %v9027_v6, %v1445_v51  ;;  %v7745_v53 = vpop.f32.mrb[54].mxu0  ;;  %7874 = vmatprep.mubr.msk.bf16.mxu1 %vm1979_vm2, %v1900_v48  ;;  %v8493_v51 = vld [vmem:[%s10400_s7 + $0x8] sm:$0xff]  }
 0x160   : > { %v1457_v54 = vadd.f32 %v7745_v53, %v9027_v6  ;;  %v1448_v55 = vpop.f32.mrb[55].mxu0  ;;  %7875 = vmatmul.mubr.msk.bf16.gmra.mrb[60].mxu1 %vm1979_vm2, %v1901_v47  ;;  %v1802_v57 = vmax.f32 %v1454_v50, 0.0  ;;  %8092 = vmatprep.subr.bf16.mxu1 %v8493_v51 }
 0x161   : > { %v1449_v56 = vadd.f32 %v9027_v6, %v1448_v55  ;;  %v1800_v60 = vmax.f32 %v1446_v52, 0.0  ;;  %8093 = vmatpush3.bf16.msra.mxu1 %v8493_v51 }
 0x162   : > { %v1803_v58 = vmax.f32 %v1457_v54, 0.0 }
 0x163   : > { %v1801_v62 = vmax.f32 %v1449_v56, 0.0 }
 0x164   : > { %v1903_v63 = vpack.c.bf16 %v1803_v58, %v1802_v57 }
 0x165   : > { %v1902_v0 = vpack.c.bf16 %v1801_v62, %v1800_v60  ;;  %v7748_v1 = vpop.f32.mrb[56].mxu0 }
 0x166   : > { %v1470_v2 = vadd.f32 %v7748_v1, %v9027_v6  ;;  %v1461_v3 = vpop.f32.mrb[57].mxu0 }
 0x167   : > { %v1462_v4 = vadd.f32 %v9027_v6, %v1461_v3  ;;  %v7749_v5 = vpop.f32.mrb[58].mxu0  ;;  %7878 = vmatprep.mubr.msk.bf16.mxu1 %vm1979_vm2, %v1902_v0 }
 0x168   : > { %v1473_v7 = vadd.f32 %v7749_v5, %v9027_v6  ;;  %v1464_v8 = vpop.f32.mrb[59].mxu0  ;;  %7879 = vmatmul.mubr.msk.bf16.gmra.mrb[64].mxu1 %vm1979_vm2, %v1903_v63  ;;  %v1806_v10 = vmax.f32 %v1470_v2, 0.0 }
 0x169   : > { %v1465_v9 = vadd.f32 %v9027_v6, %v1464_v8  ;;  %v1804_v12 = vmax.f32 %v1462_v4, 0.0 }
 0x16a   : > { %v1807_v11 = vmax.f32 %v1473_v7, 0.0 }
 0x16b   : > { %v1805_v13 = vmax.f32 %v1465_v9, 0.0 }
 0x16c   : > { %v1905_v14 = vpack.c.bf16 %v1807_v11, %v1806_v10 }
 0x16d   : > { %v1904_v15 = vpack.c.bf16 %v1805_v13, %v1804_v12  ;;  %v7752_v16 = vpop.f32.mrb[60].mxu0 }
 0x16e   : > { %v1486_v17 = vadd.f32 %v7752_v16, %v9027_v6  ;;  %v1477_v18 = vpop.f32.mrb[61].mxu0 }
 0x16f   : > { %v1478_v19 = vadd.f32 %v9027_v6, %v1477_v18  ;;  %v7753_v20 = vpop.f32.mrb[62].mxu0  ;;  %7882 = vmatprep.mubr.msk.bf16.mxu1 %vm1979_vm2, %v1904_v15 }
 0x170   : > { %v1489_v21 = vadd.f32 %v7753_v20, %v9027_v6  ;;  %v1480_v22 = vpop.f32.mrb[63].mxu0  ;;  %7883 = vmatmul.mubr.msk.bf16.gmra.mrb[68].mxu1 %vm1979_vm2, %v1905_v14  ;;  %v1810_v25 = vmax.f32 %v1486_v17, 0.0 }
 0x171   : > { %v1481_v23 = vadd.f32 %v9027_v6, %v1480_v22  ;;  %v1808_v28 = vmax.f32 %v1478_v19, 0.0 }
 0x172   : > { %v1811_v27 = vmax.f32 %v1489_v21, 0.0 }
 0x173   : > { %v1809_v29 = vmax.f32 %v1481_v23, 0.0 }
 0x174   : > { %v1907_v30 = vpack.c.bf16 %v1811_v27, %v1810_v25 }
 0x175   : > { %v1906_v32 = vpack.c.bf16 %v1809_v29, %v1808_v28  ;;  %v7756_v33 = vpop.f32.mrb[64].mxu0 }
 0x176   : > { %v1502_v35 = vadd.f32 %v7756_v33, %v9027_v6  ;;  %v1493_v36 = vpop.f32.mrb[65].mxu0 }
 0x177   : > { %v1494_v37 = vadd.f32 %v9027_v6, %v1493_v36  ;;  %v7757_v38 = vpop.f32.mrb[66].mxu0  ;;  %7886 = vmatprep.mubr.msk.bf16.mxu1 %vm1979_vm2, %v1906_v32 }
 0x178   : > { %v1505_v39 = vadd.f32 %v7757_v38, %v9027_v6  ;;  %v1496_v40 = vpop.f32.mrb[67].mxu0  ;;  %7887 = vmatmul.mubr.msk.bf16.gmra.mrb[72].mxu1 %vm1979_vm2, %v1907_v30  ;;  %v1814_v42 = vmax.f32 %v1502_v35, 0.0 }
 0x179   : > { %v1497_v41 = vadd.f32 %v9027_v6, %v1496_v40  ;;  %v1812_v44 = vmax.f32 %v1494_v37, 0.0 }
 0x17a   : > { %v1815_v43 = vmax.f32 %v1505_v39, 0.0 }
 0x17b   : > { %v1813_v45 = vmax.f32 %v1497_v41, 0.0 }
 0x17c   : > { %v1909_v46 = vpack.c.bf16 %v1815_v43, %v1814_v42 }
 0x17d   : > { %v1908_v47 = vpack.c.bf16 %v1813_v45, %v1812_v44  ;;  %v7760_v48 = vpop.f32.mrb[68].mxu0 }
 0x17e   : > { %v1518_v49 = vadd.f32 %v7760_v48, %v9027_v6  ;;  %v1509_v50 = vpop.f32.mrb[69].mxu0 }
 0x17f   : > { %v1510_v52 = vadd.f32 %v9027_v6, %v1509_v50  ;;  %v7761_v53 = vpop.f32.mrb[70].mxu0  ;;  %7890 = vmatprep.mubr.msk.bf16.mxu1 %vm1979_vm2, %v1908_v47 }
 0x180   : > { %v1521_v54 = vadd.f32 %v7761_v53, %v9027_v6  ;;  %v1512_v55 = vpop.f32.mrb[71].mxu0  ;;  %7891 = vmatmul.mubr.msk.bf16.gmra.mrb[76].mxu1 %vm1979_vm2, %v1909_v46  ;;  %v1818_v57 = vmax.f32 %v1518_v49, 0.0 }
 0x181   : > { %v1513_v56 = vadd.f32 %v9027_v6, %v1512_v55  ;;  %v1816_v60 = vmax.f32 %v1510_v52, 0.0 }
 0x182   : > { %v1819_v58 = vmax.f32 %v1521_v54, 0.0 }
 0x183   : > { %v1817_v62 = vmax.f32 %v1513_v56, 0.0 }
 0x184   : > { %v1911_v63 = vpack.c.bf16 %v1819_v58, %v1818_v57 }
 0x185   : > { %v1910_v0 = vpack.c.bf16 %v1817_v62, %v1816_v60  ;;  %v7764_v1 = vpop.f32.mrb[72].mxu0 }
 0x186   : > { %v1534_v2 = vadd.f32 %v7764_v1, %v9027_v6  ;;  %v1525_v3 = vpop.f32.mrb[73].mxu0 }
 0x187   : > { %v1526_v4 = vadd.f32 %v9027_v6, %v1525_v3  ;;  %v7765_v5 = vpop.f32.mrb[74].mxu0  ;;  %7894 = vmatprep.mubr.msk.bf16.mxu1 %vm1979_vm2, %v1910_v0 }
 0x188   : > { %v1537_v7 = vadd.f32 %v7765_v5, %v9027_v6  ;;  %v1528_v8 = vpop.f32.mrb[75].mxu0  ;;  %7895 = vmatmul.mubr.msk.bf16.gmra.mrb[80].mxu1 %vm1979_vm2, %v1911_v63  ;;  %v1822_v10 = vmax.f32 %v1534_v2, 0.0 }
 0x189   : > { %v1529_v9 = vadd.f32 %v9027_v6, %v1528_v8  ;;  %v1820_v12 = vmax.f32 %v1526_v4, 0.0 }
 0x18a   : > { %v1823_v11 = vmax.f32 %v1537_v7, 0.0 }
 0x18b   : > { %v1821_v13 = vmax.f32 %v1529_v9, 0.0 }
 0x18c   : > { %v1913_v14 = vpack.c.bf16 %v1823_v11, %v1822_v10 }
 0x18d   : > { %v1912_v15 = vpack.c.bf16 %v1821_v13, %v1820_v12  ;;  %v7768_v16 = vpop.f32.mrb[76].mxu0 }
 0x18e   : > { %v1550_v17 = vadd.f32 %v7768_v16, %v9027_v6  ;;  %v1541_v18 = vpop.f32.mrb[77].mxu0 }
 0x18f   : > { %v1542_v19 = vadd.f32 %v9027_v6, %v1541_v18  ;;  %v7769_v20 = vpop.f32.mrb[78].mxu0  ;;  %7898 = vmatprep.mubr.msk.bf16.mxu1 %vm1979_vm2, %v1912_v15 }
 0x190   : > { %v1553_v21 = vadd.f32 %v7769_v20, %v9027_v6  ;;  %v1544_v22 = vpop.f32.mrb[79].mxu0  ;;  %7899 = vmatmul.mubr.msk.bf16.gmra.mrb[84].mxu1 %vm1979_vm2, %v1913_v14  ;;  %v1826_v25 = vmax.f32 %v1550_v17, 0.0 }
 0x191   : > { %v1545_v23 = vadd.f32 %v9027_v6, %v1544_v22  ;;  %v1824_v28 = vmax.f32 %v1542_v19, 0.0 }
 0x192   : > { %v1827_v27 = vmax.f32 %v1553_v21, 0.0 }
 0x193   : > { %v1825_v29 = vmax.f32 %v1545_v23, 0.0 }
 0x194   : > { %v1915_v30 = vpack.c.bf16 %v1827_v27, %v1826_v25 }
 0x195   : > { %v1914_v32 = vpack.c.bf16 %v1825_v29, %v1824_v28  ;;  %v7772_v33 = vpop.f32.mrb[80].mxu0 }
 0x196   : > { %v1566_v35 = vadd.f32 %v7772_v33, %v9027_v6  ;;  %v1557_v36 = vpop.f32.mrb[81].mxu0 }
 0x197   : > { %v1558_v37 = vadd.f32 %v9027_v6, %v1557_v36  ;;  %v7773_v38 = vpop.f32.mrb[82].mxu0  ;;  %7902 = vmatprep.mubr.msk.bf16.mxu1 %vm1979_vm2, %v1914_v32 }
 0x198   : > { %v1569_v39 = vadd.f32 %v7773_v38, %v9027_v6  ;;  %v1560_v40 = vpop.f32.mrb[83].mxu0  ;;  %7903 = vmatmul.mubr.msk.bf16.gmra.mrb[88].mxu1 %vm1979_vm2, %v1915_v30  ;;  %v1830_v42 = vmax.f32 %v1566_v35, 0.0 }
 0x199   : > { %v1561_v41 = vadd.f32 %v9027_v6, %v1560_v40  ;;  %v1828_v44 = vmax.f32 %v1558_v37, 0.0 }
 0x19a   : > { %v1831_v43 = vmax.f32 %v1569_v39, 0.0 }
 0x19b   : > { %v1829_v45 = vmax.f32 %v1561_v41, 0.0 }
 0x19c   : > { %v1917_v46 = vpack.c.bf16 %v1831_v43, %v1830_v42 }
 0x19d   : > { %v1916_v47 = vpack.c.bf16 %v1829_v45, %v1828_v44  ;;  %v7776_v48 = vpop.f32.mrb[84].mxu0 }
 0x19e   : > { %v1582_v49 = vadd.f32 %v7776_v48, %v9027_v6  ;;  %v1573_v50 = vpop.f32.mrb[85].mxu0 }
 0x19f   : > { %v1574_v51 = vadd.f32 %v9027_v6, %v1573_v50  ;;  %v7777_v52 = vpop.f32.mrb[86].mxu0  ;;  %7906 = vmatprep.mubr.msk.bf16.mxu1 %vm1979_vm2, %v1916_v47  ;;  %v8494_v50 = vld [vmem:[%s10400_s7 + $0x10] sm:$0xff]  }
 0x1a0   : > { %v1585_v53 = vadd.f32 %v7777_v52, %v9027_v6  ;;  %v1576_v54 = vpop.f32.mrb[87].mxu0  ;;  %7907 = vmatmul.mubr.msk.bf16.gmra.mrb[92].mxu1 %vm1979_vm2, %v1917_v46  ;;  %v1834_v56 = vmax.f32 %v1582_v49, 0.0  ;;  %8094 = vmatprep.subr.bf16.mxu1 %v8494_v50 }
 0x1a1   : > { %v1577_v55 = vadd.f32 %v9027_v6, %v1576_v54  ;;  %v1832_v58 = vmax.f32 %v1574_v51, 0.0  ;;  %8095 = vmatpush3.bf16.msra.mxu1 %v8494_v50 }
 0x1a2   : > { %v1835_v57 = vmax.f32 %v1585_v53, 0.0 }
 0x1a3   : > { %v1833_v60 = vmax.f32 %v1577_v55, 0.0 }
 0x1a4   : > { %v1919_v62 = vpack.c.bf16 %v1835_v57, %v1834_v56 }
 0x1a5   : > { %v1918_v63 = vpack.c.bf16 %v1833_v60, %v1832_v58  ;;  %v7780_v0 = vpop.f32.mrb[88].mxu0 }
 0x1a6   : > { %v1598_v1 = vadd.f32 %v7780_v0, %v9027_v6  ;;  %v1589_v2 = vpop.f32.mrb[89].mxu0 }
 0x1a7   : > { %v1590_v3 = vadd.f32 %v9027_v6, %v1589_v2  ;;  %v7781_v4 = vpop.f32.mrb[90].mxu0  ;;  %7910 = vmatprep.mubr.msk.bf16.mxu1 %vm1979_vm2, %v1918_v63 }
 0x1a8   : > { %v1601_v5 = vadd.f32 %v7781_v4, %v9027_v6  ;;  %v1592_v7 = vpop.f32.mrb[91].mxu0  ;;  %7911 = vmatmul.mubr.msk.bf16.gmra.mrb[96].mxu1 %vm1979_vm2, %v1919_v62  ;;  %v1838_v9 = vmax.f32 %v1598_v1, 0.0 }
 0x1a9   : > { %v1593_v8 = vadd.f32 %v9027_v6, %v1592_v7  ;;  %v1836_v11 = vmax.f32 %v1590_v3, 0.0 }
 0x1aa   : > { %v1839_v10 = vmax.f32 %v1601_v5, 0.0 }
 0x1ab   : > { %v1837_v12 = vmax.f32 %v1593_v8, 0.0 }
 0x1ac   : > { %v1921_v13 = vpack.c.bf16 %v1839_v10, %v1838_v9 }
 0x1ad   : > { %v1920_v14 = vpack.c.bf16 %v1837_v12, %v1836_v11  ;;  %v7784_v15 = vpop.f32.mrb[92].mxu0 }
 0x1ae   : > { %v1614_v16 = vadd.f32 %v7784_v15, %v9027_v6  ;;  %v1605_v17 = vpop.f32.mrb[93].mxu0 }
 0x1af   : > { %v1606_v18 = vadd.f32 %v9027_v6, %v1605_v17  ;;  %v7785_v19 = vpop.f32.mrb[94].mxu0  ;;  %7914 = vmatprep.mubr.msk.bf16.mxu1 %vm1979_vm2, %v1920_v14 }
 0x1b0   : > { %v1617_v20 = vadd.f32 %v7785_v19, %v9027_v6  ;;  %v1608_v21 = vpop.f32.mrb[95].mxu0  ;;  %7915 = vmatmul.mubr.msk.bf16.gmra.mrb[100].mxu1 %vm1979_vm2, %v1921_v13  ;;  %v1842_v23 = vmax.f32 %v1614_v16, 0.0 }
 0x1b1   : > { %v1609_v22 = vadd.f32 %v9027_v6, %v1608_v21  ;;  %v1840_v27 = vmax.f32 %v1606_v18, 0.0 }
 0x1b2   : > { %v1843_v25 = vmax.f32 %v1617_v20, 0.0 }
 0x1b3   : > { %v1841_v28 = vmax.f32 %v1609_v22, 0.0 }
 0x1b4   : > { %v1923_v29 = vpack.c.bf16 %v1843_v25, %v1842_v23  ;;  %v9241_v23 = vld [vmem:[%s10397_s4] ss:$0 sm:$0xff] }
 0x1b5   : > { %v1922_v30 = vpack.c.bf16 %v1841_v28, %v1840_v27  ;;  %v7788_v32 = vpop.f32.mrb[96].mxu0 }
 0x1b6   : > { %v1630_v33 = vadd.f32 %v7788_v32, %v9027_v6  ;;  %v1621_v35 = vpop.f32.mrb[97].mxu0 }
 0x1b7   : > { %v1622_v36 = vadd.f32 %v9027_v6, %v1621_v35  ;;  %v7789_v37 = vpop.f32.mrb[98].mxu0  ;;  %7918 = vmatprep.mubr.msk.bf16.mxu1 %vm1979_vm2, %v1922_v30 }
 0x1b8   : > { %v1633_v38 = vadd.f32 %v7789_v37, %v9027_v6  ;;  %v1624_v39 = vpop.f32.mrb[99].mxu0  ;;  %7919 = vmatmul.mubr.msk.bf16.gmra.mrb[104].mxu1 %vm1979_vm2, %v1923_v29  ;;  %v1846_v41 = vmax.f32 %v1630_v33, 0.0 }
 0x1b9   : > { %v1625_v40 = vadd.f32 %v9027_v6, %v1624_v39  ;;  %v1844_v43 = vmax.f32 %v1622_v36, 0.0 }
 0x1ba   : > { %v1847_v42 = vmax.f32 %v1633_v38, 0.0 }
 0x1bb   : > { %v1845_v44 = vmax.f32 %v1625_v40, 0.0 }
 0x1bc   : > { %v1925_v45 = vpack.c.bf16 %v1847_v42, %v1846_v41 }
 0x1bd   : > { %v1924_v46 = vpack.c.bf16 %v1845_v44, %v1844_v43  ;;  %v7792_v47 = vpop.f32.mrb[100].mxu0 }
 0x1be   : > { %v1646_v48 = vadd.f32 %v7792_v47, %v9027_v6  ;;  %v1637_v49 = vpop.f32.mrb[101].mxu0 }
 0x1bf   : > { %v1638_v51 = vadd.f32 %v9027_v6, %v1637_v49  ;;  %v7793_v52 = vpop.f32.mrb[102].mxu0  ;;  %7922 = vmatprep.mubr.msk.bf16.mxu1 %vm1979_vm2, %v1924_v46 }
 0x1c0   : > { %v1649_v53 = vadd.f32 %v7793_v52, %v9027_v6  ;;  %v1640_v54 = vpop.f32.mrb[103].mxu0  ;;  %7923 = vmatmul.mubr.msk.bf16.gmra.mrb[108].mxu1 %vm1979_vm2, %v1925_v45  ;;  %v1850_v56 = vmax.f32 %v1646_v48, 0.0 }
 0x1c1   : > { %v1641_v55 = vadd.f32 %v9027_v6, %v1640_v54  ;;  %v1848_v58 = vmax.f32 %v1638_v51, 0.0 }
 0x1c2   : > { %v1851_v57 = vmax.f32 %v1649_v53, 0.0 }
 0x1c3   : > { %v1849_v60 = vmax.f32 %v1641_v55, 0.0 }
 0x1c4   : > { %v1927_v62 = vpack.c.bf16 %v1851_v57, %v1850_v56 }
 0x1c5   : > { %v1926_v63 = vpack.c.bf16 %v1849_v60, %v1848_v58  ;;  %v7796_v0 = vpop.f32.mrb[104].mxu0 }
 0x1c6   : > { %v1662_v1 = vadd.f32 %v7796_v0, %v9027_v6  ;;  %v1653_v2 = vpop.f32.mrb[105].mxu0 }
 0x1c7   : > { %v1654_v3 = vadd.f32 %v9027_v6, %v1653_v2  ;;  %v7797_v4 = vpop.f32.mrb[106].mxu0  ;;  %7926 = vmatprep.mubr.msk.bf16.mxu1 %vm1979_vm2, %v1926_v63 }
 0x1c8   : > { %v1665_v5 = vadd.f32 %v7797_v4, %v9027_v6  ;;  %v1656_v7 = vpop.f32.mrb[107].mxu0  ;;  %7927 = vmatmul.mubr.msk.bf16.gmra.mrb[112].mxu1 %vm1979_vm2, %v1927_v62  ;;  %v1854_v9 = vmax.f32 %v1662_v1, 0.0 }
 0x1c9   : > { %v1657_v8 = vadd.f32 %v9027_v6, %v1656_v7  ;;  %v1852_v11 = vmax.f32 %v1654_v3, 0.0 }
 0x1ca   : > { %v1855_v10 = vmax.f32 %v1665_v5, 0.0 }
 0x1cb   : > { %v1853_v12 = vmax.f32 %v1657_v8, 0.0 }
 0x1cc   : > { %v1929_v13 = vpack.c.bf16 %v1855_v10, %v1854_v9 }
 0x1cd   : > { %v1928_v14 = vpack.c.bf16 %v1853_v12, %v1852_v11  ;;  %v7800_v15 = vpop.f32.mrb[108].mxu0 }
 0x1ce   : > { %v1678_v16 = vadd.f32 %v7800_v15, %v9027_v6  ;;  %v1669_v17 = vpop.f32.mrb[109].mxu0 }
 0x1cf   : > { %v1670_v18 = vadd.f32 %v9027_v6, %v1669_v17  ;;  %v7801_v19 = vpop.f32.mrb[110].mxu0  ;;  %7930 = vmatprep.mubr.msk.bf16.mxu1 %vm1979_vm2, %v1928_v14 }
 0x1d0   : > { %v1681_v20 = vadd.f32 %v7801_v19, %v9027_v6  ;;  %v1672_v21 = vpop.f32.mrb[111].mxu0  ;;  %7931 = vmatmul.mubr.msk.bf16.gmra.mrb[116].mxu1 %vm1979_vm2, %v1929_v13  ;;  %v1858_v25 = vmax.f32 %v1678_v16, 0.0 }
 0x1d1   : > { %v1673_v22 = vadd.f32 %v9027_v6, %v1672_v21  ;;  %v1856_v28 = vmax.f32 %v1670_v18, 0.0  ;;  %v8664_v6 = vld [vmem:[%s10426_s2] ss:$0 sm:$0xff]  ;;  %s8675_s2 = scalar_lea.vmem %s8674_s0, 256 }
 0x1d2   : > { %v1859_v27 = vmax.f32 %v1681_v20, 0.0  ;;  %p8677_p1 = scmp.lt.s32.totalorder %s8675_s2, %s8669_s28 }
 0x1d3   : > { %v1857_v29 = vmax.f32 %v1673_v22, 0.0  ;;  %v7828_v30 = vpop.f32.mrb[12].mxu1 }
 0x1d4   : > { %v1931_v32 = vpack.c.bf16 %v1859_v27, %v1858_v25  ;;  %v2215_v33 = vadd.f32 %v7828_v30, %v9241_v23  ;;  %v2206_v35 = vpop.f32.mrb[13].mxu1  ;;  %p8678_p2 = por %p8677_p1, %p8676_p0 }
 0x1d5   : > { %v1930_v36 = vpack.c.bf16 %v1857_v29, %v1856_v28  ;;  %v2207_v37 = vadd.f32 %v9241_v23, %v2206_v35  ;;  %v7804_v38 = vpop.f32.mrb[112].mxu0  ;;  %v7829_v39 = vpop.f32.mrb[14].mxu1 }
 0x1d6   : > { %v1694_v40 = vadd.f32 %v8664_v6, %v7804_v38  ;;  %v2218_v41 = vadd.f32 %v7829_v39, %v9241_v23  ;;  %v1685_v42 = vpop.f32.mrb[113].mxu0  ;;  %v2209_v43 = vpop.f32.mrb[15].mxu1  ;;  %v2719_v47 = vmax.f32 %v2215_v33, 0.0  ;;  %p8679_p3 = pnand %p8678_p2, %p8672_p13 }
 0x1d7   : > { %v1686_v44 = vadd.f32 %v8664_v6, %v1685_v42  ;;  %v2210_v45 = vadd.f32 %v9241_v23, %v2209_v43  ;;  %v7805_v46 = vpop.f32.mrb[114].mxu0  ;;  %7934 = vmatprep.mubr.msk.bf16.mxu1 %vm1979_vm2, %v1930_v36  ;;  %v2717_v51 = vmax.f32 %v2207_v37, 0.0 }
 0x1d8   : > { %v2720_v48 = vmax.f32 %v2218_v41, 0.0  ;;  %v1697_v49 = vadd.f32 %v8664_v6, %v7805_v46  ;;  %v1688_v50 = vpop.f32.mrb[115].mxu0  ;;  %7935 = vmatmul.mubr.msk.bf16.gmra.mrb[120].mxu1 %vm1979_vm2, %v1931_v32  ;;  %v1862_v54 = vmax.f32 %v1694_v40, 0.0 }
 0x1d9   : > { %v2718_v52 = vmax.f32 %v2210_v45, 0.0  ;;  %v1689_v53 = vadd.f32 %v8664_v6, %v1688_v50  ;;  %v1860_v57 = vmax.f32 %v1686_v44, 0.0 }
 0x1da   : > { %v2846_v55 = vpack.c.bf16 %v2720_v48, %v2719_v47  ;;  %v1863_v56 = vmax.f32 %v1697_v49, 0.0 }
 0x1db   : > { %v2845_v58 = vpack.c.bf16 %v2718_v52, %v2717_v51  ;;  %v1861_v60 = vmax.f32 %v1689_v53, 0.0  ;;  %v7832_v62 = vpop.f32.mrb[16].mxu1 }
 0x1dc   : > { %v1933_v63 = vpack.c.bf16 %v1863_v56, %v1862_v54  ;;  %v2231_v0 = vadd.f32 %v7832_v62, %v9241_v23  ;;  %v2222_v1 = vpop.f32.mrb[17].mxu1 }
 0x1dd   : > { %v1932_v2 = vpack.c.bf16 %v1861_v60, %v1860_v57  ;;  %v2223_v3 = vadd.f32 %v9241_v23, %v2222_v1  ;;  %v7833_v4 = vpop.f32.mrb[18].mxu1  ;;  %7962 = vmatprep.mubr.msk.bf16.mxu0 %vm1979_vm2, %v2845_v58 }
 0x1de   : > { %v2234_v5 = vadd.f32 %v7833_v4, %v9241_v23  ;;  %v2225_v7 = vpop.f32.mrb[19].mxu1  ;;  %7963 = vmatmul.mubr.msk.bf16.vlgmr.msra.gmra.mrb[116].mxu0 %vm1979_vm2, %v2846_v55  ;;  %v2723_v9 = vmax.f32 %v2231_v0, 0.0 }
 0x1df   : > { %v2226_v8 = vadd.f32 %v9241_v23, %v2225_v7  ;;  %7938 = vmatprep.mubr.msk.bf16.mxu1 %vm1979_vm2, %v1932_v2  ;;  %v2721_v11 = vmax.f32 %v2223_v3, 0.0 }
 0x1e0   : > { %v2724_v10 = vmax.f32 %v2234_v5, 0.0  ;;  %7939 = vmatmul.mubr.msk.bf16.gmra.mrb[124].mxu1 %vm1979_vm2, %v1933_v63 }
 0x1e1   : > { %v2722_v12 = vmax.f32 %v2226_v8, 0.0  ;;  %7942 = vmatprep.mubr.msk.bf16.mxu1 %vm1979_vm2, %v9106_v34 }
 0x1e2   : > { %v2848_v13 = vpack.c.bf16 %v2724_v10, %v2723_v9 }
 0x1e3   : > { %v2847_v14 = vpack.c.bf16 %v2722_v12, %v2721_v11  ;;  %v7836_v15 = vpop.f32.mrb[20].mxu1 }
 0x1e4   : > { %v2247_v16 = vadd.f32 %v7836_v15, %v9241_v23  ;;  %v2238_v17 = vpop.f32.mrb[21].mxu1 }
 0x1e5   : > { %v2239_v18 = vadd.f32 %v9241_v23, %v2238_v17  ;;  %v7837_v19 = vpop.f32.mrb[22].mxu1  ;;  %7966 = vmatprep.mubr.msk.bf16.mxu0 %vm1979_vm2, %v2847_v14 }
 0x1e6   : > { %v2250_v20 = vadd.f32 %v7837_v19, %v9241_v23  ;;  %v2241_v21 = vpop.f32.mrb[23].mxu1  ;;  %7967 = vmatmul.mubr.msk.bf16.gmra.mrb[120].mxu0 %vm1979_vm2, %v2848_v13  ;;  %v2727_v25 = vmax.f32 %v2247_v16, 0.0 }
 0x1e7   : > { %v2242_v22 = vadd.f32 %v9241_v23, %v2241_v21  ;;  %v2725_v27 = vmax.f32 %v2239_v18, 0.0 }
 0x1e8   : > { %v2728_v34 = vmax.f32 %v2250_v20, 0.0  ;;  %7943 = vmatmul.mubr.msk.bf16.gmra.mrb[128].mxu1 %vm1979_vm2, %v9103_v31 }
 0x1e9   : > { %v2726_v28 = vmax.f32 %v2242_v22, 0.0  ;;  %7946 = vmatprep.mubr.msk.bf16.mxu1 %vm1979_vm2, %v9120_v61 }
 0x1ea   : > { %v2850_v29 = vpack.c.bf16 %v2728_v34, %v2727_v25 }
 0x1eb   : > { %v7840_v30 = vpop.f32.mrb[24].mxu1  ;;  %v2849_v32 = vpack.c.bf16 %v2726_v28, %v2725_v27 }
 0x1ec   : > { %v2263_v33 = vadd.f32 %v7840_v30, %v9241_v23  ;;  %v2254_v35 = vpop.f32.mrb[25].mxu1 }
 0x1ed   : > { %v2255_v36 = vadd.f32 %v9241_v23, %v2254_v35  ;;  %v7841_v37 = vpop.f32.mrb[26].mxu1  ;;  %7970 = vmatprep.mubr.msk.bf16.mxu0 %vm1979_vm2, %v2849_v32 }
 0x1ee   : > { %v2266_v38 = vadd.f32 %v7841_v37, %v9241_v23  ;;  %v2257_v39 = vpop.f32.mrb[27].mxu1  ;;  %7971 = vmatmul.mubr.msk.bf16.gmra.mrb[124].mxu0 %vm1979_vm2, %v2850_v29  ;;  %v2731_v6 = vmax.f32 %v2263_v33, 0.0 }
 0x1ef   : > { %v2258_v31 = vadd.f32 %v9241_v23, %v2257_v39  ;;  %v2729_v40 = vmax.f32 %v2255_v36, 0.0 }
 0x1f0   : > { %v2732_v61 = vmax.f32 %v2266_v38, 0.0  ;;  %7947 = vmatmul.mubr.msk.bf16.gmra.mrb[132].mxu1 %vm1979_vm2, %v9117_v59 }
 0x1f1   : > { %v2730_v41 = vmax.f32 %v2258_v31, 0.0  ;;  %7950 = vmatprep.mubr.msk.bf16.mxu1 %vm1979_vm2, %v9134_v26 }
 0x1f2   : > { %v2852_v42 = vpack.c.bf16 %v2732_v61, %v2731_v6 }
 0x1f3   : > { %v2851_v43 = vpack.c.bf16 %v2730_v41, %v2729_v40  ;;  %v7844_v44 = vpop.f32.mrb[28].mxu1 }
 0x1f4   : > { %v2279_v45 = vadd.f32 %v7844_v44, %v9241_v23  ;;  %v2270_v46 = vpop.f32.mrb[29].mxu1 }
 0x1f5   : > { %v2271_v47 = vadd.f32 %v9241_v23, %v2270_v46  ;;  %v7845_v48 = vpop.f32.mrb[30].mxu1  ;;  %7974 = vmatprep.mubr.msk.bf16.mxu0 %vm1979_vm2, %v2851_v43 }
 0x1f6   : > { %v2282_v49 = vadd.f32 %v7845_v48, %v9241_v23  ;;  %v2273_v50 = vpop.f32.mrb[31].mxu1  ;;  %7975 = vmatmul.mubr.msk.bf16.gmra.mrb[128].mxu0 %vm1979_vm2, %v2852_v42  ;;  %v2735_v51 = vmax.f32 %v2279_v45, 0.0 }
 0x1f7   : > { %v2274_v59 = vadd.f32 %v9241_v23, %v2273_v50  ;;  %v2733_v52 = vmax.f32 %v2271_v47, 0.0 }
 0x1f8   : > { %v2736_v26 = vmax.f32 %v2282_v49, 0.0  ;;  %7951 = vmatmul.mubr.msk.bf16.gmra.mrb[136].mxu1 %vm1979_vm2, %v9131_v24  ;;  %v8495_v24 = vld [vmem:[%s10400_s7 + $0x18] sm:$0xff]  }
 0x1f9   : > { %v2734_v53 = vmax.f32 %v2274_v59, 0.0  ;;  %8096 = vmatprep.subr.bf16.mxu1 %v8495_v24 }
 0x1fa   : > { %v2854_v54 = vpack.c.bf16 %v2736_v26, %v2735_v51  ;;  %8097 = vmatpush3.bf16.msra.mxu1 %v8495_v24  ;;  %v8496_v26 = vld [vmem:[%s10402_s9] sm:$0xff]  }
 0x1fb   : > { %v2853_v55 = vpack.c.bf16 %v2734_v53, %v2733_v52  ;;  %v7848_v56 = vpop.f32.mrb[32].mxu1  ;;  %8226 = vmatprep.subr.bf16.mxu0 %v8496_v26 }
 0x1fc   : > { %v2295_v57 = vadd.f32 %v7848_v56, %v9241_v23  ;;  %v2286_v58 = vpop.f32.mrb[33].mxu1  ;;  %8227 = vmatpush3.bf16.msra.mxu0 %v8496_v26 }
 0x1fd   : > { %v2287_v60 = vadd.f32 %v9241_v23, %v2286_v58  ;;  %v7849_v62 = vpop.f32.mrb[34].mxu1  ;;  %7978 = vmatprep.mubr.msk.bf16.mxu0 %vm1979_vm2, %v2853_v55 }
 0x1fe   : > { %v2298_v63 = vadd.f32 %v7849_v62, %v9241_v23  ;;  %v2289_v0 = vpop.f32.mrb[35].mxu1  ;;  %7979 = vmatmul.mubr.msk.bf16.gmra.mrb[132].mxu0 %vm1979_vm2, %v2854_v54  ;;  %v2739_v2 = vmax.f32 %v2295_v57, 0.0 }
 0x1ff   : > { %v2290_v1 = vadd.f32 %v9241_v23, %v2289_v0  ;;  %v2737_v4 = vmax.f32 %v2287_v60, 0.0 }
 0x200   : > { %v2740_v3 = vmax.f32 %v2298_v63, 0.0 }
 0x201   : > { %v2738_v5 = vmax.f32 %v2290_v1, 0.0 }
 0x202   : > { %v2856_v7 = vpack.c.bf16 %v2740_v3, %v2739_v2 }
 0x203   : > { %v2855_v8 = vpack.c.bf16 %v2738_v5, %v2737_v4  ;;  %v7852_v9 = vpop.f32.mrb[36].mxu1 }
 0x204   : > { %v2311_v10 = vadd.f32 %v7852_v9, %v9241_v23  ;;  %v2302_v11 = vpop.f32.mrb[37].mxu1 }
 0x205   : > { %v2303_v12 = vadd.f32 %v9241_v23, %v2302_v11  ;;  %v7853_v13 = vpop.f32.mrb[38].mxu1  ;;  %7982 = vmatprep.mubr.msk.bf16.mxu0 %vm1979_vm2, %v2855_v8 }
 0x206   : > { %v2314_v14 = vadd.f32 %v7853_v13, %v9241_v23  ;;  %v2305_v15 = vpop.f32.mrb[39].mxu1  ;;  %7983 = vmatmul.mubr.msk.bf16.gmra.mrb[136].mxu0 %vm1979_vm2, %v2856_v7  ;;  %v2743_v17 = vmax.f32 %v2311_v10, 0.0 }
 0x207   : > { %v2306_v16 = vadd.f32 %v9241_v23, %v2305_v15  ;;  %v2741_v19 = vmax.f32 %v2303_v12, 0.0 }
 0x208   : > { %v2744_v18 = vmax.f32 %v2314_v14, 0.0 }
 0x209   : > { %v2742_v20 = vmax.f32 %v2306_v16, 0.0 }
 0x20a   : > { %v2858_v21 = vpack.c.bf16 %v2744_v18, %v2743_v17 }
 0x20b   : > { %v2857_v22 = vpack.c.bf16 %v2742_v20, %v2741_v19  ;;  %v7856_v25 = vpop.f32.mrb[40].mxu1 }
 0x20c   : > { %v2327_v34 = vadd.f32 %v7856_v25, %v9241_v23  ;;  %v2318_v27 = vpop.f32.mrb[41].mxu1 }
 0x20d   : > { %v2319_v28 = vadd.f32 %v9241_v23, %v2318_v27  ;;  %v7857_v29 = vpop.f32.mrb[42].mxu1  ;;  %7986 = vmatprep.mubr.msk.bf16.mxu0 %vm1979_vm2, %v2857_v22 }
 0x20e   : > { %v2330_v30 = vadd.f32 %v7857_v29, %v9241_v23  ;;  %v2321_v32 = vpop.f32.mrb[43].mxu1  ;;  %7987 = vmatmul.mubr.msk.bf16.gmra.mrb[140].mxu0 %vm1979_vm2, %v2858_v21  ;;  %v2747_v35 = vmax.f32 %v2327_v34, 0.0 }
 0x20f   : > { %v2322_v33 = vadd.f32 %v9241_v23, %v2321_v32  ;;  %v2745_v37 = vmax.f32 %v2319_v28, 0.0 }
 0x210   : > { %v2748_v36 = vmax.f32 %v2330_v30, 0.0 }
 0x211   : > { %v2746_v38 = vmax.f32 %v2322_v33, 0.0 }
 0x212   : > { %v2860_v39 = vpack.c.bf16 %v2748_v36, %v2747_v35 }
 0x213   : > { %v2859_v31 = vpack.c.bf16 %v2746_v38, %v2745_v37  ;;  %v7860_v6 = vpop.f32.mrb[44].mxu1 }
 0x214   : > { %v2343_v61 = vadd.f32 %v7860_v6, %v9241_v23  ;;  %v2334_v40 = vpop.f32.mrb[45].mxu1 }
 0x215   : > { %v2335_v41 = vadd.f32 %v9241_v23, %v2334_v40  ;;  %v7861_v42 = vpop.f32.mrb[46].mxu1  ;;  %7990 = vmatprep.mubr.msk.bf16.mxu0 %vm1979_vm2, %v2859_v31 }
 0x216   : > { %v2346_v43 = vadd.f32 %v7861_v42, %v9241_v23  ;;  %v2337_v44 = vpop.f32.mrb[47].mxu1  ;;  %7991 = vmatmul.mubr.msk.bf16.gmra.mrb[144].mxu0 %vm1979_vm2, %v2860_v39  ;;  %v2751_v46 = vmax.f32 %v2343_v61, 0.0 }
 0x217   : > { %v2338_v45 = vadd.f32 %v9241_v23, %v2337_v44  ;;  %v2749_v48 = vmax.f32 %v2335_v41, 0.0 }
 0x218   : > { %v2752_v47 = vmax.f32 %v2346_v43, 0.0 }
 0x219   : > { %v2750_v49 = vmax.f32 %v2338_v45, 0.0 }
 0x21a   : > { %v2862_v50 = vpack.c.bf16 %v2752_v47, %v2751_v46 }
 0x21b   : > { %v2861_v59 = vpack.c.bf16 %v2750_v49, %v2749_v48  ;;  %v7864_v51 = vpop.f32.mrb[48].mxu1  ;;  %v8497_v49 = vld [vmem:[%s10402_s9 + $0x8] sm:$0xff]  }
 0x21c   : > { %v2359_v52 = vadd.f32 %v7864_v51, %v9241_v23  ;;  %v2350_v53 = vpop.f32.mrb[49].mxu1  ;;  %8228 = vmatprep.subr.bf16.mxu0 %v8497_v49 }
 0x21d   : > { %v2351_v54 = vadd.f32 %v9241_v23, %v2350_v53  ;;  %v7865_v55 = vpop.f32.mrb[50].mxu1  ;;  %7994 = vmatprep.mubr.msk.bf16.mxu0 %vm1979_vm2, %v2861_v59  ;;  %8229 = vmatpush3.bf16.msra.mxu0 %v8497_v49 }
 0x21e   : > { %v2362_v56 = vadd.f32 %v7865_v55, %v9241_v23  ;;  %v2353_v57 = vpop.f32.mrb[51].mxu1  ;;  %7995 = vmatmul.mubr.msk.bf16.gmra.mrb[148].mxu0 %vm1979_vm2, %v2862_v50  ;;  %v2755_v60 = vmax.f32 %v2359_v52, 0.0 }
 0x21f   : > { %v2354_v58 = vadd.f32 %v9241_v23, %v2353_v57  ;;  %v2753_v63 = vmax.f32 %v2351_v54, 0.0 }
 0x220   : > { %v2756_v62 = vmax.f32 %v2362_v56, 0.0 }
 0x221   : > { %v2754_v0 = vmax.f32 %v2354_v58, 0.0 }
 0x222   : > { %v2864_v24 = vpack.c.bf16 %v2756_v62, %v2755_v60 }
 0x223   : > { %v2863_v1 = vpack.c.bf16 %v2754_v0, %v2753_v63  ;;  %v7868_v2 = vpop.f32.mrb[52].mxu1 }
 0x224   : > { %v2375_v3 = vadd.f32 %v7868_v2, %v9241_v23  ;;  %v2366_v4 = vpop.f32.mrb[53].mxu1 }
 0x225   : > { %v2367_v5 = vadd.f32 %v9241_v23, %v2366_v4  ;;  %v7869_v7 = vpop.f32.mrb[54].mxu1  ;;  %7998 = vmatprep.mubr.msk.bf16.mxu0 %vm1979_vm2, %v2863_v1 }
 0x226   : > { %v2378_v8 = vadd.f32 %v7869_v7, %v9241_v23  ;;  %v2369_v9 = vpop.f32.mrb[55].mxu1  ;;  %7999 = vmatmul.mubr.msk.bf16.gmra.mrb[152].mxu0 %vm1979_vm2, %v2864_v24  ;;  %v2759_v11 = vmax.f32 %v2375_v3, 0.0 }
 0x227   : > { %v2370_v10 = vadd.f32 %v9241_v23, %v2369_v9  ;;  %v2757_v13 = vmax.f32 %v2367_v5, 0.0 }
 0x228   : > { %v2760_v12 = vmax.f32 %v2378_v8, 0.0 }
 0x229   : > { %v2758_v14 = vmax.f32 %v2370_v10, 0.0 }
 0x22a   : > { %v2866_v15 = vpack.c.bf16 %v2760_v12, %v2759_v11 }
 0x22b   : > { %v2865_v16 = vpack.c.bf16 %v2758_v14, %v2757_v13  ;;  %v7872_v17 = vpop.f32.mrb[56].mxu1 }
 0x22c   : > { %v2391_v18 = vadd.f32 %v7872_v17, %v9241_v23  ;;  %v2382_v19 = vpop.f32.mrb[57].mxu1 }
 0x22d   : > { %v2383_v20 = vadd.f32 %v9241_v23, %v2382_v19  ;;  %v7873_v21 = vpop.f32.mrb[58].mxu1  ;;  %8002 = vmatprep.mubr.msk.bf16.mxu0 %vm1979_vm2, %v2865_v16 }
 0x22e   : > { %v2394_v22 = vadd.f32 %v7873_v21, %v9241_v23  ;;  %v2385_v25 = vpop.f32.mrb[59].mxu1  ;;  %8003 = vmatmul.mubr.msk.bf16.gmra.mrb[156].mxu0 %vm1979_vm2, %v2866_v15  ;;  %v2763_v27 = vmax.f32 %v2391_v18, 0.0 }
 0x22f   : > { %v2386_v34 = vadd.f32 %v9241_v23, %v2385_v25  ;;  %v2761_v29 = vmax.f32 %v2383_v20, 0.0 }
 0x230   : > { %v2764_v28 = vmax.f32 %v2394_v22, 0.0 }
 0x231   : > { %v2762_v30 = vmax.f32 %v2386_v34, 0.0 }
 0x232   : > { %v2868_v32 = vpack.c.bf16 %v2764_v28, %v2763_v27 }
 0x233   : > { %v2867_v33 = vpack.c.bf16 %v2762_v30, %v2761_v29  ;;  %v7876_v35 = vpop.f32.mrb[60].mxu1 }
 0x234   : > { %v2407_v36 = vadd.f32 %v7876_v35, %v9241_v23  ;;  %v2398_v37 = vpop.f32.mrb[61].mxu1 }
 0x235   : > { %v2399_v38 = vadd.f32 %v9241_v23, %v2398_v37  ;;  %v7877_v39 = vpop.f32.mrb[62].mxu1  ;;  %8006 = vmatprep.mubr.msk.bf16.mxu0 %vm1979_vm2, %v2867_v33 }
 0x236   : > { %v2410_v31 = vadd.f32 %v7877_v39, %v9241_v23  ;;  %v2401_v6 = vpop.f32.mrb[63].mxu1  ;;  %8007 = vmatmul.mubr.msk.bf16.gmra.mrb[160].mxu0 %vm1979_vm2, %v2868_v32  ;;  %v2767_v40 = vmax.f32 %v2407_v36, 0.0 }
 0x237   : > { %v2402_v61 = vadd.f32 %v9241_v23, %v2401_v6  ;;  %v2765_v42 = vmax.f32 %v2399_v38, 0.0 }
 0x238   : > { %v2768_v41 = vmax.f32 %v2410_v31, 0.0 }
 0x239   : > { %v2766_v43 = vmax.f32 %v2402_v61, 0.0 }
 0x23a   : > { %v2870_v44 = vpack.c.bf16 %v2768_v41, %v2767_v40 }
 0x23b   : > { %v2869_v45 = vpack.c.bf16 %v2766_v43, %v2765_v42  ;;  %v7880_v46 = vpop.f32.mrb[64].mxu1  ;;  %v8498_v43 = vld [vmem:[%s10402_s9 + $0x10] sm:$0xff]  }
 0x23c   : > { %v2423_v47 = vadd.f32 %v7880_v46, %v9241_v23  ;;  %v2414_v48 = vpop.f32.mrb[65].mxu1  ;;  %8230 = vmatprep.subr.bf16.mxu0 %v8498_v43 }
 0x23d   : > { %v2415_v50 = vadd.f32 %v9241_v23, %v2414_v48  ;;  %v7881_v59 = vpop.f32.mrb[66].mxu1  ;;  %8010 = vmatprep.mubr.msk.bf16.mxu0 %vm1979_vm2, %v2869_v45  ;;  %8231 = vmatpush3.bf16.msra.mxu0 %v8498_v43 }
 0x23e   : > { %v2426_v51 = vadd.f32 %v7881_v59, %v9241_v23  ;;  %v2417_v26 = vpop.f32.mrb[67].mxu1  ;;  %8011 = vmatmul.mubr.msk.bf16.gmra.mrb[164].mxu0 %vm1979_vm2, %v2870_v44  ;;  %v2771_v53 = vmax.f32 %v2423_v47, 0.0 }
 0x23f   : > { %v2418_v52 = vadd.f32 %v9241_v23, %v2417_v26  ;;  %v2769_v55 = vmax.f32 %v2415_v50, 0.0 }
 0x240   : > { %v2772_v54 = vmax.f32 %v2426_v51, 0.0 }
 0x241   : > { %v2770_v56 = vmax.f32 %v2418_v52, 0.0 }
 0x242   : > { %v2872_v57 = vpack.c.bf16 %v2772_v54, %v2771_v53 }
 0x243   : > { %v2871_v58 = vpack.c.bf16 %v2770_v56, %v2769_v55  ;;  %v7884_v60 = vpop.f32.mrb[68].mxu1 }
 0x244   : > { %v2439_v62 = vadd.f32 %v7884_v60, %v9241_v23  ;;  %v2430_v63 = vpop.f32.mrb[69].mxu1 }
 0x245   : > { %v2431_v0 = vadd.f32 %v9241_v23, %v2430_v63  ;;  %v7885_v24 = vpop.f32.mrb[70].mxu1  ;;  %8014 = vmatprep.mubr.msk.bf16.mxu0 %vm1979_vm2, %v2871_v58 }
 0x246   : > { %v2442_v1 = vadd.f32 %v7885_v24, %v9241_v23  ;;  %v2433_v2 = vpop.f32.mrb[71].mxu1  ;;  %8015 = vmatmul.mubr.msk.bf16.gmra.mrb[168].mxu0 %vm1979_vm2, %v2872_v57  ;;  %v2775_v4 = vmax.f32 %v2439_v62, 0.0 }
 0x247   : > { %v2434_v3 = vadd.f32 %v9241_v23, %v2433_v2  ;;  %v2773_v7 = vmax.f32 %v2431_v0, 0.0 }
 0x248   : > { %v2776_v5 = vmax.f32 %v2442_v1, 0.0 }
 0x249   : > { %v2774_v8 = vmax.f32 %v2434_v3, 0.0 }
 0x24a   : > { %v2874_v9 = vpack.c.bf16 %v2776_v5, %v2775_v4 }
 0x24b   : > { %v2873_v10 = vpack.c.bf16 %v2774_v8, %v2773_v7  ;;  %v7888_v11 = vpop.f32.mrb[72].mxu1 }
 0x24c   : > { %v2455_v12 = vadd.f32 %v7888_v11, %v9241_v23  ;;  %v2446_v13 = vpop.f32.mrb[73].mxu1 }
 0x24d   : > { %v2447_v14 = vadd.f32 %v9241_v23, %v2446_v13  ;;  %v7889_v15 = vpop.f32.mrb[74].mxu1  ;;  %8018 = vmatprep.mubr.msk.bf16.mxu0 %vm1979_vm2, %v2873_v10 }
 0x24e   : > { %v2458_v16 = vadd.f32 %v7889_v15, %v9241_v23  ;;  %v2449_v17 = vpop.f32.mrb[75].mxu1  ;;  %8019 = vmatmul.mubr.msk.bf16.gmra.mrb[172].mxu0 %vm1979_vm2, %v2874_v9  ;;  %v2779_v19 = vmax.f32 %v2455_v12, 0.0 }
 0x24f   : > { %v2450_v18 = vadd.f32 %v9241_v23, %v2449_v17  ;;  %v2777_v21 = vmax.f32 %v2447_v14, 0.0 }
 0x250   : > { %v2780_v20 = vmax.f32 %v2458_v16, 0.0 }
 0x251   : > { %v2778_v22 = vmax.f32 %v2450_v18, 0.0 }
 0x252   : > { %v2876_v25 = vpack.c.bf16 %v2780_v20, %v2779_v19 }
 0x253   : > { %v2875_v34 = vpack.c.bf16 %v2778_v22, %v2777_v21  ;;  %v7892_v27 = vpop.f32.mrb[76].mxu1 }
 0x254   : > { %v2471_v28 = vadd.f32 %v7892_v27, %v9241_v23  ;;  %v2462_v29 = vpop.f32.mrb[77].mxu1 }
 0x255   : > { %v2463_v30 = vadd.f32 %v9241_v23, %v2462_v29  ;;  %v7893_v32 = vpop.f32.mrb[78].mxu1  ;;  %8022 = vmatprep.mubr.msk.bf16.mxu0 %vm1979_vm2, %v2875_v34 }
 0x256   : > { %v2474_v33 = vadd.f32 %v7893_v32, %v9241_v23  ;;  %v2465_v35 = vpop.f32.mrb[79].mxu1  ;;  %8023 = vmatmul.mubr.msk.bf16.gmra.mrb[176].mxu0 %vm1979_vm2, %v2876_v25  ;;  %v2783_v37 = vmax.f32 %v2471_v28, 0.0 }
 0x257   : > { %v2466_v36 = vadd.f32 %v9241_v23, %v2465_v35  ;;  %v2781_v39 = vmax.f32 %v2463_v30, 0.0 }
 0x258   : > { %v2784_v38 = vmax.f32 %v2474_v33, 0.0 }
 0x259   : > { %v2782_v31 = vmax.f32 %v2466_v36, 0.0 }
 0x25a   : > { %v2878_v6 = vpack.c.bf16 %v2784_v38, %v2783_v37 }
 0x25b   : > { %v2877_v61 = vpack.c.bf16 %v2782_v31, %v2781_v39  ;;  %v7896_v40 = vpop.f32.mrb[80].mxu1  ;;  %v8499_v31 = vld [vmem:[%s10402_s9 + $0x18] sm:$0xff]  }
 0x25c   : > { %v2487_v41 = vadd.f32 %v7896_v40, %v9241_v23  ;;  %v2478_v42 = vpop.f32.mrb[81].mxu1  ;;  %8232 = vmatprep.subr.bf16.mxu0 %v8499_v31 }
 0x25d   : > { %v2479_v44 = vadd.f32 %v9241_v23, %v2478_v42  ;;  %v7897_v45 = vpop.f32.mrb[82].mxu1  ;;  %8026 = vmatprep.mubr.msk.bf16.mxu0 %vm1979_vm2, %v2877_v61  ;;  %8233 = vmatpush3.bf16.msra.mxu0 %v8499_v31 }
 0x25e   : > { %v2490_v46 = vadd.f32 %v7897_v45, %v9241_v23  ;;  %v2481_v47 = vpop.f32.mrb[83].mxu1  ;;  %8027 = vmatmul.mubr.msk.bf16.gmra.mrb[180].mxu0 %vm1979_vm2, %v2878_v6  ;;  %v2787_v49 = vmax.f32 %v2487_v41, 0.0 }
 0x25f   : > { %v2482_v48 = vadd.f32 %v9241_v23, %v2481_v47  ;;  %v2785_v59 = vmax.f32 %v2479_v44, 0.0 }
 0x260   : > { %v2788_v50 = vmax.f32 %v2490_v46, 0.0 }
 0x261   : > { %v2786_v51 = vmax.f32 %v2482_v48, 0.0 }
 0x262   : > { %v2880_v26 = vpack.c.bf16 %v2788_v50, %v2787_v49 }
 0x263   : > { %v2879_v52 = vpack.c.bf16 %v2786_v51, %v2785_v59  ;;  %v7900_v53 = vpop.f32.mrb[84].mxu1 }
 0x264   : > { %v2503_v54 = vadd.f32 %v7900_v53, %v9241_v23  ;;  %v2494_v55 = vpop.f32.mrb[85].mxu1 }
 0x265   : > { %v2495_v56 = vadd.f32 %v9241_v23, %v2494_v55  ;;  %v7901_v57 = vpop.f32.mrb[86].mxu1  ;;  %8030 = vmatprep.mubr.msk.bf16.mxu0 %vm1979_vm2, %v2879_v52 }
 0x266   : > { %v2506_v58 = vadd.f32 %v7901_v57, %v9241_v23  ;;  %v2497_v60 = vpop.f32.mrb[87].mxu1  ;;  %8031 = vmatmul.mubr.msk.bf16.gmra.mrb[184].mxu0 %vm1979_vm2, %v2880_v26  ;;  %v2791_v63 = vmax.f32 %v2503_v54, 0.0 }
 0x267   : > { %v2498_v62 = vadd.f32 %v9241_v23, %v2497_v60  ;;  %v2789_v24 = vmax.f32 %v2495_v56, 0.0 }
 0x268   : > { %v2792_v0 = vmax.f32 %v2506_v58, 0.0 }
 0x269   : > { %v2790_v1 = vmax.f32 %v2498_v62, 0.0 }
 0x26a   : > { %v2882_v2 = vpack.c.bf16 %v2792_v0, %v2791_v63 }
 0x26b   : > { %v2881_v3 = vpack.c.bf16 %v2790_v1, %v2789_v24  ;;  %v7904_v4 = vpop.f32.mrb[88].mxu1 }
 0x26c   : > { %v2519_v5 = vadd.f32 %v7904_v4, %v9241_v23  ;;  %v2510_v7 = vpop.f32.mrb[89].mxu1 }
 0x26d   : > { %v2511_v8 = vadd.f32 %v9241_v23, %v2510_v7  ;;  %v7905_v9 = vpop.f32.mrb[90].mxu1  ;;  %8034 = vmatprep.mubr.msk.bf16.mxu0 %vm1979_vm2, %v2881_v3 }
 0x26e   : > { %v2522_v10 = vadd.f32 %v7905_v9, %v9241_v23  ;;  %v2513_v11 = vpop.f32.mrb[91].mxu1  ;;  %8035 = vmatmul.mubr.msk.bf16.gmra.mrb[188].mxu0 %vm1979_vm2, %v2882_v2  ;;  %v2795_v13 = vmax.f32 %v2519_v5, 0.0 }
 0x26f   : > { %v2514_v12 = vadd.f32 %v9241_v23, %v2513_v11  ;;  %v2793_v15 = vmax.f32 %v2511_v8, 0.0 }
 0x270   : > { %v2796_v14 = vmax.f32 %v2522_v10, 0.0 }
 0x271   : > { %v2794_v16 = vmax.f32 %v2514_v12, 0.0 }
 0x272   : > { %v2884_v17 = vpack.c.bf16 %v2796_v14, %v2795_v13 }
 0x273   : > { %v2883_v18 = vpack.c.bf16 %v2794_v16, %v2793_v15  ;;  %v7908_v19 = vpop.f32.mrb[92].mxu1 }
 0x274   : > { %v2535_v20 = vadd.f32 %v7908_v19, %v9241_v23  ;;  %v2526_v21 = vpop.f32.mrb[93].mxu1 }
 0x275   : > { %v2527_v22 = vadd.f32 %v9241_v23, %v2526_v21  ;;  %v7909_v25 = vpop.f32.mrb[94].mxu1  ;;  %8038 = vmatprep.mubr.msk.bf16.mxu0 %vm1979_vm2, %v2883_v18 }
 0x276   : > { %v2538_v34 = vadd.f32 %v7909_v25, %v9241_v23  ;;  %v2529_v27 = vpop.f32.mrb[95].mxu1  ;;  %8039 = vmatmul.mubr.msk.bf16.gmra.mrb[192].mxu0 %vm1979_vm2, %v2884_v17  ;;  %v2799_v29 = vmax.f32 %v2535_v20, 0.0 }
 0x277   : > { %v2530_v28 = vadd.f32 %v9241_v23, %v2529_v27  ;;  %v2797_v32 = vmax.f32 %v2527_v22, 0.0 }
 0x278   : > { %v2800_v30 = vmax.f32 %v2538_v34, 0.0 }
 0x279   : > { %v2798_v33 = vmax.f32 %v2530_v28, 0.0 }
 0x27a   : > { %v2886_v35 = vpack.c.bf16 %v2800_v30, %v2799_v29 }
 0x27b   : > { %v2885_v36 = vpack.c.bf16 %v2798_v33, %v2797_v32  ;;  %v7912_v37 = vpop.f32.mrb[96].mxu1  ;;  %v8500_v33 = vld [vmem:[%s10402_s9 + $0x20] sm:$0xff]  }
 0x27c   : > { %v2551_v38 = vadd.f32 %v7912_v37, %v9241_v23  ;;  %v2542_v39 = vpop.f32.mrb[97].mxu1  ;;  %8234 = vmatprep.subr.bf16.mxu0 %v8500_v33 }
 0x27d   : > { %v2543_v6 = vadd.f32 %v9241_v23, %v2542_v39  ;;  %v7913_v61 = vpop.f32.mrb[98].mxu1  ;;  %8042 = vmatprep.mubr.msk.bf16.mxu0 %vm1979_vm2, %v2885_v36  ;;  %8235 = vmatpush3.bf16.msra.mxu0 %v8500_v33 }
 0x27e   : > { %v2554_v40 = vadd.f32 %v7913_v61, %v9241_v23  ;;  %v2545_v41 = vpop.f32.mrb[99].mxu1  ;;  %8043 = vmatmul.mubr.msk.bf16.gmra.mrb[196].mxu0 %vm1979_vm2, %v2886_v35  ;;  %v2803_v43 = vmax.f32 %v2551_v38, 0.0 }
 0x27f   : > { %v2546_v42 = vadd.f32 %v9241_v23, %v2545_v41  ;;  %v2801_v45 = vmax.f32 %v2543_v6, 0.0 }
 0x280   : > { %v2804_v44 = vmax.f32 %v2554_v40, 0.0 }
 0x281   : > { %v2802_v46 = vmax.f32 %v2546_v42, 0.0 }
 0x282   : > { %v2888_v47 = vpack.c.bf16 %v2804_v44, %v2803_v43 }
 0x283   : > { %v2887_v48 = vpack.c.bf16 %v2802_v46, %v2801_v45  ;;  %v7916_v49 = vpop.f32.mrb[100].mxu1 }
 0x284   : > { %v2567_v50 = vadd.f32 %v7916_v49, %v9241_v23  ;;  %v2558_v59 = vpop.f32.mrb[101].mxu1 }
 0x285   : > { %v2559_v51 = vadd.f32 %v9241_v23, %v2558_v59  ;;  %v7917_v26 = vpop.f32.mrb[102].mxu1  ;;  %8046 = vmatprep.mubr.msk.bf16.mxu0 %vm1979_vm2, %v2887_v48 }
 0x286   : > { %v2570_v52 = vadd.f32 %v7917_v26, %v9241_v23  ;;  %v2561_v53 = vpop.f32.mrb[103].mxu1  ;;  %8047 = vmatmul.mubr.msk.bf16.gmra.mrb[200].mxu0 %vm1979_vm2, %v2888_v47  ;;  %v2807_v55 = vmax.f32 %v2567_v50, 0.0 }
 0x287   : > { %v2562_v54 = vadd.f32 %v9241_v23, %v2561_v53  ;;  %v2805_v57 = vmax.f32 %v2559_v51, 0.0 }
 0x288   : > { %v2808_v56 = vmax.f32 %v2570_v52, 0.0 }
 0x289   : > { %v2806_v58 = vmax.f32 %v2562_v54, 0.0 }
 0x28a   : > { %v2890_v60 = vpack.c.bf16 %v2808_v56, %v2807_v55 }
 0x28b   : > { %v2889_v62 = vpack.c.bf16 %v2806_v58, %v2805_v57  ;;  %v7920_v63 = vpop.f32.mrb[104].mxu1 }
 0x28c   : > { %v2583_v0 = vadd.f32 %v7920_v63, %v9241_v23  ;;  %v2574_v24 = vpop.f32.mrb[105].mxu1 }
 0x28d   : > { %v2575_v1 = vadd.f32 %v9241_v23, %v2574_v24  ;;  %v7921_v2 = vpop.f32.mrb[106].mxu1  ;;  %8050 = vmatprep.mubr.msk.bf16.mxu0 %vm1979_vm2, %v2889_v62  ;;  %v9449_v24 = vld [vmem:[%s10399_s6] ss:$0 sm:$0xff] }
 0x28e   : > { %v2586_v3 = vadd.f32 %v7921_v2, %v9241_v23  ;;  %v2577_v4 = vpop.f32.mrb[107].mxu1  ;;  %8051 = vmatmul.mubr.msk.bf16.gmra.mrb[204].mxu0 %vm1979_vm2, %v2890_v60  ;;  %v2811_v7 = vmax.f32 %v2583_v0, 0.0 }
 0x28f   : > { %v2578_v5 = vadd.f32 %v9241_v23, %v2577_v4  ;;  %v2809_v9 = vmax.f32 %v2575_v1, 0.0 }
 0x290   : > { %v2812_v8 = vmax.f32 %v2586_v3, 0.0 }
 0x291   : > { %v2810_v10 = vmax.f32 %v2578_v5, 0.0 }
 0x292   : > { %v2892_v11 = vpack.c.bf16 %v2812_v8, %v2811_v7 }
 0x293   : > { %v2891_v12 = vpack.c.bf16 %v2810_v10, %v2809_v9  ;;  %v7924_v13 = vpop.f32.mrb[108].mxu1 }
 0x294   : > { %v2599_v14 = vadd.f32 %v7924_v13, %v9241_v23  ;;  %v2590_v15 = vpop.f32.mrb[109].mxu1 }
 0x295   : > { %v2591_v16 = vadd.f32 %v9241_v23, %v2590_v15  ;;  %v7925_v17 = vpop.f32.mrb[110].mxu1  ;;  %8054 = vmatprep.mubr.msk.bf16.mxu0 %vm1979_vm2, %v2891_v12 }
 0x296   : > { %v2602_v18 = vadd.f32 %v7925_v17, %v9241_v23  ;;  %v2593_v19 = vpop.f32.mrb[111].mxu1  ;;  %8055 = vmatmul.mubr.msk.bf16.gmra.mrb[208].mxu0 %vm1979_vm2, %v2892_v11  ;;  %v2815_v21 = vmax.f32 %v2599_v14, 0.0 }
 0x297   : > { %v2594_v20 = vadd.f32 %v9241_v23, %v2593_v19  ;;  %v2813_v25 = vmax.f32 %v2591_v16, 0.0 }
 0x298   : > { %v2816_v22 = vmax.f32 %v2602_v18, 0.0 }
 0x299   : > { %v2814_v34 = vmax.f32 %v2594_v20, 0.0 }
 0x29a   : > { %v2894_v27 = vpack.c.bf16 %v2816_v22, %v2815_v21 }
 0x29b   : > { %v2893_v28 = vpack.c.bf16 %v2814_v34, %v2813_v25  ;;  %v7928_v29 = vpop.f32.mrb[112].mxu1  ;;  %v9461_v25 = vld [vmem:[%s10397_s4] ss:$0 sm:$0xff] }
 0x29c   : > { %v2615_v30 = vadd.f32 %v7928_v29, %v9241_v23  ;;  %v2606_v32 = vpop.f32.mrb[113].mxu1 }
 0x29d   : > { %v2607_v35 = vadd.f32 %v9241_v23, %v2606_v32  ;;  %v7929_v36 = vpop.f32.mrb[114].mxu1  ;;  %8058 = vmatprep.mubr.msk.bf16.mxu0 %vm1979_vm2, %v2893_v28 }
 0x29e   : > { %v2618_v37 = vadd.f32 %v7929_v36, %v9241_v23  ;;  %v2609_v38 = vpop.f32.mrb[115].mxu1  ;;  %8059 = vmatmul.mubr.msk.bf16.gmra.mrb[212].mxu0 %vm1979_vm2, %v2894_v27  ;;  %v2819_v31 = vmax.f32 %v2615_v30, 0.0 }
 0x29f   : > { %v2610_v39 = vadd.f32 %v9241_v23, %v2609_v38  ;;  %v2817_v61 = vmax.f32 %v2607_v35, 0.0 }
 0x2a0   : > { %v2820_v6 = vmax.f32 %v2618_v37, 0.0 }
 0x2a1   : > { %v2818_v40 = vmax.f32 %v2610_v39, 0.0 }
 0x2a2   : > { %v2896_v41 = vpack.c.bf16 %v2820_v6, %v2819_v31 }
 0x2a3   : > { %v2895_v42 = vpack.c.bf16 %v2818_v40, %v2817_v61  ;;  %v7932_v43 = vpop.f32.mrb[116].mxu1 }
 0x2a4   : > { %v2631_v44 = vadd.f32 %v7932_v43, %v9241_v23  ;;  %v2622_v45 = vpop.f32.mrb[117].mxu1 }
 0x2a5   : > { %v2623_v46 = vadd.f32 %v9241_v23, %v2622_v45  ;;  %v7933_v47 = vpop.f32.mrb[118].mxu1  ;;  %8062 = vmatprep.mubr.msk.bf16.mxu0 %vm1979_vm2, %v2895_v42 }
 0x2a6   : > { %v2634_v48 = vadd.f32 %v7933_v47, %v9241_v23  ;;  %v2625_v49 = vpop.f32.mrb[119].mxu1  ;;  %8063 = vmatmul.mubr.msk.bf16.gmra.mrb[216].mxu0 %vm1979_vm2, %v2896_v41  ;;  %v2823_v59 = vmax.f32 %v2631_v44, 0.0  ;;  %v8501_v47 = vld [vmem:[%s10402_s9 + $0x28] sm:$0xff]  }
 0x2a7   : > { %v2626_v50 = vadd.f32 %v9241_v23, %v2625_v49  ;;  %v2821_v26 = vmax.f32 %v2623_v46, 0.0  ;;  %8236 = vmatprep.subr.bf16.mxu0 %v8501_v47 }
 0x2a8   : > { %v2824_v51 = vmax.f32 %v2634_v48, 0.0  ;;  %8237 = vmatpush3.bf16.msra.mxu0 %v8501_v47 }
 0x2a9   : > { %v2822_v52 = vmax.f32 %v2626_v50, 0.0 }
 0x2aa   : > { %v2898_v53 = vpack.c.bf16 %v2824_v51, %v2823_v59 }
 0x2ab   : > { %v2897_v54 = vpack.c.bf16 %v2822_v52, %v2821_v26  ;;  %v7936_v55 = vpop.f32.mrb[120].mxu1 }
 0x2ac   : > { %v2647_v56 = vadd.f32 %v7936_v55, %v9241_v23  ;;  %v2638_v57 = vpop.f32.mrb[121].mxu1 }
 0x2ad   : > { %v2639_v58 = vadd.f32 %v9241_v23, %v2638_v57  ;;  %v7937_v60 = vpop.f32.mrb[122].mxu1  ;;  %8066 = vmatprep.mubr.msk.bf16.mxu0 %vm1979_vm2, %v2897_v54 }
 0x2ae   : > { %v2650_v62 = vadd.f32 %v7937_v60, %v9241_v23  ;;  %v2641_v63 = vpop.f32.mrb[123].mxu1  ;;  %8067 = vmatmul.mubr.msk.bf16.gmra.mrb[220].mxu0 %vm1979_vm2, %v2898_v53  ;;  %v2827_v1 = vmax.f32 %v2647_v56, 0.0 }
 0x2af   : > { %v2642_v0 = vadd.f32 %v9241_v23, %v2641_v63  ;;  %v2825_v3 = vmax.f32 %v2639_v58, 0.0 }
 0x2b0   : > { %v2828_v2 = vmax.f32 %v2650_v62, 0.0 }
 0x2b1   : > { %v2826_v4 = vmax.f32 %v2642_v0, 0.0  ;;  %v7964_v5 = vpop.f32.mrb[116].mxu0 }
 0x2b2   : > { %v2900_v7 = vpack.c.bf16 %v2828_v2, %v2827_v1  ;;  %v3183_v8 = vadd.f32 %v7964_v5, %v9449_v24  ;;  %v3174_v9 = vpop.f32.mrb[117].mxu0 }
 0x2b3   : > { %v2899_v10 = vpack.c.bf16 %v2826_v4, %v2825_v3  ;;  %v3175_v11 = vadd.f32 %v9449_v24, %v3174_v9  ;;  %v7940_v12 = vpop.f32.mrb[124].mxu1  ;;  %v7965_v13 = vpop.f32.mrb[118].mxu0 }
 0x2b4   : > { %v2663_v14 = vadd.f32 %v7940_v12, %v9241_v23  ;;  %v3186_v15 = vadd.f32 %v7965_v13, %v9449_v24  ;;  %v2654_v16 = vpop.f32.mrb[125].mxu1  ;;  %v3177_v17 = vpop.f32.mrb[119].mxu0  ;;  %v3687_v21 = vmax.f32 %v3183_v8, 0.0 }
 0x2b5   : > { %v2655_v18 = vadd.f32 %v9241_v23, %v2654_v16  ;;  %v3178_v19 = vadd.f32 %v9449_v24, %v3177_v17  ;;  %v7941_v20 = vpop.f32.mrb[126].mxu1  ;;  %8070 = vmatprep.mubr.msk.bf16.mxu0 %vm1979_vm2, %v2899_v10  ;;  %v3685_v28 = vmax.f32 %v3175_v11, 0.0 }
 0x2b6   : > { %v3688_v22 = vmax.f32 %v3186_v15, 0.0  ;;  %v2666_v34 = vadd.f32 %v9461_v25, %v7941_v20  ;;  %v2657_v27 = vpop.f32.mrb[127].mxu1  ;;  %8071 = vmatmul.mubr.msk.bf16.gmra.mrb[224].mxu0 %vm1979_vm2, %v2900_v7  ;;  %v2831_v30 = vmax.f32 %v2663_v14, 0.0 }
 0x2b7   : > { %v3686_v29 = vmax.f32 %v3178_v19, 0.0  ;;  %v2658_v23 = vadd.f32 %v9461_v25, %v2657_v27  ;;  %v2829_v35 = vmax.f32 %v2655_v18, 0.0 }
 0x2b8   : > { %v3814_v32 = vpack.c.bf16 %v3688_v22, %v3687_v21  ;;  %v2832_v33 = vmax.f32 %v2666_v34, 0.0 }
 0x2b9   : > { %v3813_v36 = vpack.c.bf16 %v3686_v29, %v3685_v28  ;;  %v2830_v37 = vmax.f32 %v2658_v23, 0.0  ;;  %v7968_v38 = vpop.f32.mrb[120].mxu0 }
 0x2ba   : > { %v2902_v39 = vpack.c.bf16 %v2832_v33, %v2831_v30  ;;  %v3199_v31 = vadd.f32 %v7968_v38, %v9449_v24  ;;  %v3190_v6 = vpop.f32.mrb[121].mxu0 }
 0x2bb   : > { %v2901_v61 = vpack.c.bf16 %v2830_v37, %v2829_v35  ;;  %v3191_v40 = vadd.f32 %v9449_v24, %v3190_v6  ;;  %v7944_v41 = vpop.f32.mrb[128].mxu1  ;;  %v7969_v42 = vpop.f32.mrb[122].mxu0  ;;  %8098 = vmatprep.mubr.msk.bf16.mxu1 %vm1979_vm2, %v3813_v36 }
 0x2bc   : > { %v2679_v43 = vadd.f32 %v9461_v25, %v7944_v41  ;;  %v3202_v44 = vadd.f32 %v7969_v42, %v9449_v24  ;;  %v2670_v45 = vpop.f32.mrb[129].mxu1  ;;  %v3193_v46 = vpop.f32.mrb[123].mxu0  ;;  %8099 = vmatmul.mubr.msk.bf16.vlgmr.msra.gmra.mrb[140].mxu1 %vm1979_vm2, %v3814_v32  ;;  %v3691_v59 = vmax.f32 %v3199_v31, 0.0 }
 0x2bd   : > { %v2671_v48 = vadd.f32 %v9461_v25, %v2670_v45  ;;  %v3194_v49 = vadd.f32 %v9449_v24, %v3193_v46  ;;  %v7945_v50 = vpop.f32.mrb[130].mxu1  ;;  %8074 = vmatprep.mubr.msk.bf16.mxu0 %vm1979_vm2, %v2901_v61  ;;  %v3689_v53 = vmax.f32 %v3191_v40, 0.0 }
 0x2be   : > { %v3692_v51 = vmax.f32 %v3202_v44, 0.0  ;;  %v2682_v26 = vadd.f32 %v9461_v25, %v7945_v50  ;;  %v2673_v52 = vpop.f32.mrb[131].mxu1  ;;  %8075 = vmatmul.mubr.msk.bf16.gmra.mrb[228].mxu0 %vm1979_vm2, %v2902_v39  ;;  %v2835_v56 = vmax.f32 %v2679_v43, 0.0 }
 0x2bf   : > { %v3690_v54 = vmax.f32 %v3194_v49, 0.0  ;;  %v2674_v55 = vadd.f32 %v9461_v25, %v2673_v52  ;;  %v2833_v60 = vmax.f32 %v2671_v48, 0.0 }
 0x2c0   : > { %v3816_v57 = vpack.c.bf16 %v3692_v51, %v3691_v59  ;;  %v2836_v58 = vmax.f32 %v2682_v26, 0.0 }
 0x2c1   : > { %v3815_v62 = vpack.c.bf16 %v3690_v54, %v3689_v53  ;;  %v2834_v63 = vmax.f32 %v2674_v55, 0.0  ;;  %v7972_v0 = vpop.f32.mrb[124].mxu0 }
 0x2c2   : > { %v2904_v1 = vpack.c.bf16 %v2836_v58, %v2835_v56  ;;  %v3215_v2 = vadd.f32 %v7972_v0, %v9449_v24  ;;  %v3206_v3 = vpop.f32.mrb[125].mxu0 }
 0x2c3   : > { %v2903_v4 = vpack.c.bf16 %v2834_v63, %v2833_v60  ;;  %v3207_v5 = vadd.f32 %v9449_v24, %v3206_v3  ;;  %v7948_v7 = vpop.f32.mrb[132].mxu1  ;;  %v7973_v8 = vpop.f32.mrb[126].mxu0  ;;  %8102 = vmatprep.mubr.msk.bf16.mxu1 %vm1979_vm2, %v3815_v62 }
 0x2c4   : > { %v2695_v9 = vadd.f32 %v9461_v25, %v7948_v7  ;;  %v3218_v10 = vadd.f32 %v7973_v8, %v9449_v24  ;;  %v2686_v11 = vpop.f32.mrb[133].mxu1  ;;  %v3209_v12 = vpop.f32.mrb[127].mxu0  ;;  %8103 = vmatmul.mubr.msk.bf16.gmra.mrb[144].mxu1 %vm1979_vm2, %v3816_v57  ;;  %v3695_v16 = vmax.f32 %v3215_v2, 0.0 }
 0x2c5   : > { %v2687_v13 = vadd.f32 %v9461_v25, %v2686_v11  ;;  %v3210_v14 = vadd.f32 %v9449_v24, %v3209_v12  ;;  %v7949_v15 = vpop.f32.mrb[134].mxu1  ;;  %8078 = vmatprep.mubr.msk.bf16.mxu0 %vm1979_vm2, %v2903_v4  ;;  %v3693_v20 = vmax.f32 %v3207_v5, 0.0 }
 0x2c6   : > { %v3696_v17 = vmax.f32 %v3218_v10, 0.0  ;;  %v2698_v18 = vadd.f32 %v9461_v25, %v7949_v15  ;;  %v2689_v19 = vpop.f32.mrb[135].mxu1  ;;  %8079 = vmatmul.mubr.msk.bf16.gmra.mrb[232].mxu0 %vm1979_vm2, %v2904_v1  ;;  %v2839_v34 = vmax.f32 %v2695_v9, 0.0 }
 0x2c7   : > { %v3694_v21 = vmax.f32 %v3210_v14, 0.0  ;;  %v2690_v22 = vadd.f32 %v9461_v25, %v2689_v19  ;;  %v2837_v29 = vmax.f32 %v2687_v13, 0.0 }
 0x2c8   : > { %v3818_v27 = vpack.c.bf16 %v3696_v17, %v3695_v16  ;;  %v2840_v28 = vmax.f32 %v2698_v18, 0.0  ;;  %v8502_v17 = vld [vmem:[%s10402_s9 + $0x30] sm:$0xff]  }
 0x2c9   : > { %v3817_v23 = vpack.c.bf16 %v3694_v21, %v3693_v20  ;;  %v2838_v30 = vmax.f32 %v2690_v22, 0.0  ;;  %v7976_v32 = vpop.f32.mrb[128].mxu0  ;;  %8238 = vmatprep.subr.bf16.mxu0 %v8502_v17 }
 0x2ca   : > { %v2906_v33 = vpack.c.bf16 %v2840_v28, %v2839_v34  ;;  %v3231_v35 = vadd.f32 %v7976_v32, %v9449_v24  ;;  %v3222_v36 = vpop.f32.mrb[129].mxu0  ;;  %8239 = vmatpush3.bf16.msra.mxu0 %v8502_v17 }
 0x2cb   : > { %v2905_v37 = vpack.c.bf16 %v2838_v30, %v2837_v29  ;;  %v3223_v38 = vadd.f32 %v9449_v24, %v3222_v36  ;;  %v7952_v39 = vpop.f32.mrb[136].mxu1  ;;  %v7977_v31 = vpop.f32.mrb[130].mxu0  ;;  %8106 = vmatprep.mubr.msk.bf16.mxu1 %vm1979_vm2, %v3817_v23 }
 0x2cc   : > { %v2711_v6 = vadd.f32 %v9461_v25, %v7952_v39  ;;  %v3234_v61 = vadd.f32 %v7977_v31, %v9449_v24  ;;  %v2702_v40 = vpop.f32.mrb[137].mxu1  ;;  %v3225_v41 = vpop.f32.mrb[131].mxu0  ;;  %8107 = vmatmul.mubr.msk.bf16.gmra.mrb[148].mxu1 %vm1979_vm2, %v3818_v27  ;;  %v3699_v45 = vmax.f32 %v3231_v35, 0.0 }
 0x2cd   : > { %v2703_v42 = vadd.f32 %v9461_v25, %v2702_v40  ;;  %v3226_v43 = vadd.f32 %v9449_v24, %v3225_v41  ;;  %v7953_v44 = vpop.f32.mrb[138].mxu1  ;;  %8082 = vmatprep.mubr.msk.bf16.mxu0 %vm1979_vm2, %v2905_v37  ;;  %v3697_v49 = vmax.f32 %v3223_v38, 0.0 }
 0x2ce   : > { %v3700_v46 = vmax.f32 %v3234_v61, 0.0  ;;  %v2714_v47 = vadd.f32 %v9461_v25, %v7953_v44  ;;  %v2705_v48 = vpop.f32.mrb[139].mxu1  ;;  %8083 = vmatmul.mubr.msk.bf16.gmra.mrb[236].mxu0 %vm1979_vm2, %v2906_v33  ;;  %v2843_v51 = vmax.f32 %v2711_v6, 0.0 }
 0x2cf   : > { %v3698_v50 = vmax.f32 %v3226_v43, 0.0  ;;  %v2706_v59 = vadd.f32 %v9461_v25, %v2705_v48  ;;  %v2841_v53 = vmax.f32 %v2703_v42, 0.0 }
 0x2d0   : > { %v3820_v26 = vpack.c.bf16 %v3700_v46, %v3699_v45  ;;  %v2844_v52 = vmax.f32 %v2714_v47, 0.0 }
 0x2d1   : > { %v3819_v54 = vpack.c.bf16 %v3698_v50, %v3697_v49  ;;  %v2842_v55 = vmax.f32 %v2706_v59, 0.0  ;;  %v7980_v56 = vpop.f32.mrb[132].mxu0 }
 0x2d2   : > { %v2908_v57 = vpack.c.bf16 %v2844_v52, %v2843_v51  ;;  %v3247_v58 = vadd.f32 %v7980_v56, %v9449_v24  ;;  %v3238_v60 = vpop.f32.mrb[133].mxu0 }
 0x2d3   : > { %v2907_v62 = vpack.c.bf16 %v2842_v55, %v2841_v53  ;;  %v3239_v63 = vadd.f32 %v9449_v24, %v3238_v60  ;;  %v7981_v0 = vpop.f32.mrb[134].mxu0  ;;  %8110 = vmatprep.mubr.msk.bf16.mxu1 %vm1979_vm2, %v3819_v54 }
 0x2d4   : > { %v3250_v1 = vadd.f32 %v7981_v0, %v9449_v24  ;;  %v3241_v25 = vpop.f32.mrb[135].mxu0  ;;  %8111 = vmatmul.mubr.msk.bf16.gmra.mrb[152].mxu1 %vm1979_vm2, %v3820_v26  ;;  %v3703_v3 = vmax.f32 %v3247_v58, 0.0 }
 0x2d5   : > { %v3242_v2 = vadd.f32 %v9449_v24, %v3241_v25  ;;  %8086 = vmatprep.mubr.msk.bf16.mxu0 %vm1979_vm2, %v2907_v62  ;;  %v3701_v5 = vmax.f32 %v3239_v63, 0.0 }
 0x2d6   : > { %v3704_v4 = vmax.f32 %v3250_v1, 0.0  ;;  %8087 = vmatmul.mubr.msk.bf16.gmra.mrb[240].mxu0 %vm1979_vm2, %v2908_v57 }
 0x2d7   : > { %v3702_v7 = vmax.f32 %v3242_v2, 0.0 }
 0x2d8   : > { %v3822_v8 = vpack.c.bf16 %v3704_v4, %v3703_v3 }
 0x2d9   : > { %v3821_v9 = vpack.c.bf16 %v3702_v7, %v3701_v5  ;;  %v7984_v10 = vpop.f32.mrb[136].mxu0 }
 0x2da   : > { %v3263_v11 = vadd.f32 %v7984_v10, %v9449_v24  ;;  %v3254_v12 = vpop.f32.mrb[137].mxu0 }
 0x2db   : > { %v3255_v13 = vadd.f32 %v9449_v24, %v3254_v12  ;;  %v7985_v14 = vpop.f32.mrb[138].mxu0  ;;  %8114 = vmatprep.mubr.msk.bf16.mxu1 %vm1979_vm2, %v3821_v9 }
 0x2dc   : > { %v3266_v15 = vadd.f32 %v7985_v14, %v9449_v24  ;;  %v3257_v16 = vpop.f32.mrb[139].mxu0  ;;  %8115 = vmatmul.mubr.msk.bf16.gmra.mrb[156].mxu1 %vm1979_vm2, %v3822_v8  ;;  %v3707_v19 = vmax.f32 %v3263_v11, 0.0  ;;  %v8503_v11 = vld [vmem:[%s10402_s9 + $0x38] sm:$0xff]  }
 0x2dd   : > { %v3258_v18 = vadd.f32 %v9449_v24, %v3257_v16  ;;  %v3705_v21 = vmax.f32 %v3255_v13, 0.0  ;;  %8240 = vmatprep.subr.bf16.mxu0 %v8503_v11 }
 0x2de   : > { %v3708_v20 = vmax.f32 %v3266_v15, 0.0  ;;  %8241 = vmatpush3.bf16.msra.mxu0 %v8503_v11 }
 0x2df   : > { %v3706_v22 = vmax.f32 %v3258_v18, 0.0 }
 0x2e0   : > { %v3824_v34 = vpack.c.bf16 %v3708_v20, %v3707_v19 }
 0x2e1   : > { %v3823_v27 = vpack.c.bf16 %v3706_v22, %v3705_v21  ;;  %v7988_v28 = vpop.f32.mrb[140].mxu0 }
 0x2e2   : > { %v3279_v29 = vadd.f32 %v7988_v28, %v9449_v24  ;;  %v3270_v23 = vpop.f32.mrb[141].mxu0 }
 0x2e3   : > { %v3271_v30 = vadd.f32 %v9449_v24, %v3270_v23  ;;  %v7989_v32 = vpop.f32.mrb[142].mxu0  ;;  %8118 = vmatprep.mubr.msk.bf16.mxu1 %vm1979_vm2, %v3823_v27 }
 0x2e4   : > { %v3282_v33 = vadd.f32 %v7989_v32, %v9449_v24  ;;  %v3273_v35 = vpop.f32.mrb[143].mxu0  ;;  %8119 = vmatmul.mubr.msk.bf16.gmra.mrb[160].mxu1 %vm1979_vm2, %v3824_v34  ;;  %v3711_v37 = vmax.f32 %v3279_v29, 0.0 }
 0x2e5   : > { %v3274_v36 = vadd.f32 %v9449_v24, %v3273_v35  ;;  %v3709_v39 = vmax.f32 %v3271_v30, 0.0 }
 0x2e6   : > { %v3712_v38 = vmax.f32 %v3282_v33, 0.0 }
 0x2e7   : > { %v3710_v31 = vmax.f32 %v3274_v36, 0.0 }
 0x2e8   : > { %v3826_v6 = vpack.c.bf16 %v3712_v38, %v3711_v37 }
 0x2e9   : > { %v3825_v61 = vpack.c.bf16 %v3710_v31, %v3709_v39  ;;  %v7992_v40 = vpop.f32.mrb[144].mxu0 }
 0x2ea   : > { %v3295_v41 = vadd.f32 %v7992_v40, %v9449_v24  ;;  %v3286_v42 = vpop.f32.mrb[145].mxu0 }
 0x2eb   : > { %v3287_v43 = vadd.f32 %v9449_v24, %v3286_v42  ;;  %v7993_v44 = vpop.f32.mrb[146].mxu0  ;;  %8122 = vmatprep.mubr.msk.bf16.mxu1 %vm1979_vm2, %v3825_v61 }
 0x2ec   : > { %v3298_v45 = vadd.f32 %v7993_v44, %v9449_v24  ;;  %v3289_v46 = vpop.f32.mrb[147].mxu0  ;;  %8123 = vmatmul.mubr.msk.bf16.gmra.mrb[164].mxu1 %vm1979_vm2, %v3826_v6  ;;  %v3715_v48 = vmax.f32 %v3295_v41, 0.0 }
 0x2ed   : > { %v3290_v47 = vadd.f32 %v9449_v24, %v3289_v46  ;;  %v3713_v50 = vmax.f32 %v3287_v43, 0.0 }
 0x2ee   : > { %v3716_v49 = vmax.f32 %v3298_v45, 0.0 }
 0x2ef   : > { %v3714_v59 = vmax.f32 %v3290_v47, 0.0 }
 0x2f0   : > { %v3828_v51 = vpack.c.bf16 %v3716_v49, %v3715_v48 }
 0x2f1   : > { %v3827_v26 = vpack.c.bf16 %v3714_v59, %v3713_v50  ;;  %v7996_v52 = vpop.f32.mrb[148].mxu0 }
 0x2f2   : > { %v3311_v53 = vadd.f32 %v7996_v52, %v9449_v24  ;;  %v3302_v54 = vpop.f32.mrb[149].mxu0 }
 0x2f3   : > { %v3303_v55 = vadd.f32 %v9449_v24, %v3302_v54  ;;  %v7997_v56 = vpop.f32.mrb[150].mxu0  ;;  %8126 = vmatprep.mubr.msk.bf16.mxu1 %vm1979_vm2, %v3827_v26 }
 0x2f4   : > { %v3314_v57 = vadd.f32 %v7997_v56, %v9449_v24  ;;  %v3305_v58 = vpop.f32.mrb[151].mxu0  ;;  %8127 = vmatmul.mubr.msk.bf16.gmra.mrb[168].mxu1 %vm1979_vm2, %v3828_v51  ;;  %v3719_v62 = vmax.f32 %v3311_v53, 0.0 }
 0x2f5   : > { %v3306_v60 = vadd.f32 %v9449_v24, %v3305_v58  ;;  %v3717_v0 = vmax.f32 %v3303_v55, 0.0 }
 0x2f6   : > { %v3720_v63 = vmax.f32 %v3314_v57, 0.0 }
 0x2f7   : > { %v3718_v1 = vmax.f32 %v3306_v60, 0.0 }
 0x2f8   : > { %v3830_v25 = vpack.c.bf16 %v3720_v63, %v3719_v62 }
 0x2f9   : > { %v3829_v2 = vpack.c.bf16 %v3718_v1, %v3717_v0  ;;  %v8000_v3 = vpop.f32.mrb[152].mxu0 }
 0x2fa   : > { %v3327_v4 = vadd.f32 %v8000_v3, %v9449_v24  ;;  %v3318_v5 = vpop.f32.mrb[153].mxu0 }
 0x2fb   : > { %v3319_v7 = vadd.f32 %v9449_v24, %v3318_v5  ;;  %v8001_v8 = vpop.f32.mrb[154].mxu0  ;;  %8130 = vmatprep.mubr.msk.bf16.mxu1 %vm1979_vm2, %v3829_v2 }
 0x2fc   : > { %v3330_v9 = vadd.f32 %v8001_v8, %v9449_v24  ;;  %v3321_v10 = vpop.f32.mrb[155].mxu0  ;;  %8131 = vmatmul.mubr.msk.bf16.gmra.mrb[172].mxu1 %vm1979_vm2, %v3830_v25  ;;  %v3723_v13 = vmax.f32 %v3327_v4, 0.0 }
 0x2fd   : > { %v3322_v12 = vadd.f32 %v9449_v24, %v3321_v10  ;;  %v3721_v15 = vmax.f32 %v3319_v7, 0.0 }
 0x2fe   : > { %v3724_v14 = vmax.f32 %v3330_v9, 0.0 }
 0x2ff   : > { %v3722_v16 = vmax.f32 %v3322_v12, 0.0 }
 0x300   : > { %v3832_v17 = vpack.c.bf16 %v3724_v14, %v3723_v13 }
 0x301   : > { %v3831_v18 = vpack.c.bf16 %v3722_v16, %v3721_v15  ;;  %v8004_v19 = vpop.f32.mrb[156].mxu0 }
 0x302   : > { %v3343_v20 = vadd.f32 %v8004_v19, %v9449_v24  ;;  %v3334_v21 = vpop.f32.mrb[157].mxu0 }
 0x303   : > { %v3335_v22 = vadd.f32 %v9449_v24, %v3334_v21  ;;  %v8005_v34 = vpop.f32.mrb[158].mxu0  ;;  %8134 = vmatprep.mubr.msk.bf16.mxu1 %vm1979_vm2, %v3831_v18 }
 0x304   : > { %v3346_v27 = vadd.f32 %v8005_v34, %v9449_v24  ;;  %v3337_v28 = vpop.f32.mrb[159].mxu0  ;;  %8135 = vmatmul.mubr.msk.bf16.gmra.mrb[176].mxu1 %vm1979_vm2, %v3832_v17  ;;  %v3727_v23 = vmax.f32 %v3343_v20, 0.0 }
 0x305   : > { %v3338_v29 = vadd.f32 %v9449_v24, %v3337_v28  ;;  %v3725_v32 = vmax.f32 %v3335_v22, 0.0 }
 0x306   : > { %v3728_v30 = vmax.f32 %v3346_v27, 0.0 }
 0x307   : > { %v3726_v33 = vmax.f32 %v3338_v29, 0.0 }
 0x308   : > { %v3834_v35 = vpack.c.bf16 %v3728_v30, %v3727_v23 }
 0x309   : > { %v3833_v36 = vpack.c.bf16 %v3726_v33, %v3725_v32  ;;  %v8008_v37 = vpop.f32.mrb[160].mxu0 }
 0x30a   : > { %v3359_v38 = vadd.f32 %v8008_v37, %v9449_v24  ;;  %v3350_v39 = vpop.f32.mrb[161].mxu0 }
 0x30b   : > { %v3351_v31 = vadd.f32 %v9449_v24, %v3350_v39  ;;  %v8009_v6 = vpop.f32.mrb[162].mxu0  ;;  %8138 = vmatprep.mubr.msk.bf16.mxu1 %vm1979_vm2, %v3833_v36 }
 0x30c   : > { %v3362_v61 = vadd.f32 %v8009_v6, %v9449_v24  ;;  %v3353_v40 = vpop.f32.mrb[163].mxu0  ;;  %8139 = vmatmul.mubr.msk.bf16.gmra.mrb[180].mxu1 %vm1979_vm2, %v3834_v35  ;;  %v3731_v42 = vmax.f32 %v3359_v38, 0.0 }
 0x30d   : > { %v3354_v41 = vadd.f32 %v9449_v24, %v3353_v40  ;;  %v3729_v44 = vmax.f32 %v3351_v31, 0.0 }
 0x30e   : > { %v3732_v43 = vmax.f32 %v3362_v61, 0.0 }
 0x30f   : > { %v3730_v45 = vmax.f32 %v3354_v41, 0.0 }
 0x310   : > { %v3836_v46 = vpack.c.bf16 %v3732_v43, %v3731_v42 }
 0x311   : > { %v3835_v47 = vpack.c.bf16 %v3730_v45, %v3729_v44  ;;  %v8012_v48 = vpop.f32.mrb[164].mxu0 }
 0x312   : > { %v3375_v49 = vadd.f32 %v8012_v48, %v9449_v24  ;;  %v3366_v50 = vpop.f32.mrb[165].mxu0 }
 0x313   : > { %v3367_v59 = vadd.f32 %v9449_v24, %v3366_v50  ;;  %v8013_v51 = vpop.f32.mrb[166].mxu0  ;;  %8142 = vmatprep.mubr.msk.bf16.mxu1 %vm1979_vm2, %v3835_v47 }
 0x314   : > { %v3378_v26 = vadd.f32 %v8013_v51, %v9449_v24  ;;  %v3369_v52 = vpop.f32.mrb[167].mxu0  ;;  %8143 = vmatmul.mubr.msk.bf16.gmra.mrb[184].mxu1 %vm1979_vm2, %v3836_v46  ;;  %v3735_v54 = vmax.f32 %v3375_v49, 0.0 }
 0x315   : > { %v3370_v53 = vadd.f32 %v9449_v24, %v3369_v52  ;;  %v3733_v56 = vmax.f32 %v3367_v59, 0.0 }
 0x316   : > { %v3736_v55 = vmax.f32 %v3378_v26, 0.0 }
 0x317   : > { %v3734_v57 = vmax.f32 %v3370_v53, 0.0 }
 0x318   : > { %v3838_v58 = vpack.c.bf16 %v3736_v55, %v3735_v54 }
 0x319   : > { %v3837_v60 = vpack.c.bf16 %v3734_v57, %v3733_v56  ;;  %v8016_v62 = vpop.f32.mrb[168].mxu0 }
 0x31a   : > { %v3391_v63 = vadd.f32 %v8016_v62, %v9449_v24  ;;  %v3382_v0 = vpop.f32.mrb[169].mxu0 }
 0x31b   : > { %v3383_v1 = vadd.f32 %v9449_v24, %v3382_v0  ;;  %v8017_v25 = vpop.f32.mrb[170].mxu0  ;;  %8146 = vmatprep.mubr.msk.bf16.mxu1 %vm1979_vm2, %v3837_v60 }
 0x31c   : > { %v3394_v2 = vadd.f32 %v8017_v25, %v9449_v24  ;;  %v3385_v3 = vpop.f32.mrb[171].mxu0  ;;  %8147 = vmatmul.mubr.msk.bf16.gmra.mrb[188].mxu1 %vm1979_vm2, %v3838_v58  ;;  %v3739_v5 = vmax.f32 %v3391_v63, 0.0 }
 0x31d   : > { %v3386_v4 = vadd.f32 %v9449_v24, %v3385_v3  ;;  %v3737_v8 = vmax.f32 %v3383_v1, 0.0 }
 0x31e   : > { %v3740_v7 = vmax.f32 %v3394_v2, 0.0 }
 0x31f   : > { %v3738_v9 = vmax.f32 %v3386_v4, 0.0 }
 0x320   : > { %v3840_v10 = vpack.c.bf16 %v3740_v7, %v3739_v5 }
 0x321   : > { %v3839_v11 = vpack.c.bf16 %v3738_v9, %v3737_v8  ;;  %v8020_v12 = vpop.f32.mrb[172].mxu0 }
 0x322   : > { %v3407_v13 = vadd.f32 %v8020_v12, %v9449_v24  ;;  %v3398_v14 = vpop.f32.mrb[173].mxu0 }
 0x323   : > { %v3399_v15 = vadd.f32 %v9449_v24, %v3398_v14  ;;  %v8021_v16 = vpop.f32.mrb[174].mxu0  ;;  %8150 = vmatprep.mubr.msk.bf16.mxu1 %vm1979_vm2, %v3839_v11 }
 0x324   : > { %v3410_v17 = vadd.f32 %v8021_v16, %v9449_v24  ;;  %v3401_v18 = vpop.f32.mrb[175].mxu0  ;;  %8151 = vmatmul.mubr.msk.bf16.gmra.mrb[192].mxu1 %vm1979_vm2, %v3840_v10  ;;  %v3743_v20 = vmax.f32 %v3407_v13, 0.0 }
 0x325   : > { %v3402_v19 = vadd.f32 %v9449_v24, %v3401_v18  ;;  %v3741_v22 = vmax.f32 %v3399_v15, 0.0 }
 0x326   : > { %v3744_v21 = vmax.f32 %v3410_v17, 0.0 }
 0x327   : > { %v3742_v34 = vmax.f32 %v3402_v19, 0.0 }
 0x328   : > { %v3842_v27 = vpack.c.bf16 %v3744_v21, %v3743_v20 }
 0x329   : > { %v3841_v28 = vpack.c.bf16 %v3742_v34, %v3741_v22  ;;  %v8024_v29 = vpop.f32.mrb[176].mxu0 }
 0x32a   : > { %v3423_v23 = vadd.f32 %v8024_v29, %v9449_v24  ;;  %v3414_v30 = vpop.f32.mrb[177].mxu0 }
 0x32b   : > { %v3415_v32 = vadd.f32 %v9449_v24, %v3414_v30  ;;  %v8025_v33 = vpop.f32.mrb[178].mxu0  ;;  %8154 = vmatprep.mubr.msk.bf16.mxu1 %vm1979_vm2, %v3841_v28 }
 0x32c   : > { %v3426_v35 = vadd.f32 %v8025_v33, %v9449_v24  ;;  %v3417_v36 = vpop.f32.mrb[179].mxu0  ;;  %8155 = vmatmul.mubr.msk.bf16.gmra.mrb[196].mxu1 %vm1979_vm2, %v3842_v27  ;;  %v3747_v38 = vmax.f32 %v3423_v23, 0.0 }
 0x32d   : > { %v3418_v37 = vadd.f32 %v9449_v24, %v3417_v36  ;;  %v3745_v31 = vmax.f32 %v3415_v32, 0.0 }
 0x32e   : > { %v3748_v39 = vmax.f32 %v3426_v35, 0.0 }
 0x32f   : > { %v3746_v6 = vmax.f32 %v3418_v37, 0.0 }
 0x330   : > { %v3844_v61 = vpack.c.bf16 %v3748_v39, %v3747_v38 }
 0x331   : > { %v3843_v40 = vpack.c.bf16 %v3746_v6, %v3745_v31  ;;  %v8028_v41 = vpop.f32.mrb[180].mxu0 }
 0x332   : > { %v3439_v42 = vadd.f32 %v8028_v41, %v9449_v24  ;;  %v3430_v43 = vpop.f32.mrb[181].mxu0 }
 0x333   : > { %v3431_v44 = vadd.f32 %v9449_v24, %v3430_v43  ;;  %v8029_v45 = vpop.f32.mrb[182].mxu0  ;;  %8158 = vmatprep.mubr.msk.bf16.mxu1 %vm1979_vm2, %v3843_v40 }
 0x334   : > { %v3442_v46 = vadd.f32 %v8029_v45, %v9449_v24  ;;  %v3433_v47 = vpop.f32.mrb[183].mxu0  ;;  %8159 = vmatmul.mubr.msk.bf16.gmra.mrb[200].mxu1 %vm1979_vm2, %v3844_v61  ;;  %v3751_v49 = vmax.f32 %v3439_v42, 0.0 }
 0x335   : > { %v3434_v48 = vadd.f32 %v9449_v24, %v3433_v47  ;;  %v3749_v59 = vmax.f32 %v3431_v44, 0.0 }
 0x336   : > { %v3752_v50 = vmax.f32 %v3442_v46, 0.0 }
 0x337   : > { %v3750_v51 = vmax.f32 %v3434_v48, 0.0 }
 0x338   : > { %v3846_v26 = vpack.c.bf16 %v3752_v50, %v3751_v49 }
 0x339   : > { %v3845_v52 = vpack.c.bf16 %v3750_v51, %v3749_v59  ;;  %v8032_v53 = vpop.f32.mrb[184].mxu0 }
 0x33a   : > { %v3455_v54 = vadd.f32 %v8032_v53, %v9449_v24  ;;  %v3446_v55 = vpop.f32.mrb[185].mxu0 }
 0x33b   : > { %v3447_v56 = vadd.f32 %v9449_v24, %v3446_v55  ;;  %v8033_v57 = vpop.f32.mrb[186].mxu0  ;;  %8162 = vmatprep.mubr.msk.bf16.mxu1 %vm1979_vm2, %v3845_v52 }
 0x33c   : > { %v3458_v58 = vadd.f32 %v8033_v57, %v9449_v24  ;;  %v3449_v60 = vpop.f32.mrb[187].mxu0  ;;  %8163 = vmatmul.mubr.msk.bf16.gmra.mrb[204].mxu1 %vm1979_vm2, %v3846_v26  ;;  %v3755_v63 = vmax.f32 %v3455_v54, 0.0 }
 0x33d   : > { %v3450_v62 = vadd.f32 %v9449_v24, %v3449_v60  ;;  %v3753_v1 = vmax.f32 %v3447_v56, 0.0 }
 0x33e   : > { %v3756_v0 = vmax.f32 %v3458_v58, 0.0 }
 0x33f   : > { %v3754_v25 = vmax.f32 %v3450_v62, 0.0 }
 0x340   : > { %v3848_v2 = vpack.c.bf16 %v3756_v0, %v3755_v63 }
 0x341   : > { %v3847_v3 = vpack.c.bf16 %v3754_v25, %v3753_v1  ;;  %v8036_v4 = vpop.f32.mrb[188].mxu0 }
 0x342   : > { %v3471_v5 = vadd.f32 %v8036_v4, %v9449_v24  ;;  %v3462_v7 = vpop.f32.mrb[189].mxu0 }
 0x343   : > { %v3463_v8 = vadd.f32 %v9449_v24, %v3462_v7  ;;  %v8037_v9 = vpop.f32.mrb[190].mxu0  ;;  %8166 = vmatprep.mubr.msk.bf16.mxu1 %vm1979_vm2, %v3847_v3 }
 0x344   : > { %v3474_v10 = vadd.f32 %v8037_v9, %v9449_v24  ;;  %v3465_v11 = vpop.f32.mrb[191].mxu0  ;;  %8167 = vmatmul.mubr.msk.bf16.gmra.mrb[208].mxu1 %vm1979_vm2, %v3848_v2  ;;  %v3759_v13 = vmax.f32 %v3471_v5, 0.0 }
 0x345   : > { %v3466_v12 = vadd.f32 %v9449_v24, %v3465_v11  ;;  %v3757_v15 = vmax.f32 %v3463_v8, 0.0 }
 0x346   : > { %v3760_v14 = vmax.f32 %v3474_v10, 0.0 }
 0x347   : > { %v3758_v16 = vmax.f32 %v3466_v12, 0.0 }
 0x348   : > { %v3850_v17 = vpack.c.bf16 %v3760_v14, %v3759_v13 }
 0x349   : > { %v3849_v18 = vpack.c.bf16 %v3758_v16, %v3757_v15  ;;  %v8040_v19 = vpop.f32.mrb[192].mxu0 }
 0x34a   : > { %v3487_v20 = vadd.f32 %v8040_v19, %v9449_v24  ;;  %v3478_v21 = vpop.f32.mrb[193].mxu0 }
 0x34b   : > { %v3479_v22 = vadd.f32 %v9449_v24, %v3478_v21  ;;  %v8041_v34 = vpop.f32.mrb[194].mxu0  ;;  %8170 = vmatprep.mubr.msk.bf16.mxu1 %vm1979_vm2, %v3849_v18 }
 0x34c   : > { %v3490_v27 = vadd.f32 %v8041_v34, %v9449_v24  ;;  %v3481_v28 = vpop.f32.mrb[195].mxu0  ;;  %8171 = vmatmul.mubr.msk.bf16.gmra.mrb[212].mxu1 %vm1979_vm2, %v3850_v17  ;;  %v3763_v23 = vmax.f32 %v3487_v20, 0.0 }
 0x34d   : > { %v3482_v29 = vadd.f32 %v9449_v24, %v3481_v28  ;;  %v3761_v32 = vmax.f32 %v3479_v22, 0.0 }
 0x34e   : > { %v3764_v30 = vmax.f32 %v3490_v27, 0.0 }
 0x34f   : > { %v3762_v33 = vmax.f32 %v3482_v29, 0.0 }
 0x350   : > { %v3852_v35 = vpack.c.bf16 %v3764_v30, %v3763_v23 }
 0x351   : > { %v3851_v36 = vpack.c.bf16 %v3762_v33, %v3761_v32  ;;  %v8044_v37 = vpop.f32.mrb[196].mxu0 }
 0x352   : > { %v3503_v38 = vadd.f32 %v8044_v37, %v9449_v24  ;;  %v3494_v39 = vpop.f32.mrb[197].mxu0 }
 0x353   : > { %v3495_v31 = vadd.f32 %v9449_v24, %v3494_v39  ;;  %v8045_v6 = vpop.f32.mrb[198].mxu0  ;;  %8174 = vmatprep.mubr.msk.bf16.mxu1 %vm1979_vm2, %v3851_v36 }
 0x354   : > { %v3506_v61 = vadd.f32 %v8045_v6, %v9449_v24  ;;  %v3497_v40 = vpop.f32.mrb[199].mxu0  ;;  %8175 = vmatmul.mubr.msk.bf16.gmra.mrb[216].mxu1 %vm1979_vm2, %v3852_v35  ;;  %v3767_v42 = vmax.f32 %v3503_v38, 0.0 }
 0x355   : > { %v3498_v41 = vadd.f32 %v9449_v24, %v3497_v40  ;;  %v3765_v44 = vmax.f32 %v3495_v31, 0.0 }
 0x356   : > { %v3768_v43 = vmax.f32 %v3506_v61, 0.0 }
 0x357   : > { %v3766_v45 = vmax.f32 %v3498_v41, 0.0 }
 0x358   : > { %v3854_v46 = vpack.c.bf16 %v3768_v43, %v3767_v42 }
 0x359   : > { %v3853_v47 = vpack.c.bf16 %v3766_v45, %v3765_v44  ;;  %v8048_v48 = vpop.f32.mrb[200].mxu0 }
 0x35a   : > { %v3519_v49 = vadd.f32 %v8048_v48, %v9449_v24  ;;  %v3510_v50 = vpop.f32.mrb[201].mxu0 }
 0x35b   : > { %v3511_v59 = vadd.f32 %v9449_v24, %v3510_v50  ;;  %v8049_v51 = vpop.f32.mrb[202].mxu0  ;;  %8178 = vmatprep.mubr.msk.bf16.mxu1 %vm1979_vm2, %v3853_v47 }
 0x35c   : > { %v3522_v26 = vadd.f32 %v8049_v51, %v9449_v24  ;;  %v3513_v52 = vpop.f32.mrb[203].mxu0  ;;  %8179 = vmatmul.mubr.msk.bf16.gmra.mrb[220].mxu1 %vm1979_vm2, %v3854_v46  ;;  %v3771_v54 = vmax.f32 %v3519_v49, 0.0 }
 0x35d   : > { %v3514_v53 = vadd.f32 %v9449_v24, %v3513_v52  ;;  %v3769_v56 = vmax.f32 %v3511_v59, 0.0 }
 0x35e   : > { %v3772_v55 = vmax.f32 %v3522_v26, 0.0 }
 0x35f   : > { %v3770_v57 = vmax.f32 %v3514_v53, 0.0 }
 0x360   : > { %v3856_v58 = vpack.c.bf16 %v3772_v55, %v3771_v54 }
 0x361   : > { %v3855_v60 = vpack.c.bf16 %v3770_v57, %v3769_v56  ;;  %v8052_v62 = vpop.f32.mrb[204].mxu0 }
 0x362   : > { %v3535_v63 = vadd.f32 %v8052_v62, %v9449_v24  ;;  %v3526_v0 = vpop.f32.mrb[205].mxu0 }
 0x363   : > { %v3527_v1 = vadd.f32 %v9449_v24, %v3526_v0  ;;  %v8053_v25 = vpop.f32.mrb[206].mxu0  ;;  %8182 = vmatprep.mubr.msk.bf16.mxu1 %vm1979_vm2, %v3855_v60 }
 0x364   : > { %v3538_v2 = vadd.f32 %v8053_v25, %v9449_v24  ;;  %v3529_v3 = vpop.f32.mrb[207].mxu0  ;;  %8183 = vmatmul.mubr.msk.bf16.gmra.mrb[224].mxu1 %vm1979_vm2, %v3856_v58  ;;  %v3775_v5 = vmax.f32 %v3535_v63, 0.0 }
 0x365   : > { %v3530_v4 = vadd.f32 %v9449_v24, %v3529_v3  ;;  %v3773_v8 = vmax.f32 %v3527_v1, 0.0 }
 0x366   : > { %v3776_v7 = vmax.f32 %v3538_v2, 0.0 }
 0x367   : > { %v3774_v9 = vmax.f32 %v3530_v4, 0.0 }
 0x368   : > { %v3858_v10 = vpack.c.bf16 %v3776_v7, %v3775_v5  ;;  %v9654_v5 = vld [vmem:[%s10399_s6] ss:$0 sm:$0xff] }
 0x369   : > { %v3857_v11 = vpack.c.bf16 %v3774_v9, %v3773_v8  ;;  %v8056_v12 = vpop.f32.mrb[208].mxu0 }
 0x36a   : > { %v3551_v13 = vadd.f32 %v8056_v12, %v9449_v24  ;;  %v3542_v14 = vpop.f32.mrb[209].mxu0 }
 0x36b   : > { %v3543_v15 = vadd.f32 %v9449_v24, %v3542_v14  ;;  %v8057_v16 = vpop.f32.mrb[210].mxu0  ;;  %8186 = vmatprep.mubr.msk.bf16.mxu1 %vm1979_vm2, %v3857_v11 }
 0x36c   : > { %v3554_v17 = vadd.f32 %v8057_v16, %v9449_v24  ;;  %v3545_v18 = vpop.f32.mrb[211].mxu0  ;;  %8187 = vmatmul.mubr.msk.bf16.gmra.mrb[228].mxu1 %vm1979_vm2, %v3858_v10  ;;  %v3779_v20 = vmax.f32 %v3551_v13, 0.0  ;;  %v9665_v13 = vld [vmem:[%s10401_s8] ss:$0 sm:$0xff] }
 0x36d   : > { %v3546_v19 = vadd.f32 %v9449_v24, %v3545_v18  ;;  %v3777_v22 = vmax.f32 %v3543_v15, 0.0 }
 0x36e   : > { %v3780_v21 = vmax.f32 %v3554_v17, 0.0 }
 0x36f   : > { %v3778_v34 = vmax.f32 %v3546_v19, 0.0 }
 0x370   : > { %v3860_v27 = vpack.c.bf16 %v3780_v21, %v3779_v20 }
 0x371   : > { %v3859_v28 = vpack.c.bf16 %v3778_v34, %v3777_v22  ;;  %v8060_v29 = vpop.f32.mrb[212].mxu0 }
 0x372   : > { %v3567_v23 = vadd.f32 %v8060_v29, %v9449_v24  ;;  %v3558_v30 = vpop.f32.mrb[213].mxu0 }
 0x373   : > { %v3559_v32 = vadd.f32 %v9449_v24, %v3558_v30  ;;  %v8061_v33 = vpop.f32.mrb[214].mxu0  ;;  %8190 = vmatprep.mubr.msk.bf16.mxu1 %vm1979_vm2, %v3859_v28 }
 0x374   : > { %v3570_v35 = vadd.f32 %v8061_v33, %v9449_v24  ;;  %v3561_v36 = vpop.f32.mrb[215].mxu0  ;;  %8191 = vmatmul.mubr.msk.bf16.gmra.mrb[232].mxu1 %vm1979_vm2, %v3860_v27  ;;  %v3783_v38 = vmax.f32 %v3567_v23, 0.0 }
 0x375   : > { %v3562_v37 = vadd.f32 %v9449_v24, %v3561_v36  ;;  %v3781_v31 = vmax.f32 %v3559_v32, 0.0 }
 0x376   : > { %v3784_v39 = vmax.f32 %v3570_v35, 0.0 }
 0x377   : > { %v3782_v6 = vmax.f32 %v3562_v37, 0.0 }
 0x378   : > { %v3862_v61 = vpack.c.bf16 %v3784_v39, %v3783_v38 }
 0x379   : > { %v3861_v40 = vpack.c.bf16 %v3782_v6, %v3781_v31  ;;  %v8064_v41 = vpop.f32.mrb[216].mxu0 }
 0x37a   : > { %v3583_v42 = vadd.f32 %v8064_v41, %v9449_v24  ;;  %v3574_v43 = vpop.f32.mrb[217].mxu0 }
 0x37b   : > { %v3575_v44 = vadd.f32 %v9449_v24, %v3574_v43  ;;  %v8065_v45 = vpop.f32.mrb[218].mxu0  ;;  %8194 = vmatprep.mubr.msk.bf16.mxu1 %vm1979_vm2, %v3861_v40 }
 0x37c   : > { %v3586_v46 = vadd.f32 %v8065_v45, %v9449_v24  ;;  %v3577_v47 = vpop.f32.mrb[219].mxu0  ;;  %8195 = vmatmul.mubr.msk.bf16.gmra.mrb[236].mxu1 %vm1979_vm2, %v3862_v61  ;;  %v3787_v49 = vmax.f32 %v3583_v42, 0.0 }
 0x37d   : > { %v3578_v48 = vadd.f32 %v9449_v24, %v3577_v47  ;;  %v3785_v59 = vmax.f32 %v3575_v44, 0.0 }
 0x37e   : > { %v3788_v50 = vmax.f32 %v3586_v46, 0.0 }
 0x37f   : > { %v3786_v51 = vmax.f32 %v3578_v48, 0.0 }
 0x380   : > { %v3864_v26 = vpack.c.bf16 %v3788_v50, %v3787_v49 }
 0x381   : > { %v3863_v52 = vpack.c.bf16 %v3786_v51, %v3785_v59  ;;  %v8068_v53 = vpop.f32.mrb[220].mxu0 }
 0x382   : > { %v3599_v54 = vadd.f32 %v8068_v53, %v9449_v24  ;;  %v3590_v55 = vpop.f32.mrb[221].mxu0 }
 0x383   : > { %v3591_v56 = vadd.f32 %v9449_v24, %v3590_v55  ;;  %v8069_v57 = vpop.f32.mrb[222].mxu0  ;;  %8198 = vmatprep.mubr.msk.bf16.mxu1 %vm1979_vm2, %v3863_v52 }
 0x384   : > { %v3602_v58 = vadd.f32 %v8069_v57, %v9449_v24  ;;  %v3593_v60 = vpop.f32.mrb[223].mxu0  ;;  %8199 = vmatmul.mubr.msk.bf16.gmra.mrb[240].mxu1 %vm1979_vm2, %v3864_v26  ;;  %v3791_v63 = vmax.f32 %v3599_v54, 0.0 }
 0x385   : > { %v3594_v62 = vadd.f32 %v9449_v24, %v3593_v60  ;;  %v3789_v1 = vmax.f32 %v3591_v56, 0.0 }
 0x386   : > { %v3792_v0 = vmax.f32 %v3602_v58, 0.0 }
 0x387   : > { %v3790_v25 = vmax.f32 %v3594_v62, 0.0 }
 0x388   : > { %v3866_v2 = vpack.c.bf16 %v3792_v0, %v3791_v63 }
 0x389   : > { %v3865_v3 = vpack.c.bf16 %v3790_v25, %v3789_v1  ;;  %v8072_v4 = vpop.f32.mrb[224].mxu0 }
 0x38a   : > { %v3615_v7 = vadd.f32 %v9654_v5, %v8072_v4  ;;  %v3606_v8 = vpop.f32.mrb[225].mxu0 }
 0x38b   : > { %v3607_v9 = vadd.f32 %v9654_v5, %v3606_v8  ;;  %v8073_v10 = vpop.f32.mrb[226].mxu0  ;;  %8202 = vmatprep.mubr.msk.bf16.mxu1 %vm1979_vm2, %v3865_v3 }
 0x38c   : > { %v3618_v24 = vadd.f32 %v9654_v5, %v8073_v10  ;;  %v3609_v11 = vpop.f32.mrb[227].mxu0  ;;  %8203 = vmatmul.mubr.msk.bf16.gmra.mrb[244].mxu1 %vm1979_vm2, %v3866_v2  ;;  %v3795_v14 = vmax.f32 %v3615_v7, 0.0 }
 0x38d   : > { %v3610_v12 = vadd.f32 %v9654_v5, %v3609_v11  ;;  %v3793_v16 = vmax.f32 %v3607_v9, 0.0 }
 0x38e   : > { %v3796_v15 = vmax.f32 %v3618_v24, 0.0 }
 0x38f   : > { %v3794_v17 = vmax.f32 %v3610_v12, 0.0  ;;  %v8100_v18 = vpop.f32.mrb[140].mxu1 }
 0x390   : > { %v3868_v19 = vpack.c.bf16 %v3796_v15, %v3795_v14  ;;  %v4151_v20 = vadd.f32 %v8100_v18, %v9665_v13  ;;  %v4142_v21 = vpop.f32.mrb[141].mxu1 }
 0x391   : > { %v3867_v22 = vpack.c.bf16 %v3794_v17, %v3793_v16  ;;  %v4143_v34 = vadd.f32 %v9665_v13, %v4142_v21  ;;  %v8076_v27 = vpop.f32.mrb[228].mxu0  ;;  %v8101_v28 = vpop.f32.mrb[142].mxu1 }
 0x392   : > { %v3631_v29 = vadd.f32 %v9654_v5, %v8076_v27  ;;  %v4154_v23 = vadd.f32 %v8101_v28, %v9665_v13  ;;  %v3622_v30 = vpop.f32.mrb[229].mxu0  ;;  %v4145_v32 = vpop.f32.mrb[143].mxu1  ;;  %v4655_v37 = vmax.f32 %v4151_v20, 0.0 }
 0x393   : > { %v3623_v33 = vadd.f32 %v9654_v5, %v3622_v30  ;;  %v4146_v35 = vadd.f32 %v9665_v13, %v4145_v32  ;;  %v8077_v36 = vpop.f32.mrb[230].mxu0  ;;  %8206 = vmatprep.mubr.msk.bf16.mxu1 %vm1979_vm2, %v3867_v22  ;;  %v4653_v6 = vmax.f32 %v4143_v34, 0.0 }
 0x394   : > { %v4656_v38 = vmax.f32 %v4154_v23, 0.0  ;;  %v3634_v39 = vadd.f32 %v9654_v5, %v8077_v36  ;;  %v3625_v31 = vpop.f32.mrb[231].mxu0  ;;  %8207 = vmatmul.mubr.msk.bf16.gmra.mrb[248].mxu1 %vm1979_vm2, %v3868_v19  ;;  %v3799_v41 = vmax.f32 %v3631_v29, 0.0 }
 0x395   : > { %v4654_v61 = vmax.f32 %v4146_v35, 0.0  ;;  %v3626_v40 = vadd.f32 %v9654_v5, %v3625_v31  ;;  %v3797_v44 = vmax.f32 %v3623_v33, 0.0 }
 0x396   : > { %v4782_v42 = vpack.c.bf16 %v4656_v38, %v4655_v37  ;;  %v3800_v43 = vmax.f32 %v3634_v39, 0.0 }
 0x397   : > { %v4781_v45 = vpack.c.bf16 %v4654_v61, %v4653_v6  ;;  %v3798_v46 = vmax.f32 %v3626_v40, 0.0  ;;  %v8104_v47 = vpop.f32.mrb[144].mxu1 }
 0x398   : > { %v3870_v48 = vpack.c.bf16 %v3800_v43, %v3799_v41  ;;  %v4167_v49 = vadd.f32 %v8104_v47, %v9665_v13  ;;  %v4158_v50 = vpop.f32.mrb[145].mxu1 }
 0x399   : > { %v3869_v59 = vpack.c.bf16 %v3798_v46, %v3797_v44  ;;  %v4159_v51 = vadd.f32 %v9665_v13, %v4158_v50  ;;  %v8080_v26 = vpop.f32.mrb[232].mxu0  ;;  %v8105_v52 = vpop.f32.mrb[146].mxu1  ;;  %8242 = vmatprep.mubr.bf16.mxu0 %v4781_v45 }
 0x39a   : > { %v3647_v53 = vadd.f32 %v9654_v5, %v8080_v26  ;;  %v4170_v54 = vadd.f32 %v8105_v52, %v9665_v13  ;;  %v3638_v55 = vpop.f32.mrb[233].mxu0  ;;  %v4161_v56 = vpop.f32.mrb[147].mxu1  ;;  %8243 = vmatmul.mubr.bf16.vlgmr.msra.gmra.mrb[244].mxu0 %v4782_v42  ;;  %v4659_v62 = vmax.f32 %v4167_v49, 0.0 }
 0x39b   : > { %v3639_v57 = vadd.f32 %v9654_v5, %v3638_v55  ;;  %v4162_v58 = vadd.f32 %v9665_v13, %v4161_v56  ;;  %v8081_v60 = vpop.f32.mrb[234].mxu0  ;;  %8210 = vmatprep.mubr.msk.bf16.mxu1 %vm1979_vm2, %v3869_v59  ;;  %v4657_v25 = vmax.f32 %v4159_v51, 0.0 }
 0x39c   : > { %v4660_v63 = vmax.f32 %v4170_v54, 0.0  ;;  %v3650_v0 = vadd.f32 %v9654_v5, %v8081_v60  ;;  %v3641_v1 = vpop.f32.mrb[235].mxu0  ;;  %8211 = vmatmul.mubr.msk.bf16.gmra.mrb[252].mxu1 %vm1979_vm2, %v3870_v48  ;;  %v3803_v4 = vmax.f32 %v3647_v53, 0.0 }
 0x39d   : > { %v4658_v2 = vmax.f32 %v4162_v58, 0.0  ;;  %v3642_v3 = vadd.f32 %v9654_v5, %v3641_v1  ;;  %v3801_v9 = vmax.f32 %v3639_v57, 0.0 }
 0x39e   : > { %v4784_v7 = vpack.c.bf16 %v4660_v63, %v4659_v62  ;;  %v3804_v8 = vmax.f32 %v3650_v0, 0.0 }
 0x39f   : > { %v4783_v10 = vpack.c.bf16 %v4658_v2, %v4657_v25  ;;  %v3802_v24 = vmax.f32 %v3642_v3, 0.0  ;;  %v8108_v11 = vpop.f32.mrb[148].mxu1 }
 0x3a0   : > { %v3872_v12 = vpack.c.bf16 %v3804_v8, %v3803_v4  ;;  %v4183_v14 = vadd.f32 %v8108_v11, %v9665_v13  ;;  %v4174_v15 = vpop.f32.mrb[149].mxu1 }
 0x3a1   : > { %v3871_v16 = vpack.c.bf16 %v3802_v24, %v3801_v9  ;;  %v4175_v17 = vadd.f32 %v9665_v13, %v4174_v15  ;;  %v8084_v18 = vpop.f32.mrb[236].mxu0  ;;  %v8109_v19 = vpop.f32.mrb[150].mxu1  ;;  %8246 = vmatprep.mubr.bf16.mxu0 %v4783_v10 }
 0x3a2   : > { %v3663_v20 = vadd.f32 %v9654_v5, %v8084_v18  ;;  %v4186_v21 = vadd.f32 %v8109_v19, %v9665_v13  ;;  %v3654_v22 = vpop.f32.mrb[237].mxu0  ;;  %v4177_v34 = vpop.f32.mrb[151].mxu1  ;;  %8247 = vmatmul.mubr.bf16.gmra.mrb[248].mxu0 %v4784_v7  ;;  %v4663_v23 = vmax.f32 %v4183_v14, 0.0 }
 0x3a3   : > { %v3655_v27 = vadd.f32 %v9654_v5, %v3654_v22  ;;  %v4178_v28 = vadd.f32 %v9665_v13, %v4177_v34  ;;  %v8085_v29 = vpop.f32.mrb[238].mxu0  ;;  %8214 = vmatprep.mubr.msk.bf16.mxu1 %vm1979_vm2, %v3871_v16  ;;  %v4661_v35 = vmax.f32 %v4175_v17, 0.0 }
 0x3a4   : > { %v4664_v30 = vmax.f32 %v4186_v21, 0.0  ;;  %v3666_v32 = vadd.f32 %v9654_v5, %v8085_v29  ;;  %v3657_v33 = vpop.f32.mrb[239].mxu0  ;;  %8215 = vmatmul.mubr.msk.bf16.gmra.mrb[0].mxu1 %vm1979_vm2, %v3872_v12  ;;  %v3807_v38 = vmax.f32 %v3663_v20, 0.0 }
 0x3a5   : > { %v4662_v36 = vmax.f32 %v4178_v28, 0.0  ;;  %v3658_v37 = vadd.f32 %v9654_v5, %v3657_v33  ;;  %v3805_v6 = vmax.f32 %v3655_v27, 0.0 }
 0x3a6   : > { %v4786_v39 = vpack.c.bf16 %v4664_v30, %v4663_v23  ;;  %v3808_v31 = vmax.f32 %v3666_v32, 0.0 }
 0x3a7   : > { %v4785_v61 = vpack.c.bf16 %v4662_v36, %v4661_v35  ;;  %v3806_v40 = vmax.f32 %v3658_v37, 0.0  ;;  %v8112_v41 = vpop.f32.mrb[152].mxu1 }
 0x3a8   : > { %v3874_v42 = vpack.c.bf16 %v3808_v31, %v3807_v38  ;;  %v4199_v43 = vadd.f32 %v8112_v41, %v9665_v13  ;;  %v4190_v44 = vpop.f32.mrb[153].mxu1 }
 0x3a9   : > { %v3873_v45 = vpack.c.bf16 %v3806_v40, %v3805_v6  ;;  %v4191_v46 = vadd.f32 %v9665_v13, %v4190_v44  ;;  %v8088_v47 = vpop.f32.mrb[240].mxu0  ;;  %v8113_v48 = vpop.f32.mrb[154].mxu1  ;;  %8250 = vmatprep.mubr.bf16.mxu0 %v4785_v61 }
 0x3aa   : > { %v3679_v49 = vadd.f32 %v9654_v5, %v8088_v47  ;;  %v4202_v50 = vadd.f32 %v8113_v48, %v9665_v13  ;;  %v3670_v59 = vpop.f32.mrb[241].mxu0  ;;  %v4193_v51 = vpop.f32.mrb[155].mxu1  ;;  %8251 = vmatmul.mubr.bf16.gmra.mrb[252].mxu0 %v4786_v39  ;;  %v4667_v54 = vmax.f32 %v4199_v43, 0.0 }
 0x3ab   : > { %v3671_v26 = vadd.f32 %v9654_v5, %v3670_v59  ;;  %v4194_v52 = vadd.f32 %v9665_v13, %v4193_v51  ;;  %v8089_v53 = vpop.f32.mrb[242].mxu0  ;;  %8218 = vmatprep.mubr.msk.bf16.mxu1 %vm1979_vm2, %v3873_v45  ;;  %v4665_v58 = vmax.f32 %v4191_v46, 0.0 }
 0x3ac   : > { %v4668_v55 = vmax.f32 %v4202_v50, 0.0  ;;  %v3682_v56 = vadd.f32 %v9654_v5, %v8089_v53  ;;  %v3673_v57 = vpop.f32.mrb[243].mxu0  ;;  %8219 = vmatmul.mubr.msk.bf16.gmra.mrb[4].mxu1 %vm1979_vm2, %v3874_v42  ;;  %v3811_v63 = vmax.f32 %v3679_v49, 0.0 }
 0x3ad   : > { %v4666_v60 = vmax.f32 %v4194_v52, 0.0  ;;  %v3674_v62 = vadd.f32 %v9654_v5, %v3673_v57  ;;  %v3809_v25 = vmax.f32 %v3671_v26, 0.0 }
 0x3ae   : > { %v4788_v0 = vpack.c.bf16 %v4668_v55, %v4667_v54  ;;  %v3812_v1 = vmax.f32 %v3682_v56, 0.0 }
 0x3af   : > { %v4787_v2 = vpack.c.bf16 %v4666_v60, %v4665_v58  ;;  %v3810_v3 = vmax.f32 %v3674_v62, 0.0  ;;  %v8116_v4 = vpop.f32.mrb[156].mxu1 }
 0x3b0   : > { %v3876_v7 = vpack.c.bf16 %v3812_v1, %v3811_v63  ;;  %v4215_v8 = vadd.f32 %v8116_v4, %v9665_v13  ;;  %v4206_v9 = vpop.f32.mrb[157].mxu1 }
 0x3b1   : > { %v3875_v10 = vpack.c.bf16 %v3810_v3, %v3809_v25  ;;  %v4207_v24 = vadd.f32 %v9665_v13, %v4206_v9  ;;  %v8117_v11 = vpop.f32.mrb[158].mxu1  ;;  %8254 = vmatprep.mubr.bf16.mxu0 %v4787_v2 }
 0x3b2   : > { %v4218_v12 = vadd.f32 %v8117_v11, %v9665_v13  ;;  %v4209_v14 = vpop.f32.mrb[159].mxu1  ;;  %8255 = vmatmul.mubr.bf16.gmra.mrb[0].mxu0 %v4788_v0  ;;  %v4671_v15 = vmax.f32 %v4215_v8, 0.0 }
 0x3b3   : > { %v4210_v5 = vadd.f32 %v9665_v13, %v4209_v14  ;;  %8222 = vmatprep.mubr.msk.bf16.mxu1 %vm1979_vm2, %v3875_v10  ;;  %v4669_v17 = vmax.f32 %v4207_v24, 0.0 }
 0x3b4   : > { %v4672_v16 = vmax.f32 %v4218_v12, 0.0  ;;  %8223 = vmatmul.mubr.msk.bf16.gmra.mrb[8].mxu1 %vm1979_vm2, %v3876_v7 }
 0x3b5   : > { %v4670_v18 = vmax.f32 %v4210_v5, 0.0 }
 0x3b6   : > { %v4790_v19 = vpack.c.bf16 %v4672_v16, %v4671_v15 }
 0x3b7   : > { %v4789_v20 = vpack.c.bf16 %v4670_v18, %v4669_v17  ;;  %v8120_v21 = vpop.f32.mrb[160].mxu1 }
 0x3b8   : > { %v4231_v22 = vadd.f32 %v8120_v21, %v9665_v13  ;;  %v4222_v34 = vpop.f32.mrb[161].mxu1 }
 0x3b9   : > { %v4223_v27 = vadd.f32 %v9665_v13, %v4222_v34  ;;  %v8121_v28 = vpop.f32.mrb[162].mxu1  ;;  %8258 = vmatprep.mubr.bf16.mxu0 %v4789_v20 }
 0x3ba   : > { %v4234_v29 = vadd.f32 %v8121_v28, %v9665_v13  ;;  %v4225_v23 = vpop.f32.mrb[163].mxu1  ;;  %8259 = vmatmul.mubr.bf16.gmra.mrb[4].mxu0 %v4790_v19  ;;  %v4675_v32 = vmax.f32 %v4231_v22, 0.0 }
 0x3bb   : > { %v4226_v30 = vadd.f32 %v9665_v13, %v4225_v23  ;;  %v4673_v35 = vmax.f32 %v4223_v27, 0.0 }
 0x3bc   : > { %v4676_v33 = vmax.f32 %v4234_v29, 0.0 }
 0x3bd   : > { %v4674_v36 = vmax.f32 %v4226_v30, 0.0 }
 0x3be   : > { %v4792_v37 = vpack.c.bf16 %v4676_v33, %v4675_v32 }
 0x3bf   : > { %v4791_v38 = vpack.c.bf16 %v4674_v36, %v4673_v35  ;;  %v8124_v39 = vpop.f32.mrb[164].mxu1 }
 0x3c0   : > { %v4247_v31 = vadd.f32 %v8124_v39, %v9665_v13  ;;  %v4238_v6 = vpop.f32.mrb[165].mxu1 }
 0x3c1   : > { %v4239_v61 = vadd.f32 %v9665_v13, %v4238_v6  ;;  %v8125_v40 = vpop.f32.mrb[166].mxu1  ;;  %8262 = vmatprep.mubr.bf16.mxu0 %v4791_v38 }
 0x3c2   : > { %v4250_v41 = vadd.f32 %v8125_v40, %v9665_v13  ;;  %v4241_v42 = vpop.f32.mrb[167].mxu1  ;;  %8263 = vmatmul.mubr.bf16.gmra.mrb[8].mxu0 %v4792_v37  ;;  %v4679_v44 = vmax.f32 %v4247_v31, 0.0 }
 0x3c3   : > { %v4242_v43 = vadd.f32 %v9665_v13, %v4241_v42  ;;  %v4677_v46 = vmax.f32 %v4239_v61, 0.0 }
 0x3c4   : > { %v4680_v45 = vmax.f32 %v4250_v41, 0.0 }
 0x3c5   : > { %v4678_v47 = vmax.f32 %v4242_v43, 0.0 }
 0x3c6   : > { %v4794_v48 = vpack.c.bf16 %v4680_v45, %v4679_v44 }
 0x3c7   : > { %v4793_v49 = vpack.c.bf16 %v4678_v47, %v4677_v46  ;;  %v8128_v50 = vpop.f32.mrb[168].mxu1 }
 0x3c8   : > { %v4263_v59 = vadd.f32 %v8128_v50, %v9665_v13  ;;  %v4254_v51 = vpop.f32.mrb[169].mxu1 }
 0x3c9   : > { %v4255_v26 = vadd.f32 %v9665_v13, %v4254_v51  ;;  %v8129_v52 = vpop.f32.mrb[170].mxu1  ;;  %8266 = vmatprep.mubr.bf16.mxu0 %v4793_v49 }
 0x3ca   : > { %v4266_v53 = vadd.f32 %v8129_v52, %v9665_v13  ;;  %v4257_v54 = vpop.f32.mrb[171].mxu1  ;;  %8267 = vmatmul.mubr.bf16.gmra.mrb[12].mxu0 %v4794_v48  ;;  %v4683_v56 = vmax.f32 %v4263_v59, 0.0 }
 0x3cb   : > { %v4258_v55 = vadd.f32 %v9665_v13, %v4257_v54  ;;  %v4681_v58 = vmax.f32 %v4255_v26, 0.0 }
 0x3cc   : > { %v4684_v57 = vmax.f32 %v4266_v53, 0.0 }
 0x3cd   : > { %v4682_v60 = vmax.f32 %v4258_v55, 0.0 }
 0x3ce   : > { %v4796_v62 = vpack.c.bf16 %v4684_v57, %v4683_v56 }
 0x3cf   : > { %v4795_v63 = vpack.c.bf16 %v4682_v60, %v4681_v58  ;;  %v8132_v0 = vpop.f32.mrb[172].mxu1 }
 0x3d0   : > { %v4279_v1 = vadd.f32 %v8132_v0, %v9665_v13  ;;  %v4270_v25 = vpop.f32.mrb[173].mxu1 }
 0x3d1   : > { %v4271_v2 = vadd.f32 %v9665_v13, %v4270_v25  ;;  %v8133_v3 = vpop.f32.mrb[174].mxu1  ;;  %8270 = vmatprep.mubr.bf16.mxu0 %v4795_v63 }
 0x3d2   : > { %v4282_v4 = vadd.f32 %v8133_v3, %v9665_v13  ;;  %v4273_v7 = vpop.f32.mrb[175].mxu1  ;;  %8271 = vmatmul.mubr.bf16.gmra.mrb[16].mxu0 %v4796_v62  ;;  %v4687_v9 = vmax.f32 %v4279_v1, 0.0 }
 0x3d3   : > { %v4274_v8 = vadd.f32 %v9665_v13, %v4273_v7  ;;  %v4685_v24 = vmax.f32 %v4271_v2, 0.0 }
 0x3d4   : > { %v4688_v10 = vmax.f32 %v4282_v4, 0.0 }
 0x3d5   : > { %v4686_v11 = vmax.f32 %v4274_v8, 0.0 }
 0x3d6   : > { %v4798_v12 = vpack.c.bf16 %v4688_v10, %v4687_v9 }
 0x3d7   : > { %v4797_v14 = vpack.c.bf16 %v4686_v11, %v4685_v24  ;;  %v8136_v5 = vpop.f32.mrb[176].mxu1 }
 0x3d8   : > { %v4295_v15 = vadd.f32 %v8136_v5, %v9665_v13  ;;  %v4286_v16 = vpop.f32.mrb[177].mxu1 }
 0x3d9   : > { %v4287_v17 = vadd.f32 %v9665_v13, %v4286_v16  ;;  %v8137_v18 = vpop.f32.mrb[178].mxu1  ;;  %8274 = vmatprep.mubr.bf16.mxu0 %v4797_v14 }
 0x3da   : > { %v4298_v19 = vadd.f32 %v8137_v18, %v9665_v13  ;;  %v4289_v20 = vpop.f32.mrb[179].mxu1  ;;  %8275 = vmatmul.mubr.bf16.gmra.mrb[20].mxu0 %v4798_v12  ;;  %v4691_v22 = vmax.f32 %v4295_v15, 0.0 }
 0x3db   : > { %v4290_v21 = vadd.f32 %v9665_v13, %v4289_v20  ;;  %v4689_v27 = vmax.f32 %v4287_v17, 0.0 }
 0x3dc   : > { %v4692_v34 = vmax.f32 %v4298_v19, 0.0 }
 0x3dd   : > { %v4690_v28 = vmax.f32 %v4290_v21, 0.0 }
 0x3de   : > { %v4800_v29 = vpack.c.bf16 %v4692_v34, %v4691_v22 }
 0x3df   : > { %v4799_v23 = vpack.c.bf16 %v4690_v28, %v4689_v27  ;;  %v8140_v30 = vpop.f32.mrb[180].mxu1 }
 0x3e0   : > { %v4311_v32 = vadd.f32 %v8140_v30, %v9665_v13  ;;  %v4302_v33 = vpop.f32.mrb[181].mxu1 }
 0x3e1   : > { %v4303_v35 = vadd.f32 %v9665_v13, %v4302_v33  ;;  %v8141_v36 = vpop.f32.mrb[182].mxu1  ;;  %8278 = vmatprep.mubr.bf16.mxu0 %v4799_v23 }
 0x3e2   : > { %v4314_v37 = vadd.f32 %v8141_v36, %v9665_v13  ;;  %v4305_v38 = vpop.f32.mrb[183].mxu1  ;;  %8279 = vmatmul.mubr.bf16.gmra.mrb[24].mxu0 %v4800_v29  ;;  %v4695_v31 = vmax.f32 %v4311_v32, 0.0 }
 0x3e3   : > { %v4306_v39 = vadd.f32 %v9665_v13, %v4305_v38  ;;  %v4693_v61 = vmax.f32 %v4303_v35, 0.0 }
 0x3e4   : > { %v4696_v6 = vmax.f32 %v4314_v37, 0.0 }
 0x3e5   : > { %v4694_v40 = vmax.f32 %v4306_v39, 0.0 }
 0x3e6   : > { %v4802_v41 = vpack.c.bf16 %v4696_v6, %v4695_v31 }
 0x3e7   : > { %v4801_v42 = vpack.c.bf16 %v4694_v40, %v4693_v61  ;;  %v8144_v43 = vpop.f32.mrb[184].mxu1 }
 0x3e8   : > { %v4327_v44 = vadd.f32 %v8144_v43, %v9665_v13  ;;  %v4318_v45 = vpop.f32.mrb[185].mxu1 }
 0x3e9   : > { %v4319_v46 = vadd.f32 %v9665_v13, %v4318_v45  ;;  %v8145_v47 = vpop.f32.mrb[186].mxu1  ;;  %8282 = vmatprep.mubr.bf16.mxu0 %v4801_v42 }
 0x3ea   : > { %v4330_v48 = vadd.f32 %v8145_v47, %v9665_v13  ;;  %v4321_v49 = vpop.f32.mrb[187].mxu1  ;;  %8283 = vmatmul.mubr.bf16.gmra.mrb[28].mxu0 %v4802_v41  ;;  %v4699_v59 = vmax.f32 %v4327_v44, 0.0 }
 0x3eb   : > { %v4322_v50 = vadd.f32 %v9665_v13, %v4321_v49  ;;  %v4697_v26 = vmax.f32 %v4319_v46, 0.0 }
 0x3ec   : > { %v4700_v51 = vmax.f32 %v4330_v48, 0.0 }
 0x3ed   : > { %v4698_v52 = vmax.f32 %v4322_v50, 0.0 }
 0x3ee   : > { %v4804_v53 = vpack.c.bf16 %v4700_v51, %v4699_v59 }
 0x3ef   : > { %v4803_v54 = vpack.c.bf16 %v4698_v52, %v4697_v26  ;;  %v8148_v55 = vpop.f32.mrb[188].mxu1 }
 0x3f0   : > { %v4343_v56 = vadd.f32 %v8148_v55, %v9665_v13  ;;  %v4334_v57 = vpop.f32.mrb[189].mxu1 }
 0x3f1   : > { %v4335_v58 = vadd.f32 %v9665_v13, %v4334_v57  ;;  %v8149_v60 = vpop.f32.mrb[190].mxu1  ;;  %8286 = vmatprep.mubr.bf16.mxu0 %v4803_v54 }
 0x3f2   : > { %v4346_v62 = vadd.f32 %v8149_v60, %v9665_v13  ;;  %v4337_v63 = vpop.f32.mrb[191].mxu1  ;;  %8287 = vmatmul.mubr.bf16.gmra.mrb[32].mxu0 %v4804_v53  ;;  %v4703_v1 = vmax.f32 %v4343_v56, 0.0 }
 0x3f3   : > { %v4338_v0 = vadd.f32 %v9665_v13, %v4337_v63  ;;  %v4701_v2 = vmax.f32 %v4335_v58, 0.0 }
 0x3f4   : > { %v4704_v25 = vmax.f32 %v4346_v62, 0.0 }
 0x3f5   : > { %v4702_v3 = vmax.f32 %v4338_v0, 0.0 }
 0x3f6   : > { %v4806_v4 = vpack.c.bf16 %v4704_v25, %v4703_v1 }
 0x3f7   : > { %v4805_v7 = vpack.c.bf16 %v4702_v3, %v4701_v2  ;;  %v8152_v8 = vpop.f32.mrb[192].mxu1 }
 0x3f8   : > { %v4359_v9 = vadd.f32 %v8152_v8, %v9665_v13  ;;  %v4350_v10 = vpop.f32.mrb[193].mxu1 }
 0x3f9   : > { %v4351_v24 = vadd.f32 %v9665_v13, %v4350_v10  ;;  %v8153_v11 = vpop.f32.mrb[194].mxu1  ;;  %8290 = vmatprep.mubr.bf16.mxu0 %v4805_v7 }
 0x3fa   : > { %v4362_v12 = vadd.f32 %v8153_v11, %v9665_v13  ;;  %v4353_v14 = vpop.f32.mrb[195].mxu1  ;;  %8291 = vmatmul.mubr.bf16.gmra.mrb[36].mxu0 %v4806_v4  ;;  %v4707_v15 = vmax.f32 %v4359_v9, 0.0 }
 0x3fb   : > { %v4354_v5 = vadd.f32 %v9665_v13, %v4353_v14  ;;  %v4705_v17 = vmax.f32 %v4351_v24, 0.0 }
 0x3fc   : > { %v4708_v16 = vmax.f32 %v4362_v12, 0.0 }
 0x3fd   : > { %v4706_v18 = vmax.f32 %v4354_v5, 0.0 }
 0x3fe   : > { %v4808_v19 = vpack.c.bf16 %v4708_v16, %v4707_v15 }
 0x3ff   : > { %v4807_v20 = vpack.c.bf16 %v4706_v18, %v4705_v17  ;;  %v8156_v21 = vpop.f32.mrb[196].mxu1 }
 0x400   : > { %v4375_v22 = vadd.f32 %v8156_v21, %v9665_v13  ;;  %v4366_v34 = vpop.f32.mrb[197].mxu1 }
 0x401   : > { %v4367_v27 = vadd.f32 %v9665_v13, %v4366_v34  ;;  %v8157_v28 = vpop.f32.mrb[198].mxu1  ;;  %8294 = vmatprep.mubr.bf16.mxu0 %v4807_v20 }
 0x402   : > { %v4378_v29 = vadd.f32 %v8157_v28, %v9665_v13  ;;  %v4369_v23 = vpop.f32.mrb[199].mxu1  ;;  %8295 = vmatmul.mubr.bf16.gmra.mrb[40].mxu0 %v4808_v19  ;;  %v4711_v32 = vmax.f32 %v4375_v22, 0.0 }
 0x403   : > { %v4370_v30 = vadd.f32 %v9665_v13, %v4369_v23  ;;  %v4709_v35 = vmax.f32 %v4367_v27, 0.0  ;;  %v8506_v23 = vld [vmem:[%s10404_s11 + $0x4] ss:$16 sps:$4 sm:$0xff]  }
 0x404   : > { %v4712_v33 = vmax.f32 %v4378_v29, 0.0  ;;  %v8504_v29 = vld [vmem:[%s10404_s11] ss:$16 sps:$4 sm:$0xff]   ;;  %6035 = vmatprep.subr.bf16.mxu1 %v8506_v23 }
 0x405   : > { %v4710_v36 = vmax.f32 %v4370_v30, 0.0  ;;  %6036 = vmatpush1.bf16.msra.mxu1 %v8504_v29 }
 0x406   : > { %v4810_v37 = vpack.c.bf16 %v4712_v33, %v4711_v32 }
 0x407   : > { %v4809_v38 = vpack.c.bf16 %v4710_v36, %v4709_v35  ;;  %v8160_v39 = vpop.f32.mrb[200].mxu1 }
 0x408   : > { %v4391_v31 = vadd.f32 %v8160_v39, %v9665_v13  ;;  %v4382_v6 = vpop.f32.mrb[201].mxu1 }
 0x409   : > { %v4383_v61 = vadd.f32 %v9665_v13, %v4382_v6  ;;  %v8161_v40 = vpop.f32.mrb[202].mxu1  ;;  %8298 = vmatprep.mubr.bf16.mxu0 %v4809_v38 }
 0x40a   : > { %v4394_v41 = vadd.f32 %v8161_v40, %v9665_v13  ;;  %v4385_v42 = vpop.f32.mrb[203].mxu1  ;;  %8299 = vmatmul.mubr.bf16.gmra.mrb[44].mxu0 %v4810_v37  ;;  %v4715_v44 = vmax.f32 %v4391_v31, 0.0 }
 0x40b   : > { %v4386_v43 = vadd.f32 %v9665_v13, %v4385_v42  ;;  %v4713_v46 = vmax.f32 %v4383_v61, 0.0 }
 0x40c   : > { %v4716_v45 = vmax.f32 %v4394_v41, 0.0 }
 0x40d   : > { %v4714_v47 = vmax.f32 %v4386_v43, 0.0 }
 0x40e   : > { %v4812_v48 = vpack.c.bf16 %v4716_v45, %v4715_v44 }
 0x40f   : > { %v4811_v49 = vpack.c.bf16 %v4714_v47, %v4713_v46  ;;  %v8164_v50 = vpop.f32.mrb[204].mxu1 }
 0x410   : > { %v4407_v59 = vadd.f32 %v8164_v50, %v9665_v13  ;;  %v4398_v51 = vpop.f32.mrb[205].mxu1 }
 0x411   : > { %v4399_v26 = vadd.f32 %v9665_v13, %v4398_v51  ;;  %v8165_v52 = vpop.f32.mrb[206].mxu1  ;;  %8302 = vmatprep.mubr.bf16.mxu0 %v4811_v49 }
 0x412   : > { %v4410_v53 = vadd.f32 %v8165_v52, %v9665_v13  ;;  %v4401_v54 = vpop.f32.mrb[207].mxu1  ;;  %8303 = vmatmul.mubr.bf16.gmra.mrb[48].mxu0 %v4812_v48  ;;  %v4719_v56 = vmax.f32 %v4407_v59, 0.0 }
 0x413   : > { %v4402_v55 = vadd.f32 %v9665_v13, %v4401_v54  ;;  %v4717_v58 = vmax.f32 %v4399_v26, 0.0 }
 0x414   : > { %v4720_v57 = vmax.f32 %v4410_v53, 0.0 }
 0x415   : > { %v4718_v60 = vmax.f32 %v4402_v55, 0.0 }
 0x416   : > { %v4814_v62 = vpack.c.bf16 %v4720_v57, %v4719_v56 }
 0x417   : > { %v4813_v63 = vpack.c.bf16 %v4718_v60, %v4717_v58  ;;  %v8168_v0 = vpop.f32.mrb[208].mxu1 }
 0x418   : > { %v4423_v1 = vadd.f32 %v8168_v0, %v9665_v13  ;;  %v4414_v25 = vpop.f32.mrb[209].mxu1 }
 0x419   : > { %v4415_v2 = vadd.f32 %v9665_v13, %v4414_v25  ;;  %v8169_v3 = vpop.f32.mrb[210].mxu1  ;;  %8306 = vmatprep.mubr.bf16.mxu0 %v4813_v63 }
 0x41a   : > { %v4426_v4 = vadd.f32 %v8169_v3, %v9665_v13  ;;  %v4417_v7 = vpop.f32.mrb[211].mxu1  ;;  %8307 = vmatmul.mubr.bf16.gmra.mrb[52].mxu0 %v4814_v62  ;;  %v4723_v9 = vmax.f32 %v4423_v1, 0.0 }
 0x41b   : > { %v4418_v8 = vadd.f32 %v9665_v13, %v4417_v7  ;;  %v4721_v24 = vmax.f32 %v4415_v2, 0.0 }
 0x41c   : > { %v4724_v10 = vmax.f32 %v4426_v4, 0.0 }
 0x41d   : > { %v4722_v11 = vmax.f32 %v4418_v8, 0.0 }
 0x41e   : > { %v4816_v12 = vpack.c.bf16 %v4724_v10, %v4723_v9 }
 0x41f   : > { %v4815_v14 = vpack.c.bf16 %v4722_v11, %v4721_v24  ;;  %v8172_v5 = vpop.f32.mrb[212].mxu1 }
 0x420   : > { %v4439_v15 = vadd.f32 %v8172_v5, %v9665_v13  ;;  %v4430_v16 = vpop.f32.mrb[213].mxu1 }
 0x421   : > { %v4431_v17 = vadd.f32 %v9665_v13, %v4430_v16  ;;  %v8173_v18 = vpop.f32.mrb[214].mxu1  ;;  %8310 = vmatprep.mubr.bf16.mxu0 %v4815_v14 }
 0x422   : > { %v4442_v19 = vadd.f32 %v8173_v18, %v9665_v13  ;;  %v4433_v20 = vpop.f32.mrb[215].mxu1  ;;  %8311 = vmatmul.mubr.bf16.gmra.mrb[56].mxu0 %v4816_v12  ;;  %v4727_v22 = vmax.f32 %v4439_v15, 0.0 }
 0x423   : > { %v4434_v21 = vadd.f32 %v9665_v13, %v4433_v20  ;;  %v4725_v27 = vmax.f32 %v4431_v17, 0.0 }
 0x424   : > { %v4728_v34 = vmax.f32 %v4442_v19, 0.0 }
 0x425   : > { %v4726_v28 = vmax.f32 %v4434_v21, 0.0 }
 0x426   : > { %v4818_v30 = vpack.c.bf16 %v4728_v34, %v4727_v22 }
 0x427   : > { %v4817_v32 = vpack.c.bf16 %v4726_v28, %v4725_v27  ;;  %v8176_v33 = vpop.f32.mrb[216].mxu1  ;;  %v8507_v27 = vld [vmem:[%s10404_s11 + $0x20] ss:$16 sps:$4 sm:$0xff]   ;;  %v8509_v28 = vld [vmem:[%s10404_s11 + $0x24] ss:$16 sps:$4 sm:$0xff]  }
 0x428   : > { %v4455_v35 = vadd.f32 %v8176_v33, %v9665_v13  ;;  %v4446_v36 = vpop.f32.mrb[217].mxu1  ;;  %6037 = vmatprep.subr.bf16.mxu1 %v8509_v28 }
 0x429   : > { %v4447_v37 = vadd.f32 %v9665_v13, %v4446_v36  ;;  %v8177_v38 = vpop.f32.mrb[218].mxu1  ;;  %8314 = vmatprep.mubr.bf16.mxu0 %v4817_v32  ;;  %6038 = vmatpush1.bf16.msra.mxu1 %v8507_v27 }
 0x42a   : > { %v4458_v39 = vadd.f32 %v8177_v38, %v9665_v13  ;;  %v4449_v31 = vpop.f32.mrb[219].mxu1  ;;  %8315 = vmatmul.mubr.bf16.gmra.mrb[60].mxu0 %v4818_v30  ;;  %v4731_v61 = vmax.f32 %v4455_v35, 0.0 }
 0x42b   : > { %v4450_v6 = vadd.f32 %v9665_v13, %v4449_v31  ;;  %v4729_v41 = vmax.f32 %v4447_v37, 0.0 }
 0x42c   : > { %v4732_v40 = vmax.f32 %v4458_v39, 0.0 }
 0x42d   : > { %v4730_v42 = vmax.f32 %v4450_v6, 0.0 }
 0x42e   : > { %v4820_v43 = vpack.c.bf16 %v4732_v40, %v4731_v61 }
 0x42f   : > { %v4819_v44 = vpack.c.bf16 %v4730_v42, %v4729_v41  ;;  %v8180_v45 = vpop.f32.mrb[220].mxu1 }
 0x430   : > { %v4471_v46 = vadd.f32 %v8180_v45, %v9665_v13  ;;  %v4462_v47 = vpop.f32.mrb[221].mxu1 }
 0x431   : > { %v4463_v48 = vadd.f32 %v9665_v13, %v4462_v47  ;;  %v8181_v49 = vpop.f32.mrb[222].mxu1  ;;  %8318 = vmatprep.mubr.bf16.mxu0 %v4819_v44 }
 0x432   : > { %v4474_v50 = vadd.f32 %v8181_v49, %v9665_v13  ;;  %v4465_v59 = vpop.f32.mrb[223].mxu1  ;;  %8319 = vmatmul.mubr.bf16.gmra.mrb[64].mxu0 %v4820_v43  ;;  %v4735_v26 = vmax.f32 %v4471_v46, 0.0 }
 0x433   : > { %v4466_v51 = vadd.f32 %v9665_v13, %v4465_v59  ;;  %v4733_v53 = vmax.f32 %v4463_v48, 0.0 }
 0x434   : > { %v4736_v52 = vmax.f32 %v4474_v50, 0.0 }
 0x435   : > { %v4734_v54 = vmax.f32 %v4466_v51, 0.0 }
 0x436   : > { %v4822_v55 = vpack.c.bf16 %v4736_v52, %v4735_v26 }
 0x437   : > { %v4821_v56 = vpack.c.bf16 %v4734_v54, %v4733_v53  ;;  %v8184_v57 = vpop.f32.mrb[224].mxu1 }
 0x438   : > { %v4487_v58 = vadd.f32 %v8184_v57, %v9665_v13  ;;  %v4478_v60 = vpop.f32.mrb[225].mxu1 }
 0x439   : > { %v4479_v62 = vadd.f32 %v9665_v13, %v4478_v60  ;;  %v8185_v63 = vpop.f32.mrb[226].mxu1  ;;  %8322 = vmatprep.mubr.bf16.mxu0 %v4821_v56 }
 0x43a   : > { %v4490_v0 = vadd.f32 %v8185_v63, %v9665_v13  ;;  %v4481_v1 = vpop.f32.mrb[227].mxu1  ;;  %8323 = vmatmul.mubr.bf16.gmra.mrb[68].mxu0 %v4822_v55  ;;  %v4739_v2 = vmax.f32 %v4487_v58, 0.0 }
 0x43b   : > { %v4482_v25 = vadd.f32 %v9665_v13, %v4481_v1  ;;  %v4737_v4 = vmax.f32 %v4479_v62, 0.0 }
 0x43c   : > { %v4740_v3 = vmax.f32 %v4490_v0, 0.0 }
 0x43d   : > { %v4738_v7 = vmax.f32 %v4482_v25, 0.0 }
 0x43e   : > { %v4824_v8 = vpack.c.bf16 %v4740_v3, %v4739_v2 }
 0x43f   : > { %v4823_v9 = vpack.c.bf16 %v4738_v7, %v4737_v4  ;;  %v8188_v10 = vpop.f32.mrb[228].mxu1 }
 0x440   : > { %v4503_v24 = vadd.f32 %v8188_v10, %v9665_v13  ;;  %v4494_v11 = vpop.f32.mrb[229].mxu1 }
 0x441   : > { %v4495_v12 = vadd.f32 %v9665_v13, %v4494_v11  ;;  %v8189_v14 = vpop.f32.mrb[230].mxu1  ;;  %8326 = vmatprep.mubr.bf16.mxu0 %v4823_v9 }
 0x442   : > { %v4506_v5 = vadd.f32 %v8189_v14, %v9665_v13  ;;  %v4497_v15 = vpop.f32.mrb[231].mxu1  ;;  %8327 = vmatmul.mubr.bf16.gmra.mrb[72].mxu0 %v4824_v8  ;;  %v4743_v17 = vmax.f32 %v4503_v24, 0.0 }
 0x443   : > { %v4498_v16 = vadd.f32 %v9665_v13, %v4497_v15  ;;  %v4741_v19 = vmax.f32 %v4495_v12, 0.0 }
 0x444   : > { %v4744_v18 = vmax.f32 %v4506_v5, 0.0 }
 0x445   : > { %v4742_v20 = vmax.f32 %v4498_v16, 0.0 }
 0x446   : > { %v4826_v21 = vpack.c.bf16 %v4744_v18, %v4743_v17 }
 0x447   : > { %v4825_v22 = vpack.c.bf16 %v4742_v20, %v4741_v19  ;;  %v8192_v34 = vpop.f32.mrb[232].mxu1  ;;  %v8510_v19 = vld [vmem:[%s10404_s11 + $0x40] ss:$16 sps:$4 sm:$0xff]   ;;  %v8512_v20 = vld [vmem:[%s10404_s11 + $0x44] ss:$16 sps:$4 sm:$0xff]  }
 0x448   : > { %v4519_v29 = vadd.f32 %v8192_v34, %v9665_v13  ;;  %v4510_v23 = vpop.f32.mrb[233].mxu1  ;;  %6039 = vmatprep.subr.bf16.mxu1 %v8512_v20 }
 0x449   : > { %v4511_v30 = vadd.f32 %v9665_v13, %v4510_v23  ;;  %v8193_v32 = vpop.f32.mrb[234].mxu1  ;;  %8330 = vmatprep.mubr.bf16.mxu0 %v4825_v22  ;;  %6040 = vmatpush1.bf16.msra.mxu1 %v8510_v19 }
 0x44a   : > { %v4522_v33 = vadd.f32 %v8193_v32, %v9665_v13  ;;  %v4513_v35 = vpop.f32.mrb[235].mxu1  ;;  %8331 = vmatmul.mubr.bf16.gmra.mrb[76].mxu0 %v4826_v21  ;;  %v4747_v37 = vmax.f32 %v4519_v29, 0.0  ;;  %v9822_v21 = vld [vmem:[%s10401_s8] ss:$0 sm:$0xff] }
 0x44b   : > { %v4514_v36 = vadd.f32 %v9665_v13, %v4513_v35  ;;  %v4745_v39 = vmax.f32 %v4511_v30, 0.0  ;;  %v9831_v30 = vld [vmem:[%s10403_s10] ss:$0 sm:$0xff] }
 0x44c   : > { %v4748_v38 = vmax.f32 %v4522_v33, 0.0 }
 0x44d   : > { %v4746_v31 = vmax.f32 %v4514_v36, 0.0 }
 0x44e   : > { %v4828_v6 = vpack.c.bf16 %v4748_v38, %v4747_v37 }
 0x44f   : > { %v4827_v61 = vpack.c.bf16 %v4746_v31, %v4745_v39  ;;  %v8196_v40 = vpop.f32.mrb[236].mxu1 }
 0x450   : > { %v4535_v41 = vadd.f32 %v8196_v40, %v9665_v13  ;;  %v4526_v42 = vpop.f32.mrb[237].mxu1 }
 0x451   : > { %v4527_v43 = vadd.f32 %v9665_v13, %v4526_v42  ;;  %v8197_v44 = vpop.f32.mrb[238].mxu1  ;;  %8334 = vmatprep.mubr.bf16.mxu0 %v4827_v61 }
 0x452   : > { %v4538_v45 = vadd.f32 %v8197_v44, %v9665_v13  ;;  %v4529_v46 = vpop.f32.mrb[239].mxu1  ;;  %8335 = vmatmul.mubr.bf16.gmra.mrb[80].mxu0 %v4828_v6  ;;  %v4751_v48 = vmax.f32 %v4535_v41, 0.0 }
 0x453   : > { %v4530_v47 = vadd.f32 %v9665_v13, %v4529_v46  ;;  %v4749_v50 = vmax.f32 %v4527_v43, 0.0 }
 0x454   : > { %v4752_v49 = vmax.f32 %v4538_v45, 0.0 }
 0x455   : > { %v4750_v59 = vmax.f32 %v4530_v47, 0.0 }
 0x456   : > { %v4830_v51 = vpack.c.bf16 %v4752_v49, %v4751_v48 }
 0x457   : > { %v4829_v26 = vpack.c.bf16 %v4750_v59, %v4749_v50  ;;  %v8200_v52 = vpop.f32.mrb[240].mxu1 }
 0x458   : > { %v4551_v53 = vadd.f32 %v8200_v52, %v9665_v13  ;;  %v4542_v54 = vpop.f32.mrb[241].mxu1 }
 0x459   : > { %v4543_v55 = vadd.f32 %v9665_v13, %v4542_v54  ;;  %v8201_v56 = vpop.f32.mrb[242].mxu1  ;;  %8338 = vmatprep.mubr.bf16.mxu0 %v4829_v26 }
 0x45a   : > { %v4554_v57 = vadd.f32 %v8201_v56, %v9665_v13  ;;  %v4545_v58 = vpop.f32.mrb[243].mxu1  ;;  %8339 = vmatmul.mubr.bf16.gmra.mrb[84].mxu0 %v4830_v51  ;;  %v4755_v62 = vmax.f32 %v4551_v53, 0.0 }
 0x45b   : > { %v4546_v60 = vadd.f32 %v9665_v13, %v4545_v58  ;;  %v4753_v0 = vmax.f32 %v4543_v55, 0.0 }
 0x45c   : > { %v4756_v63 = vmax.f32 %v4554_v57, 0.0 }
 0x45d   : > { %v4754_v1 = vmax.f32 %v4546_v60, 0.0 }
 0x45e   : > { %v4832_v25 = vpack.c.bf16 %v4756_v63, %v4755_v62 }
 0x45f   : > { %v4831_v2 = vpack.c.bf16 %v4754_v1, %v4753_v0  ;;  %v8204_v3 = vpop.f32.mrb[244].mxu1 }
 0x460   : > { %v4567_v4 = vadd.f32 %v8204_v3, %v9665_v13  ;;  %v4558_v7 = vpop.f32.mrb[245].mxu1 }
 0x461   : > { %v4559_v8 = vadd.f32 %v9665_v13, %v4558_v7  ;;  %v8205_v9 = vpop.f32.mrb[246].mxu1  ;;  %8342 = vmatprep.mubr.bf16.mxu0 %v4831_v2 }
 0x462   : > { %v4570_v10 = vadd.f32 %v8205_v9, %v9665_v13  ;;  %v4561_v24 = vpop.f32.mrb[247].mxu1  ;;  %8343 = vmatmul.mubr.bf16.gmra.mrb[88].mxu0 %v4832_v25  ;;  %v4759_v12 = vmax.f32 %v4567_v4, 0.0 }
 0x463   : > { %v4562_v11 = vadd.f32 %v9665_v13, %v4561_v24  ;;  %v4757_v5 = vmax.f32 %v4559_v8, 0.0 }
 0x464   : > { %v4760_v14 = vmax.f32 %v4570_v10, 0.0 }
 0x465   : > { %v4758_v15 = vmax.f32 %v4562_v11, 0.0 }
 0x466   : > { %v4834_v16 = vpack.c.bf16 %v4760_v14, %v4759_v12 }
 0x467   : > { %v4833_v17 = vpack.c.bf16 %v4758_v15, %v4757_v5  ;;  %v8208_v18 = vpop.f32.mrb[248].mxu1 }
 0x468   : > { %v4583_v13 = vadd.f32 %v9822_v21, %v8208_v18  ;;  %v4574_v22 = vpop.f32.mrb[249].mxu1 }
 0x469   : > { %v4575_v34 = vadd.f32 %v9822_v21, %v4574_v22  ;;  %v8209_v27 = vpop.f32.mrb[250].mxu1  ;;  %8346 = vmatprep.mubr.bf16.mxu0 %v4833_v17 }
 0x46a   : > { %v4586_v28 = vadd.f32 %v9822_v21, %v8209_v27  ;;  %v4577_v29 = vpop.f32.mrb[251].mxu1  ;;  %8347 = vmatmul.mubr.bf16.gmra.mrb[92].mxu0 %v4834_v16  ;;  %v4763_v32 = vmax.f32 %v4583_v13, 0.0 }
 0x46b   : > { %v4578_v23 = vadd.f32 %v9822_v21, %v4577_v29  ;;  %v4761_v35 = vmax.f32 %v4575_v34, 0.0 }
 0x46c   : > { %v4764_v33 = vmax.f32 %v4586_v28, 0.0 }
 0x46d   : > { %v4762_v36 = vmax.f32 %v4578_v23, 0.0  ;;  %v8244_v37 = vpop.f32.mrb[244].mxu0 }
 0x46e   : > { %v4836_v38 = vpack.c.bf16 %v4764_v33, %v4763_v32  ;;  %v4959_v39 = vadd.f32 %v8244_v37, %v9831_v30  ;;  %v4950_v31 = vpop.f32.mrb[245].mxu0 }
 0x46f   : > { %v4835_v6 = vpack.c.bf16 %v4762_v36, %v4761_v35  ;;  %v4951_v61 = vadd.f32 %v9831_v30, %v4950_v31  ;;  %v8212_v40 = vpop.f32.mrb[252].mxu1  ;;  %v8245_v41 = vpop.f32.mrb[246].mxu0 }
 0x470   : > { %v4599_v42 = vadd.f32 %v9822_v21, %v8212_v40  ;;  %v4962_v43 = vadd.f32 %v8245_v41, %v9831_v30  ;;  %v4590_v44 = vpop.f32.mrb[253].mxu1  ;;  %v4953_v45 = vpop.f32.mrb[247].mxu0  ;;  %v5463_v49 = vmax.f32 %v4959_v39, 0.0 }
 0x471   : > { %v4591_v46 = vadd.f32 %v9822_v21, %v4590_v44  ;;  %v4954_v47 = vadd.f32 %v9831_v30, %v4953_v45  ;;  %v8213_v48 = vpop.f32.mrb[254].mxu1  ;;  %8350 = vmatprep.mubr.bf16.mxu0 %v4835_v6  ;;  %v5461_v26 = vmax.f32 %v4951_v61, 0.0 }
 0x472   : > { %v5464_v50 = vmax.f32 %v4962_v43, 0.0  ;;  %v4602_v59 = vadd.f32 %v9822_v21, %v8213_v48  ;;  %v4593_v51 = vpop.f32.mrb[255].mxu1  ;;  %8351 = vmatmul.mubr.bf16.gmra.mrb[96].mxu0 %v4836_v38  ;;  %v4767_v54 = vmax.f32 %v4599_v42, 0.0 }
 0x473   : > { %v5462_v52 = vmax.f32 %v4954_v47, 0.0  ;;  %v4594_v53 = vadd.f32 %v9822_v21, %v4593_v51  ;;  %v4765_v57 = vmax.f32 %v4591_v46, 0.0 }
 0x474   : > { %v5590_v55 = vpack.c.bf16 %v5464_v50, %v5463_v49  ;;  %v4768_v56 = vmax.f32 %v4602_v59, 0.0 }
 0x475   : > { %v5589_v58 = vpack.c.bf16 %v5462_v52, %v5461_v26  ;;  %v4766_v60 = vmax.f32 %v4594_v53, 0.0  ;;  %v8248_v62 = vpop.f32.mrb[248].mxu0 }
 0x476   : > { %v4838_v63 = vpack.c.bf16 %v4768_v56, %v4767_v54  ;;  %v4975_v0 = vadd.f32 %v8248_v62, %v9831_v30  ;;  %v4966_v1 = vpop.f32.mrb[249].mxu0 }
 0x477   : > { %v5653_v25 = vmax.bf16 %v5590_v55, %v5589_v58  ;;  %v4837_v2 = vpack.c.bf16 %v4766_v60, %v4765_v57  ;;  %v4967_v3 = vadd.f32 %v9831_v30, %v4966_v1  ;;  %v8216_v4 = vpop.f32.mrb[0].mxu1  ;;  %v8249_v7 = vpop.f32.mrb[250].mxu0 }
 0x478   : > { %v4615_v8 = vadd.f32 %v9822_v21, %v8216_v4  ;;  %v4978_v9 = vadd.f32 %v8249_v7, %v9831_v30  ;;  %v4606_v10 = vpop.f32.mrb[1].mxu1  ;;  %v4969_v24 = vpop.f32.mrb[251].mxu0  ;;  %v5467_v5 = vmax.f32 %v4975_v0, 0.0  ;;  %v8515_v4 = vld [vmem:[%s10404_s11 + $0x64] ss:$16 sps:$4 sm:$0xff]  }
 0x479   : > { %v4607_v11 = vadd.f32 %v9822_v21, %v4606_v10  ;;  %v4970_v12 = vadd.f32 %v9831_v30, %v4969_v24  ;;  %v8217_v14 = vpop.f32.mrb[2].mxu1  ;;  %8354 = vmatprep.mubr.bf16.mxu0 %v4837_v2  ;;  %v5465_v18 = vmax.f32 %v4967_v3, 0.0  ;;  %v8513_v3 = vld [vmem:[%s10404_s11 + $0x60] ss:$16 sps:$4 sm:$0xff]   ;;  %6041 = vmatprep.subr.bf16.mxu1 %v8515_v4 }
 0x47a   : > { %v5468_v15 = vmax.f32 %v4978_v9, 0.0  ;;  %v4618_v16 = vadd.f32 %v9822_v21, %v8217_v14  ;;  %v4609_v17 = vpop.f32.mrb[3].mxu1  ;;  %8355 = vmatmul.mubr.bf16.gmra.mrb[100].mxu0 %v4838_v63  ;;  %v4771_v13 = vmax.f32 %v4615_v8, 0.0  ;;  %6042 = vmatpush1.bf16.msra.mxu1 %v8513_v3 }
 0x47b   : > { %v5466_v19 = vmax.f32 %v4970_v12, 0.0  ;;  %v4610_v20 = vadd.f32 %v9822_v21, %v4609_v17  ;;  %v4769_v27 = vmax.f32 %v4607_v11, 0.0 }
 0x47c   : > { %v5592_v22 = vpack.c.bf16 %v5468_v15, %v5467_v5  ;;  %v4772_v34 = vmax.f32 %v4618_v16, 0.0 }
 0x47d   : > { %v5591_v28 = vpack.c.bf16 %v5466_v19, %v5465_v18  ;;  %v4770_v29 = vmax.f32 %v4610_v20, 0.0  ;;  %v8252_v23 = vpop.f32.mrb[252].mxu0 }
 0x47e   : > { %v4840_v32 = vpack.c.bf16 %v4772_v34, %v4771_v13  ;;  %v4991_v33 = vadd.f32 %v8252_v23, %v9831_v30  ;;  %v4982_v35 = vpop.f32.mrb[253].mxu0 }
 0x47f   : > { %v5654_v36 = vmax.bf16 %v5653_v25, %v5591_v28  ;;  %v4839_v37 = vpack.c.bf16 %v4770_v29, %v4769_v27  ;;  %v4983_v38 = vadd.f32 %v9831_v30, %v4982_v35  ;;  %v8220_v39 = vpop.f32.mrb[4].mxu1  ;;  %v8253_v31 = vpop.f32.mrb[254].mxu0 }
 0x480   : > { %v4631_v6 = vadd.f32 %v9822_v21, %v8220_v39  ;;  %v4994_v61 = vadd.f32 %v8253_v31, %v9831_v30  ;;  %v4622_v40 = vpop.f32.mrb[5].mxu1  ;;  %v4985_v41 = vpop.f32.mrb[255].mxu0  ;;  %v5471_v46 = vmax.f32 %v4991_v33, 0.0 }
 0x481   : > { %v4623_v42 = vadd.f32 %v9822_v21, %v4622_v40  ;;  %v4986_v43 = vadd.f32 %v9831_v30, %v4985_v41  ;;  %v5655_v44 = vmax.bf16 %v5654_v36, %v5592_v22  ;;  %v8221_v45 = vpop.f32.mrb[6].mxu1  ;;  %8358 = vmatprep.mubr.bf16.mxu0 %v4839_v37  ;;  %v5469_v50 = vmax.f32 %v4983_v38, 0.0 }
 0x482   : > { %v5472_v47 = vmax.f32 %v4994_v61, 0.0  ;;  %v4634_v48 = vadd.f32 %v9822_v21, %v8221_v45  ;;  %v4625_v49 = vpop.f32.mrb[7].mxu1  ;;  %8359 = vmatmul.mubr.bf16.gmra.mrb[104].mxu0 %v4840_v32  ;;  %v4775_v26 = vmax.f32 %v4631_v6, 0.0 }
 0x483   : > { %v5470_v59 = vmax.f32 %v4986_v43, 0.0  ;;  %v4626_v51 = vadd.f32 %v9822_v21, %v4625_v49  ;;  %v4773_v54 = vmax.f32 %v4623_v42, 0.0 }
 0x484   : > { %v5594_v52 = vpack.c.bf16 %v5472_v47, %v5471_v46  ;;  %v4776_v53 = vmax.f32 %v4634_v48, 0.0 }
 0x485   : > { %v5593_v55 = vpack.c.bf16 %v5470_v59, %v5469_v50  ;;  %v4774_v56 = vmax.f32 %v4626_v51, 0.0  ;;  %v8256_v57 = vpop.f32.mrb[0].mxu0 }
 0x486   : > { %v4842_v58 = vpack.c.bf16 %v4776_v53, %v4775_v26  ;;  %v5007_v60 = vadd.f32 %v8256_v57, %v9831_v30  ;;  %v4998_v62 = vpop.f32.mrb[1].mxu0 }
 0x487   : > { %v5656_v63 = vmax.bf16 %v5655_v44, %v5593_v55  ;;  %v4841_v0 = vpack.c.bf16 %v4774_v56, %v4773_v54  ;;  %v4999_v1 = vadd.f32 %v9831_v30, %v4998_v62  ;;  %v8224_v25 = vpop.f32.mrb[8].mxu1  ;;  %v8257_v2 = vpop.f32.mrb[2].mxu0 }
 0x488   : > { %v4647_v7 = vadd.f32 %v9822_v21, %v8224_v25  ;;  %v5010_v8 = vadd.f32 %v8257_v2, %v9831_v30  ;;  %v4638_v9 = vpop.f32.mrb[9].mxu1  ;;  %v5001_v10 = vpop.f32.mrb[3].mxu0  ;;  %v5475_v5 = vmax.f32 %v5007_v60, 0.0 }
 0x489   : > { %v4639_v24 = vadd.f32 %v9822_v21, %v4638_v9  ;;  %v5002_v11 = vadd.f32 %v9831_v30, %v5001_v10  ;;  %v5657_v12 = vmax.bf16 %v5656_v63, %v5594_v52  ;;  %v8225_v14 = vpop.f32.mrb[10].mxu1  ;;  %8362 = vmatprep.mubr.bf16.mxu0 %v4841_v0  ;;  %v5473_v18 = vmax.f32 %v4999_v1, 0.0 }
 0x48a   : > { %v5476_v15 = vmax.f32 %v5010_v8, 0.0  ;;  %v4650_v16 = vadd.f32 %v9822_v21, %v8225_v14  ;;  %v4641_v17 = vpop.f32.mrb[11].mxu1  ;;  %8363 = vmatmul.mubr.bf16.gmra.mrb[108].mxu0 %v4842_v58  ;;  %v4779_v13 = vmax.f32 %v4647_v7, 0.0 }
 0x48b   : > { %v5474_v19 = vmax.f32 %v5002_v11, 0.0  ;;  %v4642_v20 = vadd.f32 %v9822_v21, %v4641_v17  ;;  %v4777_v27 = vmax.f32 %v4639_v24, 0.0 }
 0x48c   : > { %v5596_v22 = vpack.c.bf16 %v5476_v15, %v5475_v5  ;;  %v4780_v34 = vmax.f32 %v4650_v16, 0.0 }
 0x48d   : > { %v5595_v28 = vpack.c.bf16 %v5474_v19, %v5473_v18  ;;  %v4778_v29 = vmax.f32 %v4642_v20, 0.0  ;;  %v8260_v23 = vpop.f32.mrb[4].mxu0 }
 0x48e   : > { %v4844_v32 = vpack.c.bf16 %v4780_v34, %v4779_v13  ;;  %v5023_v33 = vadd.f32 %v8260_v23, %v9831_v30  ;;  %v5014_v35 = vpop.f32.mrb[5].mxu0  ;;  %v8518_v34 = vld [vmem:[%s10404_s11 + $0x84] ss:$16 sps:$4 sm:$0xff]  }
 0x48f   : > { %v5658_v36 = vmax.bf16 %v5657_v12, %v5595_v28  ;;  %v4843_v37 = vpack.c.bf16 %v4778_v29, %v4777_v27  ;;  %v5015_v38 = vadd.f32 %v9831_v30, %v5014_v35  ;;  %v8261_v39 = vpop.f32.mrb[6].mxu0  ;;  %6043 = vmatprep.subr.bf16.mxu1 %v8518_v34 }
 0x490   : > { %v5026_v31 = vadd.f32 %v8261_v39, %v9831_v30  ;;  %v5017_v6 = vpop.f32.mrb[7].mxu0  ;;  %v5479_v40 = vmax.f32 %v5023_v33, 0.0 }
 0x491   : > { %v5659_v21 = vmax.bf16 %v5658_v36, %v5596_v22  ;;  %v5018_v61 = vadd.f32 %v9831_v30, %v5017_v6  ;;  %8366 = vmatprep.mubr.bf16.mxu0 %v4843_v37  ;;  %v5477_v42 = vmax.f32 %v5015_v38, 0.0  ;;  %v8516_v22 = vld [vmem:[%s10404_s11 + $0x80] ss:$16 sps:$4 sm:$0xff]  }
 0x492   : > { %v5480_v41 = vmax.f32 %v5026_v31, 0.0  ;;  %8367 = vmatmul.mubr.bf16.gmra.mrb[112].mxu0 %v4844_v32  ;;  %6044 = vmatpush1.bf16.msra.mxu1 %v8516_v22 }
 0x493   : > { %v5478_v43 = vmax.f32 %v5018_v61, 0.0  ;;  %v5660_v4 = vunpack.i.l.bf16 %v5659_v21  ;;  %v5661_v7 = vunpack.i.h.bf16 %v5659_v21 }
 0x494   : > { %v5598_v44 = vpack.c.bf16 %v5480_v41, %v5479_v40 }
 0x495   : > { %v5597_v45 = vpack.c.bf16 %v5478_v43, %v5477_v42  ;;  %v8264_v46 = vpop.f32.mrb[8].mxu0  ;;  %v5662_v5 = vmax.f32 %v5660_v4, %v5661_v7 }
 0x496   : > { %v5039_v47 = vadd.f32 %v8264_v46, %v9831_v30  ;;  %v5030_v48 = vpop.f32.mrb[9].mxu0 }
 0x497   : > { %v5670_v49 = vmax.bf16 %v5598_v44, %v5597_v45  ;;  %v5031_v50 = vadd.f32 %v9831_v30, %v5030_v48  ;;  %v8265_v59 = vpop.f32.mrb[10].mxu0  ;;  %v5663_v29 = vrot.slane %v5662_v5, 4 }
 0x498   : > { %v5042_v51 = vadd.f32 %v8265_v59, %v9831_v30  ;;  %v5033_v26 = vpop.f32.mrb[11].mxu0  ;;  %v5483_v53 = vmax.f32 %v5039_v47, 0.0 }
 0x499   : > { %v5034_v52 = vadd.f32 %v9831_v30, %v5033_v26  ;;  %v5481_v55 = vmax.f32 %v5031_v50, 0.0  ;;  %v5664_v39 = vmax.f32 %v5662_v5, %v5663_v29 }
 0x49a   : > { %v5484_v54 = vmax.f32 %v5042_v51, 0.0 }
 0x49b   : > { %v5482_v56 = vmax.f32 %v5034_v52, 0.0  ;;  %v5665_v45 = vrot.slane %v5664_v39, 2 }
 0x49c   : > { %v5600_v57 = vpack.c.bf16 %v5484_v54, %v5483_v53 }
 0x49d   : > { %v5599_v58 = vpack.c.bf16 %v5482_v56, %v5481_v55  ;;  %v8268_v60 = vpop.f32.mrb[12].mxu0  ;;  %v5666_v53 = vmax.f32 %v5664_v39, %v5665_v45  ;;  %v8519_v45 = vld [vmem:[%s10404_s11 + $0xa0] ss:$16 sps:$4 sm:$0xff]  }
 0x49e   : > { %v5055_v62 = vadd.f32 %v8268_v60, %v9831_v30  ;;  %v5046_v63 = vpop.f32.mrb[13].mxu0 }
 0x49f   : > { %v5671_v0 = vmax.bf16 %v5670_v49, %v5599_v58  ;;  %v5047_v1 = vadd.f32 %v9831_v30, %v5046_v63  ;;  %v8269_v25 = vpop.f32.mrb[14].mxu0 }
 0x4a0   : > { %v5058_v2 = vadd.f32 %v8269_v25, %v9831_v30  ;;  %v5049_v3 = vpop.f32.mrb[15].mxu0  ;;  %v5487_v10 = vmax.f32 %v5055_v62, 0.0 }
 0x4a1   : > { %v5050_v8 = vadd.f32 %v9831_v30, %v5049_v3  ;;  %v5672_v9 = vmax.bf16 %v5671_v0, %v5600_v57  ;;  %v5485_v11 = vmax.f32 %v5047_v1, 0.0 }
 0x4a2   : > { %v5488_v24 = vmax.f32 %v5058_v2, 0.0  ;;  %v5667_v2 = vrot.slane %v5666_v53, 1 }
 0x4a3   : > { %v5486_v12 = vmax.f32 %v5050_v8, 0.0 }
 0x4a4   : > { %v5602_v14 = vpack.c.bf16 %v5488_v24, %v5487_v10 }
 0x4a5   : > { %v5601_v15 = vpack.c.bf16 %v5486_v12, %v5485_v11  ;;  %v8272_v16 = vpop.f32.mrb[16].mxu0  ;;  %v5668_v12 = vmax.f32 %v5666_v53, %v5667_v2 }
 0x4a6   : > { %v5071_v17 = vadd.f32 %v8272_v16, %v9831_v30  ;;  %v5062_v18 = vpop.f32.mrb[17].mxu0 }
 0x4a7   : > { %v5673_v19 = vmax.bf16 %v5672_v9, %v5601_v15  ;;  %v5063_v20 = vadd.f32 %v9831_v30, %v5062_v18  ;;  %v8273_v13 = vpop.f32.mrb[18].mxu0 }
 0x4a8   : > { %v5074_v27 = vadd.f32 %v8273_v13, %v9831_v30  ;;  %v5065_v28 = vpop.f32.mrb[19].mxu0  ;;  %v5491_v33 = vmax.f32 %v5071_v17, 0.0 }
 0x4a9   : > { %v5066_v23 = vadd.f32 %v9831_v30, %v5065_v28  ;;  %v5674_v32 = vmax.bf16 %v5673_v19, %v5602_v14  ;;  %v5489_v36 = vmax.f32 %v5063_v20, 0.0 }
 0x4aa   : > { %v5492_v35 = vmax.f32 %v5074_v27, 0.0  ;;  %v5669_v27 = vpack.i.bf16 %v5668_v12, %v5668_v12 }
 0x4ab   : > { %v5490_v37 = vmax.f32 %v5066_v23, 0.0 }
 0x4ac   : > { %v5604_v38 = vpack.c.bf16 %v5492_v35, %v5491_v33  ;;  %v5851_v39 = vunpack.c.l.b16 %v5669_v27 }
 0x4ad   : > { %v5603_v31 = vpack.c.bf16 %v5490_v37, %v5489_v36  ;;  %v8276_v6 = vpop.f32.mrb[20].mxu0 }
 0x4ae   : > { %v5087_v21 = vadd.f32 %v8276_v6, %v9831_v30  ;;  %v5078_v61 = vpop.f32.mrb[21].mxu0 }
 0x4af   : > { %v5675_v40 = vmax.bf16 %v5674_v32, %v5603_v31  ;;  %v5079_v41 = vadd.f32 %v9831_v30, %v5078_v61  ;;  %v8277_v42 = vpop.f32.mrb[22].mxu0 }
 0x4b0   : > { %v5090_v43 = vadd.f32 %v8277_v42, %v9831_v30  ;;  %v5081_v44 = vpop.f32.mrb[23].mxu0  ;;  %v5495_v48 = vmax.f32 %v5087_v21, 0.0 }
 0x4b1   : > { %v5676_v46 = vmax.bf16 %v5675_v40, %v5604_v38  ;;  %v5082_v47 = vadd.f32 %v9831_v30, %v5081_v44  ;;  %v5493_v51 = vmax.f32 %v5079_v41, 0.0 }
 0x4b2   : > { %v5496_v49 = vmax.f32 %v5090_v43, 0.0 }
 0x4b3   : > { %v5677_v50 = vunpack.i.l.bf16 %v5676_v46  ;;  %v5678_v59 = vunpack.i.h.bf16 %v5676_v46  ;;  %v5494_v26 = vmax.f32 %v5082_v47, 0.0  ;;  %v8521_v46 = vld [vmem:[%s10404_s11 + $0xa4] ss:$16 sps:$4 sm:$0xff]  }
 0x4b4   : > { %v5606_v52 = vpack.c.bf16 %v5496_v49, %v5495_v48  ;;  %6045 = vmatprep.subr.bf16.mxu1 %v8521_v46 }
 0x4b5   : > { %v5679_v54 = vmax.f32 %v5677_v50, %v5678_v59  ;;  %v5605_v55 = vpack.c.bf16 %v5494_v26, %v5493_v51  ;;  %v8280_v56 = vpop.f32.mrb[24].mxu0  ;;  %6046 = vmatpush1.bf16.msra.mxu1 %v8519_v45 }
 0x4b6   : > { %v5103_v57 = vadd.f32 %v8280_v56, %v9831_v30  ;;  %v5094_v58 = vpop.f32.mrb[25].mxu0 }
 0x4b7   : > { %v5680_v60 = vrot.slane %v5679_v54, 4  ;;  %v5687_v62 = vmax.bf16 %v5606_v52, %v5605_v55  ;;  %v5095_v63 = vadd.f32 %v9831_v30, %v5094_v58  ;;  %v8281_v0 = vpop.f32.mrb[26].mxu0 }
 0x4b8   : > { %v5106_v1 = vadd.f32 %v8281_v0, %v9831_v30  ;;  %v5097_v25 = vpop.f32.mrb[27].mxu0  ;;  %v5499_v7 = vmax.f32 %v5103_v57, 0.0 }
 0x4b9   : > { %v5681_v3 = vmax.f32 %v5679_v54, %v5680_v60  ;;  %v5098_v4 = vadd.f32 %v9831_v30, %v5097_v25  ;;  %v5497_v10 = vmax.f32 %v5095_v63, 0.0 }
 0x4ba   : > { %v5500_v8 = vmax.f32 %v5106_v1, 0.0 }
 0x4bb   : > { %v5682_v9 = vrot.slane %v5681_v3, 2  ;;  %v5498_v24 = vmax.f32 %v5098_v4, 0.0 }
 0x4bc   : > { %v5608_v11 = vpack.c.bf16 %v5500_v8, %v5499_v7 }
 0x4bd   : > { %v5683_v14 = vmax.f32 %v5681_v3, %v5682_v9  ;;  %v5607_v5 = vpack.c.bf16 %v5498_v24, %v5497_v10  ;;  %v8284_v15 = vpop.f32.mrb[28].mxu0 }
 0x4be   : > { %v5119_v16 = vadd.f32 %v8284_v15, %v9831_v30  ;;  %v5110_v17 = vpop.f32.mrb[29].mxu0 }
 0x4bf   : > { %v5684_v18 = vrot.slane %v5683_v14, 1  ;;  %v5688_v19 = vmax.bf16 %v5687_v62, %v5607_v5  ;;  %v5111_v20 = vadd.f32 %v9831_v30, %v5110_v17  ;;  %v8285_v13 = vpop.f32.mrb[30].mxu0 }
 0x4c0   : > { %v5122_v22 = vadd.f32 %v8285_v13, %v9831_v30  ;;  %v5113_v34 = vpop.f32.mrb[31].mxu0  ;;  %v5503_v32 = vmax.f32 %v5119_v16, 0.0 }
 0x4c1   : > { %v5685_v28 = vmax.f32 %v5683_v14, %v5684_v18  ;;  %v5114_v29 = vadd.f32 %v9831_v30, %v5113_v34  ;;  %v5689_v23 = vmax.bf16 %v5688_v19, %v5608_v11  ;;  %v5501_v36 = vmax.f32 %v5111_v20, 0.0 }
 0x4c2   : > { %v5504_v33 = vmax.f32 %v5122_v22, 0.0 }
 0x4c3   : > { %v5686_v35 = vpack.i.bf16 %v5685_v28, %v5685_v28  ;;  %v5502_v37 = vmax.f32 %v5114_v29, 0.0 }
 0x4c4   : > { %v5610_v38 = vpack.c.bf16 %v5504_v33, %v5503_v32 }
 0x4c5   : > { %v5852_v31 = vunpack.c.l.b16 %v5686_v35  ;;  %v5609_v6 = vpack.c.bf16 %v5502_v37, %v5501_v36  ;;  %v8288_v21 = vpop.f32.mrb[32].mxu0 }
 0x4c6   : > { %v5135_v61 = vadd.f32 %v8288_v21, %v9831_v30  ;;  %v5126_v40 = vpop.f32.mrb[33].mxu0 }
 0x4c7   : > { %v9906_v41 = vsel %vm5859_vm3, %v5852_v31, %v5851_v39  ;;  %v5690_v42 = vmax.bf16 %v5689_v23, %v5609_v6  ;;  %v5127_v43 = vadd.f32 %v9831_v30, %v5126_v40  ;;  %v8289_v44 = vpop.f32.mrb[34].mxu0 }
 0x4c8   : > { %v5138_v47 = vadd.f32 %v8289_v44, %v9831_v30  ;;  %v5129_v48 = vpop.f32.mrb[35].mxu0  ;;  %v5507_v59 = vmax.f32 %v5135_v61, 0.0 }
 0x4c9   : > { %v5130_v49 = vadd.f32 %v9831_v30, %v5129_v48  ;;  %v5691_v50 = vmax.bf16 %v5690_v42, %v5610_v38  ;;  %v5505_v26 = vmax.f32 %v5127_v43, 0.0 }
 0x4ca   : > { %v5508_v51 = vmax.f32 %v5138_v47, 0.0 }
 0x4cb   : > { %v5506_v52 = vmax.f32 %v5130_v49, 0.0 }
 0x4cc   : > { %v5612_v53 = vpack.c.bf16 %v5508_v51, %v5507_v59 }
 0x4cd   : > { %v5611_v54 = vpack.c.bf16 %v5506_v52, %v5505_v26  ;;  %v8292_v55 = vpop.f32.mrb[36].mxu0 }
 0x4ce   : > { %v5151_v56 = vadd.f32 %v8292_v55, %v9831_v30  ;;  %v5142_v57 = vpop.f32.mrb[37].mxu0 }
 0x4cf   : > { %v5692_v58 = vmax.bf16 %v5691_v50, %v5611_v54  ;;  %v5143_v60 = vadd.f32 %v9831_v30, %v5142_v57  ;;  %v8293_v62 = vpop.f32.mrb[38].mxu0 }
 0x4d0   : > { %v5154_v63 = vadd.f32 %v8293_v62, %v9831_v30  ;;  %v5145_v0 = vpop.f32.mrb[39].mxu0  ;;  %v5511_v2 = vmax.f32 %v5151_v56, 0.0 }
 0x4d1   : > { %v5693_v1 = vmax.bf16 %v5692_v58, %v5612_v53  ;;  %v5146_v25 = vadd.f32 %v9831_v30, %v5145_v0  ;;  %v5509_v8 = vmax.f32 %v5143_v60, 0.0  ;;  %v8522_v58 = vld [vmem:[%s10404_s11 + $0xc0] ss:$16 sps:$4 sm:$0xff]   ;;  %v8524_v60 = vld [vmem:[%s10404_s11 + $0xc4] ss:$16 sps:$4 sm:$0xff]  }
 0x4d2   : > { %v5512_v3 = vmax.f32 %v5154_v63, 0.0  ;;  %6047 = vmatprep.subr.bf16.mxu1 %v8524_v60 }
 0x4d3   : > { %v5694_v4 = vunpack.i.l.bf16 %v5693_v1  ;;  %v5695_v7 = vunpack.i.h.bf16 %v5693_v1  ;;  %v5510_v9 = vmax.f32 %v5146_v25, 0.0  ;;  %6048 = vmatpush1.bf16.msra.mxu1 %v8522_v58 }
 0x4d4   : > { %v5614_v10 = vpack.c.bf16 %v5512_v3, %v5511_v2 }
 0x4d5   : > { %v5696_v24 = vmax.f32 %v5694_v4, %v5695_v7  ;;  %v5613_v11 = vpack.c.bf16 %v5510_v9, %v5509_v8  ;;  %v8296_v12 = vpop.f32.mrb[40].mxu0 }
 0x4d6   : > { %v5167_v14 = vadd.f32 %v8296_v12, %v9831_v30  ;;  %v5158_v5 = vpop.f32.mrb[41].mxu0 }
 0x4d7   : > { %v5697_v15 = vrot.slane %v5696_v24, 4  ;;  %v5704_v16 = vmax.bf16 %v5614_v10, %v5613_v11  ;;  %v5159_v17 = vadd.f32 %v9831_v30, %v5158_v5  ;;  %v8297_v18 = vpop.f32.mrb[42].mxu0 }
 0x4d8   : > { %v5170_v19 = vadd.f32 %v8297_v18, %v9831_v30  ;;  %v5161_v20 = vpop.f32.mrb[43].mxu0  ;;  %v5515_v34 = vmax.f32 %v5167_v14, 0.0 }
 0x4d9   : > { %v5698_v13 = vmax.f32 %v5696_v24, %v5697_v15  ;;  %v5162_v22 = vadd.f32 %v9831_v30, %v5161_v20  ;;  %v5513_v29 = vmax.f32 %v5159_v17, 0.0 }
 0x4da   : > { %v5516_v27 = vmax.f32 %v5170_v19, 0.0 }
 0x4db   : > { %v5699_v28 = vrot.slane %v5698_v13, 2  ;;  %v5514_v23 = vmax.f32 %v5162_v22, 0.0 }
 0x4dc   : > { %v5616_v32 = vpack.c.bf16 %v5516_v27, %v5515_v34 }
 0x4dd   : > { %v5700_v33 = vmax.f32 %v5698_v13, %v5699_v28  ;;  %v5615_v35 = vpack.c.bf16 %v5514_v23, %v5513_v29  ;;  %v8300_v36 = vpop.f32.mrb[44].mxu0 }
 0x4de   : > { %v5183_v37 = vadd.f32 %v8300_v36, %v9831_v30  ;;  %v5174_v38 = vpop.f32.mrb[45].mxu0 }
 0x4df   : > { %v5701_v39 = vrot.slane %v5700_v33, 1  ;;  %v5705_v31 = vmax.bf16 %v5704_v16, %v5615_v35  ;;  %v5175_v6 = vadd.f32 %v9831_v30, %v5174_v38  ;;  %v8301_v21 = vpop.f32.mrb[46].mxu0 }
 0x4e0   : > { %v5186_v61 = vadd.f32 %v8301_v21, %v9831_v30  ;;  %v5177_v40 = vpop.f32.mrb[47].mxu0  ;;  %v5519_v45 = vmax.f32 %v5183_v37, 0.0 }
 0x4e1   : > { %v5702_v42 = vmax.f32 %v5700_v33, %v5701_v39  ;;  %v5178_v43 = vadd.f32 %v9831_v30, %v5177_v40  ;;  %v5706_v44 = vmax.bf16 %v5705_v31, %v5616_v32  ;;  %v5517_v48 = vmax.f32 %v5175_v6, 0.0 }
 0x4e2   : > { %v5520_v46 = vmax.f32 %v5186_v61, 0.0 }
 0x4e3   : > { %v5703_v47 = vpack.i.bf16 %v5702_v42, %v5702_v42  ;;  %v5518_v49 = vmax.f32 %v5178_v43, 0.0 }
 0x4e4   : > { %v5618_v50 = vpack.c.bf16 %v5520_v46, %v5519_v45 }
 0x4e5   : > { %v5853_v59 = vunpack.c.l.b16 %v5703_v47  ;;  %v5617_v51 = vpack.c.bf16 %v5518_v49, %v5517_v48  ;;  %v8304_v26 = vpop.f32.mrb[48].mxu0 }
 0x4e6   : > { %v5199_v52 = vadd.f32 %v8304_v26, %v9831_v30  ;;  %v5190_v53 = vpop.f32.mrb[49].mxu0 }
 0x4e7   : > { %v9931_v54 = vsel %vm5861_vm4, %v5853_v59, %v9906_v41  ;;  %v5707_v55 = vmax.bf16 %v5706_v44, %v5617_v51  ;;  %v5191_v56 = vadd.f32 %v9831_v30, %v5190_v53  ;;  %v8305_v57 = vpop.f32.mrb[50].mxu0 }
 0x4e8   : > { %v5202_v62 = vadd.f32 %v8305_v57, %v9831_v30  ;;  %v5193_v63 = vpop.f32.mrb[51].mxu0  ;;  %v5523_v41 = vmax.f32 %v5199_v52, 0.0 }
 0x4e9   : > { %v5194_v0 = vadd.f32 %v9831_v30, %v5193_v63  ;;  %v5708_v1 = vmax.bf16 %v5707_v55, %v5618_v50  ;;  %v5521_v2 = vmax.f32 %v5191_v56, 0.0 }
 0x4ea   : > { %v5524_v25 = vmax.f32 %v5202_v62, 0.0 }
 0x4eb   : > { %v5522_v3 = vmax.f32 %v5194_v0, 0.0 }
 0x4ec   : > { %v5620_v4 = vpack.c.bf16 %v5524_v25, %v5523_v41  ;;  %v8525_v25 = vld [vmem:[%s10404_s11 + $0xe0] ss:$16 sps:$4 sm:$0xff]  }
 0x4ed   : > { %v5619_v7 = vpack.c.bf16 %v5522_v3, %v5521_v2  ;;  %v8308_v8 = vpop.f32.mrb[52].mxu0 }
 0x4ee   : > { %v5215_v9 = vadd.f32 %v8308_v8, %v9831_v30  ;;  %v5206_v10 = vpop.f32.mrb[53].mxu0 }
 0x4ef   : > { %v5709_v24 = vmax.bf16 %v5708_v1, %v5619_v7  ;;  %v5207_v11 = vadd.f32 %v9831_v30, %v5206_v10  ;;  %v8309_v12 = vpop.f32.mrb[54].mxu0  ;;  %v8527_v1 = vld [vmem:[%s10404_s11 + $0xe4] ss:$16 sps:$4 sm:$0xff]  }
 0x4f0   : > { %v5218_v14 = vadd.f32 %v8309_v12, %v9831_v30  ;;  %v5209_v5 = vpop.f32.mrb[55].mxu0  ;;  %v5527_v17 = vmax.f32 %v5215_v9, 0.0  ;;  %6049 = vmatprep.subr.bf16.mxu1 %v8527_v1  ;;  %v8530_v12 = vld [vmem:[%s10404_s11 + $0xc] ss:$16 sps:$4 sm:$0xff]  }
 0x4f1   : > { %v5710_v15 = vmax.bf16 %v5709_v24, %v5620_v4  ;;  %v5210_v16 = vadd.f32 %v9831_v30, %v5209_v5  ;;  %v5525_v13 = vmax.f32 %v5207_v11, 0.0  ;;  %6050 = vmatpush1.bf16.msra.mxu1 %v8525_v25 }
 0x4f2   : > { %v5528_v18 = vmax.f32 %v5218_v14, 0.0  ;;  %6076 = vmatprep.subr.bf16.mxu1 %v8530_v12 }
 0x4f3   : > { %v5711_v19 = vunpack.i.l.bf16 %v5710_v15  ;;  %v5712_v20 = vunpack.i.h.bf16 %v5710_v15  ;;  %v5526_v22 = vmax.f32 %v5210_v16, 0.0 }
 0x4f4   : > { %v5622_v34 = vpack.c.bf16 %v5528_v18, %v5527_v17  ;;  %v8733_v17 = vmov 0  }
 0x4f5   : > { %v5713_v27 = vmax.f32 %v5711_v19, %v5712_v20  ;;  %v5621_v28 = vpack.c.bf16 %v5526_v22, %v5525_v13  ;;  %v8312_v29 = vpop.f32.mrb[56].mxu0  ;;  %6067 = vmatprep.mubr.bf16.mxu1 %v8733_v17 }
 0x4f6   : > { %v5231_v23 = vadd.f32 %v8312_v29, %v9831_v30  ;;  %v5222_v32 = vpop.f32.mrb[57].mxu0 }
 0x4f7   : > { %v5714_v33 = vrot.slane %v5713_v27, 4  ;;  %v5721_v35 = vmax.bf16 %v5622_v34, %v5621_v28  ;;  %v5223_v36 = vadd.f32 %v9831_v30, %v5222_v32  ;;  %v8313_v37 = vpop.f32.mrb[58].mxu0 }
 0x4f8   : > { %v5234_v38 = vadd.f32 %v8313_v37, %v9831_v30  ;;  %v5225_v39 = vpop.f32.mrb[59].mxu0  ;;  %v5531_v21 = vmax.f32 %v5231_v23, 0.0 }
 0x4f9   : > { %v5715_v31 = vmax.f32 %v5713_v27, %v5714_v33  ;;  %v5226_v6 = vadd.f32 %v9831_v30, %v5225_v39  ;;  %v5529_v42 = vmax.f32 %v5223_v36, 0.0 }
 0x4fa   : > { %v5532_v61 = vmax.f32 %v5234_v38, 0.0 }
 0x4fb   : > { %v5716_v40 = vrot.slane %v5715_v31, 2  ;;  %v5530_v43 = vmax.f32 %v5226_v6, 0.0 }
 0x4fc   : > { %v5624_v44 = vpack.c.bf16 %v5532_v61, %v5531_v21 }
 0x4fd   : > { %v5717_v45 = vmax.f32 %v5715_v31, %v5716_v40  ;;  %v5623_v46 = vpack.c.bf16 %v5530_v43, %v5529_v42  ;;  %v8316_v47 = vpop.f32.mrb[60].mxu0 }
 0x4fe   : > { %v5247_v48 = vadd.f32 %v8316_v47, %v9831_v30  ;;  %v5238_v49 = vpop.f32.mrb[61].mxu0 }
 0x4ff   : > { %v5718_v50 = vrot.slane %v5717_v45, 1  ;;  %v5722_v59 = vmax.bf16 %v5721_v35, %v5623_v46  ;;  %v5239_v51 = vadd.f32 %v9831_v30, %v5238_v49  ;;  %v8317_v26 = vpop.f32.mrb[62].mxu0 }
 0x500   : > { %v5250_v52 = vadd.f32 %v8317_v26, %v9831_v30  ;;  %v5241_v53 = vpop.f32.mrb[63].mxu0  ;;  %v5535_v58 = vmax.f32 %v5247_v48, 0.0 }
 0x501   : > { %v5719_v55 = vmax.f32 %v5717_v45, %v5718_v50  ;;  %v5242_v56 = vadd.f32 %v9831_v30, %v5241_v53  ;;  %v5723_v57 = vmax.bf16 %v5722_v59, %v5624_v44  ;;  %v5533_v63 = vmax.f32 %v5239_v51, 0.0 }
 0x502   : > { %v5536_v60 = vmax.f32 %v5250_v52, 0.0 }
 0x503   : > { %v5720_v62 = vpack.i.bf16 %v5719_v55, %v5719_v55  ;;  %v5534_v0 = vmax.f32 %v5242_v56, 0.0 }
 0x504   : > { %v5626_v41 = vpack.c.bf16 %v5536_v60, %v5535_v58 }
 0x505   : > { %v5854_v2 = vunpack.c.l.b16 %v5720_v62  ;;  %v5625_v3 = vpack.c.bf16 %v5534_v0, %v5533_v63  ;;  %v8320_v4 = vpop.f32.mrb[64].mxu0 }
 0x506   : > { %v5263_v7 = vadd.f32 %v8320_v4, %v9831_v30  ;;  %v5254_v8 = vpop.f32.mrb[65].mxu0 }
 0x507   : > { %v9962_v9 = vsel %vm5863_vm5, %v5854_v2, %v9931_v54  ;;  %v5724_v10 = vmax.bf16 %v5723_v57, %v5625_v3  ;;  %v5255_v24 = vadd.f32 %v9831_v30, %v5254_v8  ;;  %v8321_v11 = vpop.f32.mrb[66].mxu0 }
 0x508   : > { %v5266_v14 = vadd.f32 %v8321_v11, %v9831_v30  ;;  %v5257_v5 = vpop.f32.mrb[67].mxu0  ;;  %v5539_v54 = vmax.f32 %v5263_v7, 0.0 }
 0x509   : > { %v5258_v15 = vadd.f32 %v9831_v30, %v5257_v5  ;;  %v5725_v16 = vmax.bf16 %v5724_v10, %v5626_v41  ;;  %v5537_v19 = vmax.f32 %v5255_v24, 0.0 }
 0x50a   : > { %v5540_v18 = vmax.f32 %v5266_v14, 0.0 }
 0x50b   : > { %v5538_v20 = vmax.f32 %v5258_v15, 0.0 }
 0x50c   : > { %v5628_v13 = vpack.c.bf16 %v5540_v18, %v5539_v54 }
 0x50d   : > { %v5627_v22 = vpack.c.bf16 %v5538_v20, %v5537_v19  ;;  %v8324_v34 = vpop.f32.mrb[68].mxu0 }
 0x50e   : > { %v5279_v27 = vadd.f32 %v8324_v34, %v9831_v30  ;;  %v5270_v28 = vpop.f32.mrb[69].mxu0 }
 0x50f   : > { %v5726_v29 = vmax.bf16 %v5725_v16, %v5627_v22  ;;  %v5271_v23 = vadd.f32 %v9831_v30, %v5270_v28  ;;  %v8325_v32 = vpop.f32.mrb[70].mxu0 }
 0x510   : > { %v5282_v33 = vadd.f32 %v8325_v32, %v9831_v30  ;;  %v5273_v35 = vpop.f32.mrb[71].mxu0  ;;  %v5543_v38 = vmax.f32 %v5279_v27, 0.0 }
 0x511   : > { %v5727_v36 = vmax.bf16 %v5726_v29, %v5628_v13  ;;  %v5274_v37 = vadd.f32 %v9831_v30, %v5273_v35  ;;  %v5541_v21 = vmax.f32 %v5271_v23, 0.0  ;;  %v9986_v13 = vld [vmem:[%s10403_s10] ss:$0 sm:$0xff] }
 0x512   : > { %v5544_v39 = vmax.f32 %v5282_v33, 0.0 }
 0x513   : > { %v5728_v31 = vunpack.i.l.bf16 %v5727_v36  ;;  %v5729_v6 = vunpack.i.h.bf16 %v5727_v36  ;;  %v5542_v61 = vmax.f32 %v5274_v37, 0.0 }
 0x514   : > { %v5630_v40 = vpack.c.bf16 %v5544_v39, %v5543_v38 }
 0x515   : > { %v5730_v42 = vmax.f32 %v5728_v31, %v5729_v6  ;;  %v5629_v43 = vpack.c.bf16 %v5542_v61, %v5541_v21  ;;  %v8328_v44 = vpop.f32.mrb[72].mxu0 }
 0x516   : > { %v5295_v45 = vadd.f32 %v8328_v44, %v9831_v30  ;;  %v5286_v46 = vpop.f32.mrb[73].mxu0 }
 0x517   : > { %v5731_v47 = vrot.slane %v5730_v42, 4  ;;  %v5738_v48 = vmax.bf16 %v5630_v40, %v5629_v43  ;;  %v5287_v49 = vadd.f32 %v9831_v30, %v5286_v46  ;;  %v8329_v50 = vpop.f32.mrb[74].mxu0 }
 0x518   : > { %v5298_v59 = vadd.f32 %v8329_v50, %v9831_v30  ;;  %v5289_v51 = vpop.f32.mrb[75].mxu0  ;;  %v5547_v53 = vmax.f32 %v5295_v45, 0.0 }
 0x519   : > { %v5732_v26 = vmax.f32 %v5730_v42, %v5731_v47  ;;  %v5290_v52 = vadd.f32 %v9831_v30, %v5289_v51  ;;  %v5545_v57 = vmax.f32 %v5287_v49, 0.0 }
 0x51a   : > { %v5548_v55 = vmax.f32 %v5298_v59, 0.0 }
 0x51b   : > { %v5733_v56 = vrot.slane %v5732_v26, 2  ;;  %v5546_v58 = vmax.f32 %v5290_v52, 0.0 }
 0x51c   : > { %v5632_v60 = vpack.c.bf16 %v5548_v55, %v5547_v53 }
 0x51d   : > { %v5734_v62 = vmax.f32 %v5732_v26, %v5733_v56  ;;  %v5631_v63 = vpack.c.bf16 %v5546_v58, %v5545_v57  ;;  %v8332_v0 = vpop.f32.mrb[76].mxu0 }
 0x51e   : > { %v5311_v1 = vadd.f32 %v8332_v0, %v9831_v30  ;;  %v5302_v41 = vpop.f32.mrb[77].mxu0 }
 0x51f   : > { %v5735_v25 = vrot.slane %v5734_v62, 1  ;;  %v5739_v2 = vmax.bf16 %v5738_v48, %v5631_v63  ;;  %v5303_v3 = vadd.f32 %v9831_v30, %v5302_v41  ;;  %v8333_v4 = vpop.f32.mrb[78].mxu0 }
 0x520   : > { %v5314_v7 = vadd.f32 %v8333_v4, %v9831_v30  ;;  %v5305_v8 = vpop.f32.mrb[79].mxu0  ;;  %v5551_v12 = vmax.f32 %v5311_v1, 0.0 }
 0x521   : > { %v5736_v10 = vmax.f32 %v5734_v62, %v5735_v25  ;;  %v5306_v24 = vadd.f32 %v9831_v30, %v5305_v8  ;;  %v5740_v11 = vmax.bf16 %v5739_v2, %v5632_v60  ;;  %v5549_v15 = vmax.f32 %v5303_v3, 0.0 }
 0x522   : > { %v5552_v14 = vmax.f32 %v5314_v7, 0.0 }
 0x523   : > { %v5737_v5 = vpack.i.bf16 %v5736_v10, %v5736_v10  ;;  %v5550_v16 = vmax.f32 %v5306_v24, 0.0 }
 0x524   : > { %v5634_v54 = vpack.c.bf16 %v5552_v14, %v5551_v12 }
 0x525   : > { %v5855_v18 = vunpack.c.l.b16 %v5737_v5  ;;  %v5633_v19 = vpack.c.bf16 %v5550_v16, %v5549_v15  ;;  %v8336_v20 = vpop.f32.mrb[80].mxu0 }
 0x526   : > { %v5327_v22 = vadd.f32 %v9986_v13, %v8336_v20  ;;  %v5318_v34 = vpop.f32.mrb[81].mxu0 }
 0x527   : > { %v9990_v30 = vsel %vm5865_vm6, %v5855_v18, %v9962_v9  ;;  %v5741_v27 = vmax.bf16 %v5740_v11, %v5633_v19  ;;  %v5319_v28 = vadd.f32 %v9986_v13, %v5318_v34  ;;  %v8337_v29 = vpop.f32.mrb[82].mxu0 }
 0x528   : > { %v5330_v23 = vadd.f32 %v9986_v13, %v8337_v29  ;;  %v5321_v32 = vpop.f32.mrb[83].mxu0  ;;  %v5555_v36 = vmax.f32 %v5327_v22, 0.0 }
 0x529   : > { %v5322_v33 = vadd.f32 %v9986_v13, %v5321_v32  ;;  %v5742_v35 = vmax.bf16 %v5741_v27, %v5634_v54  ;;  %v5553_v38 = vmax.f32 %v5319_v28, 0.0 }
 0x52a   : > { %v5556_v37 = vmax.f32 %v5330_v23, 0.0 }
 0x52b   : > { %v5554_v39 = vmax.f32 %v5322_v33, 0.0 }
 0x52c   : > { %v5636_v31 = vpack.c.bf16 %v5556_v37, %v5555_v36 }
 0x52d   : > { %v5635_v6 = vpack.c.bf16 %v5554_v39, %v5553_v38  ;;  %v8340_v21 = vpop.f32.mrb[84].mxu0 }
 0x52e   : > { %v5343_v9 = vadd.f32 %v9986_v13, %v8340_v21  ;;  %v5334_v61 = vpop.f32.mrb[85].mxu0 }
 0x52f   : > { %v5743_v40 = vmax.bf16 %v5742_v35, %v5635_v6  ;;  %v5335_v42 = vadd.f32 %v9986_v13, %v5334_v61  ;;  %v8341_v43 = vpop.f32.mrb[86].mxu0 }
 0x530   : > { %v5346_v44 = vadd.f32 %v9986_v13, %v8341_v43  ;;  %v5337_v45 = vpop.f32.mrb[87].mxu0  ;;  %v5559_v48 = vmax.f32 %v5343_v9, 0.0 }
 0x531   : > { %v5744_v46 = vmax.bf16 %v5743_v40, %v5636_v31  ;;  %v5338_v47 = vadd.f32 %v9986_v13, %v5337_v45  ;;  %v5557_v51 = vmax.f32 %v5335_v42, 0.0 }
 0x532   : > { %v5560_v49 = vmax.f32 %v5346_v44, 0.0 }
 0x533   : > { %v5745_v50 = vunpack.i.l.bf16 %v5744_v46  ;;  %v5746_v59 = vunpack.i.h.bf16 %v5744_v46  ;;  %v5558_v26 = vmax.f32 %v5338_v47, 0.0 }
 0x534   : > { %v5638_v52 = vpack.c.bf16 %v5560_v49, %v5559_v48 }
 0x535   : > { %v5747_v53 = vmax.f32 %v5745_v50, %v5746_v59  ;;  %v5637_v55 = vpack.c.bf16 %v5558_v26, %v5557_v51  ;;  %v8344_v56 = vpop.f32.mrb[88].mxu0 }
 0x536   : > { %v5359_v57 = vadd.f32 %v9986_v13, %v8344_v56  ;;  %v5350_v58 = vpop.f32.mrb[89].mxu0 }
 0x537   : > { %v5748_v60 = vrot.slane %v5747_v53, 4  ;;  %v5755_v62 = vmax.bf16 %v5638_v52, %v5637_v55  ;;  %v5351_v63 = vadd.f32 %v9986_v13, %v5350_v58  ;;  %v8345_v0 = vpop.f32.mrb[90].mxu0 }
 0x538   : > { %v5362_v1 = vadd.f32 %v9986_v13, %v8345_v0  ;;  %v5353_v41 = vpop.f32.mrb[91].mxu0  ;;  %v5563_v3 = vmax.f32 %v5359_v57, 0.0 }
 0x539   : > { %v5749_v25 = vmax.f32 %v5747_v53, %v5748_v60  ;;  %v5354_v2 = vadd.f32 %v9986_v13, %v5353_v41  ;;  %v5561_v8 = vmax.f32 %v5351_v63, 0.0 }
 0x53a   : > { %v5564_v4 = vmax.f32 %v5362_v1, 0.0 }
 0x53b   : > { %v5750_v7 = vrot.slane %v5749_v25, 2  ;;  %v5562_v10 = vmax.f32 %v5354_v2, 0.0 }
 0x53c   : > { %v5640_v24 = vpack.c.bf16 %v5564_v4, %v5563_v3 }
 0x53d   : > { %v5751_v11 = vmax.f32 %v5749_v25, %v5750_v7  ;;  %v5639_v12 = vpack.c.bf16 %v5562_v10, %v5561_v8  ;;  %v8348_v14 = vpop.f32.mrb[92].mxu0 }
 0x53e   : > { %v5375_v5 = vadd.f32 %v9986_v13, %v8348_v14  ;;  %v5366_v15 = vpop.f32.mrb[93].mxu0 }
 0x53f   : > { %v5752_v16 = vrot.slane %v5751_v11, 1  ;;  %v5756_v54 = vmax.bf16 %v5755_v62, %v5639_v12  ;;  %v5367_v18 = vadd.f32 %v9986_v13, %v5366_v15  ;;  %v8349_v19 = vpop.f32.mrb[94].mxu0 }
 0x540   : > { %v5378_v20 = vadd.f32 %v9986_v13, %v8349_v19  ;;  %v5369_v22 = vpop.f32.mrb[95].mxu0  ;;  %v5567_v29 = vmax.f32 %v5375_v5, 0.0 }
 0x541   : > { %v5753_v34 = vmax.f32 %v5751_v11, %v5752_v16  ;;  %v5370_v27 = vadd.f32 %v9986_v13, %v5369_v22  ;;  %v5757_v28 = vmax.bf16 %v5756_v54, %v5640_v24  ;;  %v5565_v33 = vmax.f32 %v5367_v18, 0.0 }
 0x542   : > { %v5568_v23 = vmax.f32 %v5378_v20, 0.0 }
 0x543   : > { %v5754_v32 = vpack.i.bf16 %v5753_v34, %v5753_v34  ;;  %v5566_v35 = vmax.f32 %v5370_v27, 0.0 }
 0x544   : > { %v5642_v36 = vpack.c.bf16 %v5568_v23, %v5567_v29 }
 0x545   : > { %v5856_v37 = vunpack.c.l.b16 %v5754_v32  ;;  %v5641_v38 = vpack.c.bf16 %v5566_v35, %v5565_v33  ;;  %v8352_v39 = vpop.f32.mrb[96].mxu0 }
 0x546   : > { %v5391_v31 = vadd.f32 %v9986_v13, %v8352_v39  ;;  %v5382_v6 = vpop.f32.mrb[97].mxu0 }
 0x547   : > { %v10009_v21 = vsel %vm5867_vm7, %v5856_v37, %v9990_v30  ;;  %v5758_v9 = vmax.bf16 %v5757_v28, %v5641_v38  ;;  %v5383_v61 = vadd.f32 %v9986_v13, %v5382_v6  ;;  %v8353_v40 = vpop.f32.mrb[98].mxu0 }
 0x548   : > { %v5394_v42 = vadd.f32 %v9986_v13, %v8353_v40  ;;  %v5385_v43 = vpop.f32.mrb[99].mxu0  ;;  %v5571_v46 = vmax.f32 %v5391_v31, 0.0 }
 0x549   : > { %v5386_v44 = vadd.f32 %v9986_v13, %v5385_v43  ;;  %v5759_v45 = vmax.bf16 %v5758_v9, %v5642_v36  ;;  %v5569_v48 = vmax.f32 %v5383_v61, 0.0 }
 0x54a   : > { %v5572_v47 = vmax.f32 %v5394_v42, 0.0 }
 0x54b   : > { %v5570_v49 = vmax.f32 %v5386_v44, 0.0 }
 0x54c   : > { %v5644_v50 = vpack.c.bf16 %v5572_v47, %v5571_v46 }
 0x54d   : > { %v5643_v59 = vpack.c.bf16 %v5570_v49, %v5569_v48  ;;  %v8356_v51 = vpop.f32.mrb[100].mxu0 }
 0x54e   : > { %v5407_v30 = vadd.f32 %v9986_v13, %v8356_v51  ;;  %v5398_v26 = vpop.f32.mrb[101].mxu0 }
 0x54f   : > { %v5760_v52 = vmax.bf16 %v5759_v45, %v5643_v59  ;;  %v5399_v53 = vadd.f32 %v9986_v13, %v5398_v26  ;;  %v8357_v55 = vpop.f32.mrb[102].mxu0 }
 0x550   : > { %v5410_v56 = vadd.f32 %v9986_v13, %v8357_v55  ;;  %v5401_v57 = vpop.f32.mrb[103].mxu0  ;;  %v5575_v62 = vmax.f32 %v5407_v30, 0.0 }
 0x551   : > { %v5761_v58 = vmax.bf16 %v5760_v52, %v5644_v50  ;;  %v5402_v60 = vadd.f32 %v9986_v13, %v5401_v57  ;;  %v5573_v41 = vmax.f32 %v5399_v53, 0.0 }
 0x552   : > { %v5576_v63 = vmax.f32 %v5410_v56, 0.0 }
 0x553   : > { %v5762_v0 = vunpack.i.l.bf16 %v5761_v58  ;;  %v5763_v1 = vunpack.i.h.bf16 %v5761_v58  ;;  %v5574_v25 = vmax.f32 %v5402_v60, 0.0 }
 0x554   : > { %v5646_v2 = vpack.c.bf16 %v5576_v63, %v5575_v62 }
 0x555   : > { %v5764_v3 = vmax.f32 %v5762_v0, %v5763_v1  ;;  %v5645_v4 = vpack.c.bf16 %v5574_v25, %v5573_v41  ;;  %v8360_v7 = vpop.f32.mrb[104].mxu0 }
 0x556   : > { %v5423_v8 = vadd.f32 %v9986_v13, %v8360_v7  ;;  %v5414_v10 = vpop.f32.mrb[105].mxu0 }
 0x557   : > { %v5765_v24 = vrot.slane %v5764_v3, 4  ;;  %v5772_v11 = vmax.bf16 %v5646_v2, %v5645_v4  ;;  %v5415_v12 = vadd.f32 %v9986_v13, %v5414_v10  ;;  %v8361_v14 = vpop.f32.mrb[106].mxu0 }
 0x558   : > { %v5426_v5 = vadd.f32 %v9986_v13, %v8361_v14  ;;  %v5417_v15 = vpop.f32.mrb[107].mxu0  ;;  %v5579_v18 = vmax.f32 %v5423_v8, 0.0 }
 0x559   : > { %v5766_v16 = vmax.f32 %v5764_v3, %v5765_v24  ;;  %v5418_v54 = vadd.f32 %v9986_v13, %v5417_v15  ;;  %v5577_v22 = vmax.f32 %v5415_v12, 0.0 }
 0x55a   : > { %v5580_v19 = vmax.f32 %v5426_v5, 0.0  ;;  %v8528_v5 = vld [vmem:[%s10404_s11 + $0x8] ss:$16 sps:$4 sm:$0xff]  }
 0x55b   : > { %v5767_v20 = vrot.slane %v5766_v16, 2  ;;  %v5578_v34 = vmax.f32 %v5418_v54, 0.0  ;;  %v8531_v54 = vld [vmem:[%s10404_s11 + $0x28] ss:$16 sps:$4 sm:$0xff]  }
 0x55c   : > { %v5648_v27 = vpack.c.bf16 %v5580_v19, %v5579_v18  ;;  %v8536_v18 = vld [vmem:[%s10404_s11 + $0x4c] ss:$16 sps:$4 sm:$0xff]   ;;  %v8534_v19 = vld [vmem:[%s10404_s11 + $0x48] ss:$16 sps:$4 sm:$0xff]  }
 0x55d   : > { %v5768_v28 = vmax.f32 %v5766_v16, %v5767_v20  ;;  %v5647_v29 = vpack.c.bf16 %v5578_v34, %v5577_v22  ;;  %v8364_v23 = vpop.f32.mrb[108].mxu0  ;;  %v8533_v16 = vld [vmem:[%s10404_s11 + $0x2c] ss:$16 sps:$4 sm:$0xff]   ;;  %v8540_v34 = vld [vmem:[%s10404_s11 + $0x88] ss:$16 sps:$4 sm:$0xff]  }
 0x55e   : > { %v5439_v32 = vadd.f32 %v9986_v13, %v8364_v23  ;;  %v5430_v33 = vpop.f32.mrb[109].mxu0  ;;  %v8539_v20 = vld [vmem:[%s10404_s11 + $0x6c] ss:$16 sps:$4 sm:$0xff]   ;;  %v8546_v23 = vld [vmem:[%s10404_s11 + $0xc8] ss:$16 sps:$4 sm:$0xff]  }
 0x55f   : > { %v5769_v35 = vrot.slane %v5768_v28, 1  ;;  %v5773_v36 = vmax.bf16 %v5772_v11, %v5647_v29  ;;  %v5431_v37 = vadd.f32 %v9986_v13, %v5430_v33  ;;  %v8365_v38 = vpop.f32.mrb[110].mxu0  ;;  %v8542_v22 = vld [vmem:[%s10404_s11 + $0x8c] ss:$16 sps:$4 sm:$0xff]   ;;  %v8549_v33 = vld [vmem:[%s10404_s11 + $0xe8] ss:$16 sps:$4 sm:$0xff]  }
 0x560   : > { %v5442_v39 = vadd.f32 %v9986_v13, %v8365_v38  ;;  %v5433_v31 = vpop.f32.mrb[111].mxu0  ;;  %v5583_v40 = vmax.f32 %v5439_v32, 0.0  ;;  %v8548_v29 = vld [vmem:[%s10404_s11 + $0xcc] ss:$16 sps:$4 sm:$0xff]   ;;  %v8555_v38 = vld [vmem:[%s10406_s13 + $0x10] ss:$8 sps:$4 sm:$0xff]  }
 0x561   : > { %v5770_v6 = vmax.f32 %v5768_v28, %v5769_v35  ;;  %v5434_v9 = vadd.f32 %v9986_v13, %v5433_v31  ;;  %v5774_v61 = vmax.bf16 %v5773_v36, %v5648_v27  ;;  %v5581_v44 = vmax.f32 %v5431_v37, 0.0  ;;  %v8545_v27 = vld [vmem:[%s10404_s11 + $0xac] ss:$16 sps:$4 sm:$0xff]   ;;  %v8543_v28 = vld [vmem:[%s10404_s11 + $0xa8] ss:$16 sps:$4 sm:$0xff]  }
 0x562   : > { %v5584_v42 = vmax.f32 %v5442_v39, 0.0  ;;  %v8551_v32 = vld [vmem:[%s10404_s11 + $0xec] ss:$16 sps:$4 sm:$0xff]   ;;  %v8552_v36 = vld [vmem:[%s10406_s13] ss:$8 sps:$4 sm:$0xff]  }
 0x563   : > { %v5771_v43 = vpack.i.bf16 %v5770_v6, %v5770_v6  ;;  %v5582_v45 = vmax.f32 %v5434_v9, 0.0  ;;  %v8554_v35 = vld [vmem:[%s10406_s13 + $0x4] ss:$8 sps:$4 sm:$0xff]   ;;  %v8557_v37 = vld [vmem:[%s10406_s13 + $0x14] ss:$8 sps:$4 sm:$0xff]  }
 0x564   : > { %v5650_v46 = vpack.c.bf16 %v5584_v42, %v5583_v40  ;;  %v8560_v39 = vld [vmem:[%s10406_s13 + $0x24] ss:$8 sps:$4 sm:$0xff]   ;;  %v8558_v31 = vld [vmem:[%s10406_s13 + $0x20] ss:$8 sps:$4 sm:$0xff]   ;;  %v8563_v6 = vld [vmem:[%s10406_s13 + $0x34] ss:$8 sps:$4 sm:$0xff]  }
 0x565   : > { %v5857_v47 = vunpack.c.l.b16 %v5771_v43  ;;  %v5649_v48 = vpack.c.bf16 %v5582_v45, %v5581_v44  ;;  %v8368_v49 = vpop.f32.mrb[112].mxu0  ;;  %v8561_v9 = vld [vmem:[%s10406_s13 + $0x30] ss:$8 sps:$4 sm:$0xff]   ;;  %v8564_v40 = vld [vmem:[%s10406_s13 + $0x40] ss:$8 sps:$4 sm:$0xff]  }
 0x566   : > { %v5455_v50 = vadd.f32 %v9986_v13, %v8368_v49  ;;  %v5446_v59 = vpop.f32.mrb[113].mxu0  ;;  %v8569_v42 = vld [vmem:[%s10406_s13 + $0x54] ss:$8 sps:$4 sm:$0xff]   ;;  %v8567_v43 = vld [vmem:[%s10406_s13 + $0x50] ss:$8 sps:$4 sm:$0xff]  }
 0x567   : > { %v5870_v51 = vsel %vm5869_vm8, %v5857_v47, %v10009_v21  ;;  %v5775_v30 = vmax.bf16 %v5774_v61, %v5649_v48  ;;  %v5447_v26 = vadd.f32 %v9986_v13, %v5446_v59  ;;  %v8369_v52 = vpop.f32.mrb[114].mxu0  ;;  %v8566_v61 = vld [vmem:[%s10406_s13 + $0x44] ss:$8 sps:$4 sm:$0xff]   ;;  %v8570_v45 = vld [vmem:[%s10406_s13 + $0x60] ss:$8 sps:$4 sm:$0xff]  }
 0x568   : > { %v5458_v53 = vadd.f32 %v9986_v13, %v8369_v52  ;;  %v5449_v55 = vpop.f32.mrb[115].mxu0  ;;  %v5587_v58 = vmax.f32 %v5455_v50, 0.0  ;;  %v8572_v44 = vld [vmem:[%s10406_s13 + $0x64] ss:$8 sps:$4 sm:$0xff]   ;;  %v8573_v47 = vld [vmem:[%s10406_s13 + $0x70] ss:$8 sps:$4 sm:$0xff]  }
 0x569   : > { %v5450_v56 = vadd.f32 %v9986_v13, %v5449_v55  ;;  %v5776_v57 = vmax.bf16 %v5775_v30, %v5650_v46  ;;  %v5585_v62 = vmax.f32 %v5447_v26, 0.0  ;;  %v8575_v46 = vld [vmem:[%s10406_s13 + $0x74] ss:$8 sps:$4 sm:$0xff]   ;;  %v8578_v48 = vld [vmem:[%s10406_s13 + $0x84] ss:$8 sps:$4 sm:$0xff]  }
 0x56a   : > { %v5588_v60 = vmax.f32 %v5458_v53, 0.0  ;;  %v8576_v49 = vld [vmem:[%s10406_s13 + $0x80] ss:$8 sps:$4 sm:$0xff]   ;;  %v8581_v50 = vld [vmem:[%s10406_s13 + $0x94] ss:$8 sps:$4 sm:$0xff]  }
 0x56b   : > { %v5586_v63 = vmax.f32 %v5450_v56, 0.0  ;;  %v8579_v59 = vld [vmem:[%s10406_s13 + $0x90] ss:$8 sps:$4 sm:$0xff]   ;;  %v8582_v30 = vld [vmem:[%s10406_s13 + $0xa0] ss:$8 sps:$4 sm:$0xff]  }
 0x56c   : > { %v5652_v0 = vpack.c.bf16 %v5588_v60, %v5587_v58  ;;  %v8587_v26 = vld [vmem:[%s10406_s13 + $0xb4] ss:$8 sps:$4 sm:$0xff]   ;;  %v8585_v52 = vld [vmem:[%s10406_s13 + $0xb0] ss:$8 sps:$4 sm:$0xff]   ;;  %v8590_v53 = vld [vmem:[%s10406_s13 + $0xc4] ss:$8 sps:$4 sm:$0xff]  }
 0x56d   : > { %v5651_v1 = vpack.c.bf16 %v5586_v63, %v5585_v62  ;;  %v8588_v55 = vld [vmem:[%s10406_s13 + $0xc0] ss:$8 sps:$4 sm:$0xff]   ;;  %v8593_v56 = vld [vmem:[%s10406_s13 + $0xd4] ss:$8 sps:$4 sm:$0xff]   ;;  %v8596_v58 = vld [vmem:[%s10406_s13 + $0xe4] ss:$8 sps:$4 sm:$0xff]  }
 0x56e   : > { %v8594_v60 = vld [vmem:[%s10406_s13 + $0xe0] ss:$8 sps:$4 sm:$0xff]   ;;  %v8599_v62 = vld [vmem:[%s10406_s13 + $0xf4] ss:$8 sps:$4 sm:$0xff]   ;;  %v8597_v63 = vld [vmem:[%s10406_s13 + $0xf0] ss:$8 sps:$4 sm:$0xff]  }
 0x56f   : > { %v5777_v41 = vmax.bf16 %v5776_v57, %v5651_v1  ;;  %v8591_v57 = vld [vmem:[%s10406_s13 + $0xd0] ss:$8 sps:$4 sm:$0xff]   ;;  %v5823_v1 = vlaneseq }
 0x571   : > { %v5778_v25 = vmax.bf16 %v5777_v41, %v5652_v0  ;;  %v8602_v0 = vld [vmem:[%s10406_s13 + $0x104] ss:$8 sps:$4 sm:$0xff]   ;;  %v10176_v41 = vshrl.u32 %v5823_v1, 7 }
 0x572   : > { %v8650_v1 = vld [vmem:[%s10408_s15 + $0x48] sm:$0xff]  }
 0x573   : > { %v5779_v2 = vunpack.i.l.bf16 %v5778_v25  ;;  %v5780_v21 = vunpack.i.h.bf16 %v5778_v25  ;;  %v5825_v25 = vsub.s32 0, %v10176_v41 }
 0x575   : > { %v5781_v3 = vmax.f32 %v5779_v2, %v5780_v21  ;;  %v10182_v2 = vld [vmem:[%s10405_s12] sm:$0xf]  ;;  %v5829_v21 = vsub.s32 1, %v10176_v41 }
 0x577   : > { %v5782_v4 = vrot.slane %v5781_v3, 4 }
 0x579   : > { %v5783_v7 = vmax.f32 %v5781_v3, %v5782_v4  ;;  %v5826_v3 = vrot.slane %v10182_v2, %v5825_v25  ;;  %v5830_v4 = vrot.slane %v10182_v2, %v5829_v21 }
 0x57b   : > { %v5784_v8 = vrot.slane %v5783_v7, 2 }
 0x57d   : > { %v5785_v10 = vmax.f32 %v5783_v7, %v5784_v8 }
 0x57f   : > { %v5786_v24 = vrot.slane %v5785_v10, 1 }
 0x581   : > { %v5787_v11 = vmax.f32 %v5785_v10, %v5786_v24 }
 0x583   : > { %v5788_v12 = vpack.i.bf16 %v5787_v11, %v5787_v11 }
 0x585   : > { %v5858_v13 = vunpack.c.l.b16 %v5788_v12 }
 0x587   : > { %v5872_v14 = vsel %vm5871_vm9, %v5858_v13, %v5870_v51  ;;  %v8584_v51 = vld [vmem:[%s10406_s13 + $0xa4] ss:$8 sps:$4 sm:$0xff]  }
 0x588   : > { %v5873_v15 = vpack.c.b16 %v5872_v14, %v5872_v14 }
 0x58a   : > { %6068 = vmatmul.mubr.bf16.vlgmr.msra.gmra.mrb[12].mxu1 %v5873_v15 }
 0x58b   : > { %6077 = vmatpush1.bf16.msra.mxu1 %v8528_v5  ;;  %6108 = vmatprep.mubr.bf16.mxu1 %v8733_v17  ;;  %v8537_v17 = vld [vmem:[%s10404_s11 + $0x68] ss:$16 sps:$4 sm:$0xff]  }
 0x58c   : > { %6078 = vmatprep.subr.bf16.mxu1 %v8533_v16 }
 0x58f   : > { %6079 = vmatpush1.bf16.msra.mxu1 %v8531_v54  ;;  %v8605_v54 = vld [vmem:[%s10406_s13 + $0x114] ss:$8 sps:$4 sm:$0xff]  }
 0x590   : > { %6080 = vmatprep.subr.bf16.mxu1 %v8536_v18  ;;  %v8603_v18 = vld [vmem:[%s10406_s13 + $0x110] ss:$8 sps:$4 sm:$0xff]  }
 0x593   : > { %6081 = vmatpush1.bf16.msra.mxu1 %v8534_v19  ;;  %v8608_v19 = vld [vmem:[%s10406_s13 + $0x124] ss:$8 sps:$4 sm:$0xff]  }
 0x594   : > { %6082 = vmatprep.subr.bf16.mxu1 %v8539_v20  ;;  %v8606_v20 = vld [vmem:[%s10406_s13 + $0x120] ss:$8 sps:$4 sm:$0xff]  }
 0x597   : > { %6083 = vmatpush1.bf16.msra.mxu1 %v8537_v17  ;;  %v8611_v17 = vld [vmem:[%s10406_s13 + $0x134] ss:$8 sps:$4 sm:$0xff]  }
 0x598   : > { %6084 = vmatprep.subr.bf16.mxu1 %v8542_v22  ;;  %v8609_v22 = vld [vmem:[%s10406_s13 + $0x130] ss:$8 sps:$4 sm:$0xff]  }
 0x59b   : > { %6085 = vmatpush1.bf16.msra.mxu1 %v8540_v34  ;;  %v8614_v34 = vld [vmem:[%s10406_s13 + $0x144] ss:$8 sps:$4 sm:$0xff]  }
 0x59c   : > { %6086 = vmatprep.subr.bf16.mxu1 %v8545_v27  ;;  %v8612_v27 = vld [vmem:[%s10406_s13 + $0x140] ss:$8 sps:$4 sm:$0xff]  }
 0x59f   : > { %6087 = vmatpush1.bf16.msra.mxu1 %v8543_v28  ;;  %v8617_v28 = vld [vmem:[%s10406_s13 + $0x154] ss:$8 sps:$4 sm:$0xff]  }
 0x5a0   : > { %6088 = vmatprep.subr.bf16.mxu1 %v8548_v29  ;;  %v8615_v29 = vld [vmem:[%s10406_s13 + $0x150] ss:$8 sps:$4 sm:$0xff]  }
 0x5a3   : > { %6089 = vmatpush1.bf16.msra.mxu1 %v8546_v23  ;;  %v5837_v23 = vsub.s32 3, %v10176_v41 }
 0x5a4   : > { %6090 = vmatprep.subr.bf16.mxu1 %v8551_v32  ;;  %v8620_v32 = vld [vmem:[%s10406_s13 + $0x164] ss:$8 sps:$4 sm:$0xff]  }
 0x5a7   : > { %6091 = vmatpush1.bf16.msra.mxu1 %v8549_v33  ;;  %v5838_v33 = vrot.slane %v10182_v2, %v5837_v23 }
 0x5a8   : > { %6521 = vmatprep.subr.bf16.mxu1 %v8554_v35  ;;  %v8618_v35 = vld [vmem:[%s10406_s13 + $0x160] ss:$8 sps:$4 sm:$0xff]  }
 0x5aa   : > { %6109 = vmatmul.mubr.bf16.vlgmr.msra.gmra.mrb[16].mxu1 %v5873_v15  ;;  %v8600_v15 = vld [vmem:[%s10406_s13 + $0x100] ss:$8 sps:$4 sm:$0xff]  }
 0x5ab   : > { %6522 = vmatpush1.bf16.msra.mxu1 %v8552_v36  ;;  %v8623_v36 = vld [vmem:[%s10406_s13 + $0x174] ss:$8 sps:$4 sm:$0xff]  }
 0x5ac   : > { %6523 = vmatprep.subr.bf16.mxu1 %v8557_v37 }
 0x5af   : > { %6524 = vmatpush1.bf16.msra.mxu1 %v8555_v38 }
 0x5b0   : > { %6525 = vmatprep.subr.bf16.mxu1 %v8560_v39 }
 0x5b3   : > { %6526 = vmatpush1.bf16.msra.mxu1 %v8558_v31 }
 0x5b4   : > { %6527 = vmatprep.subr.bf16.mxu1 %v8563_v6  ;;  %v8621_v6 = vld [vmem:[%s10406_s13 + $0x170] ss:$8 sps:$4 sm:$0xff]  }
 0x5b7   : > { %6528 = vmatpush1.bf16.msra.mxu1 %v8561_v9 }
 0x5b8   : > { %6529 = vmatprep.subr.bf16.mxu1 %v8566_v61  ;;  %v8626_v61 = vld [vmem:[%s10406_s13 + $0x184] ss:$8 sps:$4 sm:$0xff]  }
 0x5bb   : > { %6530 = vmatpush1.bf16.msra.mxu1 %v8564_v40 }
 0x5bc   : > { %6531 = vmatprep.subr.bf16.mxu1 %v8569_v42 }
 0x5bf   : > { %6532 = vmatpush1.bf16.msra.mxu1 %v8567_v43  ;;  %v8624_v43 = vld [vmem:[%s10406_s13 + $0x180] ss:$8 sps:$4 sm:$0xff]  }
 0x5c0   : > { %6533 = vmatprep.subr.bf16.mxu1 %v8572_v44  ;;  %v8629_v44 = vld [vmem:[%s10406_s13 + $0x194] ss:$8 sps:$4 sm:$0xff]  }
 0x5c3   : > { %6534 = vmatpush1.bf16.msra.mxu1 %v8570_v45  ;;  %v8627_v45 = vld [vmem:[%s10406_s13 + $0x190] ss:$8 sps:$4 sm:$0xff]  }
 0x5c4   : > { %6535 = vmatprep.subr.bf16.mxu1 %v8575_v46  ;;  %v8632_v46 = vld [vmem:[%s10406_s13 + $0x1a4] ss:$8 sps:$4 sm:$0xff]  }
 0x5c7   : > { %6536 = vmatpush1.bf16.msra.mxu1 %v8573_v47  ;;  %v8630_v47 = vld [vmem:[%s10406_s13 + $0x1a0] ss:$8 sps:$4 sm:$0xff]  }
 0x5c8   : > { %6537 = vmatprep.subr.bf16.mxu1 %v8578_v48  ;;  %v8635_v48 = vld [vmem:[%s10406_s13 + $0x1b4] ss:$8 sps:$4 sm:$0xff]  }
 0x5cb   : > { %6538 = vmatpush1.bf16.msra.mxu1 %v8576_v49  ;;  %v8633_v49 = vld [vmem:[%s10406_s13 + $0x1b0] ss:$8 sps:$4 sm:$0xff]  }
 0x5cc   : > { %6539 = vmatprep.subr.bf16.mxu1 %v8581_v50  ;;  %v8638_v50 = vld [vmem:[%s10406_s13 + $0x1c4] ss:$8 sps:$4 sm:$0xff]  }
 0x5cf   : > { %6540 = vmatpush1.bf16.msra.mxu1 %v8579_v59  ;;  %v8636_v59 = vld [vmem:[%s10406_s13 + $0x1c0] ss:$8 sps:$4 sm:$0xff]  }
 0x5d0   : > { %6541 = vmatprep.subr.bf16.mxu1 %v8584_v51  ;;  %v5833_v51 = vsub.s32 2, %v10176_v41  ;;  %v7304_v41 = vld [vmem:[%s10409_s16] ss:$0 sm:$0xff] }
 0x5d3   : > { %6542 = vmatpush1.bf16.msra.mxu1 %v8582_v30  ;;  %v8641_v30 = vld [vmem:[%s10406_s13 + $0x1d4] ss:$8 sps:$4 sm:$0xff]  }
 0x5d4   : > { %6543 = vmatprep.subr.bf16.mxu1 %v8587_v26  ;;  %v8639_v26 = vld [vmem:[%s10406_s13 + $0x1d0] ss:$8 sps:$4 sm:$0xff]  }
 0x5d7   : > { %6544 = vmatpush1.bf16.msra.mxu1 %v8585_v52  ;;  %v5834_v52 = vrot.slane %v10182_v2, %v5833_v51  ;;  %v8651_v2 = vld [vmem:[%s10408_s15 + $0x8] sm:$0xff]  }
 0x5d8   : > { %6545 = vmatprep.subr.bf16.mxu1 %v8590_v53  ;;  %v8644_v53 = vld [vmem:[%s10406_s13 + $0x1e4] ss:$8 sps:$4 sm:$0xff]  }
 0x5db   : > { %6546 = vmatpush1.bf16.msra.mxu1 %v8588_v55  ;;  %v8642_v55 = vld [vmem:[%s10406_s13 + $0x1e0] ss:$8 sps:$4 sm:$0xff]  }
 0x5dc   : > { %6547 = vmatprep.subr.bf16.mxu1 %v8593_v56 }
 0x5df   : > { %6548 = vmatpush1.bf16.msra.mxu1 %v8591_v57  ;;  %v8647_v57 = vld [vmem:[%s10406_s13 + $0x1f4] ss:$8 sps:$4 sm:$0xff]  }
 0x5e0   : > { %6549 = vmatprep.subr.bf16.mxu1 %v8596_v58  ;;  %v8645_v58 = vld [vmem:[%s10406_s13 + $0x1f0] ss:$8 sps:$4 sm:$0xff]  }
 0x5e3   : > { %6550 = vmatpush1.bf16.msra.mxu1 %v8594_v60 }
 0x5e4   : > { %6551 = vmatprep.subr.bf16.mxu1 %v8599_v62  ;;  %v8648_v62 = vld [vmem:[%s10408_s15 + $0x40] sm:$0xff]  }
 0x5e7   : > { %6552 = vmatpush1.bf16.msra.mxu1 %v8597_v63  ;;  %v8649_v63 = vld [vmem:[%s10408_s15] sm:$0xff]  }
 0x5e8   : > { %6562 = vmatprep.subr.bf16.mxu1 %v8602_v0 }
 0x65d   : > { %v6069_v7 = vpop.f32.mrb[12].mxu1 }
 0x65e   : > { %v6070_v8 = vadd.f32 %v6069_v7, %v5826_v3  ;;  %v6071_v10 = vpop.f32.mrb[13].mxu1  ;;  %v8652_v3 = vld [vmem:[%s10408_s15 + $0x50] sm:$0xff]   ;;  %v8654_v7 = vld [vmem:[%s10408_s15 + $0x58] sm:$0xff]  }
 0x65f   : > { %v6072_v24 = vadd.f32 %v6071_v10, %v5830_v4  ;;  %v6073_v11 = vpop.f32.mrb[14].mxu1  ;;  %v8653_v4 = vld [vmem:[%s10408_s15 + $0x10] sm:$0xff]   ;;  %v8656_v10 = vld [vmem:[%s10408_s15 + $0x60] sm:$0xff]  }
 0x660   : > { %v6117_v12 = vmax.f32 %v6070_v8, 0.0  ;;  %v6074_v13 = vpop.f32.mrb[15].mxu1  ;;  %v8655_v8 = vld [vmem:[%s10408_s15 + $0x18] sm:$0xff]   ;;  %v8658_v11 = vld [vmem:[%s10408_s15 + $0x68] sm:$0xff]  }
 0x661   : > { %v6118_v14 = vmax.f32 %v6072_v24, 0.0  ;;  %v8657_v24 = vld [vmem:[%s10408_s15 + $0x20] sm:$0xff]   ;;  %v8660_v13 = vld [vmem:[%s10408_s15 + $0x70] sm:$0xff]  }
 0x662   : > { %v6121_v16 = vpack.c.bf16 %v6117_v12, %v6117_v12  ;;  %v8659_v12 = vld [vmem:[%s10408_s15 + $0x28] sm:$0xff]  }
 0x663   : > { %v6122_v5 = vpack.c.bf16 %v6118_v14, %v6118_v14  ;;  %v8661_v14 = vld [vmem:[%s10408_s15 + $0x30] sm:$0xff]  }
 0x665   : > { %6553 = vmatprep.mubr.bf16.mxu1 %v6122_v5  ;;  %v8662_v5 = vld [vmem:[%s10408_s15 + $0x78] sm:$0xff]  }
 0x666   : > { %6554 = vmatmul.mubr.bf16.vlgmr.msra.gmra.mrb[20].mxu1 %v6121_v16  ;;  %v6189_v16 = vld [vmem:[%s10407_s14] sm:$0x3] }
 0x667   : > { %6563 = vmatpush1.bf16.msra.mxu1 %v8600_v15  ;;  %v8663_v15 = vld [vmem:[%s10408_s15 + $0x38] sm:$0xff]  }
 0x668   : > { %6564 = vmatprep.subr.bf16.mxu1 %v8605_v54  ;;  %v6194_v54 = vrot.slane %v6189_v16, %v5825_v25 }
 0x66b   : > { %6565 = vmatpush1.bf16.msra.mxu1 %v8603_v18  ;;  %v6198_v18 = vrot.slane %v6189_v16, %v5829_v21 }
 0x66c   : > { %6566 = vmatprep.subr.bf16.mxu1 %v8608_v19 }
 0x66f   : > { %6567 = vmatpush1.bf16.msra.mxu1 %v8606_v20 }
 0x670   : > { %6568 = vmatprep.subr.bf16.mxu1 %v8611_v17 }
 0x673   : > { %6569 = vmatpush1.bf16.msra.mxu1 %v8609_v22 }
 0x674   : > { %6570 = vmatprep.subr.bf16.mxu1 %v8614_v34 }
 0x677   : > { %6571 = vmatpush1.bf16.msra.mxu1 %v8612_v27 }
 0x678   : > { %6572 = vmatprep.subr.bf16.mxu1 %v8617_v28 }
 0x67b   : > { %6573 = vmatpush1.bf16.msra.mxu1 %v8615_v29 }
 0x67c   : > { %6574 = vmatprep.subr.bf16.mxu1 %v8620_v32 }
 0x67d   : > { %v6110_v37 = vpop.f32.mrb[16].mxu1 }
 0x67e   : > { %v6112_v38 = vpop.f32.mrb[17].mxu1  ;;  %v6111_v56 = vadd.f32 %v6110_v37, %v5834_v52 }
 0x67f   : > { %v6113_v39 = vadd.f32 %v6112_v38, %v5838_v33  ;;  %v6114_v31 = vpop.f32.mrb[18].mxu1  ;;  %6575 = vmatpush1.bf16.msra.mxu1 %v8618_v35 }
 0x680   : > { %v6115_v9 = vpop.f32.mrb[19].mxu1  ;;  %6576 = vmatprep.subr.bf16.mxu1 %v8623_v36  ;;  %v6119_v60 = vmax.f32 %v6111_v56, 0.0 }
 0x681   : > { %v6120_v40 = vmax.f32 %v6113_v39, 0.0 }
 0x682   : > { %v6123_v0 = vpack.c.bf16 %v6119_v60, %v6119_v60 }
 0x683   : > { %v6124_v42 = vpack.c.bf16 %v6120_v40, %v6120_v40  ;;  %6577 = vmatpush1.bf16.msra.mxu1 %v8621_v6 }
 0x684   : > { %6578 = vmatprep.subr.bf16.mxu1 %v8626_v61 }
 0x685   : > { %6594 = vmatprep.mubr.bf16.mxu1 %v6124_v42 }
 0x687   : > { %6579 = vmatpush1.bf16.msra.mxu1 %v8624_v43 }
 0x688   : > { %6580 = vmatprep.subr.bf16.mxu1 %v8629_v44 }
 0x68b   : > { %6581 = vmatpush1.bf16.msra.mxu1 %v8627_v45 }
 0x68c   : > { %6582 = vmatprep.subr.bf16.mxu1 %v8632_v46 }
 0x68f   : > { %6583 = vmatpush1.bf16.msra.mxu1 %v8630_v47 }
 0x690   : > { %6584 = vmatprep.subr.bf16.mxu1 %v8635_v48 }
 0x693   : > { %6585 = vmatpush1.bf16.msra.mxu1 %v8633_v49 }
 0x694   : > { %6586 = vmatprep.subr.bf16.mxu1 %v8638_v50 }
 0x697   : > { %6587 = vmatpush1.bf16.msra.mxu1 %v8636_v59 }
 0x698   : > { %6588 = vmatprep.subr.bf16.mxu1 %v8641_v30 }
 0x69b   : > { %6589 = vmatpush1.bf16.msra.mxu1 %v8639_v26 }
 0x69c   : > { %6590 = vmatprep.subr.bf16.mxu1 %v8644_v53 }
 0x69f   : > { %6591 = vmatpush1.bf16.msra.mxu1 %v8642_v55 }
 0x6a0   : > { %6592 = vmatprep.subr.bf16.mxu1 %v8647_v57 }
 0x6a3   : > { %6593 = vmatpush1.bf16.msra.mxu1 %v8645_v58 }
 0x6a4   : > { %7666 = vmatprep.subr.bf16.mxu1 %v8648_v62 }
 0x6a6   : > { %6595 = vmatmul.mubr.bf16.vlgmr.msra.gmra.mrb[20].mxu1 %v6123_v0 }
 0x6a7   : > { %7667 = vmatpush3.bf16.msra.mxu1 %v8649_v63 }
 0x6a8   : > { %7668 = vmatprep.subr.bf16.mxu1 %v8650_v1 }
 0x6ab   : > { %7669 = vmatpush3.bf16.msra.mxu1 %v8651_v2 }
 0x6ac   : > { %7670 = vmatprep.subr.bf16.mxu1 %v8652_v3 }
 0x6af   : > { %7671 = vmatpush3.bf16.msra.mxu1 %v8653_v4 }
 0x6b0   : > { %7672 = vmatprep.subr.bf16.mxu1 %v8654_v7 }
 0x6b3   : > { %7673 = vmatpush3.bf16.msra.mxu1 %v8655_v8 }
 0x6b4   : > { %7674 = vmatprep.subr.bf16.mxu1 %v8656_v10 }
 0x6b7   : > { %7675 = vmatpush3.bf16.msra.mxu1 %v8657_v24 }
 0x6b8   : > { %7676 = vmatprep.subr.bf16.mxu1 %v8658_v11 }
 0x6bb   : > { %7677 = vmatpush3.bf16.msra.mxu1 %v8659_v12 }
 0x6bc   : > { %7678 = vmatprep.subr.bf16.mxu1 %v8660_v13 }
 0x6bf   : > { %7679 = vmatpush3.bf16.msra.mxu1 %v8661_v14 }
 0x6c0   : > { %7680 = vmatprep.subr.bf16.mxu1 %v8662_v5 }
 0x6c3   : > { %7681 = vmatpush3.bf16.msra.mxu1 %v8663_v15 }
 0x779   : > { %v6596_v19 = vpop.f32.mrb[20].mxu1 }
 0x77a   : > { %v8372_v20 = vadd.f32 %v6596_v19, %v6194_v54  ;;  %v6598_v17 = vpop.f32.mrb[21].mxu1 }
 0x77b   : > { %v8373_v22 = vadd.f32 %v6598_v17, %v6198_v18  ;;  %v6600_v34 = vpop.f32.mrb[22].mxu1 }
 0x77c   : > { %v6603_v27 = vmax.f32 %v8372_v20, 0.0  ;;  %v6601_v28 = vpop.f32.mrb[23].mxu1 }
 0x77d   : > { %v6604_v29 = vmax.f32 %v8373_v22, 0.0 }
 0x77e   : > { %v6605_v32 = vpack.c.bf16 %v6603_v27, %v6603_v27 }
 0x77f   : > { %v6606_v23 = vpack.c.bf16 %v6604_v29, %v6604_v29 }
 0x781   : > { %6774 = vmatprep.mubr.bf16.mxu1 %v6606_v23 }
 0x782   : > { %6775 = vmatmul.mubr.bf16.vlgmr.msra.gmra.mrb[24].mxu1 %v6605_v32 }
 0x855   : > { %v7682_v25 = vpop.f32.mrb[24].mxu1 }
 0x856   : > { %v7683_v21 = vpop.f32.mrb[25].mxu1 }
 0x857   : > { %v7684_v33 = vadd.f32 %v7683_v21, %v7682_v25  ;;  %v7685_v35 = vpop.f32.mrb[26].mxu1 }
 0x858   : > { %v7686_v36 = vpop.f32.mrb[27].mxu1 }
 0x859   : > { %v6777_v37 = vadd.f32 %v7684_v33, %v7304_v41 }
 0x85b   : > { %6782 = vst [vmem:[%s542_s19] sm:$0xff] %v6777_v37 }
 0x85c   : > { %8682 = shalt.err (!%p8679_p3)
}
 0x85d   : > { %s8683_s29 = scalar_lea.hbm %s10351_s20, 128  ;;  %s8687_s22 = scalar_lea.hbm %s10410_s17, 256 }
 0x85e   : > { %p8684_p4 = scmp.ne.s32.totalorder %s10351_s20, %s8683_s29  ;;  %p8688_p9 = scmp.lt.u32.totalorder %s10351_s20, %s10410_s17 }
 0x85f   : > { %p8689_p10 = scmp.lt.u32.totalorder %s8687_s22, %s8683_s29  ;;  %p8691_p12 = scmp.lt.u32.totalorder %s8683_s29, %s10351_s20 }
 0x860   : > { %p8685_p7 = pnand %p8684_p4, %p8860_p5 }
 0x861   : > { %p8690_p11 = por %p8689_p10, %p8688_p9 }
 0x862   : > { %p8686_p8 = pneg %p8685_p7 }
 0x863   : > { %p8692_p13 = por %p8691_p12, %p8690_p11 }
 0x865   : > { %p8693_p0 = pnand %p8692_p13, %p8686_p8 }
 0x867   : > { %8696 = shalt.err (!%p8693_p0)
}
 0x868   : > { %8380 = dma.vmem_to_hbm [thread:$0]  (%p8860_p5), %s10353_s21, 128, %s10351_s20, %s6784_s30  }
 0x869 PF: > { %p8386_p1 = scmp.ge.s32.totalorder %s8731_s27, 2  ;;  %s6809_s28 = sand.u32 1, %s8719_s24  }
 0x86a   : > { %s6810_s0 = scalar_lea.sflag [#allocation3], %s6809_s28 }
 0x86b   : > { %p8383_p2 = pnand %p8386_p1, %p8864_p6 }
 0x86d   : > { %8714 = dma.done.wait (!%p8383_p2), %s6810_s0, 128  }
 0x86e   : > { %8716 = vsyncadd (!%p8383_p2), %s6810_s0, 4294967168  ;;  %s10428_s27 = sld [smem:[#allocation6_spill]]  ;;  %s10429_s29 = sld [smem:[#allocation5_spill]] }
 0x86f   : > { %s10430_s26 = sld [smem:[#allocation7_spill]]  ;;  %s10431_s24 = smov %s8723_s25 }
 0x874   : > { %p27_p3 = scmp.ge.s32.totalorder %s10428_s27, 4   ;;  %s10432_s25 = smov %s10429_s29 }
 0x876   :  { %29 = sbr.rel (!%p27_p3) target bundleno = 7 (0x7), region = 123 }
 0x87d   :  { %6815 = vsyncpa [#allocation3], 1 }
 0x87e   :  { %6817 = vsyncpa [#allocation3 + $0x1], 1 }

</bundles_post_ra>
